<compile_context>
chip_gen: v5e
topology: v5e:2x2
jax: 0.10.0
libtpu: 0.0.40
codegen_flags: <defaults>
</compile_context>

<pallas_src>
import numpy as np

import jax
import jax.numpy as jnp
from jax import lax
from jax.experimental import pallas as pl
from jax.experimental.pallas import tpu as pltpu

EPS = 1e-5                       # PyTorch LayerNorm default eps
F32 = jnp.float32
BF16 = jnp.bfloat16
CONV_K = 3                       # Temporal_Merging_Block kernel size (fixed in module)


# ----------------------------- in-kernel helpers -----------------------------

def _layernorm(x, g, b):
    mu = jnp.mean(x, axis=-1, keepdims=True)
    var = jnp.mean((x - mu) ** 2, axis=-1, keepdims=True)
    return (x - mu) * lax.rsqrt(var + EPS) * g + b


def _gelu_tanh(x):
    # tanh-form GELU (single EUP tanh); matches torch.nn.GELU() to ~3e-4 abs error.
    # TODO(synk): switch to lax.erf-based exact GELU if bit-level parity with torch is needed.
    c = 0.7978845608028654  # sqrt(2/pi)
    return 0.5 * x * (1.0 + jnp.tanh(c * (x + 0.044715 * x * x * x)))


def _mm(a_bf16, b_bf16):
    # bf16 operands, f32 accumulation on the MXU.
    return jnp.dot(a_bf16, b_bf16, preferred_element_type=F32)


def _mm_nt(a_bf16, b_bf16):
    # a @ b.T (contract last dims of both), bf16 operands, f32 accumulation.
    return lax.dot_general(a_bf16, b_bf16, (((1,), (1,)), ((), ())),
                           preferred_element_type=F32)


# --------------------------- host-side constant builders ----------------------

def _head_constants(n, c, h):
    """Constant matrices for sublane-stacked multi-head attention."""
    d = c // h
    r = np.arange(h * n)
    rep = (np.arange(n)[None, :] == (r % n)[:, None]).astype(np.float32)            # (H*N, N)
    hmask = ((np.arange(c)[None, :] // d) == (r // n)[:, None]).astype(np.float32)  # (H*N, C)
    gat = ((r[None, :] % n) == np.arange(n)[:, None]).astype(np.float32)            # (N, H*N)
    return rep, hmask, gat


def _conv_select(t_in, t_out, stride, k, pad):
    """sel[i, j] = 1 iff j == i*stride + k - pad; all-zero row == conv zero padding."""
    rows = np.arange(t_out)[:, None] * stride + (k - pad)
    cols = np.arange(t_in)[None, :]
    return (cols == rows).astype(np.float32)


class _Slab:
    """Packs many small 2-D parameter arrays into one (rows, lane_width) slab.

    Each entry's row offset is aligned to `row_mult` (16 for bf16, 8 for f32) so
    in-kernel static slices land on native sublane-tile boundaries."""

    def __init__(self, lane_width, row_mult):
        self.width = lane_width
        self.mult = row_mult
        self.parts = []
        self.nrows = 0

    def add(self, arr):
        a = np.asarray(jax.device_get(arr), np.float32)
        if a.ndim == 1:
            a = a[None, :]
        r, w = a.shape
        assert w <= self.width
        r_pad = -(-r // self.mult) * self.mult
        buf = np.zeros((r_pad, self.width), np.float32)
        buf[:r, :w] = a
        off = self.nrows
        self.parts.append(buf)
        self.nrows += r_pad
        return (off, r, w)                      # static (row offset, rows, width)

    def finalize(self, dtype):
        return jnp.asarray(np.concatenate(self.parts, axis=0), dtype=dtype)


# ------------------------------- plan building --------------------------------

def build_encoder_plan(stages, T):
    """Pack all 4 stages' weights + attention/conv constants into two VMEM slabs and
    record every static offset/shape the fused kernel needs."""
    pad = CONV_K // 2

    metas = []
    t_in = T
    for st in stages:
        w = np.asarray(jax.device_get(st["merge_w"]), np.float32)   # (c_out, c_in, K)
        c_out, c_in, _ = w.shape
        stride = int(st["stride"])
        t_out = (t_in + 2 * pad - CONV_K) // stride + 1
        H = int(st["num_heads"])
        hd = int(np.asarray(jax.device_get(st["blocks"][0]["w1"])).shape[1])
        metas.append(dict(t_in=t_in, t_out=t_out, c_in=c_in, c_out=c_out,
                          stride=stride, H=H, hd=hd, nb=len(st["blocks"])))
        t_in = t_out

    lw = 0
    for mt in metas:
        lw = max(lw, mt["c_in"], mt["c_out"], mt["hd"],
                 mt["t_in"], mt["t_out"], mt["H"] * mt["t_out"])
    lw = -(-lw // 128) * 128                       # lane-width of both slabs

    wsl = _Slab(lw, 16)    # bf16: matmul weights + 0/1 selection/replicate/gather matrices
    fsl = _Slab(lw, 8)     # f32 : LN params, biases, depthwise-conv taps, head mask

    stage_plans = []
    for st, mt in zip(stages, metas):
        c_out = mt["c_out"]
        w = np.asarray(jax.device_get(st["merge_w"]), np.float32)
        sp = dict(meta=mt)
        sp["sel"] = [wsl.add(_conv_select(mt["t_in"], mt["t_out"], mt["stride"], k, pad))
                     for k in range(CONV_K)]
        sp["tap"] = [wsl.add(w[:, :, k].T) for k in range(CONV_K)]     # (c_in, c_out)
        rep, hmask, gat = _head_constants(mt["t_out"], c_out, mt["H"])
        sp["rep"] = wsl.add(rep)
        sp["gat"] = wsl.add(gat)
        sp["hmask"] = fsl.add(hmask)
        sp["merge_b"] = fsl.add(st["merge_b"])
        sp["merge_g"] = fsl.add(st["merge_g"])
        sp["merge_beta"] = fsl.add(st["merge_beta"])
        blks = []
        for blk in st["blocks"]:
            # torch kv = Linear(dim, 2*dim); reshape(B,-1,2,H,D) -> features [:dim] are k,
            # [dim:] are v, with head h in the contiguous channel block [h*D:(h+1)*D].
            wkv = np.asarray(jax.device_get(blk["wkv"]), np.float32)
            bkv = np.asarray(jax.device_get(blk["bkv"]), np.float32)
            blks.append(dict(
                g1=fsl.add(blk["g1"]), b1=fsl.add(blk["b1"]),
                wq=wsl.add(blk["wq"]), bq=fsl.add(blk["bq"]),
                wk=wsl.add(wkv[:, :c_out]), bk=fsl.add(bkv[:c_out]),
                wv=wsl.add(wkv[:, c_out:]), bv=fsl.add(bkv[c_out:]),
                wp=wsl.add(blk["wp"]), bp=fsl.add(blk["bp"]),
                g2=fsl.add(blk["g2"]), b2=fsl.add(blk["b2"]),
                w1=wsl.add(blk["w1"]), bl1=fsl.add(blk["bl1"]),
                wc=fsl.add(blk["wc"]), bc=fsl.add(blk["bc"]),
                w2=wsl.add(blk["w2"]), bl2=fsl.add(blk["bl2"]),
            ))
        sp["blocks"] = blks
        sp["norm_g"] = fsl.add(st["norm_g"])
        sp["norm_b"] = fsl.add(st["norm_b"])
        stage_plans.append(sp)

    return dict(lane_width=lw,
                wslab=wsl.finalize(BF16),
                fslab=fsl.finalize(F32),
                stages=stage_plans)


# ------------------------------ fused kernel ----------------------------------

def _make_kernel(plan):
    stage_plans = plan["stages"]

    def kernel(x_ref, w_ref, f_ref, *out_refs):
        # Lazy loads: statically slice the slab refs at each weight's point of use,
        # keeping live ranges short (no up-front take(18) of a whole block's params).
        def wmat(e):
            off, r, w = e
            return w_ref[off:off + r, 0:w]          # bf16 (r, w)

        def fmat(e):
            off, r, w = e
            return f_ref[off:off + r, 0:w]          # f32 (r, w); (1, w) for vectors

        x = x_ref[0].astype(F32)                    # (T_in, C_in) channels-last
        for sp, o_ref in zip(stage_plans, out_refs):
            mt = sp["meta"]
            t_out, c_out, hd, H = mt["t_out"], mt["c_out"], mt["hd"], mt["H"]
            scale = float(c_out // H) ** -0.5

            # ---- Temporal_Merging_Block: Conv1d(k=3, stride, pad=1) as 3 precomputed
            #      selection matmuls (zero padding for free) + LayerNorm.
            xb = x.astype(BF16)
            y = jnp.zeros((t_out, c_out), F32) + fmat(sp["merge_b"])
            for k in range(CONV_K):
                gathered = _mm(wmat(sp["sel"][k]), xb)                   # (t_out, c_in)
                y = y + _mm(gathered.astype(BF16), wmat(sp["tap"][k]))   # (t_out, c_out)
            x = _layernorm(y, fmat(sp["merge_g"]), fmat(sp["merge_beta"]))

            # ---- per-stage constants, loaded/built ONCE (hoisted out of the block loop)
            rep = wmat(sp["rep"])                    # (H*N, N)  bf16
            gat = wmat(sp["gat"])                    # (N, H*N)  bf16
            hmask = fmat(sp["hmask"])                # (H*N, C)  f32
            rowi = lax.broadcasted_iota(jnp.int32, (t_out, hd), 0)
            is_first = rowi == 0                     # depthwise-conv zero padding masks
            is_last = rowi == t_out - 1

            # ---- GLR blocks (activation never leaves VMEM)
            for bp in sp["blocks"]:
                # Global_Relational_Block: multi-head self-attention with heads stacked
                # along sublanes (full-width MXU matmuls + 0/1 masks, no per-head loop).
                h = _layernorm(x, fmat(bp["g1"]), fmat(bp["b1"]))
                hb = h.astype(BF16)                                   # shared q/k/v operand
                q = _mm(hb, wmat(bp["wq"])) + fmat(bp["bq"])          # (N, C)
                k_ = _mm(hb, wmat(bp["wk"])) + fmat(bp["bk"])         # (N, C)
                v_ = _mm(hb, wmat(bp["wv"])) + fmat(bp["bv"])         # (N, C)
                qb = _mm(rep, q.astype(BF16)) * hmask                 # (H*N, C)
                s = _mm_nt(qb.astype(BF16), k_.astype(BF16)) * scale  # (H*N, N)
                s = s - jnp.max(s, axis=-1, keepdims=True)
                p = jnp.exp(s)
                p = p * pl.reciprocal(jnp.sum(p, axis=-1, keepdims=True), approx=True)
                o = _mm(p.astype(BF16), v_.astype(BF16)) * hmask      # (H*N, C)
                attn = _mm(gat, o.astype(BF16))                       # (N, C)
                x = x + _mm(attn.astype(BF16), wmat(bp["wp"])) + fmat(bp["bp"])

                # Local_Relational_Block: Linear -> depthwise Conv1d(3,1,1) -> GELU -> Linear
                h2 = _layernorm(x, fmat(bp["g2"]), fmat(bp["b2"]))
                m = _mm(h2.astype(BF16), wmat(bp["w1"])) + fmat(bp["bl1"])   # (N, hd)
                m_prev = jnp.where(is_first, 0.0, pltpu.roll(m, shift=1, axis=0))
                m_next = jnp.where(is_last, 0.0, pltpu.roll(m, shift=t_out - 1, axis=0))
                wc = fmat(bp["wc"])                                          # (3, hd)
                mc = m_prev * wc[0:1] + m * wc[1:2] + m_next * wc[2:3] + fmat(bp["bc"])
                x = x + _mm(_gelu_tanh(mc).astype(BF16), wmat(bp["w2"])) + fmat(bp["bl2"])

            # ---- stage-final LayerNorm: store this stage's output; the NEXT stage keeps
            #      consuming `x` directly from VMEM/vregs (no HBM read-back).
            x = _layernorm(x, fmat(sp["norm_g"]), fmat(sp["norm_b"]))
            o_ref[0] = x.astype(o_ref.dtype)

    return kernel


def temporal_encoder_forward(x_nct, plan):
    """x_nct: (B, in_feat_dim, T) NCL like the PyTorch Conv1d input.
    Returns the module's 4 outputs, each (B, C_i, T_i)."""
    x_tc = jnp.transpose(x_nct, (0, 2, 1))            # channels-last once
    B, T, c_in = x_tc.shape
    sp0 = plan["stages"][0]["meta"]
    assert sp0["t_in"] == T and sp0["c_in"] == c_in

    kernel = _make_kernel(plan)
    wslab, fslab = plan["wslab"], plan["fslab"]

    out_shape = tuple(
        jax.ShapeDtypeStruct((B, sp["meta"]["t_out"], sp["meta"]["c_out"]), x_tc.dtype)
        for sp in plan["stages"])
    out_specs = tuple(
        pl.BlockSpec((1, sp["meta"]["t_out"], sp["meta"]["c_out"]), lambda i: (i, 0, 0))
        for sp in plan["stages"])
    in_specs = [
        pl.BlockSpec((1, T, c_in), lambda i: (i, 0, 0)),
        pl.BlockSpec(wslab.shape, lambda i: (0, 0)),   # constant block index: DMA'd once
        pl.BlockSpec(fslab.shape, lambda i: (0, 0)),
    ]

    outs_tc = pl.pallas_call(
        kernel,
        out_shape=out_shape,
        grid=(B,),
        in_specs=in_specs,
        out_specs=out_specs,
        compiler_params=pltpu.CompilerParams(
            # One grid step per batch element: fills both v7x TensorCores; on single-TC
            # v5e/v6e it is just a 2-step serial loop (~0.7us) on top of the fused body.
            dimension_semantics=("parallel",)),
    )(x_tc, wslab, fslab)

    # Module returns x.permute(0, 2, 1) per stage -> NCL (B, C, T).
    return [jnp.transpose(o, (0, 2, 1)) for o in outs_tc]


# ------------------------- deterministic parameter init ----------------------

def init_temporal_encoder_params(key, in_feat_dim, embed_dims, num_head,
                                 mlp_ratio, num_block):
    strides = [1, 2, 2, 2]
    stages = []
    in_c = in_feat_dim
    for dim, stride in zip(embed_dims, strides):
        key, km = jax.random.split(key)
        K = CONV_K
        merge_w = jax.random.normal(km, (dim, in_c, K), F32) * jnp.sqrt(2.0 / (K * dim))
        hd = int(dim * mlp_ratio)
        blocks = []
        for _ in range(num_block):
            key, k1, k2, k3, k4, k5, k6 = jax.random.split(key, 7)
            blocks.append(dict(
                g1=jnp.ones((dim,), F32), b1=jnp.zeros((dim,), F32),
                # Linear weights stored as (in, out): y = x @ W + b
                wq=0.02 * jax.random.normal(k1, (dim, dim), F32),
                bq=jnp.zeros((dim,), F32),
                wkv=0.02 * jax.random.normal(k2, (dim, 2 * dim), F32),
                bkv=jnp.zeros((2 * dim,), F32),
                wp=0.02 * jax.random.normal(k3, (dim, dim), F32),
                bp=jnp.zeros((dim,), F32),
                g2=jnp.ones((dim,), F32), b2=jnp.zeros((dim,), F32),
                w1=0.02 * jax.random.normal(k4, (dim, hd), F32),
                bl1=jnp.zeros((hd,), F32),
                # depthwise Conv1d(hd, hd, 3, groups=hd): fan_out = 3*hd/hd = 3
                wc=jax.random.normal(k5, (3, hd), F32) * jnp.sqrt(2.0 / 3.0),
                bc=jnp.zeros((hd,), F32),
                w2=0.02 * jax.random.normal(k6, (hd, dim), F32),
                bl2=jnp.zeros((dim,), F32),
            ))
        stages.append(dict(
            stride=stride, num_heads=num_head,
            merge_w=merge_w, merge_b=jnp.zeros((dim,), F32),
            merge_g=jnp.ones((dim,), F32), merge_beta=jnp.zeros((dim,), F32),
            blocks=blocks,
            norm_g=jnp.ones((dim,), F32), norm_b=jnp.zeros((dim,), F32),
        ))
        in_c = dim
    return stages


# ----------------------------------- main -------------------------------------

if __name__ == "__main__":
    key = jax.random.PRNGKey(0)
    kx, kp = jax.random.split(key)

    # Small config consistent with the module (dims divisible by num_head=8).
    B, in_feat_dim, T = 2, 32, 16
    embed_dims = [32, 64, 64, 128]
    num_head, mlp_ratio, num_block = 8, 2, 2

    x = jax.random.normal(kx, (B, in_feat_dim, T), F32)    # NCL like PyTorch Conv1d
    stages = init_temporal_encoder_params(kp, in_feat_dim, embed_dims,
                                          num_head, mlp_ratio, num_block)
    plan = build_encoder_plan(stages, T)                   # host-side packing, done once

    fwd = jax.jit(lambda xx: temporal_encoder_forward(xx, plan))
    outs = jax.block_until_ready(fwd(x))

    # Expected shapes: (2,32,16), (2,64,8), (2,64,4), (2,128,2)
    assert [o.shape for o in outs] == [(2, 32, 16), (2, 64, 8), (2, 64, 4), (2, 128, 2)]
    assert all(bool(jnp.all(jnp.isfinite(o))) for o in outs)
    print("KERNEL_OK")
</pallas_src>

<mosaic_0001>
module attributes {stable_mosaic.version = 11 : i64} {
  func.func @kernel(%arg0: i32, %arg1: memref<1x16x32xf32, #tpu.memory_space<vmem>>, %arg2: memref<5104x256xbf16, #tpu.memory_space<vmem>>, %arg3: memref<1168x256xf32, #tpu.memory_space<vmem>>, %arg4: memref<1x16x32xf32, #tpu.memory_space<vmem>>, %arg5: memref<1x8x64xf32, #tpu.memory_space<vmem>>, %arg6: memref<1x4x64xf32, #tpu.memory_space<vmem>>, %arg7: memref<1x2x128xf32, #tpu.memory_space<vmem>>) attributes {dimension_semantics = [#tpu.dimension_semantics<parallel>], iteration_bounds = array<i64: 2>, scalar_prefetch = 0 : i64, scratch_operands = 0 : i64, tpu.core_type = #tpu.core_type<tc>, window_params = [{transform_indices = @transform_0, window_bounds = array<i64: 1, 16, 32>}, {pipeline_mode = #tpu.pipeline_mode<synchronous>, transform_indices = @transform_1, window_bounds = array<i64: 5104, 256>}, {pipeline_mode = #tpu.pipeline_mode<synchronous>, transform_indices = @transform_2, window_bounds = array<i64: 1168, 256>}, {transform_indices = @transform_3, window_bounds = array<i64: 1, 16, 32>}, {transform_indices = @transform_4, window_bounds = array<i64: 1, 8, 64>}, {transform_indices = @transform_5, window_bounds = array<i64: 1, 4, 64>}, {transform_indices = @transform_6, window_bounds = array<i64: 1, 2, 128>}]} {
    %c0 = arith.constant 0 : index
    %c0_0 = arith.constant 0 : index
    %c0_1 = arith.constant 0 : index
    %0 = vector.load %arg1[%c0, %c0_0, %c0_1] : memref<1x16x32xf32, #tpu.memory_space<vmem>>, vector<1x16x32xf32>
    %1 = vector.shape_cast %0 : vector<1x16x32xf32> to vector<16x32xf32>
    %2 = arith.truncf %1 : vector<16x32xf32> to vector<16x32xbf16>
    %cst = arith.constant 0.000000e+00 : f32
    %3 = vector.broadcast %cst : f32 to vector<16x32xf32>
    %c128 = arith.constant 128 : index
    %c0_2 = arith.constant 0 : index
    %4 = vector.load %arg3[%c128, %c0_2] : memref<1168x256xf32, #tpu.memory_space<vmem>>, vector<1x32xf32>
    %5 = vector.broadcast %4 : vector<1x32xf32> to vector<16x32xf32>
    %6 = arith.addf %3, %5 : vector<16x32xf32>
    %c0_3 = arith.constant 0 : index
    %c0_4 = arith.constant 0 : index
    %7 = vector.load %arg2[%c0_3, %c0_4] : memref<5104x256xbf16, #tpu.memory_space<vmem>>, vector<16x16xbf16>
    %cst_5 = arith.constant dense<0.000000e+00> : vector<16x32xf32>
    %8 = tpu.matmul %7, %2, %cst_5 {dimension_numbers = #tpu.dot_dimension_numbers<[1], [0], [0], [1], [0, 0, 1, 1], [], []>} : vector<16x16xbf16>, vector<16x32xbf16>, vector<16x32xf32> -> vector<16x32xf32>
    %9 = arith.truncf %8 : vector<16x32xf32> to vector<16x32xbf16>
    %c48 = arith.constant 48 : index
    %c0_6 = arith.constant 0 : index
    %10 = vector.load %arg2[%c48, %c0_6] : memref<5104x256xbf16, #tpu.memory_space<vmem>>, vector<32x32xbf16>
    %cst_7 = arith.constant dense<0.000000e+00> : vector<16x32xf32>
    %11 = tpu.matmul %9, %10, %cst_7 {dimension_numbers = #tpu.dot_dimension_numbers<[1], [0], [0], [1], [0, 0, 1, 1], [], []>} : vector<16x32xbf16>, vector<32x32xbf16>, vector<16x32xf32> -> vector<16x32xf32>
    %12 = arith.addf %6, %11 : vector<16x32xf32>
    %c16 = arith.constant 16 : index
    %c0_8 = arith.constant 0 : index
    %13 = vector.load %arg2[%c16, %c0_8] : memref<5104x256xbf16, #tpu.memory_space<vmem>>, vector<16x16xbf16>
    %cst_9 = arith.constant dense<0.000000e+00> : vector<16x32xf32>
    %14 = tpu.matmul %13, %2, %cst_9 {dimension_numbers = #tpu.dot_dimension_numbers<[1], [0], [0], [1], [0, 0, 1, 1], [], []>} : vector<16x16xbf16>, vector<16x32xbf16>, vector<16x32xf32> -> vector<16x32xf32>
    %15 = arith.truncf %14 : vector<16x32xf32> to vector<16x32xbf16>
    %c80 = arith.constant 80 : index
    %c0_10 = arith.constant 0 : index
    %16 = vector.load %arg2[%c80, %c0_10] : memref<5104x256xbf16, #tpu.memory_space<vmem>>, vector<32x32xbf16>
    %cst_11 = arith.constant dense<0.000000e+00> : vector<16x32xf32>
    %17 = tpu.matmul %15, %16, %cst_11 {dimension_numbers = #tpu.dot_dimension_numbers<[1], [0], [0], [1], [0, 0, 1, 1], [], []>} : vector<16x32xbf16>, vector<32x32xbf16>, vector<16x32xf32> -> vector<16x32xf32>
    %18 = arith.addf %12, %17 : vector<16x32xf32>
    %c32 = arith.constant 32 : index
    %c0_12 = arith.constant 0 : index
    %19 = vector.load %arg2[%c32, %c0_12] : memref<5104x256xbf16, #tpu.memory_space<vmem>>, vector<16x16xbf16>
    %cst_13 = arith.constant dense<0.000000e+00> : vector<16x32xf32>
    %20 = tpu.matmul %19, %2, %cst_13 {dimension_numbers = #tpu.dot_dimension_numbers<[1], [0], [0], [1], [0, 0, 1, 1], [], []>} : vector<16x16xbf16>, vector<16x32xbf16>, vector<16x32xf32> -> vector<16x32xf32>
    %21 = arith.truncf %20 : vector<16x32xf32> to vector<16x32xbf16>
    %c112 = arith.constant 112 : index
    %c0_14 = arith.constant 0 : index
    %22 = vector.load %arg2[%c112, %c0_14] : memref<5104x256xbf16, #tpu.memory_space<vmem>>, vector<32x32xbf16>
    %cst_15 = arith.constant dense<0.000000e+00> : vector<16x32xf32>
    %23 = tpu.matmul %21, %22, %cst_15 {dimension_numbers = #tpu.dot_dimension_numbers<[1], [0], [0], [1], [0, 0, 1, 1], [], []>} : vector<16x32xbf16>, vector<32x32xbf16>, vector<16x32xf32> -> vector<16x32xf32>
    %24 = arith.addf %18, %23 : vector<16x32xf32>
    %c136 = arith.constant 136 : index
    %c0_16 = arith.constant 0 : index
    %25 = vector.load %arg3[%c136, %c0_16] : memref<1168x256xf32, #tpu.memory_space<vmem>>, vector<1x32xf32>
    %c144 = arith.constant 144 : index
    %c0_17 = arith.constant 0 : index
    %26 = vector.load %arg3[%c144, %c0_17] : memref<1168x256xf32, #tpu.memory_space<vmem>>, vector<1x32xf32>
    %cst_18 = arith.constant dense<0.000000e+00> : vector<16xf32>
    %27 = vector.multi_reduction <add>, %24, %cst_18 [1] : vector<16x32xf32> to vector<16xf32>
    %28 = vector.shape_cast %27 : vector<16xf32> to vector<16x1xf32>
    %cst_19 = arith.constant 3.200000e+01 : f32
    %29 = vector.broadcast %cst_19 : f32 to vector<16x1xf32>
    %30 = arith.divf %28, %29 : vector<16x1xf32>
    %31 = vector.broadcast %30 : vector<16x1xf32> to vector<16x32xf32>
    %32 = arith.subf %24, %31 : vector<16x32xf32>
    %33 = arith.mulf %32, %32 : vector<16x32xf32>
    %cst_20 = arith.constant dense<0.000000e+00> : vector<16xf32>
    %34 = vector.multi_reduction <add>, %33, %cst_20 [1] : vector<16x32xf32> to vector<16xf32>
    %35 = vector.shape_cast %34 : vector<16xf32> to vector<16x1xf32>
    %cst_21 = arith.constant 3.200000e+01 : f32
    %36 = vector.broadcast %cst_21 : f32 to vector<16x1xf32>
    %37 = arith.divf %35, %36 : vector<16x1xf32>
    %38 = vector.broadcast %30 : vector<16x1xf32> to vector<16x32xf32>
    %39 = arith.subf %24, %38 : vector<16x32xf32>
    %cst_22 = arith.constant 9.99999974E-6 : f32
    %40 = vector.broadcast %cst_22 : f32 to vector<16x1xf32>
    %41 = arith.addf %37, %40 : vector<16x1xf32>
    %42 = math.rsqrt %41 : vector<16x1xf32>
    %43 = vector.broadcast %42 : vector<16x1xf32> to vector<16x32xf32>
    %44 = arith.mulf %39, %43 : vector<16x32xf32>
    %45 = vector.broadcast %25 : vector<1x32xf32> to vector<16x32xf32>
    %46 = arith.mulf %44, %45 : vector<16x32xf32>
    %47 = vector.broadcast %26 : vector<1x32xf32> to vector<16x32xf32>
    %48 = arith.addf %46, %47 : vector<16x32xf32>
    %c144_23 = arith.constant 144 : index
    %c0_24 = arith.constant 0 : index
    %49 = vector.load %arg2[%c144_23, %c0_24] : memref<5104x256xbf16, #tpu.memory_space<vmem>>, vector<128x16xbf16>
    %c272 = arith.constant 272 : index
    %c0_25 = arith.constant 0 : index
    %50 = vector.load %arg2[%c272, %c0_25] : memref<5104x256xbf16, #tpu.memory_space<vmem>>, vector<16x128xbf16>
    %c0_26 = arith.constant 0 : index
    %c0_27 = arith.constant 0 : index
    %51 = vector.load %arg3[%c0_26, %c0_27] : memref<1168x256xf32, #tpu.memory_space<vmem>>, vector<128x32xf32>
    %52 = tpu.iota {dimensions = array<i32: 0>} : vector<16x64xi32>
    %c0_i32 = arith.constant 0 : i32
    %53 = vector.broadcast %c0_i32 : i32 to vector<16x64xi32>
    %54 = arith.cmpi eq, %52, %53 : vector<16x64xi32>
    %c15_i32 = arith.constant 15 : i32
    %55 = vector.broadcast %c15_i32 : i32 to vector<16x64xi32>
    %56 = arith.cmpi eq, %52, %55 : vector<16x64xi32>
    %c152 = arith.constant 152 : index
    %c0_28 = arith.constant 0 : index
    %57 = vector.load %arg3[%c152, %c0_28] : memref<1168x256xf32, #tpu.memory_space<vmem>>, vector<1x32xf32>
    %c160 = arith.constant 160 : index
    %c0_29 = arith.constant 0 : index
    %58 = vector.load %arg3[%c160, %c0_29] : memref<1168x256xf32, #tpu.memory_space<vmem>>, vector<1x32xf32>
    %cst_30 = arith.constant dense<0.000000e+00> : vector<16xf32>
    %59 = vector.multi_reduction <add>, %48, %cst_30 [1] : vector<16x32xf32> to vector<16xf32>
    %60 = vector.shape_cast %59 : vector<16xf32> to vector<16x1xf32>
    %cst_31 = arith.constant 3.200000e+01 : f32
    %61 = vector.broadcast %cst_31 : f32 to vector<16x1xf32>
    %62 = arith.divf %60, %61 : vector<16x1xf32>
    %63 = vector.broadcast %62 : vector<16x1xf32> to vector<16x32xf32>
    %64 = arith.subf %48, %63 : vector<16x32xf32>
    %65 = arith.mulf %64, %64 : vector<16x32xf32>
    %cst_32 = arith.constant dense<0.000000e+00> : vector<16xf32>
    %66 = vector.multi_reduction <add>, %65, %cst_32 [1] : vector<16x32xf32> to vector<16xf32>
    %67 = vector.shape_cast %66 : vector<16xf32> to vector<16x1xf32>
    %cst_33 = arith.constant 3.200000e+01 : f32
    %68 = vector.broadcast %cst_33 : f32 to vector<16x1xf32>
    %69 = arith.divf %67, %68 : vector<16x1xf32>
    %70 = vector.broadcast %62 : vector<16x1xf32> to vector<16x32xf32>
    %71 = arith.subf %48, %70 : vector<16x32xf32>
    %cst_34 = arith.constant 9.99999974E-6 : f32
    %72 = vector.broadcast %cst_34 : f32 to vector<16x1xf32>
    %73 = arith.addf %69, %72 : vector<16x1xf32>
    %74 = math.rsqrt %73 : vector<16x1xf32>
    %75 = vector.broadcast %74 : vector<16x1xf32> to vector<16x32xf32>
    %76 = arith.mulf %71, %75 : vector<16x32xf32>
    %77 = vector.broadcast %57 : vector<1x32xf32> to vector<16x32xf32>
    %78 = arith.mulf %76, %77 : vector<16x32xf32>
    %79 = vector.broadcast %58 : vector<1x32xf32> to vector<16x32xf32>
    %80 = arith.addf %78, %79 : vector<16x32xf32>
    %81 = arith.truncf %80 : vector<16x32xf32> to vector<16x32xbf16>
    %c288 = arith.constant 288 : index
    %c0_35 = arith.constant 0 : index
    %82 = vector.load %arg2[%c288, %c0_35] : memref<5104x256xbf16, #tpu.memory_space<vmem>>, vector<32x32xbf16>
    %cst_36 = arith.constant dense<0.000000e+00> : vector<16x32xf32>
    %83 = tpu.matmul %81, %82, %cst_36 {dimension_numbers = #tpu.dot_dimension_numbers<[1], [0], [0], [1], [0, 0, 1, 1], [], []>} : vector<16x32xbf16>, vector<32x32xbf16>, vector<16x32xf32> -> vector<16x32xf32>
    %c168 = arith.constant 168 : index
    %c0_37 = arith.constant 0 : index
    %84 = vector.load %arg3[%c168, %c0_37] : memref<1168x256xf32, #tpu.memory_space<vmem>>, vector<1x32xf32>
    %85 = vector.broadcast %84 : vector<1x32xf32> to vector<16x32xf32>
    %86 = arith.addf %83, %85 : vector<16x32xf32>
    %c320 = arith.constant 320 : index
    %c0_38 = arith.constant 0 : index
    %87 = vector.load %arg2[%c320, %c0_38] : memref<5104x256xbf16, #tpu.memory_space<vmem>>, vector<32x32xbf16>
    %cst_39 = arith.constant dense<0.000000e+00> : vector<16x32xf32>
    %88 = tpu.matmul %81, %87, %cst_39 {dimension_numbers = #tpu.dot_dimension_numbers<[1], [0], [0], [1], [0, 0, 1, 1], [], []>} : vector<16x32xbf16>, vector<32x32xbf16>, vector<16x32xf32> -> vector<16x32xf32>
    %c176 = arith.constant 176 : index
    %c0_40 = arith.constant 0 : index
    %89 = vector.load %arg3[%c176, %c0_40] : memref<1168x256xf32, #tpu.memory_space<vmem>>, vector<1x32xf32>
    %90 = vector.broadcast %89 : vector<1x32xf32> to vector<16x32xf32>
    %91 = arith.addf %88, %90 : vector<16x32xf32>
    %c352 = arith.constant 352 : index
    %c0_41 = arith.constant 0 : index
    %92 = vector.load %arg2[%c352, %c0_41] : memref<5104x256xbf16, #tpu.memory_space<vmem>>, vector<32x32xbf16>
    %cst_42 = arith.constant dense<0.000000e+00> : vector<16x32xf32>
    %93 = tpu.matmul %81, %92, %cst_42 {dimension_numbers = #tpu.dot_dimension_numbers<[1], [0], [0], [1], [0, 0, 1, 1], [], []>} : vector<16x32xbf16>, vector<32x32xbf16>, vector<16x32xf32> -> vector<16x32xf32>
    %c184 = arith.constant 184 : index
    %c0_43 = arith.constant 0 : index
    %94 = vector.load %arg3[%c184, %c0_43] : memref<1168x256xf32, #tpu.memory_space<vmem>>, vector<1x32xf32>
    %95 = vector.broadcast %94 : vector<1x32xf32> to vector<16x32xf32>
    %96 = arith.addf %93, %95 : vector<16x32xf32>
    %97 = arith.truncf %86 : vector<16x32xf32> to vector<16x32xbf16>
    %cst_44 = arith.constant dense<0.000000e+00> : vector<128x32xf32>
    %98 = tpu.matmul %49, %97, %cst_44 {dimension_numbers = #tpu.dot_dimension_numbers<[1], [0], [0], [1], [0, 0, 1, 1], [], []>} : vector<128x16xbf16>, vector<16x32xbf16>, vector<128x32xf32> -> vector<128x32xf32>
    %99 = arith.mulf %98, %51 : vector<128x32xf32>
    %100 = arith.truncf %99 : vector<128x32xf32> to vector<128x32xbf16>
    %101 = arith.truncf %91 : vector<16x32xf32> to vector<16x32xbf16>
    %cst_45 = arith.constant dense<0.000000e+00> : vector<128x16xf32>
    %102 = tpu.matmul %100, %101, %cst_45 {dimension_numbers = #tpu.dot_dimension_numbers<[1], [1], [0], [0], [0, 0, 1, 0], [], []>} : vector<128x32xbf16>, vector<16x32xbf16>, vector<128x16xf32> -> vector<128x16xf32>
    %cst_46 = arith.constant 5.000000e-01 : f32
    %103 = vector.broadcast %cst_46 : f32 to vector<128x16xf32>
    %104 = arith.mulf %102, %103 : vector<128x16xf32>
    %cst_47 = arith.constant dense<0xFF800000> : vector<128xf32>
    %105 = vector.multi_reduction <maximumf>, %104, %cst_47 [1] : vector<128x16xf32> to vector<128xf32>
    %106 = vector.shape_cast %105 : vector<128xf32> to vector<128x1xf32>
    %107 = vector.broadcast %106 : vector<128x1xf32> to vector<128x16xf32>
    %108 = arith.subf %104, %107 : vector<128x16xf32>
    %109 = math.exp %108 : vector<128x16xf32>
    %cst_48 = arith.constant dense<0.000000e+00> : vector<128xf32>
    %110 = vector.multi_reduction <add>, %109, %cst_48 [1] : vector<128x16xf32> to vector<128xf32>
    %111 = vector.shape_cast %110 : vector<128xf32> to vector<128x1xf32>
    %112 = tpu.reciprocal %111 {approx = true} : vector<128x1xf32> -> vector<128x1xf32>
    %113 = vector.broadcast %112 : vector<128x1xf32> to vector<128x16xf32>
    %114 = arith.mulf %109, %113 : vector<128x16xf32>
    %115 = arith.truncf %114 : vector<128x16xf32> to vector<128x16xbf16>
    %116 = arith.truncf %96 : vector<16x32xf32> to vector<16x32xbf16>
    %cst_49 = arith.constant dense<0.000000e+00> : vector<128x32xf32>
    %117 = tpu.matmul %115, %116, %cst_49 {dimension_numbers = #tpu.dot_dimension_numbers<[1], [0], [0], [1], [0, 0, 1, 1], [], []>} : vector<128x16xbf16>, vector<16x32xbf16>, vector<128x32xf32> -> vector<128x32xf32>
    %118 = arith.mulf %117, %51 : vector<128x32xf32>
    %119 = arith.truncf %118 : vector<128x32xf32> to vector<128x32xbf16>
    %cst_50 = arith.constant dense<0.000000e+00> : vector<16x32xf32>
    %120 = tpu.matmul %50, %119, %cst_50 {dimension_numbers = #tpu.dot_dimension_numbers<[1], [0], [0], [1], [0, 0, 1, 1], [], []>} : vector<16x128xbf16>, vector<128x32xbf16>, vector<16x32xf32> -> vector<16x32xf32>
    %121 = arith.truncf %120 : vector<16x32xf32> to vector<16x32xbf16>
    %c384 = arith.constant 384 : index
    %c0_51 = arith.constant 0 : index
    %122 = vector.load %arg2[%c384, %c0_51] : memref<5104x256xbf16, #tpu.memory_space<vmem>>, vector<32x32xbf16>
    %cst_52 = arith.constant dense<0.000000e+00> : vector<16x32xf32>
    %123 = tpu.matmul %121, %122, %cst_52 {dimension_numbers = #tpu.dot_dimension_numbers<[1], [0], [0], [1], [0, 0, 1, 1], [], []>} : vector<16x32xbf16>, vector<32x32xbf16>, vector<16x32xf32> -> vector<16x32xf32>
    %124 = arith.addf %48, %123 : vector<16x32xf32>
    %c192 = arith.constant 192 : index
    %c0_53 = arith.constant 0 : index
    %125 = vector.load %arg3[%c192, %c0_53] : memref<1168x256xf32, #tpu.memory_space<vmem>>, vector<1x32xf32>
    %126 = vector.broadcast %125 : vector<1x32xf32> to vector<16x32xf32>
    %127 = arith.addf %124, %126 : vector<16x32xf32>
    %c200 = arith.constant 200 : index
    %c0_54 = arith.constant 0 : index
    %128 = vector.load %arg3[%c200, %c0_54] : memref<1168x256xf32, #tpu.memory_space<vmem>>, vector<1x32xf32>
    %c208 = arith.constant 208 : index
    %c0_55 = arith.constant 0 : index
    %129 = vector.load %arg3[%c208, %c0_55] : memref<1168x256xf32, #tpu.memory_space<vmem>>, vector<1x32xf32>
    %cst_56 = arith.constant dense<0.000000e+00> : vector<16xf32>
    %130 = vector.multi_reduction <add>, %127, %cst_56 [1] : vector<16x32xf32> to vector<16xf32>
    %131 = vector.shape_cast %130 : vector<16xf32> to vector<16x1xf32>
    %cst_57 = arith.constant 3.200000e+01 : f32
    %132 = vector.broadcast %cst_57 : f32 to vector<16x1xf32>
    %133 = arith.divf %131, %132 : vector<16x1xf32>
    %134 = vector.broadcast %133 : vector<16x1xf32> to vector<16x32xf32>
    %135 = arith.subf %127, %134 : vector<16x32xf32>
    %136 = arith.mulf %135, %135 : vector<16x32xf32>
    %cst_58 = arith.constant dense<0.000000e+00> : vector<16xf32>
    %137 = vector.multi_reduction <add>, %136, %cst_58 [1] : vector<16x32xf32> to vector<16xf32>
    %138 = vector.shape_cast %137 : vector<16xf32> to vector<16x1xf32>
    %cst_59 = arith.constant 3.200000e+01 : f32
    %139 = vector.broadcast %cst_59 : f32 to vector<16x1xf32>
    %140 = arith.divf %138, %139 : vector<16x1xf32>
    %141 = vector.broadcast %133 : vector<16x1xf32> to vector<16x32xf32>
    %142 = arith.subf %127, %141 : vector<16x32xf32>
    %cst_60 = arith.constant 9.99999974E-6 : f32
    %143 = vector.broadcast %cst_60 : f32 to vector<16x1xf32>
    %144 = arith.addf %140, %143 : vector<16x1xf32>
    %145 = math.rsqrt %144 : vector<16x1xf32>
    %146 = vector.broadcast %145 : vector<16x1xf32> to vector<16x32xf32>
    %147 = arith.mulf %142, %146 : vector<16x32xf32>
    %148 = vector.broadcast %128 : vector<1x32xf32> to vector<16x32xf32>
    %149 = arith.mulf %147, %148 : vector<16x32xf32>
    %150 = vector.broadcast %129 : vector<1x32xf32> to vector<16x32xf32>
    %151 = arith.addf %149, %150 : vector<16x32xf32>
    %152 = arith.truncf %151 : vector<16x32xf32> to vector<16x32xbf16>
    %c416 = arith.constant 416 : index
    %c0_61 = arith.constant 0 : index
    %153 = vector.load %arg2[%c416, %c0_61] : memref<5104x256xbf16, #tpu.memory_space<vmem>>, vector<32x64xbf16>
    %cst_62 = arith.constant dense<0.000000e+00> : vector<16x64xf32>
    %154 = tpu.matmul %152, %153, %cst_62 {dimension_numbers = #tpu.dot_dimension_numbers<[1], [0], [0], [1], [0, 0, 1, 1], [], []>} : vector<16x32xbf16>, vector<32x64xbf16>, vector<16x64xf32> -> vector<16x64xf32>
    %c216 = arith.constant 216 : index
    %c0_63 = arith.constant 0 : index
    %155 = vector.load %arg3[%c216, %c0_63] : memref<1168x256xf32, #tpu.memory_space<vmem>>, vector<1x64xf32>
    %156 = vector.broadcast %155 : vector<1x64xf32> to vector<16x64xf32>
    %157 = arith.addf %154, %156 : vector<16x64xf32>
    %c1_i32 = arith.constant 1 : i32
    %158 = tpu.dynamic_rotate %157 by %c1_i32 dim 0 : vector<16x64xf32>, i32 -> vector<16x64xf32>
    %cst_64 = arith.constant 0.000000e+00 : f32
    %159 = vector.broadcast %cst_64 : f32 to vector<16x64xf32>
    %160 = arith.select %54, %159, %158 : vector<16x64xi1>, vector<16x64xf32>
    %c15_i32_65 = arith.constant 15 : i32
    %161 = tpu.dynamic_rotate %157 by %c15_i32_65 dim 0 : vector<16x64xf32>, i32 -> vector<16x64xf32>
    %cst_66 = arith.constant 0.000000e+00 : f32
    %162 = vector.broadcast %cst_66 : f32 to vector<16x64xf32>
    %163 = arith.select %56, %162, %161 : vector<16x64xi1>, vector<16x64xf32>
    %c224 = arith.constant 224 : index
    %c0_67 = arith.constant 0 : index
    %164 = vector.load %arg3[%c224, %c0_67] : memref<1168x256xf32, #tpu.memory_space<vmem>>, vector<3x64xf32>
    %165 = vector.extract_strided_slice %164 {offsets = [0, 0], sizes = [1, 64], strides = [1, 1]} : vector<3x64xf32> to vector<1x64xf32>
    %166 = vector.broadcast %165 : vector<1x64xf32> to vector<16x64xf32>
    %167 = arith.mulf %160, %166 : vector<16x64xf32>
    %168 = vector.extract_strided_slice %164 {offsets = [1, 0], sizes = [1, 64], strides = [1, 1]} : vector<3x64xf32> to vector<1x64xf32>
    %169 = vector.broadcast %168 : vector<1x64xf32> to vector<16x64xf32>
    %170 = arith.mulf %157, %169 : vector<16x64xf32>
    %171 = arith.addf %167, %170 : vector<16x64xf32>
    %172 = vector.extract_strided_slice %164 {offsets = [2, 0], sizes = [1, 64], strides = [1, 1]} : vector<3x64xf32> to vector<1x64xf32>
    %173 = vector.broadcast %172 : vector<1x64xf32> to vector<16x64xf32>
    %174 = arith.mulf %163, %173 : vector<16x64xf32>
    %175 = arith.addf %171, %174 : vector<16x64xf32>
    %c232 = arith.constant 232 : index
    %c0_68 = arith.constant 0 : index
    %176 = vector.load %arg3[%c232, %c0_68] : memref<1168x256xf32, #tpu.memory_space<vmem>>, vector<1x64xf32>
    %177 = vector.broadcast %176 : vector<1x64xf32> to vector<16x64xf32>
    %178 = arith.addf %175, %177 : vector<16x64xf32>
    %cst_69 = arith.constant 5.000000e-01 : f32
    %179 = vector.broadcast %cst_69 : f32 to vector<16x64xf32>
    %180 = arith.mulf %179, %178 : vector<16x64xf32>
    %cst_70 = arith.constant 4.471500e-02 : f32
    %181 = vector.broadcast %cst_70 : f32 to vector<16x64xf32>
    %182 = arith.mulf %181, %178 : vector<16x64xf32>
    %183 = arith.mulf %182, %178 : vector<16x64xf32>
    %184 = arith.mulf %183, %178 : vector<16x64xf32>
    %185 = arith.addf %178, %184 : vector<16x64xf32>
    %cst_71 = arith.constant 0.797884583 : f32
    %186 = vector.broadcast %cst_71 : f32 to vector<16x64xf32>
    %187 = arith.mulf %186, %185 : vector<16x64xf32>
    %188 = math.tanh %187 : vector<16x64xf32>
    %cst_72 = arith.constant 1.000000e+00 : f32
    %189 = vector.broadcast %cst_72 : f32 to vector<16x64xf32>
    %190 = arith.addf %189, %188 : vector<16x64xf32>
    %191 = arith.mulf %180, %190 : vector<16x64xf32>
    %192 = arith.truncf %191 : vector<16x64xf32> to vector<16x64xbf16>
    %c448 = arith.constant 448 : index
    %c0_73 = arith.constant 0 : index
    %193 = vector.load %arg2[%c448, %c0_73] : memref<5104x256xbf16, #tpu.memory_space<vmem>>, vector<64x32xbf16>
    %cst_74 = arith.constant dense<0.000000e+00> : vector<16x32xf32>
    %194 = tpu.matmul %192, %193, %cst_74 {dimension_numbers = #tpu.dot_dimension_numbers<[1], [0], [0], [1], [0, 0, 1, 1], [], []>} : vector<16x64xbf16>, vector<64x32xbf16>, vector<16x32xf32> -> vector<16x32xf32>
    %195 = arith.addf %127, %194 : vector<16x32xf32>
    %c240 = arith.constant 240 : index
    %c0_75 = arith.constant 0 : index
    %196 = vector.load %arg3[%c240, %c0_75] : memref<1168x256xf32, #tpu.memory_space<vmem>>, vector<1x32xf32>
    %197 = vector.broadcast %196 : vector<1x32xf32> to vector<16x32xf32>
    %198 = arith.addf %195, %197 : vector<16x32xf32>
    %c248 = arith.constant 248 : index
    %c0_76 = arith.constant 0 : index
    %199 = vector.load %arg3[%c248, %c0_76] : memref<1168x256xf32, #tpu.memory_space<vmem>>, vector<1x32xf32>
    %c256 = arith.constant 256 : index
    %c0_77 = arith.constant 0 : index
    %200 = vector.load %arg3[%c256, %c0_77] : memref<1168x256xf32, #tpu.memory_space<vmem>>, vector<1x32xf32>
    %cst_78 = arith.constant dense<0.000000e+00> : vector<16xf32>
    %201 = vector.multi_reduction <add>, %198, %cst_78 [1] : vector<16x32xf32> to vector<16xf32>
    %202 = vector.shape_cast %201 : vector<16xf32> to vector<16x1xf32>
    %cst_79 = arith.constant 3.200000e+01 : f32
    %203 = vector.broadcast %cst_79 : f32 to vector<16x1xf32>
    %204 = arith.divf %202, %203 : vector<16x1xf32>
    %205 = vector.broadcast %204 : vector<16x1xf32> to vector<16x32xf32>
    %206 = arith.subf %198, %205 : vector<16x32xf32>
    %207 = arith.mulf %206, %206 : vector<16x32xf32>
    %cst_80 = arith.constant dense<0.000000e+00> : vector<16xf32>
    %208 = vector.multi_reduction <add>, %207, %cst_80 [1] : vector<16x32xf32> to vector<16xf32>
    %209 = vector.shape_cast %208 : vector<16xf32> to vector<16x1xf32>
    %cst_81 = arith.constant 3.200000e+01 : f32
    %210 = vector.broadcast %cst_81 : f32 to vector<16x1xf32>
    %211 = arith.divf %209, %210 : vector<16x1xf32>
    %212 = vector.broadcast %204 : vector<16x1xf32> to vector<16x32xf32>
    %213 = arith.subf %198, %212 : vector<16x32xf32>
    %cst_82 = arith.constant 9.99999974E-6 : f32
    %214 = vector.broadcast %cst_82 : f32 to vector<16x1xf32>
    %215 = arith.addf %211, %214 : vector<16x1xf32>
    %216 = math.rsqrt %215 : vector<16x1xf32>
    %217 = vector.broadcast %216 : vector<16x1xf32> to vector<16x32xf32>
    %218 = arith.mulf %213, %217 : vector<16x32xf32>
    %219 = vector.broadcast %199 : vector<1x32xf32> to vector<16x32xf32>
    %220 = arith.mulf %218, %219 : vector<16x32xf32>
    %221 = vector.broadcast %200 : vector<1x32xf32> to vector<16x32xf32>
    %222 = arith.addf %220, %221 : vector<16x32xf32>
    %223 = arith.truncf %222 : vector<16x32xf32> to vector<16x32xbf16>
    %c512 = arith.constant 512 : index
    %c0_83 = arith.constant 0 : index
    %224 = vector.load %arg2[%c512, %c0_83] : memref<5104x256xbf16, #tpu.memory_space<vmem>>, vector<32x32xbf16>
    %cst_84 = arith.constant dense<0.000000e+00> : vector<16x32xf32>
    %225 = tpu.matmul %223, %224, %cst_84 {dimension_numbers = #tpu.dot_dimension_numbers<[1], [0], [0], [1], [0, 0, 1, 1], [], []>} : vector<16x32xbf16>, vector<32x32xbf16>, vector<16x32xf32> -> vector<16x32xf32>
    %c264 = arith.constant 264 : index
    %c0_85 = arith.constant 0 : index
    %226 = vector.load %arg3[%c264, %c0_85] : memref<1168x256xf32, #tpu.memory_space<vmem>>, vector<1x32xf32>
    %227 = vector.broadcast %226 : vector<1x32xf32> to vector<16x32xf32>
    %228 = arith.addf %225, %227 : vector<16x32xf32>
    %c544 = arith.constant 544 : index
    %c0_86 = arith.constant 0 : index
    %229 = vector.load %arg2[%c544, %c0_86] : memref<5104x256xbf16, #tpu.memory_space<vmem>>, vector<32x32xbf16>
    %cst_87 = arith.constant dense<0.000000e+00> : vector<16x32xf32>
    %230 = tpu.matmul %223, %229, %cst_87 {dimension_numbers = #tpu.dot_dimension_numbers<[1], [0], [0], [1], [0, 0, 1, 1], [], []>} : vector<16x32xbf16>, vector<32x32xbf16>, vector<16x32xf32> -> vector<16x32xf32>
    %c272_88 = arith.constant 272 : index
    %c0_89 = arith.constant 0 : index
    %231 = vector.load %arg3[%c272_88, %c0_89] : memref<1168x256xf32, #tpu.memory_space<vmem>>, vector<1x32xf32>
    %232 = vector.broadcast %231 : vector<1x32xf32> to vector<16x32xf32>
    %233 = arith.addf %230, %232 : vector<16x32xf32>
    %c576 = arith.constant 576 : index
    %c0_90 = arith.constant 0 : index
    %234 = vector.load %arg2[%c576, %c0_90] : memref<5104x256xbf16, #tpu.memory_space<vmem>>, vector<32x32xbf16>
    %cst_91 = arith.constant dense<0.000000e+00> : vector<16x32xf32>
    %235 = tpu.matmul %223, %234, %cst_91 {dimension_numbers = #tpu.dot_dimension_numbers<[1], [0], [0], [1], [0, 0, 1, 1], [], []>} : vector<16x32xbf16>, vector<32x32xbf16>, vector<16x32xf32> -> vector<16x32xf32>
    %c280 = arith.constant 280 : index
    %c0_92 = arith.constant 0 : index
    %236 = vector.load %arg3[%c280, %c0_92] : memref<1168x256xf32, #tpu.memory_space<vmem>>, vector<1x32xf32>
    %237 = vector.broadcast %236 : vector<1x32xf32> to vector<16x32xf32>
    %238 = arith.addf %235, %237 : vector<16x32xf32>
    %239 = arith.truncf %228 : vector<16x32xf32> to vector<16x32xbf16>
    %cst_93 = arith.constant dense<0.000000e+00> : vector<128x32xf32>
    %240 = tpu.matmul %49, %239, %cst_93 {dimension_numbers = #tpu.dot_dimension_numbers<[1], [0], [0], [1], [0, 0, 1, 1], [], []>} : vector<128x16xbf16>, vector<16x32xbf16>, vector<128x32xf32> -> vector<128x32xf32>
    %241 = arith.mulf %240, %51 : vector<128x32xf32>
    %242 = arith.truncf %241 : vector<128x32xf32> to vector<128x32xbf16>
    %243 = arith.truncf %233 : vector<16x32xf32> to vector<16x32xbf16>
    %cst_94 = arith.constant dense<0.000000e+00> : vector<128x16xf32>
    %244 = tpu.matmul %242, %243, %cst_94 {dimension_numbers = #tpu.dot_dimension_numbers<[1], [1], [0], [0], [0, 0, 1, 0], [], []>} : vector<128x32xbf16>, vector<16x32xbf16>, vector<128x16xf32> -> vector<128x16xf32>
    %cst_95 = arith.constant 5.000000e-01 : f32
    %245 = vector.broadcast %cst_95 : f32 to vector<128x16xf32>
    %246 = arith.mulf %244, %245 : vector<128x16xf32>
    %cst_96 = arith.constant dense<0xFF800000> : vector<128xf32>
    %247 = vector.multi_reduction <maximumf>, %246, %cst_96 [1] : vector<128x16xf32> to vector<128xf32>
    %248 = vector.shape_cast %247 : vector<128xf32> to vector<128x1xf32>
    %249 = vector.broadcast %248 : vector<128x1xf32> to vector<128x16xf32>
    %250 = arith.subf %246, %249 : vector<128x16xf32>
    %251 = math.exp %250 : vector<128x16xf32>
    %cst_97 = arith.constant dense<0.000000e+00> : vector<128xf32>
    %252 = vector.multi_reduction <add>, %251, %cst_97 [1] : vector<128x16xf32> to vector<128xf32>
    %253 = vector.shape_cast %252 : vector<128xf32> to vector<128x1xf32>
    %254 = tpu.reciprocal %253 {approx = true} : vector<128x1xf32> -> vector<128x1xf32>
    %255 = vector.broadcast %254 : vector<128x1xf32> to vector<128x16xf32>
    %256 = arith.mulf %251, %255 : vector<128x16xf32>
    %257 = arith.truncf %256 : vector<128x16xf32> to vector<128x16xbf16>
    %258 = arith.truncf %238 : vector<16x32xf32> to vector<16x32xbf16>
    %cst_98 = arith.constant dense<0.000000e+00> : vector<128x32xf32>
    %259 = tpu.matmul %257, %258, %cst_98 {dimension_numbers = #tpu.dot_dimension_numbers<[1], [0], [0], [1], [0, 0, 1, 1], [], []>} : vector<128x16xbf16>, vector<16x32xbf16>, vector<128x32xf32> -> vector<128x32xf32>
    %260 = arith.mulf %259, %51 : vector<128x32xf32>
    %261 = arith.truncf %260 : vector<128x32xf32> to vector<128x32xbf16>
    %cst_99 = arith.constant dense<0.000000e+00> : vector<16x32xf32>
    %262 = tpu.matmul %50, %261, %cst_99 {dimension_numbers = #tpu.dot_dimension_numbers<[1], [0], [0], [1], [0, 0, 1, 1], [], []>} : vector<16x128xbf16>, vector<128x32xbf16>, vector<16x32xf32> -> vector<16x32xf32>
    %263 = arith.truncf %262 : vector<16x32xf32> to vector<16x32xbf16>
    %c608 = arith.constant 608 : index
    %c0_100 = arith.constant 0 : index
    %264 = vector.load %arg2[%c608, %c0_100] : memref<5104x256xbf16, #tpu.memory_space<vmem>>, vector<32x32xbf16>
    %cst_101 = arith.constant dense<0.000000e+00> : vector<16x32xf32>
    %265 = tpu.matmul %263, %264, %cst_101 {dimension_numbers = #tpu.dot_dimension_numbers<[1], [0], [0], [1], [0, 0, 1, 1], [], []>} : vector<16x32xbf16>, vector<32x32xbf16>, vector<16x32xf32> -> vector<16x32xf32>
    %266 = arith.addf %198, %265 : vector<16x32xf32>
    %c288_102 = arith.constant 288 : index
    %c0_103 = arith.constant 0 : index
    %267 = vector.load %arg3[%c288_102, %c0_103] : memref<1168x256xf32, #tpu.memory_space<vmem>>, vector<1x32xf32>
    %268 = vector.broadcast %267 : vector<1x32xf32> to vector<16x32xf32>
    %269 = arith.addf %266, %268 : vector<16x32xf32>
    %c296 = arith.constant 296 : index
    %c0_104 = arith.constant 0 : index
    %270 = vector.load %arg3[%c296, %c0_104] : memref<1168x256xf32, #tpu.memory_space<vmem>>, vector<1x32xf32>
    %c304 = arith.constant 304 : index
    %c0_105 = arith.constant 0 : index
    %271 = vector.load %arg3[%c304, %c0_105] : memref<1168x256xf32, #tpu.memory_space<vmem>>, vector<1x32xf32>
    %cst_106 = arith.constant dense<0.000000e+00> : vector<16xf32>
    %272 = vector.multi_reduction <add>, %269, %cst_106 [1] : vector<16x32xf32> to vector<16xf32>
    %273 = vector.shape_cast %272 : vector<16xf32> to vector<16x1xf32>
    %cst_107 = arith.constant 3.200000e+01 : f32
    %274 = vector.broadcast %cst_107 : f32 to vector<16x1xf32>
    %275 = arith.divf %273, %274 : vector<16x1xf32>
    %276 = vector.broadcast %275 : vector<16x1xf32> to vector<16x32xf32>
    %277 = arith.subf %269, %276 : vector<16x32xf32>
    %278 = arith.mulf %277, %277 : vector<16x32xf32>
    %cst_108 = arith.constant dense<0.000000e+00> : vector<16xf32>
    %279 = vector.multi_reduction <add>, %278, %cst_108 [1] : vector<16x32xf32> to vector<16xf32>
    %280 = vector.shape_cast %279 : vector<16xf32> to vector<16x1xf32>
    %cst_109 = arith.constant 3.200000e+01 : f32
    %281 = vector.broadcast %cst_109 : f32 to vector<16x1xf32>
    %282 = arith.divf %280, %281 : vector<16x1xf32>
    %283 = vector.broadcast %275 : vector<16x1xf32> to vector<16x32xf32>
    %284 = arith.subf %269, %283 : vector<16x32xf32>
    %cst_110 = arith.constant 9.99999974E-6 : f32
    %285 = vector.broadcast %cst_110 : f32 to vector<16x1xf32>
    %286 = arith.addf %282, %285 : vector<16x1xf32>
    %287 = math.rsqrt %286 : vector<16x1xf32>
    %288 = vector.broadcast %287 : vector<16x1xf32> to vector<16x32xf32>
    %289 = arith.mulf %284, %288 : vector<16x32xf32>
    %290 = vector.broadcast %270 : vector<1x32xf32> to vector<16x32xf32>
    %291 = arith.mulf %289, %290 : vector<16x32xf32>
    %292 = vector.broadcast %271 : vector<1x32xf32> to vector<16x32xf32>
    %293 = arith.addf %291, %292 : vector<16x32xf32>
    %294 = arith.truncf %293 : vector<16x32xf32> to vector<16x32xbf16>
    %c640 = arith.constant 640 : index
    %c0_111 = arith.constant 0 : index
    %295 = vector.load %arg2[%c640, %c0_111] : memref<5104x256xbf16, #tpu.memory_space<vmem>>, vector<32x64xbf16>
    %cst_112 = arith.constant dense<0.000000e+00> : vector<16x64xf32>
    %296 = tpu.matmul %294, %295, %cst_112 {dimension_numbers = #tpu.dot_dimension_numbers<[1], [0], [0], [1], [0, 0, 1, 1], [], []>} : vector<16x32xbf16>, vector<32x64xbf16>, vector<16x64xf32> -> vector<16x64xf32>
    %c312 = arith.constant 312 : index
    %c0_113 = arith.constant 0 : index
    %297 = vector.load %arg3[%c312, %c0_113] : memref<1168x256xf32, #tpu.memory_space<vmem>>, vector<1x64xf32>
    %298 = vector.broadcast %297 : vector<1x64xf32> to vector<16x64xf32>
    %299 = arith.addf %296, %298 : vector<16x64xf32>
    %c1_i32_114 = arith.constant 1 : i32
    %300 = tpu.dynamic_rotate %299 by %c1_i32_114 dim 0 : vector<16x64xf32>, i32 -> vector<16x64xf32>
    %cst_115 = arith.constant 0.000000e+00 : f32
    %301 = vector.broadcast %cst_115 : f32 to vector<16x64xf32>
    %302 = arith.select %54, %301, %300 : vector<16x64xi1>, vector<16x64xf32>
    %c15_i32_116 = arith.constant 15 : i32
    %303 = tpu.dynamic_rotate %299 by %c15_i32_116 dim 0 : vector<16x64xf32>, i32 -> vector<16x64xf32>
    %cst_117 = arith.constant 0.000000e+00 : f32
    %304 = vector.broadcast %cst_117 : f32 to vector<16x64xf32>
    %305 = arith.select %56, %304, %303 : vector<16x64xi1>, vector<16x64xf32>
    %c320_118 = arith.constant 320 : index
    %c0_119 = arith.constant 0 : index
    %306 = vector.load %arg3[%c320_118, %c0_119] : memref<1168x256xf32, #tpu.memory_space<vmem>>, vector<3x64xf32>
    %307 = vector.extract_strided_slice %306 {offsets = [0, 0], sizes = [1, 64], strides = [1, 1]} : vector<3x64xf32> to vector<1x64xf32>
    %308 = vector.broadcast %307 : vector<1x64xf32> to vector<16x64xf32>
    %309 = arith.mulf %302, %308 : vector<16x64xf32>
    %310 = vector.extract_strided_slice %306 {offsets = [1, 0], sizes = [1, 64], strides = [1, 1]} : vector<3x64xf32> to vector<1x64xf32>
    %311 = vector.broadcast %310 : vector<1x64xf32> to vector<16x64xf32>
    %312 = arith.mulf %299, %311 : vector<16x64xf32>
    %313 = arith.addf %309, %312 : vector<16x64xf32>
    %314 = vector.extract_strided_slice %306 {offsets = [2, 0], sizes = [1, 64], strides = [1, 1]} : vector<3x64xf32> to vector<1x64xf32>
    %315 = vector.broadcast %314 : vector<1x64xf32> to vector<16x64xf32>
    %316 = arith.mulf %305, %315 : vector<16x64xf32>
    %317 = arith.addf %313, %316 : vector<16x64xf32>
    %c328 = arith.constant 328 : index
    %c0_120 = arith.constant 0 : index
    %318 = vector.load %arg3[%c328, %c0_120] : memref<1168x256xf32, #tpu.memory_space<vmem>>, vector<1x64xf32>
    %319 = vector.broadcast %318 : vector<1x64xf32> to vector<16x64xf32>
    %320 = arith.addf %317, %319 : vector<16x64xf32>
    %cst_121 = arith.constant 5.000000e-01 : f32
    %321 = vector.broadcast %cst_121 : f32 to vector<16x64xf32>
    %322 = arith.mulf %321, %320 : vector<16x64xf32>
    %cst_122 = arith.constant 4.471500e-02 : f32
    %323 = vector.broadcast %cst_122 : f32 to vector<16x64xf32>
    %324 = arith.mulf %323, %320 : vector<16x64xf32>
    %325 = arith.mulf %324, %320 : vector<16x64xf32>
    %326 = arith.mulf %325, %320 : vector<16x64xf32>
    %327 = arith.addf %320, %326 : vector<16x64xf32>
    %cst_123 = arith.constant 0.797884583 : f32
    %328 = vector.broadcast %cst_123 : f32 to vector<16x64xf32>
    %329 = arith.mulf %328, %327 : vector<16x64xf32>
    %330 = math.tanh %329 : vector<16x64xf32>
    %cst_124 = arith.constant 1.000000e+00 : f32
    %331 = vector.broadcast %cst_124 : f32 to vector<16x64xf32>
    %332 = arith.addf %331, %330 : vector<16x64xf32>
    %333 = arith.mulf %322, %332 : vector<16x64xf32>
    %334 = arith.truncf %333 : vector<16x64xf32> to vector<16x64xbf16>
    %c672 = arith.constant 672 : index
    %c0_125 = arith.constant 0 : index
    %335 = vector.load %arg2[%c672, %c0_125] : memref<5104x256xbf16, #tpu.memory_space<vmem>>, vector<64x32xbf16>
    %cst_126 = arith.constant dense<0.000000e+00> : vector<16x32xf32>
    %336 = tpu.matmul %334, %335, %cst_126 {dimension_numbers = #tpu.dot_dimension_numbers<[1], [0], [0], [1], [0, 0, 1, 1], [], []>} : vector<16x64xbf16>, vector<64x32xbf16>, vector<16x32xf32> -> vector<16x32xf32>
    %337 = arith.addf %269, %336 : vector<16x32xf32>
    %c336 = arith.constant 336 : index
    %c0_127 = arith.constant 0 : index
    %338 = vector.load %arg3[%c336, %c0_127] : memref<1168x256xf32, #tpu.memory_space<vmem>>, vector<1x32xf32>
    %339 = vector.broadcast %338 : vector<1x32xf32> to vector<16x32xf32>
    %340 = arith.addf %337, %339 : vector<16x32xf32>
    %c344 = arith.constant 344 : index
    %c0_128 = arith.constant 0 : index
    %341 = vector.load %arg3[%c344, %c0_128] : memref<1168x256xf32, #tpu.memory_space<vmem>>, vector<1x32xf32>
    %c352_129 = arith.constant 352 : index
    %c0_130 = arith.constant 0 : index
    %342 = vector.load %arg3[%c352_129, %c0_130] : memref<1168x256xf32, #tpu.memory_space<vmem>>, vector<1x32xf32>
    %cst_131 = arith.constant dense<0.000000e+00> : vector<16xf32>
    %343 = vector.multi_reduction <add>, %340, %cst_131 [1] : vector<16x32xf32> to vector<16xf32>
    %344 = vector.shape_cast %343 : vector<16xf32> to vector<16x1xf32>
    %cst_132 = arith.constant 3.200000e+01 : f32
    %345 = vector.broadcast %cst_132 : f32 to vector<16x1xf32>
    %346 = arith.divf %344, %345 : vector<16x1xf32>
    %347 = vector.broadcast %346 : vector<16x1xf32> to vector<16x32xf32>
    %348 = arith.subf %340, %347 : vector<16x32xf32>
    %349 = arith.mulf %348, %348 : vector<16x32xf32>
    %cst_133 = arith.constant dense<0.000000e+00> : vector<16xf32>
    %350 = vector.multi_reduction <add>, %349, %cst_133 [1] : vector<16x32xf32> to vector<16xf32>
    %351 = vector.shape_cast %350 : vector<16xf32> to vector<16x1xf32>
    %cst_134 = arith.constant 3.200000e+01 : f32
    %352 = vector.broadcast %cst_134 : f32 to vector<16x1xf32>
    %353 = arith.divf %351, %352 : vector<16x1xf32>
    %354 = vector.broadcast %346 : vector<16x1xf32> to vector<16x32xf32>
    %355 = arith.subf %340, %354 : vector<16x32xf32>
    %cst_135 = arith.constant 9.99999974E-6 : f32
    %356 = vector.broadcast %cst_135 : f32 to vector<16x1xf32>
    %357 = arith.addf %353, %356 : vector<16x1xf32>
    %358 = math.rsqrt %357 : vector<16x1xf32>
    %359 = vector.broadcast %358 : vector<16x1xf32> to vector<16x32xf32>
    %360 = arith.mulf %355, %359 : vector<16x32xf32>
    %361 = vector.broadcast %341 : vector<1x32xf32> to vector<16x32xf32>
    %362 = arith.mulf %360, %361 : vector<16x32xf32>
    %363 = vector.broadcast %342 : vector<1x32xf32> to vector<16x32xf32>
    %364 = arith.addf %362, %363 : vector<16x32xf32>
    %c0_136 = arith.constant 0 : index
    %c0_137 = arith.constant 0 : index
    %c0_138 = arith.constant 0 : index
    %365 = vector.load %arg4[%c0_136, %c0_137, %c0_138] : memref<1x16x32xf32, #tpu.memory_space<vmem>>, vector<1x16x32xf32>
    %366 = vector.shape_cast %365 : vector<1x16x32xf32> to vector<16x32xf32>
    %367 = vector.shape_cast %364 : vector<16x32xf32> to vector<1x16x32xf32>
    tpu.vector_store %arg4[%c0_136, %c0_137, %c0_138], %367 {strides = array<i32>} : memref<1x16x32xf32, #tpu.memory_space<vmem>>, vector<1x16x32xf32>,
    %368 = arith.truncf %364 : vector<16x32xf32> to vector<16x32xbf16>
    %cst_139 = arith.constant 0.000000e+00 : f32
    %369 = vector.broadcast %cst_139 : f32 to vector<8x64xf32>
    %c424 = arith.constant 424 : index
    %c0_140 = arith.constant 0 : index
    %370 = vector.load %arg3[%c424, %c0_140] : memref<1168x256xf32, #tpu.memory_space<vmem>>, vector<1x64xf32>
    %371 = vector.broadcast %370 : vector<1x64xf32> to vector<8x64xf32>
    %372 = arith.addf %369, %371 : vector<8x64xf32>
    %c736 = arith.constant 736 : index
    %c0_141 = arith.constant 0 : index
    %373 = vector.load %arg2[%c736, %c0_141] : memref<5104x256xbf16, #tpu.memory_space<vmem>>, vector<8x16xbf16>
    %cst_142 = arith.constant dense<0.000000e+00> : vector<8x32xf32>
    %374 = tpu.matmul %373, %368, %cst_142 {dimension_numbers = #tpu.dot_dimension_numbers<[1], [0], [0], [1], [0, 0, 1, 1], [], []>} : vector<8x16xbf16>, vector<16x32xbf16>, vector<8x32xf32> -> vector<8x32xf32>
    %375 = arith.truncf %374 : vector<8x32xf32> to vector<8x32xbf16>
    %c784 = arith.constant 784 : index
    %c0_143 = arith.constant 0 : index
    %376 = vector.load %arg2[%c784, %c0_143] : memref<5104x256xbf16, #tpu.memory_space<vmem>>, vector<32x64xbf16>
    %cst_144 = arith.constant dense<0.000000e+00> : vector<8x64xf32>
    %377 = tpu.matmul %375, %376, %cst_144 {dimension_numbers = #tpu.dot_dimension_numbers<[1], [0], [0], [1], [0, 0, 1, 1], [], []>} : vector<8x32xbf16>, vector<32x64xbf16>, vector<8x64xf32> -> vector<8x64xf32>
    %378 = arith.addf %372, %377 : vector<8x64xf32>
    %c752 = arith.constant 752 : index
    %c0_145 = arith.constant 0 : index
    %379 = vector.load %arg2[%c752, %c0_145] : memref<5104x256xbf16, #tpu.memory_space<vmem>>, vector<8x16xbf16>
    %cst_146 = arith.constant dense<0.000000e+00> : vector<8x32xf32>
    %380 = tpu.matmul %379, %368, %cst_146 {dimension_numbers = #tpu.dot_dimension_numbers<[1], [0], [0], [1], [0, 0, 1, 1], [], []>} : vector<8x16xbf16>, vector<16x32xbf16>, vector<8x32xf32> -> vector<8x32xf32>
    %381 = arith.truncf %380 : vector<8x32xf32> to vector<8x32xbf16>
    %c816 = arith.constant 816 : index
    %c0_147 = arith.constant 0 : index
    %382 = vector.load %arg2[%c816, %c0_147] : memref<5104x256xbf16, #tpu.memory_space<vmem>>, vector<32x64xbf16>
    %cst_148 = arith.constant dense<0.000000e+00> : vector<8x64xf32>
    %383 = tpu.matmul %381, %382, %cst_148 {dimension_numbers = #tpu.dot_dimension_numbers<[1], [0], [0], [1], [0, 0, 1, 1], [], []>} : vector<8x32xbf16>, vector<32x64xbf16>, vector<8x64xf32> -> vector<8x64xf32>
    %384 = arith.addf %378, %383 : vector<8x64xf32>
    %c768 = arith.constant 768 : index
    %c0_149 = arith.constant 0 : index
    %385 = vector.load %arg2[%c768, %c0_149] : memref<5104x256xbf16, #tpu.memory_space<vmem>>, vector<8x16xbf16>
    %cst_150 = arith.constant dense<0.000000e+00> : vector<8x32xf32>
    %386 = tpu.matmul %385, %368, %cst_150 {dimension_numbers = #tpu.dot_dimension_numbers<[1], [0], [0], [1], [0, 0, 1, 1], [], []>} : vector<8x16xbf16>, vector<16x32xbf16>, vector<8x32xf32> -> vector<8x32xf32>
    %387 = arith.truncf %386 : vector<8x32xf32> to vector<8x32xbf16>
    %c848 = arith.constant 848 : index
    %c0_151 = arith.constant 0 : index
    %388 = vector.load %arg2[%c848, %c0_151] : memref<5104x256xbf16, #tpu.memory_space<vmem>>, vector<32x64xbf16>
    %cst_152 = arith.constant dense<0.000000e+00> : vector<8x64xf32>
    %389 = tpu.matmul %387, %388, %cst_152 {dimension_numbers = #tpu.dot_dimension_numbers<[1], [0], [0], [1], [0, 0, 1, 1], [], []>} : vector<8x32xbf16>, vector<32x64xbf16>, vector<8x64xf32> -> vector<8x64xf32>
    %390 = arith.addf %384, %389 : vector<8x64xf32>
    %c432 = arith.constant 432 : index
    %c0_153 = arith.constant 0 : index
    %391 = vector.load %arg3[%c432, %c0_153] : memref<1168x256xf32, #tpu.memory_space<vmem>>, vector<1x64xf32>
    %c440 = arith.constant 440 : index
    %c0_154 = arith.constant 0 : index
    %392 = vector.load %arg3[%c440, %c0_154] : memref<1168x256xf32, #tpu.memory_space<vmem>>, vector<1x64xf32>
    %cst_155 = arith.constant dense<0.000000e+00> : vector<8xf32>
    %393 = vector.multi_reduction <add>, %390, %cst_155 [1] : vector<8x64xf32> to vector<8xf32>
    %394 = vector.shape_cast %393 : vector<8xf32> to vector<8x1xf32>
    %cst_156 = arith.constant 6.400000e+01 : f32
    %395 = vector.broadcast %cst_156 : f32 to vector<8x1xf32>
    %396 = arith.divf %394, %395 : vector<8x1xf32>
    %397 = vector.broadcast %396 : vector<8x1xf32> to vector<8x64xf32>
    %398 = arith.subf %390, %397 : vector<8x64xf32>
    %399 = arith.mulf %398, %398 : vector<8x64xf32>
    %cst_157 = arith.constant dense<0.000000e+00> : vector<8xf32>
    %400 = vector.multi_reduction <add>, %399, %cst_157 [1] : vector<8x64xf32> to vector<8xf32>
    %401 = vector.shape_cast %400 : vector<8xf32> to vector<8x1xf32>
    %cst_158 = arith.constant 6.400000e+01 : f32
    %402 = vector.broadcast %cst_158 : f32 to vector<8x1xf32>
    %403 = arith.divf %401, %402 : vector<8x1xf32>
    %404 = vector.broadcast %396 : vector<8x1xf32> to vector<8x64xf32>
    %405 = arith.subf %390, %404 : vector<8x64xf32>
    %cst_159 = arith.constant 9.99999974E-6 : f32
    %406 = vector.broadcast %cst_159 : f32 to vector<8x1xf32>
    %407 = arith.addf %403, %406 : vector<8x1xf32>
    %408 = math.rsqrt %407 : vector<8x1xf32>
    %409 = vector.broadcast %408 : vector<8x1xf32> to vector<8x64xf32>
    %410 = arith.mulf %405, %409 : vector<8x64xf32>
    %411 = vector.broadcast %391 : vector<1x64xf32> to vector<8x64xf32>
    %412 = arith.mulf %410, %411 : vector<8x64xf32>
    %413 = vector.broadcast %392 : vector<1x64xf32> to vector<8x64xf32>
    %414 = arith.addf %412, %413 : vector<8x64xf32>
    %c880 = arith.constant 880 : index
    %c0_160 = arith.constant 0 : index
    %415 = vector.load %arg2[%c880, %c0_160] : memref<5104x256xbf16, #tpu.memory_space<vmem>>, vector<64x8xbf16>
    %c944 = arith.constant 944 : index
    %c0_161 = arith.constant 0 : index
    %416 = vector.load %arg2[%c944, %c0_161] : memref<5104x256xbf16, #tpu.memory_space<vmem>>, vector<8x64xbf16>
    %c360 = arith.constant 360 : index
    %c0_162 = arith.constant 0 : index
    %417 = vector.load %arg3[%c360, %c0_162] : memref<1168x256xf32, #tpu.memory_space<vmem>>, vector<64x64xf32>
    %418 = tpu.iota {dimensions = array<i32: 0>} : vector<8x128xi32>
    %c0_i32_163 = arith.constant 0 : i32
    %419 = vector.broadcast %c0_i32_163 : i32 to vector<8x128xi32>
    %420 = arith.cmpi eq, %418, %419 : vector<8x128xi32>
    %c7_i32 = arith.constant 7 : i32
    %421 = vector.broadcast %c7_i32 : i32 to vector<8x128xi32>
    %422 = arith.cmpi eq, %418, %421 : vector<8x128xi32>
    %c448_164 = arith.constant 448 : index
    %c0_165 = arith.constant 0 : index
    %423 = vector.load %arg3[%c448_164, %c0_165] : memref<1168x256xf32, #tpu.memory_space<vmem>>, vector<1x64xf32>
    %c456 = arith.constant 456 : index
    %c0_166 = arith.constant 0 : index
    %424 = vector.load %arg3[%c456, %c0_166] : memref<1168x256xf32, #tpu.memory_space<vmem>>, vector<1x64xf32>
    %cst_167 = arith.constant dense<0.000000e+00> : vector<8xf32>
    %425 = vector.multi_reduction <add>, %414, %cst_167 [1] : vector<8x64xf32> to vector<8xf32>
    %426 = vector.shape_cast %425 : vector<8xf32> to vector<8x1xf32>
    %cst_168 = arith.constant 6.400000e+01 : f32
    %427 = vector.broadcast %cst_168 : f32 to vector<8x1xf32>
    %428 = arith.divf %426, %427 : vector<8x1xf32>
    %429 = vector.broadcast %428 : vector<8x1xf32> to vector<8x64xf32>
    %430 = arith.subf %414, %429 : vector<8x64xf32>
    %431 = arith.mulf %430, %430 : vector<8x64xf32>
    %cst_169 = arith.constant dense<0.000000e+00> : vector<8xf32>
    %432 = vector.multi_reduction <add>, %431, %cst_169 [1] : vector<8x64xf32> to vector<8xf32>
    %433 = vector.shape_cast %432 : vector<8xf32> to vector<8x1xf32>
    %cst_170 = arith.constant 6.400000e+01 : f32
    %434 = vector.broadcast %cst_170 : f32 to vector<8x1xf32>
    %435 = arith.divf %433, %434 : vector<8x1xf32>
    %436 = vector.broadcast %428 : vector<8x1xf32> to vector<8x64xf32>
    %437 = arith.subf %414, %436 : vector<8x64xf32>
    %cst_171 = arith.constant 9.99999974E-6 : f32
    %438 = vector.broadcast %cst_171 : f32 to vector<8x1xf32>
    %439 = arith.addf %435, %438 : vector<8x1xf32>
    %440 = math.rsqrt %439 : vector<8x1xf32>
    %441 = vector.broadcast %440 : vector<8x1xf32> to vector<8x64xf32>
    %442 = arith.mulf %437, %441 : vector<8x64xf32>
    %443 = vector.broadcast %423 : vector<1x64xf32> to vector<8x64xf32>
    %444 = arith.mulf %442, %443 : vector<8x64xf32>
    %445 = vector.broadcast %424 : vector<1x64xf32> to vector<8x64xf32>
    %446 = arith.addf %444, %445 : vector<8x64xf32>
    %447 = arith.truncf %446 : vector<8x64xf32> to vector<8x64xbf16>
    %c960 = arith.constant 960 : index
    %c0_172 = arith.constant 0 : index
    %448 = vector.load %arg2[%c960, %c0_172] : memref<5104x256xbf16, #tpu.memory_space<vmem>>, vector<64x64xbf16>
    %cst_173 = arith.constant dense<0.000000e+00> : vector<8x64xf32>
    %449 = tpu.matmul %447, %448, %cst_173 {dimension_numbers = #tpu.dot_dimension_numbers<[1], [0], [0], [1], [0, 0, 1, 1], [], []>} : vector<8x64xbf16>, vector<64x64xbf16>, vector<8x64xf32> -> vector<8x64xf32>
    %c464 = arith.constant 464 : index
    %c0_174 = arith.constant 0 : index
    %450 = vector.load %arg3[%c464, %c0_174] : memref<1168x256xf32, #tpu.memory_space<vmem>>, vector<1x64xf32>
    %451 = vector.broadcast %450 : vector<1x64xf32> to vector<8x64xf32>
    %452 = arith.addf %449, %451 : vector<8x64xf32>
    %c1024 = arith.constant 1024 : index
    %c0_175 = arith.constant 0 : index
    %453 = vector.load %arg2[%c1024, %c0_175] : memref<5104x256xbf16, #tpu.memory_space<vmem>>, vector<64x64xbf16>
    %cst_176 = arith.constant dense<0.000000e+00> : vector<8x64xf32>
    %454 = tpu.matmul %447, %453, %cst_176 {dimension_numbers = #tpu.dot_dimension_numbers<[1], [0], [0], [1], [0, 0, 1, 1], [], []>} : vector<8x64xbf16>, vector<64x64xbf16>, vector<8x64xf32> -> vector<8x64xf32>
    %c472 = arith.constant 472 : index
    %c0_177 = arith.constant 0 : index
    %455 = vector.load %arg3[%c472, %c0_177] : memref<1168x256xf32, #tpu.memory_space<vmem>>, vector<1x64xf32>
    %456 = vector.broadcast %455 : vector<1x64xf32> to vector<8x64xf32>
    %457 = arith.addf %454, %456 : vector<8x64xf32>
    %c1088 = arith.constant 1088 : index
    %c0_178 = arith.constant 0 : index
    %458 = vector.load %arg2[%c1088, %c0_178] : memref<5104x256xbf16, #tpu.memory_space<vmem>>, vector<64x64xbf16>
    %cst_179 = arith.constant dense<0.000000e+00> : vector<8x64xf32>
    %459 = tpu.matmul %447, %458, %cst_179 {dimension_numbers = #tpu.dot_dimension_numbers<[1], [0], [0], [1], [0, 0, 1, 1], [], []>} : vector<8x64xbf16>, vector<64x64xbf16>, vector<8x64xf32> -> vector<8x64xf32>
    %c480 = arith.constant 480 : index
    %c0_180 = arith.constant 0 : index
    %460 = vector.load %arg3[%c480, %c0_180] : memref<1168x256xf32, #tpu.memory_space<vmem>>, vector<1x64xf32>
    %461 = vector.broadcast %460 : vector<1x64xf32> to vector<8x64xf32>
    %462 = arith.addf %459, %461 : vector<8x64xf32>
    %463 = arith.truncf %452 : vector<8x64xf32> to vector<8x64xbf16>
    %cst_181 = arith.constant dense<0.000000e+00> : vector<64x64xf32>
    %464 = tpu.matmul %415, %463, %cst_181 {dimension_numbers = #tpu.dot_dimension_numbers<[1], [0], [0], [1], [0, 0, 1, 1], [], []>} : vector<64x8xbf16>, vector<8x64xbf16>, vector<64x64xf32> -> vector<64x64xf32>
    %465 = arith.mulf %464, %417 : vector<64x64xf32>
    %466 = arith.truncf %465 : vector<64x64xf32> to vector<64x64xbf16>
    %467 = arith.truncf %457 : vector<8x64xf32> to vector<8x64xbf16>
    %cst_182 = arith.constant dense<0.000000e+00> : vector<64x8xf32>
    %468 = tpu.matmul %466, %467, %cst_182 {dimension_numbers = #tpu.dot_dimension_numbers<[1], [1], [0], [0], [0, 0, 1, 0], [], []>} : vector<64x64xbf16>, vector<8x64xbf16>, vector<64x8xf32> -> vector<64x8xf32>
    %cst_183 = arith.constant 0.353553385 : f32
    %469 = vector.broadcast %cst_183 : f32 to vector<64x8xf32>
    %470 = arith.mulf %468, %469 : vector<64x8xf32>
    %cst_184 = arith.constant dense<0xFF800000> : vector<64xf32>
    %471 = vector.multi_reduction <maximumf>, %470, %cst_184 [1] : vector<64x8xf32> to vector<64xf32>
    %472 = vector.shape_cast %471 : vector<64xf32> to vector<64x1xf32>
    %473 = vector.broadcast %472 : vector<64x1xf32> to vector<64x8xf32>
    %474 = arith.subf %470, %473 : vector<64x8xf32>
    %475 = math.exp %474 : vector<64x8xf32>
    %cst_185 = arith.constant dense<0.000000e+00> : vector<64xf32>
    %476 = vector.multi_reduction <add>, %475, %cst_185 [1] : vector<64x8xf32> to vector<64xf32>
    %477 = vector.shape_cast %476 : vector<64xf32> to vector<64x1xf32>
    %478 = tpu.reciprocal %477 {approx = true} : vector<64x1xf32> -> vector<64x1xf32>
    %479 = vector.broadcast %478 : vector<64x1xf32> to vector<64x8xf32>
    %480 = arith.mulf %475, %479 : vector<64x8xf32>
    %481 = arith.truncf %480 : vector<64x8xf32> to vector<64x8xbf16>
    %482 = arith.truncf %462 : vector<8x64xf32> to vector<8x64xbf16>
    %cst_186 = arith.constant dense<0.000000e+00> : vector<64x64xf32>
    %483 = tpu.matmul %481, %482, %cst_186 {dimension_numbers = #tpu.dot_dimension_numbers<[1], [0], [0], [1], [0, 0, 1, 1], [], []>} : vector<64x8xbf16>, vector<8x64xbf16>, vector<64x64xf32> -> vector<64x64xf32>
    %484 = arith.mulf %483, %417 : vector<64x64xf32>
    %485 = arith.truncf %484 : vector<64x64xf32> to vector<64x64xbf16>
    %cst_187 = arith.constant dense<0.000000e+00> : vector<8x64xf32>
    %486 = tpu.matmul %416, %485, %cst_187 {dimension_numbers = #tpu.dot_dimension_numbers<[1], [0], [0], [1], [0, 0, 1, 1], [], []>} : vector<8x64xbf16>, vector<64x64xbf16>, vector<8x64xf32> -> vector<8x64xf32>
    %487 = arith.truncf %486 : vector<8x64xf32> to vector<8x64xbf16>
    %c1152 = arith.constant 1152 : index
    %c0_188 = arith.constant 0 : index
    %488 = vector.load %arg2[%c1152, %c0_188] : memref<5104x256xbf16, #tpu.memory_space<vmem>>, vector<64x64xbf16>
    %cst_189 = arith.constant dense<0.000000e+00> : vector<8x64xf32>
    %489 = tpu.matmul %487, %488, %cst_189 {dimension_numbers = #tpu.dot_dimension_numbers<[1], [0], [0], [1], [0, 0, 1, 1], [], []>} : vector<8x64xbf16>, vector<64x64xbf16>, vector<8x64xf32> -> vector<8x64xf32>
    %490 = arith.addf %414, %489 : vector<8x64xf32>
    %c488 = arith.constant 488 : index
    %c0_190 = arith.constant 0 : index
    %491 = vector.load %arg3[%c488, %c0_190] : memref<1168x256xf32, #tpu.memory_space<vmem>>, vector<1x64xf32>
    %492 = vector.broadcast %491 : vector<1x64xf32> to vector<8x64xf32>
    %493 = arith.addf %490, %492 : vector<8x64xf32>
    %c496 = arith.constant 496 : index
    %c0_191 = arith.constant 0 : index
    %494 = vector.load %arg3[%c496, %c0_191] : memref<1168x256xf32, #tpu.memory_space<vmem>>, vector<1x64xf32>
    %c504 = arith.constant 504 : index
    %c0_192 = arith.constant 0 : index
    %495 = vector.load %arg3[%c504, %c0_192] : memref<1168x256xf32, #tpu.memory_space<vmem>>, vector<1x64xf32>
    %cst_193 = arith.constant dense<0.000000e+00> : vector<8xf32>
    %496 = vector.multi_reduction <add>, %493, %cst_193 [1] : vector<8x64xf32> to vector<8xf32>
    %497 = vector.shape_cast %496 : vector<8xf32> to vector<8x1xf32>
    %cst_194 = arith.constant 6.400000e+01 : f32
    %498 = vector.broadcast %cst_194 : f32 to vector<8x1xf32>
    %499 = arith.divf %497, %498 : vector<8x1xf32>
    %500 = vector.broadcast %499 : vector<8x1xf32> to vector<8x64xf32>
    %501 = arith.subf %493, %500 : vector<8x64xf32>
    %502 = arith.mulf %501, %501 : vector<8x64xf32>
    %cst_195 = arith.constant dense<0.000000e+00> : vector<8xf32>
    %503 = vector.multi_reduction <add>, %502, %cst_195 [1] : vector<8x64xf32> to vector<8xf32>
    %504 = vector.shape_cast %503 : vector<8xf32> to vector<8x1xf32>
    %cst_196 = arith.constant 6.400000e+01 : f32
    %505 = vector.broadcast %cst_196 : f32 to vector<8x1xf32>
    %506 = arith.divf %504, %505 : vector<8x1xf32>
    %507 = vector.broadcast %499 : vector<8x1xf32> to vector<8x64xf32>
    %508 = arith.subf %493, %507 : vector<8x64xf32>
    %cst_197 = arith.constant 9.99999974E-6 : f32
    %509 = vector.broadcast %cst_197 : f32 to vector<8x1xf32>
    %510 = arith.addf %506, %509 : vector<8x1xf32>
    %511 = math.rsqrt %510 : vector<8x1xf32>
    %512 = vector.broadcast %511 : vector<8x1xf32> to vector<8x64xf32>
    %513 = arith.mulf %508, %512 : vector<8x64xf32>
    %514 = vector.broadcast %494 : vector<1x64xf32> to vector<8x64xf32>
    %515 = arith.mulf %513, %514 : vector<8x64xf32>
    %516 = vector.broadcast %495 : vector<1x64xf32> to vector<8x64xf32>
    %517 = arith.addf %515, %516 : vector<8x64xf32>
    %518 = arith.truncf %517 : vector<8x64xf32> to vector<8x64xbf16>
    %c1216 = arith.constant 1216 : index
    %c0_198 = arith.constant 0 : index
    %519 = vector.load %arg2[%c1216, %c0_198] : memref<5104x256xbf16, #tpu.memory_space<vmem>>, vector<64x128xbf16>
    %cst_199 = arith.constant dense<0.000000e+00> : vector<8x128xf32>
    %520 = tpu.matmul %518, %519, %cst_199 {dimension_numbers = #tpu.dot_dimension_numbers<[1], [0], [0], [1], [0, 0, 1, 1], [], []>} : vector<8x64xbf16>, vector<64x128xbf16>, vector<8x128xf32> -> vector<8x128xf32>
    %c512_200 = arith.constant 512 : index
    %c0_201 = arith.constant 0 : index
    %521 = vector.load %arg3[%c512_200, %c0_201] : memref<1168x256xf32, #tpu.memory_space<vmem>>, vector<1x128xf32>
    %522 = vector.broadcast %521 : vector<1x128xf32> to vector<8x128xf32>
    %523 = arith.addf %520, %522 : vector<8x128xf32>
    %c1_i32_202 = arith.constant 1 : i32
    %524 = tpu.dynamic_rotate %523 by %c1_i32_202 dim 0 : vector<8x128xf32>, i32 -> vector<8x128xf32>
    %cst_203 = arith.constant 0.000000e+00 : f32
    %525 = vector.broadcast %cst_203 : f32 to vector<8x128xf32>
    %526 = arith.select %420, %525, %524 : vector<8x128xi1>, vector<8x128xf32>
    %c7_i32_204 = arith.constant 7 : i32
    %527 = tpu.dynamic_rotate %523 by %c7_i32_204 dim 0 : vector<8x128xf32>, i32 -> vector<8x128xf32>
    %cst_205 = arith.constant 0.000000e+00 : f32
    %528 = vector.broadcast %cst_205 : f32 to vector<8x128xf32>
    %529 = arith.select %422, %528, %527 : vector<8x128xi1>, vector<8x128xf32>
    %c520 = arith.constant 520 : index
    %c0_206 = arith.constant 0 : index
    %530 = vector.load %arg3[%c520, %c0_206] : memref<1168x256xf32, #tpu.memory_space<vmem>>, vector<3x128xf32>
    %531 = vector.extract_strided_slice %530 {offsets = [0, 0], sizes = [1, 128], strides = [1, 1]} : vector<3x128xf32> to vector<1x128xf32>
    %532 = vector.broadcast %531 : vector<1x128xf32> to vector<8x128xf32>
    %533 = arith.mulf %526, %532 : vector<8x128xf32>
    %534 = vector.extract_strided_slice %530 {offsets = [1, 0], sizes = [1, 128], strides = [1, 1]} : vector<3x128xf32> to vector<1x128xf32>
    %535 = vector.broadcast %534 : vector<1x128xf32> to vector<8x128xf32>
    %536 = arith.mulf %523, %535 : vector<8x128xf32>
    %537 = arith.addf %533, %536 : vector<8x128xf32>
    %538 = vector.extract_strided_slice %530 {offsets = [2, 0], sizes = [1, 128], strides = [1, 1]} : vector<3x128xf32> to vector<1x128xf32>
    %539 = vector.broadcast %538 : vector<1x128xf32> to vector<8x128xf32>
    %540 = arith.mulf %529, %539 : vector<8x128xf32>
    %541 = arith.addf %537, %540 : vector<8x128xf32>
    %c528 = arith.constant 528 : index
    %c0_207 = arith.constant 0 : index
    %542 = vector.load %arg3[%c528, %c0_207] : memref<1168x256xf32, #tpu.memory_space<vmem>>, vector<1x128xf32>
    %543 = vector.broadcast %542 : vector<1x128xf32> to vector<8x128xf32>
    %544 = arith.addf %541, %543 : vector<8x128xf32>
    %cst_208 = arith.constant 5.000000e-01 : f32
    %545 = vector.broadcast %cst_208 : f32 to vector<8x128xf32>
    %546 = arith.mulf %545, %544 : vector<8x128xf32>
    %cst_209 = arith.constant 4.471500e-02 : f32
    %547 = vector.broadcast %cst_209 : f32 to vector<8x128xf32>
    %548 = arith.mulf %547, %544 : vector<8x128xf32>
    %549 = arith.mulf %548, %544 : vector<8x128xf32>
    %550 = arith.mulf %549, %544 : vector<8x128xf32>
    %551 = arith.addf %544, %550 : vector<8x128xf32>
    %cst_210 = arith.constant 0.797884583 : f32
    %552 = vector.broadcast %cst_210 : f32 to vector<8x128xf32>
    %553 = arith.mulf %552, %551 : vector<8x128xf32>
    %554 = math.tanh %553 : vector<8x128xf32>
    %cst_211 = arith.constant 1.000000e+00 : f32
    %555 = vector.broadcast %cst_211 : f32 to vector<8x128xf32>
    %556 = arith.addf %555, %554 : vector<8x128xf32>
    %557 = arith.mulf %546, %556 : vector<8x128xf32>
    %558 = arith.truncf %557 : vector<8x128xf32> to vector<8x128xbf16>
    %c1280 = arith.constant 1280 : index
    %c0_212 = arith.constant 0 : index
    %559 = vector.load %arg2[%c1280, %c0_212] : memref<5104x256xbf16, #tpu.memory_space<vmem>>, vector<128x64xbf16>
    %cst_213 = arith.constant dense<0.000000e+00> : vector<8x64xf32>
    %560 = tpu.matmul %558, %559, %cst_213 {dimension_numbers = #tpu.dot_dimension_numbers<[1], [0], [0], [1], [0, 0, 1, 1], [], []>} : vector<8x128xbf16>, vector<128x64xbf16>, vector<8x64xf32> -> vector<8x64xf32>
    %561 = arith.addf %493, %560 : vector<8x64xf32>
    %c536 = arith.constant 536 : index
    %c0_214 = arith.constant 0 : index
    %562 = vector.load %arg3[%c536, %c0_214] : memref<1168x256xf32, #tpu.memory_space<vmem>>, vector<1x64xf32>
    %563 = vector.broadcast %562 : vector<1x64xf32> to vector<8x64xf32>
    %564 = arith.addf %561, %563 : vector<8x64xf32>
    %c544_215 = arith.constant 544 : index
    %c0_216 = arith.constant 0 : index
    %565 = vector.load %arg3[%c544_215, %c0_216] : memref<1168x256xf32, #tpu.memory_space<vmem>>, vector<1x64xf32>
    %c552 = arith.constant 552 : index
    %c0_217 = arith.constant 0 : index
    %566 = vector.load %arg3[%c552, %c0_217] : memref<1168x256xf32, #tpu.memory_space<vmem>>, vector<1x64xf32>
    %cst_218 = arith.constant dense<0.000000e+00> : vector<8xf32>
    %567 = vector.multi_reduction <add>, %564, %cst_218 [1] : vector<8x64xf32> to vector<8xf32>
    %568 = vector.shape_cast %567 : vector<8xf32> to vector<8x1xf32>
    %cst_219 = arith.constant 6.400000e+01 : f32
    %569 = vector.broadcast %cst_219 : f32 to vector<8x1xf32>
    %570 = arith.divf %568, %569 : vector<8x1xf32>
    %571 = vector.broadcast %570 : vector<8x1xf32> to vector<8x64xf32>
    %572 = arith.subf %564, %571 : vector<8x64xf32>
    %573 = arith.mulf %572, %572 : vector<8x64xf32>
    %cst_220 = arith.constant dense<0.000000e+00> : vector<8xf32>
    %574 = vector.multi_reduction <add>, %573, %cst_220 [1] : vector<8x64xf32> to vector<8xf32>
    %575 = vector.shape_cast %574 : vector<8xf32> to vector<8x1xf32>
    %cst_221 = arith.constant 6.400000e+01 : f32
    %576 = vector.broadcast %cst_221 : f32 to vector<8x1xf32>
    %577 = arith.divf %575, %576 : vector<8x1xf32>
    %578 = vector.broadcast %570 : vector<8x1xf32> to vector<8x64xf32>
    %579 = arith.subf %564, %578 : vector<8x64xf32>
    %cst_222 = arith.constant 9.99999974E-6 : f32
    %580 = vector.broadcast %cst_222 : f32 to vector<8x1xf32>
    %581 = arith.addf %577, %580 : vector<8x1xf32>
    %582 = math.rsqrt %581 : vector<8x1xf32>
    %583 = vector.broadcast %582 : vector<8x1xf32> to vector<8x64xf32>
    %584 = arith.mulf %579, %583 : vector<8x64xf32>
    %585 = vector.broadcast %565 : vector<1x64xf32> to vector<8x64xf32>
    %586 = arith.mulf %584, %585 : vector<8x64xf32>
    %587 = vector.broadcast %566 : vector<1x64xf32> to vector<8x64xf32>
    %588 = arith.addf %586, %587 : vector<8x64xf32>
    %589 = arith.truncf %588 : vector<8x64xf32> to vector<8x64xbf16>
    %c1408 = arith.constant 1408 : index
    %c0_223 = arith.constant 0 : index
    %590 = vector.load %arg2[%c1408, %c0_223] : memref<5104x256xbf16, #tpu.memory_space<vmem>>, vector<64x64xbf16>
    %cst_224 = arith.constant dense<0.000000e+00> : vector<8x64xf32>
    %591 = tpu.matmul %589, %590, %cst_224 {dimension_numbers = #tpu.dot_dimension_numbers<[1], [0], [0], [1], [0, 0, 1, 1], [], []>} : vector<8x64xbf16>, vector<64x64xbf16>, vector<8x64xf32> -> vector<8x64xf32>
    %c560 = arith.constant 560 : index
    %c0_225 = arith.constant 0 : index
    %592 = vector.load %arg3[%c560, %c0_225] : memref<1168x256xf32, #tpu.memory_space<vmem>>, vector<1x64xf32>
    %593 = vector.broadcast %592 : vector<1x64xf32> to vector<8x64xf32>
    %594 = arith.addf %591, %593 : vector<8x64xf32>
    %c1472 = arith.constant 1472 : index
    %c0_226 = arith.constant 0 : index
    %595 = vector.load %arg2[%c1472, %c0_226] : memref<5104x256xbf16, #tpu.memory_space<vmem>>, vector<64x64xbf16>
    %cst_227 = arith.constant dense<0.000000e+00> : vector<8x64xf32>
    %596 = tpu.matmul %589, %595, %cst_227 {dimension_numbers = #tpu.dot_dimension_numbers<[1], [0], [0], [1], [0, 0, 1, 1], [], []>} : vector<8x64xbf16>, vector<64x64xbf16>, vector<8x64xf32> -> vector<8x64xf32>
    %c568 = arith.constant 568 : index
    %c0_228 = arith.constant 0 : index
    %597 = vector.load %arg3[%c568, %c0_228] : memref<1168x256xf32, #tpu.memory_space<vmem>>, vector<1x64xf32>
    %598 = vector.broadcast %597 : vector<1x64xf32> to vector<8x64xf32>
    %599 = arith.addf %596, %598 : vector<8x64xf32>
    %c1536 = arith.constant 1536 : index
    %c0_229 = arith.constant 0 : index
    %600 = vector.load %arg2[%c1536, %c0_229] : memref<5104x256xbf16, #tpu.memory_space<vmem>>, vector<64x64xbf16>
    %cst_230 = arith.constant dense<0.000000e+00> : vector<8x64xf32>
    %601 = tpu.matmul %589, %600, %cst_230 {dimension_numbers = #tpu.dot_dimension_numbers<[1], [0], [0], [1], [0, 0, 1, 1], [], []>} : vector<8x64xbf16>, vector<64x64xbf16>, vector<8x64xf32> -> vector<8x64xf32>
    %c576_231 = arith.constant 576 : index
    %c0_232 = arith.constant 0 : index
    %602 = vector.load %arg3[%c576_231, %c0_232] : memref<1168x256xf32, #tpu.memory_space<vmem>>, vector<1x64xf32>
    %603 = vector.broadcast %602 : vector<1x64xf32> to vector<8x64xf32>
    %604 = arith.addf %601, %603 : vector<8x64xf32>
    %605 = arith.truncf %594 : vector<8x64xf32> to vector<8x64xbf16>
    %cst_233 = arith.constant dense<0.000000e+00> : vector<64x64xf32>
    %606 = tpu.matmul %415, %605, %cst_233 {dimension_numbers = #tpu.dot_dimension_numbers<[1], [0], [0], [1], [0, 0, 1, 1], [], []>} : vector<64x8xbf16>, vector<8x64xbf16>, vector<64x64xf32> -> vector<64x64xf32>
    %607 = arith.mulf %606, %417 : vector<64x64xf32>
    %608 = arith.truncf %607 : vector<64x64xf32> to vector<64x64xbf16>
    %609 = arith.truncf %599 : vector<8x64xf32> to vector<8x64xbf16>
    %cst_234 = arith.constant dense<0.000000e+00> : vector<64x8xf32>
    %610 = tpu.matmul %608, %609, %cst_234 {dimension_numbers = #tpu.dot_dimension_numbers<[1], [1], [0], [0], [0, 0, 1, 0], [], []>} : vector<64x64xbf16>, vector<8x64xbf16>, vector<64x8xf32> -> vector<64x8xf32>
    %cst_235 = arith.constant 0.353553385 : f32
    %611 = vector.broadcast %cst_235 : f32 to vector<64x8xf32>
    %612 = arith.mulf %610, %611 : vector<64x8xf32>
    %cst_236 = arith.constant dense<0xFF800000> : vector<64xf32>
    %613 = vector.multi_reduction <maximumf>, %612, %cst_236 [1] : vector<64x8xf32> to vector<64xf32>
    %614 = vector.shape_cast %613 : vector<64xf32> to vector<64x1xf32>
    %615 = vector.broadcast %614 : vector<64x1xf32> to vector<64x8xf32>
    %616 = arith.subf %612, %615 : vector<64x8xf32>
    %617 = math.exp %616 : vector<64x8xf32>
    %cst_237 = arith.constant dense<0.000000e+00> : vector<64xf32>
    %618 = vector.multi_reduction <add>, %617, %cst_237 [1] : vector<64x8xf32> to vector<64xf32>
    %619 = vector.shape_cast %618 : vector<64xf32> to vector<64x1xf32>
    %620 = tpu.reciprocal %619 {approx = true} : vector<64x1xf32> -> vector<64x1xf32>
    %621 = vector.broadcast %620 : vector<64x1xf32> to vector<64x8xf32>
    %622 = arith.mulf %617, %621 : vector<64x8xf32>
    %623 = arith.truncf %622 : vector<64x8xf32> to vector<64x8xbf16>
    %624 = arith.truncf %604 : vector<8x64xf32> to vector<8x64xbf16>
    %cst_238 = arith.constant dense<0.000000e+00> : vector<64x64xf32>
    %625 = tpu.matmul %623, %624, %cst_238 {dimension_numbers = #tpu.dot_dimension_numbers<[1], [0], [0], [1], [0, 0, 1, 1], [], []>} : vector<64x8xbf16>, vector<8x64xbf16>, vector<64x64xf32> -> vector<64x64xf32>
    %626 = arith.mulf %625, %417 : vector<64x64xf32>
    %627 = arith.truncf %626 : vector<64x64xf32> to vector<64x64xbf16>
    %cst_239 = arith.constant dense<0.000000e+00> : vector<8x64xf32>
    %628 = tpu.matmul %416, %627, %cst_239 {dimension_numbers = #tpu.dot_dimension_numbers<[1], [0], [0], [1], [0, 0, 1, 1], [], []>} : vector<8x64xbf16>, vector<64x64xbf16>, vector<8x64xf32> -> vector<8x64xf32>
    %629 = arith.truncf %628 : vector<8x64xf32> to vector<8x64xbf16>
    %c1600 = arith.constant 1600 : index
    %c0_240 = arith.constant 0 : index
    %630 = vector.load %arg2[%c1600, %c0_240] : memref<5104x256xbf16, #tpu.memory_space<vmem>>, vector<64x64xbf16>
    %cst_241 = arith.constant dense<0.000000e+00> : vector<8x64xf32>
    %631 = tpu.matmul %629, %630, %cst_241 {dimension_numbers = #tpu.dot_dimension_numbers<[1], [0], [0], [1], [0, 0, 1, 1], [], []>} : vector<8x64xbf16>, vector<64x64xbf16>, vector<8x64xf32> -> vector<8x64xf32>
    %632 = arith.addf %564, %631 : vector<8x64xf32>
    %c584 = arith.constant 584 : index
    %c0_242 = arith.constant 0 : index
    %633 = vector.load %arg3[%c584, %c0_242] : memref<1168x256xf32, #tpu.memory_space<vmem>>, vector<1x64xf32>
    %634 = vector.broadcast %633 : vector<1x64xf32> to vector<8x64xf32>
    %635 = arith.addf %632, %634 : vector<8x64xf32>
    %c592 = arith.constant 592 : index
    %c0_243 = arith.constant 0 : index
    %636 = vector.load %arg3[%c592, %c0_243] : memref<1168x256xf32, #tpu.memory_space<vmem>>, vector<1x64xf32>
    %c600 = arith.constant 600 : index
    %c0_244 = arith.constant 0 : index
    %637 = vector.load %arg3[%c600, %c0_244] : memref<1168x256xf32, #tpu.memory_space<vmem>>, vector<1x64xf32>
    %cst_245 = arith.constant dense<0.000000e+00> : vector<8xf32>
    %638 = vector.multi_reduction <add>, %635, %cst_245 [1] : vector<8x64xf32> to vector<8xf32>
    %639 = vector.shape_cast %638 : vector<8xf32> to vector<8x1xf32>
    %cst_246 = arith.constant 6.400000e+01 : f32
    %640 = vector.broadcast %cst_246 : f32 to vector<8x1xf32>
    %641 = arith.divf %639, %640 : vector<8x1xf32>
    %642 = vector.broadcast %641 : vector<8x1xf32> to vector<8x64xf32>
    %643 = arith.subf %635, %642 : vector<8x64xf32>
    %644 = arith.mulf %643, %643 : vector<8x64xf32>
    %cst_247 = arith.constant dense<0.000000e+00> : vector<8xf32>
    %645 = vector.multi_reduction <add>, %644, %cst_247 [1] : vector<8x64xf32> to vector<8xf32>
    %646 = vector.shape_cast %645 : vector<8xf32> to vector<8x1xf32>
    %cst_248 = arith.constant 6.400000e+01 : f32
    %647 = vector.broadcast %cst_248 : f32 to vector<8x1xf32>
    %648 = arith.divf %646, %647 : vector<8x1xf32>
    %649 = vector.broadcast %641 : vector<8x1xf32> to vector<8x64xf32>
    %650 = arith.subf %635, %649 : vector<8x64xf32>
    %cst_249 = arith.constant 9.99999974E-6 : f32
    %651 = vector.broadcast %cst_249 : f32 to vector<8x1xf32>
    %652 = arith.addf %648, %651 : vector<8x1xf32>
    %653 = math.rsqrt %652 : vector<8x1xf32>
    %654 = vector.broadcast %653 : vector<8x1xf32> to vector<8x64xf32>
    %655 = arith.mulf %650, %654 : vector<8x64xf32>
    %656 = vector.broadcast %636 : vector<1x64xf32> to vector<8x64xf32>
    %657 = arith.mulf %655, %656 : vector<8x64xf32>
    %658 = vector.broadcast %637 : vector<1x64xf32> to vector<8x64xf32>
    %659 = arith.addf %657, %658 : vector<8x64xf32>
    %660 = arith.truncf %659 : vector<8x64xf32> to vector<8x64xbf16>
    %c1664 = arith.constant 1664 : index
    %c0_250 = arith.constant 0 : index
    %661 = vector.load %arg2[%c1664, %c0_250] : memref<5104x256xbf16, #tpu.memory_space<vmem>>, vector<64x128xbf16>
    %cst_251 = arith.constant dense<0.000000e+00> : vector<8x128xf32>
    %662 = tpu.matmul %660, %661, %cst_251 {dimension_numbers = #tpu.dot_dimension_numbers<[1], [0], [0], [1], [0, 0, 1, 1], [], []>} : vector<8x64xbf16>, vector<64x128xbf16>, vector<8x128xf32> -> vector<8x128xf32>
    %c608_252 = arith.constant 608 : index
    %c0_253 = arith.constant 0 : index
    %663 = vector.load %arg3[%c608_252, %c0_253] : memref<1168x256xf32, #tpu.memory_space<vmem>>, vector<1x128xf32>
    %664 = vector.broadcast %663 : vector<1x128xf32> to vector<8x128xf32>
    %665 = arith.addf %662, %664 : vector<8x128xf32>
    %c1_i32_254 = arith.constant 1 : i32
    %666 = tpu.dynamic_rotate %665 by %c1_i32_254 dim 0 : vector<8x128xf32>, i32 -> vector<8x128xf32>
    %cst_255 = arith.constant 0.000000e+00 : f32
    %667 = vector.broadcast %cst_255 : f32 to vector<8x128xf32>
    %668 = arith.select %420, %667, %666 : vector<8x128xi1>, vector<8x128xf32>
    %c7_i32_256 = arith.constant 7 : i32
    %669 = tpu.dynamic_rotate %665 by %c7_i32_256 dim 0 : vector<8x128xf32>, i32 -> vector<8x128xf32>
    %cst_257 = arith.constant 0.000000e+00 : f32
    %670 = vector.broadcast %cst_257 : f32 to vector<8x128xf32>
    %671 = arith.select %422, %670, %669 : vector<8x128xi1>, vector<8x128xf32>
    %c616 = arith.constant 616 : index
    %c0_258 = arith.constant 0 : index
    %672 = vector.load %arg3[%c616, %c0_258] : memref<1168x256xf32, #tpu.memory_space<vmem>>, vector<3x128xf32>
    %673 = vector.extract_strided_slice %672 {offsets = [0, 0], sizes = [1, 128], strides = [1, 1]} : vector<3x128xf32> to vector<1x128xf32>
    %674 = vector.broadcast %673 : vector<1x128xf32> to vector<8x128xf32>
    %675 = arith.mulf %668, %674 : vector<8x128xf32>
    %676 = vector.extract_strided_slice %672 {offsets = [1, 0], sizes = [1, 128], strides = [1, 1]} : vector<3x128xf32> to vector<1x128xf32>
    %677 = vector.broadcast %676 : vector<1x128xf32> to vector<8x128xf32>
    %678 = arith.mulf %665, %677 : vector<8x128xf32>
    %679 = arith.addf %675, %678 : vector<8x128xf32>
    %680 = vector.extract_strided_slice %672 {offsets = [2, 0], sizes = [1, 128], strides = [1, 1]} : vector<3x128xf32> to vector<1x128xf32>
    %681 = vector.broadcast %680 : vector<1x128xf32> to vector<8x128xf32>
    %682 = arith.mulf %671, %681 : vector<8x128xf32>
    %683 = arith.addf %679, %682 : vector<8x128xf32>
    %c624 = arith.constant 624 : index
    %c0_259 = arith.constant 0 : index
    %684 = vector.load %arg3[%c624, %c0_259] : memref<1168x256xf32, #tpu.memory_space<vmem>>, vector<1x128xf32>
    %685 = vector.broadcast %684 : vector<1x128xf32> to vector<8x128xf32>
    %686 = arith.addf %683, %685 : vector<8x128xf32>
    %cst_260 = arith.constant 5.000000e-01 : f32
    %687 = vector.broadcast %cst_260 : f32 to vector<8x128xf32>
    %688 = arith.mulf %687, %686 : vector<8x128xf32>
    %cst_261 = arith.constant 4.471500e-02 : f32
    %689 = vector.broadcast %cst_261 : f32 to vector<8x128xf32>
    %690 = arith.mulf %689, %686 : vector<8x128xf32>
    %691 = arith.mulf %690, %686 : vector<8x128xf32>
    %692 = arith.mulf %691, %686 : vector<8x128xf32>
    %693 = arith.addf %686, %692 : vector<8x128xf32>
    %cst_262 = arith.constant 0.797884583 : f32
    %694 = vector.broadcast %cst_262 : f32 to vector<8x128xf32>
    %695 = arith.mulf %694, %693 : vector<8x128xf32>
    %696 = math.tanh %695 : vector<8x128xf32>
    %cst_263 = arith.constant 1.000000e+00 : f32
    %697 = vector.broadcast %cst_263 : f32 to vector<8x128xf32>
    %698 = arith.addf %697, %696 : vector<8x128xf32>
    %699 = arith.mulf %688, %698 : vector<8x128xf32>
    %700 = arith.truncf %699 : vector<8x128xf32> to vector<8x128xbf16>
    %c1728 = arith.constant 1728 : index
    %c0_264 = arith.constant 0 : index
    %701 = vector.load %arg2[%c1728, %c0_264] : memref<5104x256xbf16, #tpu.memory_space<vmem>>, vector<128x64xbf16>
    %cst_265 = arith.constant dense<0.000000e+00> : vector<8x64xf32>
    %702 = tpu.matmul %700, %701, %cst_265 {dimension_numbers = #tpu.dot_dimension_numbers<[1], [0], [0], [1], [0, 0, 1, 1], [], []>} : vector<8x128xbf16>, vector<128x64xbf16>, vector<8x64xf32> -> vector<8x64xf32>
    %703 = arith.addf %635, %702 : vector<8x64xf32>
    %c632 = arith.constant 632 : index
    %c0_266 = arith.constant 0 : index
    %704 = vector.load %arg3[%c632, %c0_266] : memref<1168x256xf32, #tpu.memory_space<vmem>>, vector<1x64xf32>
    %705 = vector.broadcast %704 : vector<1x64xf32> to vector<8x64xf32>
    %706 = arith.addf %703, %705 : vector<8x64xf32>
    %c640_267 = arith.constant 640 : index
    %c0_268 = arith.constant 0 : index
    %707 = vector.load %arg3[%c640_267, %c0_268] : memref<1168x256xf32, #tpu.memory_space<vmem>>, vector<1x64xf32>
    %c648 = arith.constant 648 : index
    %c0_269 = arith.constant 0 : index
    %708 = vector.load %arg3[%c648, %c0_269] : memref<1168x256xf32, #tpu.memory_space<vmem>>, vector<1x64xf32>
    %cst_270 = arith.constant dense<0.000000e+00> : vector<8xf32>
    %709 = vector.multi_reduction <add>, %706, %cst_270 [1] : vector<8x64xf32> to vector<8xf32>
    %710 = vector.shape_cast %709 : vector<8xf32> to vector<8x1xf32>
    %cst_271 = arith.constant 6.400000e+01 : f32
    %711 = vector.broadcast %cst_271 : f32 to vector<8x1xf32>
    %712 = arith.divf %710, %711 : vector<8x1xf32>
    %713 = vector.broadcast %712 : vector<8x1xf32> to vector<8x64xf32>
    %714 = arith.subf %706, %713 : vector<8x64xf32>
    %715 = arith.mulf %714, %714 : vector<8x64xf32>
    %cst_272 = arith.constant dense<0.000000e+00> : vector<8xf32>
    %716 = vector.multi_reduction <add>, %715, %cst_272 [1] : vector<8x64xf32> to vector<8xf32>
    %717 = vector.shape_cast %716 : vector<8xf32> to vector<8x1xf32>
    %cst_273 = arith.constant 6.400000e+01 : f32
    %718 = vector.broadcast %cst_273 : f32 to vector<8x1xf32>
    %719 = arith.divf %717, %718 : vector<8x1xf32>
    %720 = vector.broadcast %712 : vector<8x1xf32> to vector<8x64xf32>
    %721 = arith.subf %706, %720 : vector<8x64xf32>
    %cst_274 = arith.constant 9.99999974E-6 : f32
    %722 = vector.broadcast %cst_274 : f32 to vector<8x1xf32>
    %723 = arith.addf %719, %722 : vector<8x1xf32>
    %724 = math.rsqrt %723 : vector<8x1xf32>
    %725 = vector.broadcast %724 : vector<8x1xf32> to vector<8x64xf32>
    %726 = arith.mulf %721, %725 : vector<8x64xf32>
    %727 = vector.broadcast %707 : vector<1x64xf32> to vector<8x64xf32>
    %728 = arith.mulf %726, %727 : vector<8x64xf32>
    %729 = vector.broadcast %708 : vector<1x64xf32> to vector<8x64xf32>
    %730 = arith.addf %728, %729 : vector<8x64xf32>
    %c0_275 = arith.constant 0 : index
    %c0_276 = arith.constant 0 : index
    %c0_277 = arith.constant 0 : index
    %731 = vector.load %arg5[%c0_275, %c0_276, %c0_277] : memref<1x8x64xf32, #tpu.memory_space<vmem>>, vector<1x8x64xf32>
    %732 = vector.shape_cast %731 : vector<1x8x64xf32> to vector<8x64xf32>
    %733 = vector.shape_cast %730 : vector<8x64xf32> to vector<1x8x64xf32>
    tpu.vector_store %arg5[%c0_275, %c0_276, %c0_277], %733 {strides = array<i32>} : memref<1x8x64xf32, #tpu.memory_space<vmem>>, vector<1x8x64xf32>,
    %734 = arith.truncf %730 : vector<8x64xf32> to vector<8x64xbf16>
    %cst_278 = arith.constant 0.000000e+00 : f32
    %735 = vector.broadcast %cst_278 : f32 to vector<4x64xf32>
    %c688 = arith.constant 688 : index
    %c0_279 = arith.constant 0 : index
    %736 = vector.load %arg3[%c688, %c0_279] : memref<1168x256xf32, #tpu.memory_space<vmem>>, vector<1x64xf32>
    %737 = vector.broadcast %736 : vector<1x64xf32> to vector<4x64xf32>
    %738 = arith.addf %735, %737 : vector<4x64xf32>
    %c1856 = arith.constant 1856 : index
    %c0_280 = arith.constant 0 : index
    %739 = vector.load %arg2[%c1856, %c0_280] : memref<5104x256xbf16, #tpu.memory_space<vmem>>, vector<4x8xbf16>
    %cst_281 = arith.constant dense<0.000000e+00> : vector<4x64xf32>
    %740 = tpu.matmul %739, %734, %cst_281 {dimension_numbers = #tpu.dot_dimension_numbers<[1], [0], [0], [1], [0, 0, 1, 1], [], []>} : vector<4x8xbf16>, vector<8x64xbf16>, vector<4x64xf32> -> vector<4x64xf32>
    %741 = arith.truncf %740 : vector<4x64xf32> to vector<4x64xbf16>
    %c1904 = arith.constant 1904 : index
    %c0_282 = arith.constant 0 : index
    %742 = vector.load %arg2[%c1904, %c0_282] : memref<5104x256xbf16, #tpu.memory_space<vmem>>, vector<64x64xbf16>
    %cst_283 = arith.constant dense<0.000000e+00> : vector<4x64xf32>
    %743 = tpu.matmul %741, %742, %cst_283 {dimension_numbers = #tpu.dot_dimension_numbers<[1], [0], [0], [1], [0, 0, 1, 1], [], []>} : vector<4x64xbf16>, vector<64x64xbf16>, vector<4x64xf32> -> vector<4x64xf32>
    %744 = arith.addf %738, %743 : vector<4x64xf32>
    %c1872 = arith.constant 1872 : index
    %c0_284 = arith.constant 0 : index
    %745 = vector.load %arg2[%c1872, %c0_284] : memref<5104x256xbf16, #tpu.memory_space<vmem>>, vector<4x8xbf16>
    %cst_285 = arith.constant dense<0.000000e+00> : vector<4x64xf32>
    %746 = tpu.matmul %745, %734, %cst_285 {dimension_numbers = #tpu.dot_dimension_numbers<[1], [0], [0], [1], [0, 0, 1, 1], [], []>} : vector<4x8xbf16>, vector<8x64xbf16>, vector<4x64xf32> -> vector<4x64xf32>
    %747 = arith.truncf %746 : vector<4x64xf32> to vector<4x64xbf16>
    %c1968 = arith.constant 1968 : index
    %c0_286 = arith.constant 0 : index
    %748 = vector.load %arg2[%c1968, %c0_286] : memref<5104x256xbf16, #tpu.memory_space<vmem>>, vector<64x64xbf16>
    %cst_287 = arith.constant dense<0.000000e+00> : vector<4x64xf32>
    %749 = tpu.matmul %747, %748, %cst_287 {dimension_numbers = #tpu.dot_dimension_numbers<[1], [0], [0], [1], [0, 0, 1, 1], [], []>} : vector<4x64xbf16>, vector<64x64xbf16>, vector<4x64xf32> -> vector<4x64xf32>
    %750 = arith.addf %744, %749 : vector<4x64xf32>
    %c1888 = arith.constant 1888 : index
    %c0_288 = arith.constant 0 : index
    %751 = vector.load %arg2[%c1888, %c0_288] : memref<5104x256xbf16, #tpu.memory_space<vmem>>, vector<4x8xbf16>
    %cst_289 = arith.constant dense<0.000000e+00> : vector<4x64xf32>
    %752 = tpu.matmul %751, %734, %cst_289 {dimension_numbers = #tpu.dot_dimension_numbers<[1], [0], [0], [1], [0, 0, 1, 1], [], []>} : vector<4x8xbf16>, vector<8x64xbf16>, vector<4x64xf32> -> vector<4x64xf32>
    %753 = arith.truncf %752 : vector<4x64xf32> to vector<4x64xbf16>
    %c2032 = arith.constant 2032 : index
    %c0_290 = arith.constant 0 : index
    %754 = vector.load %arg2[%c2032, %c0_290] : memref<5104x256xbf16, #tpu.memory_space<vmem>>, vector<64x64xbf16>
    %cst_291 = arith.constant dense<0.000000e+00> : vector<4x64xf32>
    %755 = tpu.matmul %753, %754, %cst_291 {dimension_numbers = #tpu.dot_dimension_numbers<[1], [0], [0], [1], [0, 0, 1, 1], [], []>} : vector<4x64xbf16>, vector<64x64xbf16>, vector<4x64xf32> -> vector<4x64xf32>
    %756 = arith.addf %750, %755 : vector<4x64xf32>
    %c696 = arith.constant 696 : index
    %c0_292 = arith.constant 0 : index
    %757 = vector.load %arg3[%c696, %c0_292] : memref<1168x256xf32, #tpu.memory_space<vmem>>, vector<1x64xf32>
    %c704 = arith.constant 704 : index
    %c0_293 = arith.constant 0 : index
    %758 = vector.load %arg3[%c704, %c0_293] : memref<1168x256xf32, #tpu.memory_space<vmem>>, vector<1x64xf32>
    %cst_294 = arith.constant dense<0.000000e+00> : vector<4xf32>
    %759 = vector.multi_reduction <add>, %756, %cst_294 [1] : vector<4x64xf32> to vector<4xf32>
    %760 = vector.shape_cast %759 : vector<4xf32> to vector<4x1xf32>
    %cst_295 = arith.constant 6.400000e+01 : f32
    %761 = vector.broadcast %cst_295 : f32 to vector<4x1xf32>
    %762 = arith.divf %760, %761 : vector<4x1xf32>
    %763 = vector.broadcast %762 : vector<4x1xf32> to vector<4x64xf32>
    %764 = arith.subf %756, %763 : vector<4x64xf32>
    %765 = arith.mulf %764, %764 : vector<4x64xf32>
    %cst_296 = arith.constant dense<0.000000e+00> : vector<4xf32>
    %766 = vector.multi_reduction <add>, %765, %cst_296 [1] : vector<4x64xf32> to vector<4xf32>
    %767 = vector.shape_cast %766 : vector<4xf32> to vector<4x1xf32>
    %cst_297 = arith.constant 6.400000e+01 : f32
    %768 = vector.broadcast %cst_297 : f32 to vector<4x1xf32>
    %769 = arith.divf %767, %768 : vector<4x1xf32>
    %770 = vector.broadcast %762 : vector<4x1xf32> to vector<4x64xf32>
    %771 = arith.subf %756, %770 : vector<4x64xf32>
    %cst_298 = arith.constant 9.99999974E-6 : f32
    %772 = vector.broadcast %cst_298 : f32 to vector<4x1xf32>
    %773 = arith.addf %769, %772 : vector<4x1xf32>
    %774 = math.rsqrt %773 : vector<4x1xf32>
    %775 = vector.broadcast %774 : vector<4x1xf32> to vector<4x64xf32>
    %776 = arith.mulf %771, %775 : vector<4x64xf32>
    %777 = vector.broadcast %757 : vector<1x64xf32> to vector<4x64xf32>
    %778 = arith.mulf %776, %777 : vector<4x64xf32>
    %779 = vector.broadcast %758 : vector<1x64xf32> to vector<4x64xf32>
    %780 = arith.addf %778, %779 : vector<4x64xf32>
    %c2096 = arith.constant 2096 : index
    %c0_299 = arith.constant 0 : index
    %781 = vector.load %arg2[%c2096, %c0_299] : memref<5104x256xbf16, #tpu.memory_space<vmem>>, vector<32x4xbf16>
    %c2128 = arith.constant 2128 : index
    %c0_300 = arith.constant 0 : index
    %782 = vector.load %arg2[%c2128, %c0_300] : memref<5104x256xbf16, #tpu.memory_space<vmem>>, vector<4x32xbf16>
    %c656 = arith.constant 656 : index
    %c0_301 = arith.constant 0 : index
    %783 = vector.load %arg3[%c656, %c0_301] : memref<1168x256xf32, #tpu.memory_space<vmem>>, vector<32x64xf32>
    %784 = tpu.iota {dimensions = array<i32: 0>} : vector<4x128xi32>
    %c0_i32_302 = arith.constant 0 : i32
    %785 = vector.broadcast %c0_i32_302 : i32 to vector<4x128xi32>
    %786 = arith.cmpi eq, %784, %785 : vector<4x128xi32>
    %c3_i32 = arith.constant 3 : i32
    %787 = vector.broadcast %c3_i32 : i32 to vector<4x128xi32>
    %788 = arith.cmpi eq, %784, %787 : vector<4x128xi32>
    %c712 = arith.constant 712 : index
    %c0_303 = arith.constant 0 : index
    %789 = vector.load %arg3[%c712, %c0_303] : memref<1168x256xf32, #tpu.memory_space<vmem>>, vector<1x64xf32>
    %c720 = arith.constant 720 : index
    %c0_304 = arith.constant 0 : index
    %790 = vector.load %arg3[%c720, %c0_304] : memref<1168x256xf32, #tpu.memory_space<vmem>>, vector<1x64xf32>
    %cst_305 = arith.constant dense<0.000000e+00> : vector<4xf32>
    %791 = vector.multi_reduction <add>, %780, %cst_305 [1] : vector<4x64xf32> to vector<4xf32>
    %792 = vector.shape_cast %791 : vector<4xf32> to vector<4x1xf32>
    %cst_306 = arith.constant 6.400000e+01 : f32
    %793 = vector.broadcast %cst_306 : f32 to vector<4x1xf32>
    %794 = arith.divf %792, %793 : vector<4x1xf32>
    %795 = vector.broadcast %794 : vector<4x1xf32> to vector<4x64xf32>
    %796 = arith.subf %780, %795 : vector<4x64xf32>
    %797 = arith.mulf %796, %796 : vector<4x64xf32>
    %cst_307 = arith.constant dense<0.000000e+00> : vector<4xf32>
    %798 = vector.multi_reduction <add>, %797, %cst_307 [1] : vector<4x64xf32> to vector<4xf32>
    %799 = vector.shape_cast %798 : vector<4xf32> to vector<4x1xf32>
    %cst_308 = arith.constant 6.400000e+01 : f32
    %800 = vector.broadcast %cst_308 : f32 to vector<4x1xf32>
    %801 = arith.divf %799, %800 : vector<4x1xf32>
    %802 = vector.broadcast %794 : vector<4x1xf32> to vector<4x64xf32>
    %803 = arith.subf %780, %802 : vector<4x64xf32>
    %cst_309 = arith.constant 9.99999974E-6 : f32
    %804 = vector.broadcast %cst_309 : f32 to vector<4x1xf32>
    %805 = arith.addf %801, %804 : vector<4x1xf32>
    %806 = math.rsqrt %805 : vector<4x1xf32>
    %807 = vector.broadcast %806 : vector<4x1xf32> to vector<4x64xf32>
    %808 = arith.mulf %803, %807 : vector<4x64xf32>
    %809 = vector.broadcast %789 : vector<1x64xf32> to vector<4x64xf32>
    %810 = arith.mulf %808, %809 : vector<4x64xf32>
    %811 = vector.broadcast %790 : vector<1x64xf32> to vector<4x64xf32>
    %812 = arith.addf %810, %811 : vector<4x64xf32>
    %813 = arith.truncf %812 : vector<4x64xf32> to vector<4x64xbf16>
    %c2144 = arith.constant 2144 : index
    %c0_310 = arith.constant 0 : index
    %814 = vector.load %arg2[%c2144, %c0_310] : memref<5104x256xbf16, #tpu.memory_space<vmem>>, vector<64x64xbf16>
    %cst_311 = arith.constant dense<0.000000e+00> : vector<4x64xf32>
    %815 = tpu.matmul %813, %814, %cst_311 {dimension_numbers = #tpu.dot_dimension_numbers<[1], [0], [0], [1], [0, 0, 1, 1], [], []>} : vector<4x64xbf16>, vector<64x64xbf16>, vector<4x64xf32> -> vector<4x64xf32>
    %c728 = arith.constant 728 : index
    %c0_312 = arith.constant 0 : index
    %816 = vector.load %arg3[%c728, %c0_312] : memref<1168x256xf32, #tpu.memory_space<vmem>>, vector<1x64xf32>
    %817 = vector.broadcast %816 : vector<1x64xf32> to vector<4x64xf32>
    %818 = arith.addf %815, %817 : vector<4x64xf32>
    %c2208 = arith.constant 2208 : index
    %c0_313 = arith.constant 0 : index
    %819 = vector.load %arg2[%c2208, %c0_313] : memref<5104x256xbf16, #tpu.memory_space<vmem>>, vector<64x64xbf16>
    %cst_314 = arith.constant dense<0.000000e+00> : vector<4x64xf32>
    %820 = tpu.matmul %813, %819, %cst_314 {dimension_numbers = #tpu.dot_dimension_numbers<[1], [0], [0], [1], [0, 0, 1, 1], [], []>} : vector<4x64xbf16>, vector<64x64xbf16>, vector<4x64xf32> -> vector<4x64xf32>
    %c736_315 = arith.constant 736 : index
    %c0_316 = arith.constant 0 : index
    %821 = vector.load %arg3[%c736_315, %c0_316] : memref<1168x256xf32, #tpu.memory_space<vmem>>, vector<1x64xf32>
    %822 = vector.broadcast %821 : vector<1x64xf32> to vector<4x64xf32>
    %823 = arith.addf %820, %822 : vector<4x64xf32>
    %c2272 = arith.constant 2272 : index
    %c0_317 = arith.constant 0 : index
    %824 = vector.load %arg2[%c2272, %c0_317] : memref<5104x256xbf16, #tpu.memory_space<vmem>>, vector<64x64xbf16>
    %cst_318 = arith.constant dense<0.000000e+00> : vector<4x64xf32>
    %825 = tpu.matmul %813, %824, %cst_318 {dimension_numbers = #tpu.dot_dimension_numbers<[1], [0], [0], [1], [0, 0, 1, 1], [], []>} : vector<4x64xbf16>, vector<64x64xbf16>, vector<4x64xf32> -> vector<4x64xf32>
    %c744 = arith.constant 744 : index
    %c0_319 = arith.constant 0 : index
    %826 = vector.load %arg3[%c744, %c0_319] : memref<1168x256xf32, #tpu.memory_space<vmem>>, vector<1x64xf32>
    %827 = vector.broadcast %826 : vector<1x64xf32> to vector<4x64xf32>
    %828 = arith.addf %825, %827 : vector<4x64xf32>
    %829 = arith.truncf %818 : vector<4x64xf32> to vector<4x64xbf16>
    %cst_320 = arith.constant dense<0.000000e+00> : vector<32x64xf32>
    %830 = tpu.matmul %781, %829, %cst_320 {dimension_numbers = #tpu.dot_dimension_numbers<[1], [0], [0], [1], [0, 0, 1, 1], [], []>} : vector<32x4xbf16>, vector<4x64xbf16>, vector<32x64xf32> -> vector<32x64xf32>
    %831 = arith.mulf %830, %783 : vector<32x64xf32>
    %832 = arith.truncf %831 : vector<32x64xf32> to vector<32x64xbf16>
    %833 = arith.truncf %823 : vector<4x64xf32> to vector<4x64xbf16>
    %cst_321 = arith.constant dense<0.000000e+00> : vector<32x4xf32>
    %834 = tpu.matmul %832, %833, %cst_321 {dimension_numbers = #tpu.dot_dimension_numbers<[1], [1], [0], [0], [0, 0, 1, 0], [], []>} : vector<32x64xbf16>, vector<4x64xbf16>, vector<32x4xf32> -> vector<32x4xf32>
    %cst_322 = arith.constant 0.353553385 : f32
    %835 = vector.broadcast %cst_322 : f32 to vector<32x4xf32>
    %836 = arith.mulf %834, %835 : vector<32x4xf32>
    %cst_323 = arith.constant dense<0xFF800000> : vector<32xf32>
    %837 = vector.multi_reduction <maximumf>, %836, %cst_323 [1] : vector<32x4xf32> to vector<32xf32>
    %838 = vector.shape_cast %837 : vector<32xf32> to vector<32x1xf32>
    %839 = vector.broadcast %838 : vector<32x1xf32> to vector<32x4xf32>
    %840 = arith.subf %836, %839 : vector<32x4xf32>
    %841 = math.exp %840 : vector<32x4xf32>
    %cst_324 = arith.constant dense<0.000000e+00> : vector<32xf32>
    %842 = vector.multi_reduction <add>, %841, %cst_324 [1] : vector<32x4xf32> to vector<32xf32>
    %843 = vector.shape_cast %842 : vector<32xf32> to vector<32x1xf32>
    %844 = tpu.reciprocal %843 {approx = true} : vector<32x1xf32> -> vector<32x1xf32>
    %845 = vector.broadcast %844 : vector<32x1xf32> to vector<32x4xf32>
    %846 = arith.mulf %841, %845 : vector<32x4xf32>
    %847 = arith.truncf %846 : vector<32x4xf32> to vector<32x4xbf16>
    %848 = arith.truncf %828 : vector<4x64xf32> to vector<4x64xbf16>
    %cst_325 = arith.constant dense<0.000000e+00> : vector<32x64xf32>
    %849 = tpu.matmul %847, %848, %cst_325 {dimension_numbers = #tpu.dot_dimension_numbers<[1], [0], [0], [1], [0, 0, 1, 1], [], []>} : vector<32x4xbf16>, vector<4x64xbf16>, vector<32x64xf32> -> vector<32x64xf32>
    %850 = arith.mulf %849, %783 : vector<32x64xf32>
    %851 = arith.truncf %850 : vector<32x64xf32> to vector<32x64xbf16>
    %cst_326 = arith.constant dense<0.000000e+00> : vector<4x64xf32>
    %852 = tpu.matmul %782, %851, %cst_326 {dimension_numbers = #tpu.dot_dimension_numbers<[1], [0], [0], [1], [0, 0, 1, 1], [], []>} : vector<4x32xbf16>, vector<32x64xbf16>, vector<4x64xf32> -> vector<4x64xf32>
    %853 = arith.truncf %852 : vector<4x64xf32> to vector<4x64xbf16>
    %c2336 = arith.constant 2336 : index
    %c0_327 = arith.constant 0 : index
    %854 = vector.load %arg2[%c2336, %c0_327] : memref<5104x256xbf16, #tpu.memory_space<vmem>>, vector<64x64xbf16>
    %cst_328 = arith.constant dense<0.000000e+00> : vector<4x64xf32>
    %855 = tpu.matmul %853, %854, %cst_328 {dimension_numbers = #tpu.dot_dimension_numbers<[1], [0], [0], [1], [0, 0, 1, 1], [], []>} : vector<4x64xbf16>, vector<64x64xbf16>, vector<4x64xf32> -> vector<4x64xf32>
    %856 = arith.addf %780, %855 : vector<4x64xf32>
    %c752_329 = arith.constant 752 : index
    %c0_330 = arith.constant 0 : index
    %857 = vector.load %arg3[%c752_329, %c0_330] : memref<1168x256xf32, #tpu.memory_space<vmem>>, vector<1x64xf32>
    %858 = vector.broadcast %857 : vector<1x64xf32> to vector<4x64xf32>
    %859 = arith.addf %856, %858 : vector<4x64xf32>
    %c760 = arith.constant 760 : index
    %c0_331 = arith.constant 0 : index
    %860 = vector.load %arg3[%c760, %c0_331] : memref<1168x256xf32, #tpu.memory_space<vmem>>, vector<1x64xf32>
    %c768_332 = arith.constant 768 : index
    %c0_333 = arith.constant 0 : index
    %861 = vector.load %arg3[%c768_332, %c0_333] : memref<1168x256xf32, #tpu.memory_space<vmem>>, vector<1x64xf32>
    %cst_334 = arith.constant dense<0.000000e+00> : vector<4xf32>
    %862 = vector.multi_reduction <add>, %859, %cst_334 [1] : vector<4x64xf32> to vector<4xf32>
    %863 = vector.shape_cast %862 : vector<4xf32> to vector<4x1xf32>
    %cst_335 = arith.constant 6.400000e+01 : f32
    %864 = vector.broadcast %cst_335 : f32 to vector<4x1xf32>
    %865 = arith.divf %863, %864 : vector<4x1xf32>
    %866 = vector.broadcast %865 : vector<4x1xf32> to vector<4x64xf32>
    %867 = arith.subf %859, %866 : vector<4x64xf32>
    %868 = arith.mulf %867, %867 : vector<4x64xf32>
    %cst_336 = arith.constant dense<0.000000e+00> : vector<4xf32>
    %869 = vector.multi_reduction <add>, %868, %cst_336 [1] : vector<4x64xf32> to vector<4xf32>
    %870 = vector.shape_cast %869 : vector<4xf32> to vector<4x1xf32>
    %cst_337 = arith.constant 6.400000e+01 : f32
    %871 = vector.broadcast %cst_337 : f32 to vector<4x1xf32>
    %872 = arith.divf %870, %871 : vector<4x1xf32>
    %873 = vector.broadcast %865 : vector<4x1xf32> to vector<4x64xf32>
    %874 = arith.subf %859, %873 : vector<4x64xf32>
    %cst_338 = arith.constant 9.99999974E-6 : f32
    %875 = vector.broadcast %cst_338 : f32 to vector<4x1xf32>
    %876 = arith.addf %872, %875 : vector<4x1xf32>
    %877 = math.rsqrt %876 : vector<4x1xf32>
    %878 = vector.broadcast %877 : vector<4x1xf32> to vector<4x64xf32>
    %879 = arith.mulf %874, %878 : vector<4x64xf32>
    %880 = vector.broadcast %860 : vector<1x64xf32> to vector<4x64xf32>
    %881 = arith.mulf %879, %880 : vector<4x64xf32>
    %882 = vector.broadcast %861 : vector<1x64xf32> to vector<4x64xf32>
    %883 = arith.addf %881, %882 : vector<4x64xf32>
    %884 = arith.truncf %883 : vector<4x64xf32> to vector<4x64xbf16>
    %c2400 = arith.constant 2400 : index
    %c0_339 = arith.constant 0 : index
    %885 = vector.load %arg2[%c2400, %c0_339] : memref<5104x256xbf16, #tpu.memory_space<vmem>>, vector<64x128xbf16>
    %cst_340 = arith.constant dense<0.000000e+00> : vector<4x128xf32>
    %886 = tpu.matmul %884, %885, %cst_340 {dimension_numbers = #tpu.dot_dimension_numbers<[1], [0], [0], [1], [0, 0, 1, 1], [], []>} : vector<4x64xbf16>, vector<64x128xbf16>, vector<4x128xf32> -> vector<4x128xf32>
    %c776 = arith.constant 776 : index
    %c0_341 = arith.constant 0 : index
    %887 = vector.load %arg3[%c776, %c0_341] : memref<1168x256xf32, #tpu.memory_space<vmem>>, vector<1x128xf32>
    %888 = vector.broadcast %887 : vector<1x128xf32> to vector<4x128xf32>
    %889 = arith.addf %886, %888 : vector<4x128xf32>
    %c1_i32_342 = arith.constant 1 : i32
    %890 = tpu.dynamic_rotate %889 by %c1_i32_342 dim 0 : vector<4x128xf32>, i32 -> vector<4x128xf32>
    %cst_343 = arith.constant 0.000000e+00 : f32
    %891 = vector.broadcast %cst_343 : f32 to vector<4x128xf32>
    %892 = arith.select %786, %891, %890 : vector<4x128xi1>, vector<4x128xf32>
    %c3_i32_344 = arith.constant 3 : i32
    %893 = tpu.dynamic_rotate %889 by %c3_i32_344 dim 0 : vector<4x128xf32>, i32 -> vector<4x128xf32>
    %cst_345 = arith.constant 0.000000e+00 : f32
    %894 = vector.broadcast %cst_345 : f32 to vector<4x128xf32>
    %895 = arith.select %788, %894, %893 : vector<4x128xi1>, vector<4x128xf32>
    %c784_346 = arith.constant 784 : index
    %c0_347 = arith.constant 0 : index
    %896 = vector.load %arg3[%c784_346, %c0_347] : memref<1168x256xf32, #tpu.memory_space<vmem>>, vector<3x128xf32>
    %897 = vector.extract_strided_slice %896 {offsets = [0, 0], sizes = [1, 128], strides = [1, 1]} : vector<3x128xf32> to vector<1x128xf32>
    %898 = vector.broadcast %897 : vector<1x128xf32> to vector<4x128xf32>
    %899 = arith.mulf %892, %898 : vector<4x128xf32>
    %900 = vector.extract_strided_slice %896 {offsets = [1, 0], sizes = [1, 128], strides = [1, 1]} : vector<3x128xf32> to vector<1x128xf32>
    %901 = vector.broadcast %900 : vector<1x128xf32> to vector<4x128xf32>
    %902 = arith.mulf %889, %901 : vector<4x128xf32>
    %903 = arith.addf %899, %902 : vector<4x128xf32>
    %904 = vector.extract_strided_slice %896 {offsets = [2, 0], sizes = [1, 128], strides = [1, 1]} : vector<3x128xf32> to vector<1x128xf32>
    %905 = vector.broadcast %904 : vector<1x128xf32> to vector<4x128xf32>
    %906 = arith.mulf %895, %905 : vector<4x128xf32>
    %907 = arith.addf %903, %906 : vector<4x128xf32>
    %c792 = arith.constant 792 : index
    %c0_348 = arith.constant 0 : index
    %908 = vector.load %arg3[%c792, %c0_348] : memref<1168x256xf32, #tpu.memory_space<vmem>>, vector<1x128xf32>
    %909 = vector.broadcast %908 : vector<1x128xf32> to vector<4x128xf32>
    %910 = arith.addf %907, %909 : vector<4x128xf32>
    %cst_349 = arith.constant 5.000000e-01 : f32
    %911 = vector.broadcast %cst_349 : f32 to vector<4x128xf32>
    %912 = arith.mulf %911, %910 : vector<4x128xf32>
    %cst_350 = arith.constant 4.471500e-02 : f32
    %913 = vector.broadcast %cst_350 : f32 to vector<4x128xf32>
    %914 = arith.mulf %913, %910 : vector<4x128xf32>
    %915 = arith.mulf %914, %910 : vector<4x128xf32>
    %916 = arith.mulf %915, %910 : vector<4x128xf32>
    %917 = arith.addf %910, %916 : vector<4x128xf32>
    %cst_351 = arith.constant 0.797884583 : f32
    %918 = vector.broadcast %cst_351 : f32 to vector<4x128xf32>
    %919 = arith.mulf %918, %917 : vector<4x128xf32>
    %920 = math.tanh %919 : vector<4x128xf32>
    %cst_352 = arith.constant 1.000000e+00 : f32
    %921 = vector.broadcast %cst_352 : f32 to vector<4x128xf32>
    %922 = arith.addf %921, %920 : vector<4x128xf32>
    %923 = arith.mulf %912, %922 : vector<4x128xf32>
    %924 = arith.truncf %923 : vector<4x128xf32> to vector<4x128xbf16>
    %c2464 = arith.constant 2464 : index
    %c0_353 = arith.constant 0 : index
    %925 = vector.load %arg2[%c2464, %c0_353] : memref<5104x256xbf16, #tpu.memory_space<vmem>>, vector<128x64xbf16>
    %cst_354 = arith.constant dense<0.000000e+00> : vector<4x64xf32>
    %926 = tpu.matmul %924, %925, %cst_354 {dimension_numbers = #tpu.dot_dimension_numbers<[1], [0], [0], [1], [0, 0, 1, 1], [], []>} : vector<4x128xbf16>, vector<128x64xbf16>, vector<4x64xf32> -> vector<4x64xf32>
    %927 = arith.addf %859, %926 : vector<4x64xf32>
    %c800 = arith.constant 800 : index
    %c0_355 = arith.constant 0 : index
    %928 = vector.load %arg3[%c800, %c0_355] : memref<1168x256xf32, #tpu.memory_space<vmem>>, vector<1x64xf32>
    %929 = vector.broadcast %928 : vector<1x64xf32> to vector<4x64xf32>
    %930 = arith.addf %927, %929 : vector<4x64xf32>
    %c808 = arith.constant 808 : index
    %c0_356 = arith.constant 0 : index
    %931 = vector.load %arg3[%c808, %c0_356] : memref<1168x256xf32, #tpu.memory_space<vmem>>, vector<1x64xf32>
    %c816_357 = arith.constant 816 : index
    %c0_358 = arith.constant 0 : index
    %932 = vector.load %arg3[%c816_357, %c0_358] : memref<1168x256xf32, #tpu.memory_space<vmem>>, vector<1x64xf32>
    %cst_359 = arith.constant dense<0.000000e+00> : vector<4xf32>
    %933 = vector.multi_reduction <add>, %930, %cst_359 [1] : vector<4x64xf32> to vector<4xf32>
    %934 = vector.shape_cast %933 : vector<4xf32> to vector<4x1xf32>
    %cst_360 = arith.constant 6.400000e+01 : f32
    %935 = vector.broadcast %cst_360 : f32 to vector<4x1xf32>
    %936 = arith.divf %934, %935 : vector<4x1xf32>
    %937 = vector.broadcast %936 : vector<4x1xf32> to vector<4x64xf32>
    %938 = arith.subf %930, %937 : vector<4x64xf32>
    %939 = arith.mulf %938, %938 : vector<4x64xf32>
    %cst_361 = arith.constant dense<0.000000e+00> : vector<4xf32>
    %940 = vector.multi_reduction <add>, %939, %cst_361 [1] : vector<4x64xf32> to vector<4xf32>
    %941 = vector.shape_cast %940 : vector<4xf32> to vector<4x1xf32>
    %cst_362 = arith.constant 6.400000e+01 : f32
    %942 = vector.broadcast %cst_362 : f32 to vector<4x1xf32>
    %943 = arith.divf %941, %942 : vector<4x1xf32>
    %944 = vector.broadcast %936 : vector<4x1xf32> to vector<4x64xf32>
    %945 = arith.subf %930, %944 : vector<4x64xf32>
    %cst_363 = arith.constant 9.99999974E-6 : f32
    %946 = vector.broadcast %cst_363 : f32 to vector<4x1xf32>
    %947 = arith.addf %943, %946 : vector<4x1xf32>
    %948 = math.rsqrt %947 : vector<4x1xf32>
    %949 = vector.broadcast %948 : vector<4x1xf32> to vector<4x64xf32>
    %950 = arith.mulf %945, %949 : vector<4x64xf32>
    %951 = vector.broadcast %931 : vector<1x64xf32> to vector<4x64xf32>
    %952 = arith.mulf %950, %951 : vector<4x64xf32>
    %953 = vector.broadcast %932 : vector<1x64xf32> to vector<4x64xf32>
    %954 = arith.addf %952, %953 : vector<4x64xf32>
    %955 = arith.truncf %954 : vector<4x64xf32> to vector<4x64xbf16>
    %c2592 = arith.constant 2592 : index
    %c0_364 = arith.constant 0 : index
    %956 = vector.load %arg2[%c2592, %c0_364] : memref<5104x256xbf16, #tpu.memory_space<vmem>>, vector<64x64xbf16>
    %cst_365 = arith.constant dense<0.000000e+00> : vector<4x64xf32>
    %957 = tpu.matmul %955, %956, %cst_365 {dimension_numbers = #tpu.dot_dimension_numbers<[1], [0], [0], [1], [0, 0, 1, 1], [], []>} : vector<4x64xbf16>, vector<64x64xbf16>, vector<4x64xf32> -> vector<4x64xf32>
    %c824 = arith.constant 824 : index
    %c0_366 = arith.constant 0 : index
    %958 = vector.load %arg3[%c824, %c0_366] : memref<1168x256xf32, #tpu.memory_space<vmem>>, vector<1x64xf32>
    %959 = vector.broadcast %958 : vector<1x64xf32> to vector<4x64xf32>
    %960 = arith.addf %957, %959 : vector<4x64xf32>
    %c2656 = arith.constant 2656 : index
    %c0_367 = arith.constant 0 : index
    %961 = vector.load %arg2[%c2656, %c0_367] : memref<5104x256xbf16, #tpu.memory_space<vmem>>, vector<64x64xbf16>
    %cst_368 = arith.constant dense<0.000000e+00> : vector<4x64xf32>
    %962 = tpu.matmul %955, %961, %cst_368 {dimension_numbers = #tpu.dot_dimension_numbers<[1], [0], [0], [1], [0, 0, 1, 1], [], []>} : vector<4x64xbf16>, vector<64x64xbf16>, vector<4x64xf32> -> vector<4x64xf32>
    %c832 = arith.constant 832 : index
    %c0_369 = arith.constant 0 : index
    %963 = vector.load %arg3[%c832, %c0_369] : memref<1168x256xf32, #tpu.memory_space<vmem>>, vector<1x64xf32>
    %964 = vector.broadcast %963 : vector<1x64xf32> to vector<4x64xf32>
    %965 = arith.addf %962, %964 : vector<4x64xf32>
    %c2720 = arith.constant 2720 : index
    %c0_370 = arith.constant 0 : index
    %966 = vector.load %arg2[%c2720, %c0_370] : memref<5104x256xbf16, #tpu.memory_space<vmem>>, vector<64x64xbf16>
    %cst_371 = arith.constant dense<0.000000e+00> : vector<4x64xf32>
    %967 = tpu.matmul %955, %966, %cst_371 {dimension_numbers = #tpu.dot_dimension_numbers<[1], [0], [0], [1], [0, 0, 1, 1], [], []>} : vector<4x64xbf16>, vector<64x64xbf16>, vector<4x64xf32> -> vector<4x64xf32>
    %c840 = arith.constant 840 : index
    %c0_372 = arith.constant 0 : index
    %968 = vector.load %arg3[%c840, %c0_372] : memref<1168x256xf32, #tpu.memory_space<vmem>>, vector<1x64xf32>
    %969 = vector.broadcast %968 : vector<1x64xf32> to vector<4x64xf32>
    %970 = arith.addf %967, %969 : vector<4x64xf32>
    %971 = arith.truncf %960 : vector<4x64xf32> to vector<4x64xbf16>
    %cst_373 = arith.constant dense<0.000000e+00> : vector<32x64xf32>
    %972 = tpu.matmul %781, %971, %cst_373 {dimension_numbers = #tpu.dot_dimension_numbers<[1], [0], [0], [1], [0, 0, 1, 1], [], []>} : vector<32x4xbf16>, vector<4x64xbf16>, vector<32x64xf32> -> vector<32x64xf32>
    %973 = arith.mulf %972, %783 : vector<32x64xf32>
    %974 = arith.truncf %973 : vector<32x64xf32> to vector<32x64xbf16>
    %975 = arith.truncf %965 : vector<4x64xf32> to vector<4x64xbf16>
    %cst_374 = arith.constant dense<0.000000e+00> : vector<32x4xf32>
    %976 = tpu.matmul %974, %975, %cst_374 {dimension_numbers = #tpu.dot_dimension_numbers<[1], [1], [0], [0], [0, 0, 1, 0], [], []>} : vector<32x64xbf16>, vector<4x64xbf16>, vector<32x4xf32> -> vector<32x4xf32>
    %cst_375 = arith.constant 0.353553385 : f32
    %977 = vector.broadcast %cst_375 : f32 to vector<32x4xf32>
    %978 = arith.mulf %976, %977 : vector<32x4xf32>
    %cst_376 = arith.constant dense<0xFF800000> : vector<32xf32>
    %979 = vector.multi_reduction <maximumf>, %978, %cst_376 [1] : vector<32x4xf32> to vector<32xf32>
    %980 = vector.shape_cast %979 : vector<32xf32> to vector<32x1xf32>
    %981 = vector.broadcast %980 : vector<32x1xf32> to vector<32x4xf32>
    %982 = arith.subf %978, %981 : vector<32x4xf32>
    %983 = math.exp %982 : vector<32x4xf32>
    %cst_377 = arith.constant dense<0.000000e+00> : vector<32xf32>
    %984 = vector.multi_reduction <add>, %983, %cst_377 [1] : vector<32x4xf32> to vector<32xf32>
    %985 = vector.shape_cast %984 : vector<32xf32> to vector<32x1xf32>
    %986 = tpu.reciprocal %985 {approx = true} : vector<32x1xf32> -> vector<32x1xf32>
    %987 = vector.broadcast %986 : vector<32x1xf32> to vector<32x4xf32>
    %988 = arith.mulf %983, %987 : vector<32x4xf32>
    %989 = arith.truncf %988 : vector<32x4xf32> to vector<32x4xbf16>
    %990 = arith.truncf %970 : vector<4x64xf32> to vector<4x64xbf16>
    %cst_378 = arith.constant dense<0.000000e+00> : vector<32x64xf32>
    %991 = tpu.matmul %989, %990, %cst_378 {dimension_numbers = #tpu.dot_dimension_numbers<[1], [0], [0], [1], [0, 0, 1, 1], [], []>} : vector<32x4xbf16>, vector<4x64xbf16>, vector<32x64xf32> -> vector<32x64xf32>
    %992 = arith.mulf %991, %783 : vector<32x64xf32>
    %993 = arith.truncf %992 : vector<32x64xf32> to vector<32x64xbf16>
    %cst_379 = arith.constant dense<0.000000e+00> : vector<4x64xf32>
    %994 = tpu.matmul %782, %993, %cst_379 {dimension_numbers = #tpu.dot_dimension_numbers<[1], [0], [0], [1], [0, 0, 1, 1], [], []>} : vector<4x32xbf16>, vector<32x64xbf16>, vector<4x64xf32> -> vector<4x64xf32>
    %995 = arith.truncf %994 : vector<4x64xf32> to vector<4x64xbf16>
    %c2784 = arith.constant 2784 : index
    %c0_380 = arith.constant 0 : index
    %996 = vector.load %arg2[%c2784, %c0_380] : memref<5104x256xbf16, #tpu.memory_space<vmem>>, vector<64x64xbf16>
    %cst_381 = arith.constant dense<0.000000e+00> : vector<4x64xf32>
    %997 = tpu.matmul %995, %996, %cst_381 {dimension_numbers = #tpu.dot_dimension_numbers<[1], [0], [0], [1], [0, 0, 1, 1], [], []>} : vector<4x64xbf16>, vector<64x64xbf16>, vector<4x64xf32> -> vector<4x64xf32>
    %998 = arith.addf %930, %997 : vector<4x64xf32>
    %c848_382 = arith.constant 848 : index
    %c0_383 = arith.constant 0 : index
    %999 = vector.load %arg3[%c848_382, %c0_383] : memref<1168x256xf32, #tpu.memory_space<vmem>>, vector<1x64xf32>
    %1000 = vector.broadcast %999 : vector<1x64xf32> to vector<4x64xf32>
    %1001 = arith.addf %998, %1000 : vector<4x64xf32>
    %c856 = arith.constant 856 : index
    %c0_384 = arith.constant 0 : index
    %1002 = vector.load %arg3[%c856, %c0_384] : memref<1168x256xf32, #tpu.memory_space<vmem>>, vector<1x64xf32>
    %c864 = arith.constant 864 : index
    %c0_385 = arith.constant 0 : index
    %1003 = vector.load %arg3[%c864, %c0_385] : memref<1168x256xf32, #tpu.memory_space<vmem>>, vector<1x64xf32>
    %cst_386 = arith.constant dense<0.000000e+00> : vector<4xf32>
    %1004 = vector.multi_reduction <add>, %1001, %cst_386 [1] : vector<4x64xf32> to vector<4xf32>
    %1005 = vector.shape_cast %1004 : vector<4xf32> to vector<4x1xf32>
    %cst_387 = arith.constant 6.400000e+01 : f32
    %1006 = vector.broadcast %cst_387 : f32 to vector<4x1xf32>
    %1007 = arith.divf %1005, %1006 : vector<4x1xf32>
    %1008 = vector.broadcast %1007 : vector<4x1xf32> to vector<4x64xf32>
    %1009 = arith.subf %1001, %1008 : vector<4x64xf32>
    %1010 = arith.mulf %1009, %1009 : vector<4x64xf32>
    %cst_388 = arith.constant dense<0.000000e+00> : vector<4xf32>
    %1011 = vector.multi_reduction <add>, %1010, %cst_388 [1] : vector<4x64xf32> to vector<4xf32>
    %1012 = vector.shape_cast %1011 : vector<4xf32> to vector<4x1xf32>
    %cst_389 = arith.constant 6.400000e+01 : f32
    %1013 = vector.broadcast %cst_389 : f32 to vector<4x1xf32>
    %1014 = arith.divf %1012, %1013 : vector<4x1xf32>
    %1015 = vector.broadcast %1007 : vector<4x1xf32> to vector<4x64xf32>
    %1016 = arith.subf %1001, %1015 : vector<4x64xf32>
    %cst_390 = arith.constant 9.99999974E-6 : f32
    %1017 = vector.broadcast %cst_390 : f32 to vector<4x1xf32>
    %1018 = arith.addf %1014, %1017 : vector<4x1xf32>
    %1019 = math.rsqrt %1018 : vector<4x1xf32>
    %1020 = vector.broadcast %1019 : vector<4x1xf32> to vector<4x64xf32>
    %1021 = arith.mulf %1016, %1020 : vector<4x64xf32>
    %1022 = vector.broadcast %1002 : vector<1x64xf32> to vector<4x64xf32>
    %1023 = arith.mulf %1021, %1022 : vector<4x64xf32>
    %1024 = vector.broadcast %1003 : vector<1x64xf32> to vector<4x64xf32>
    %1025 = arith.addf %1023, %1024 : vector<4x64xf32>
    %1026 = arith.truncf %1025 : vector<4x64xf32> to vector<4x64xbf16>
    %c2848 = arith.constant 2848 : index
    %c0_391 = arith.constant 0 : index
    %1027 = vector.load %arg2[%c2848, %c0_391] : memref<5104x256xbf16, #tpu.memory_space<vmem>>, vector<64x128xbf16>
    %cst_392 = arith.constant dense<0.000000e+00> : vector<4x128xf32>
    %1028 = tpu.matmul %1026, %1027, %cst_392 {dimension_numbers = #tpu.dot_dimension_numbers<[1], [0], [0], [1], [0, 0, 1, 1], [], []>} : vector<4x64xbf16>, vector<64x128xbf16>, vector<4x128xf32> -> vector<4x128xf32>
    %c872 = arith.constant 872 : index
    %c0_393 = arith.constant 0 : index
    %1029 = vector.load %arg3[%c872, %c0_393] : memref<1168x256xf32, #tpu.memory_space<vmem>>, vector<1x128xf32>
    %1030 = vector.broadcast %1029 : vector<1x128xf32> to vector<4x128xf32>
    %1031 = arith.addf %1028, %1030 : vector<4x128xf32>
    %c1_i32_394 = arith.constant 1 : i32
    %1032 = tpu.dynamic_rotate %1031 by %c1_i32_394 dim 0 : vector<4x128xf32>, i32 -> vector<4x128xf32>
    %cst_395 = arith.constant 0.000000e+00 : f32
    %1033 = vector.broadcast %cst_395 : f32 to vector<4x128xf32>
    %1034 = arith.select %786, %1033, %1032 : vector<4x128xi1>, vector<4x128xf32>
    %c3_i32_396 = arith.constant 3 : i32
    %1035 = tpu.dynamic_rotate %1031 by %c3_i32_396 dim 0 : vector<4x128xf32>, i32 -> vector<4x128xf32>
    %cst_397 = arith.constant 0.000000e+00 : f32
    %1036 = vector.broadcast %cst_397 : f32 to vector<4x128xf32>
    %1037 = arith.select %788, %1036, %1035 : vector<4x128xi1>, vector<4x128xf32>
    %c880_398 = arith.constant 880 : index
    %c0_399 = arith.constant 0 : index
    %1038 = vector.load %arg3[%c880_398, %c0_399] : memref<1168x256xf32, #tpu.memory_space<vmem>>, vector<3x128xf32>
    %1039 = vector.extract_strided_slice %1038 {offsets = [0, 0], sizes = [1, 128], strides = [1, 1]} : vector<3x128xf32> to vector<1x128xf32>
    %1040 = vector.broadcast %1039 : vector<1x128xf32> to vector<4x128xf32>
    %1041 = arith.mulf %1034, %1040 : vector<4x128xf32>
    %1042 = vector.extract_strided_slice %1038 {offsets = [1, 0], sizes = [1, 128], strides = [1, 1]} : vector<3x128xf32> to vector<1x128xf32>
    %1043 = vector.broadcast %1042 : vector<1x128xf32> to vector<4x128xf32>
    %1044 = arith.mulf %1031, %1043 : vector<4x128xf32>
    %1045 = arith.addf %1041, %1044 : vector<4x128xf32>
    %1046 = vector.extract_strided_slice %1038 {offsets = [2, 0], sizes = [1, 128], strides = [1, 1]} : vector<3x128xf32> to vector<1x128xf32>
    %1047 = vector.broadcast %1046 : vector<1x128xf32> to vector<4x128xf32>
    %1048 = arith.mulf %1037, %1047 : vector<4x128xf32>
    %1049 = arith.addf %1045, %1048 : vector<4x128xf32>
    %c888 = arith.constant 888 : index
    %c0_400 = arith.constant 0 : index
    %1050 = vector.load %arg3[%c888, %c0_400] : memref<1168x256xf32, #tpu.memory_space<vmem>>, vector<1x128xf32>
    %1051 = vector.broadcast %1050 : vector<1x128xf32> to vector<4x128xf32>
    %1052 = arith.addf %1049, %1051 : vector<4x128xf32>
    %cst_401 = arith.constant 5.000000e-01 : f32
    %1053 = vector.broadcast %cst_401 : f32 to vector<4x128xf32>
    %1054 = arith.mulf %1053, %1052 : vector<4x128xf32>
    %cst_402 = arith.constant 4.471500e-02 : f32
    %1055 = vector.broadcast %cst_402 : f32 to vector<4x128xf32>
    %1056 = arith.mulf %1055, %1052 : vector<4x128xf32>
    %1057 = arith.mulf %1056, %1052 : vector<4x128xf32>
    %1058 = arith.mulf %1057, %1052 : vector<4x128xf32>
    %1059 = arith.addf %1052, %1058 : vector<4x128xf32>
    %cst_403 = arith.constant 0.797884583 : f32
    %1060 = vector.broadcast %cst_403 : f32 to vector<4x128xf32>
    %1061 = arith.mulf %1060, %1059 : vector<4x128xf32>
    %1062 = math.tanh %1061 : vector<4x128xf32>
    %cst_404 = arith.constant 1.000000e+00 : f32
    %1063 = vector.broadcast %cst_404 : f32 to vector<4x128xf32>
    %1064 = arith.addf %1063, %1062 : vector<4x128xf32>
    %1065 = arith.mulf %1054, %1064 : vector<4x128xf32>
    %1066 = arith.truncf %1065 : vector<4x128xf32> to vector<4x128xbf16>
    %c2912 = arith.constant 2912 : index
    %c0_405 = arith.constant 0 : index
    %1067 = vector.load %arg2[%c2912, %c0_405] : memref<5104x256xbf16, #tpu.memory_space<vmem>>, vector<128x64xbf16>
    %cst_406 = arith.constant dense<0.000000e+00> : vector<4x64xf32>
    %1068 = tpu.matmul %1066, %1067, %cst_406 {dimension_numbers = #tpu.dot_dimension_numbers<[1], [0], [0], [1], [0, 0, 1, 1], [], []>} : vector<4x128xbf16>, vector<128x64xbf16>, vector<4x64xf32> -> vector<4x64xf32>
    %1069 = arith.addf %1001, %1068 : vector<4x64xf32>
    %c896 = arith.constant 896 : index
    %c0_407 = arith.constant 0 : index
    %1070 = vector.load %arg3[%c896, %c0_407] : memref<1168x256xf32, #tpu.memory_space<vmem>>, vector<1x64xf32>
    %1071 = vector.broadcast %1070 : vector<1x64xf32> to vector<4x64xf32>
    %1072 = arith.addf %1069, %1071 : vector<4x64xf32>
    %c904 = arith.constant 904 : index
    %c0_408 = arith.constant 0 : index
    %1073 = vector.load %arg3[%c904, %c0_408] : memref<1168x256xf32, #tpu.memory_space<vmem>>, vector<1x64xf32>
    %c912 = arith.constant 912 : index
    %c0_409 = arith.constant 0 : index
    %1074 = vector.load %arg3[%c912, %c0_409] : memref<1168x256xf32, #tpu.memory_space<vmem>>, vector<1x64xf32>
    %cst_410 = arith.constant dense<0.000000e+00> : vector<4xf32>
    %1075 = vector.multi_reduction <add>, %1072, %cst_410 [1] : vector<4x64xf32> to vector<4xf32>
    %1076 = vector.shape_cast %1075 : vector<4xf32> to vector<4x1xf32>
    %cst_411 = arith.constant 6.400000e+01 : f32
    %1077 = vector.broadcast %cst_411 : f32 to vector<4x1xf32>
    %1078 = arith.divf %1076, %1077 : vector<4x1xf32>
    %1079 = vector.broadcast %1078 : vector<4x1xf32> to vector<4x64xf32>
    %1080 = arith.subf %1072, %1079 : vector<4x64xf32>
    %1081 = arith.mulf %1080, %1080 : vector<4x64xf32>
    %cst_412 = arith.constant dense<0.000000e+00> : vector<4xf32>
    %1082 = vector.multi_reduction <add>, %1081, %cst_412 [1] : vector<4x64xf32> to vector<4xf32>
    %1083 = vector.shape_cast %1082 : vector<4xf32> to vector<4x1xf32>
    %cst_413 = arith.constant 6.400000e+01 : f32
    %1084 = vector.broadcast %cst_413 : f32 to vector<4x1xf32>
    %1085 = arith.divf %1083, %1084 : vector<4x1xf32>
    %1086 = vector.broadcast %1078 : vector<4x1xf32> to vector<4x64xf32>
    %1087 = arith.subf %1072, %1086 : vector<4x64xf32>
    %cst_414 = arith.constant 9.99999974E-6 : f32
    %1088 = vector.broadcast %cst_414 : f32 to vector<4x1xf32>
    %1089 = arith.addf %1085, %1088 : vector<4x1xf32>
    %1090 = math.rsqrt %1089 : vector<4x1xf32>
    %1091 = vector.broadcast %1090 : vector<4x1xf32> to vector<4x64xf32>
    %1092 = arith.mulf %1087, %1091 : vector<4x64xf32>
    %1093 = vector.broadcast %1073 : vector<1x64xf32> to vector<4x64xf32>
    %1094 = arith.mulf %1092, %1093 : vector<4x64xf32>
    %1095 = vector.broadcast %1074 : vector<1x64xf32> to vector<4x64xf32>
    %1096 = arith.addf %1094, %1095 : vector<4x64xf32>
    %c0_415 = arith.constant 0 : index
    %c0_416 = arith.constant 0 : index
    %c0_417 = arith.constant 0 : index
    %1097 = vector.load %arg6[%c0_415, %c0_416, %c0_417] : memref<1x4x64xf32, #tpu.memory_space<vmem>>, vector<1x4x64xf32>
    %1098 = vector.shape_cast %1097 : vector<1x4x64xf32> to vector<4x64xf32>
    %1099 = vector.shape_cast %1096 : vector<4x64xf32> to vector<1x4x64xf32>
    tpu.vector_store %arg6[%c0_415, %c0_416, %c0_417], %1099 {strides = array<i32>} : memref<1x4x64xf32, #tpu.memory_space<vmem>>, vector<1x4x64xf32>,
    %1100 = arith.truncf %1096 : vector<4x64xf32> to vector<4x64xbf16>
    %cst_418 = arith.constant 0.000000e+00 : f32
    %1101 = vector.broadcast %cst_418 : f32 to vector<2x128xf32>
    %c936 = arith.constant 936 : index
    %c0_419 = arith.constant 0 : index
    %1102 = vector.load %arg3[%c936, %c0_419] : memref<1168x256xf32, #tpu.memory_space<vmem>>, vector<1x128xf32>
    %1103 = vector.broadcast %1102 : vector<1x128xf32> to vector<2x128xf32>
    %1104 = arith.addf %1101, %1103 : vector<2x128xf32>
    %c3040 = arith.constant 3040 : index
    %c0_420 = arith.constant 0 : index
    %1105 = vector.load %arg2[%c3040, %c0_420] : memref<5104x256xbf16, #tpu.memory_space<vmem>>, vector<2x4xbf16>
    %cst_421 = arith.constant dense<0.000000e+00> : vector<2x64xf32>
    %1106 = tpu.matmul %1105, %1100, %cst_421 {dimension_numbers = #tpu.dot_dimension_numbers<[1], [0], [0], [1], [0, 0, 1, 1], [], []>} : vector<2x4xbf16>, vector<4x64xbf16>, vector<2x64xf32> -> vector<2x64xf32>
    %1107 = arith.truncf %1106 : vector<2x64xf32> to vector<2x64xbf16>
    %c3088 = arith.constant 3088 : index
    %c0_422 = arith.constant 0 : index
    %1108 = vector.load %arg2[%c3088, %c0_422] : memref<5104x256xbf16, #tpu.memory_space<vmem>>, vector<64x128xbf16>
    %cst_423 = arith.constant dense<0.000000e+00> : vector<2x128xf32>
    %1109 = tpu.matmul %1107, %1108, %cst_423 {dimension_numbers = #tpu.dot_dimension_numbers<[1], [0], [0], [1], [0, 0, 1, 1], [], []>} : vector<2x64xbf16>, vector<64x128xbf16>, vector<2x128xf32> -> vector<2x128xf32>
    %1110 = arith.addf %1104, %1109 : vector<2x128xf32>
    %c3056 = arith.constant 3056 : index
    %c0_424 = arith.constant 0 : index
    %1111 = vector.load %arg2[%c3056, %c0_424] : memref<5104x256xbf16, #tpu.memory_space<vmem>>, vector<2x4xbf16>
    %cst_425 = arith.constant dense<0.000000e+00> : vector<2x64xf32>
    %1112 = tpu.matmul %1111, %1100, %cst_425 {dimension_numbers = #tpu.dot_dimension_numbers<[1], [0], [0], [1], [0, 0, 1, 1], [], []>} : vector<2x4xbf16>, vector<4x64xbf16>, vector<2x64xf32> -> vector<2x64xf32>
    %1113 = arith.truncf %1112 : vector<2x64xf32> to vector<2x64xbf16>
    %c3152 = arith.constant 3152 : index
    %c0_426 = arith.constant 0 : index
    %1114 = vector.load %arg2[%c3152, %c0_426] : memref<5104x256xbf16, #tpu.memory_space<vmem>>, vector<64x128xbf16>
    %cst_427 = arith.constant dense<0.000000e+00> : vector<2x128xf32>
    %1115 = tpu.matmul %1113, %1114, %cst_427 {dimension_numbers = #tpu.dot_dimension_numbers<[1], [0], [0], [1], [0, 0, 1, 1], [], []>} : vector<2x64xbf16>, vector<64x128xbf16>, vector<2x128xf32> -> vector<2x128xf32>
    %1116 = arith.addf %1110, %1115 : vector<2x128xf32>
    %c3072 = arith.constant 3072 : index
    %c0_428 = arith.constant 0 : index
    %1117 = vector.load %arg2[%c3072, %c0_428] : memref<5104x256xbf16, #tpu.memory_space<vmem>>, vector<2x4xbf16>
    %cst_429 = arith.constant dense<0.000000e+00> : vector<2x64xf32>
    %1118 = tpu.matmul %1117, %1100, %cst_429 {dimension_numbers = #tpu.dot_dimension_numbers<[1], [0], [0], [1], [0, 0, 1, 1], [], []>} : vector<2x4xbf16>, vector<4x64xbf16>, vector<2x64xf32> -> vector<2x64xf32>
    %1119 = arith.truncf %1118 : vector<2x64xf32> to vector<2x64xbf16>
    %c3216 = arith.constant 3216 : index
    %c0_430 = arith.constant 0 : index
    %1120 = vector.load %arg2[%c3216, %c0_430] : memref<5104x256xbf16, #tpu.memory_space<vmem>>, vector<64x128xbf16>
    %cst_431 = arith.constant dense<0.000000e+00> : vector<2x128xf32>
    %1121 = tpu.matmul %1119, %1120, %cst_431 {dimension_numbers = #tpu.dot_dimension_numbers<[1], [0], [0], [1], [0, 0, 1, 1], [], []>} : vector<2x64xbf16>, vector<64x128xbf16>, vector<2x128xf32> -> vector<2x128xf32>
    %1122 = arith.addf %1116, %1121 : vector<2x128xf32>
    %c944_432 = arith.constant 944 : index
    %c0_433 = arith.constant 0 : index
    %1123 = vector.load %arg3[%c944_432, %c0_433] : memref<1168x256xf32, #tpu.memory_space<vmem>>, vector<1x128xf32>
    %c952 = arith.constant 952 : index
    %c0_434 = arith.constant 0 : index
    %1124 = vector.load %arg3[%c952, %c0_434] : memref<1168x256xf32, #tpu.memory_space<vmem>>, vector<1x128xf32>
    %cst_435 = arith.constant dense<0.000000e+00> : vector<2xf32>
    %1125 = vector.multi_reduction <add>, %1122, %cst_435 [1] : vector<2x128xf32> to vector<2xf32>
    %1126 = vector.shape_cast %1125 : vector<2xf32> to vector<2x1xf32>
    %cst_436 = arith.constant 1.280000e+02 : f32
    %1127 = vector.broadcast %cst_436 : f32 to vector<2x1xf32>
    %1128 = arith.divf %1126, %1127 : vector<2x1xf32>
    %1129 = vector.broadcast %1128 : vector<2x1xf32> to vector<2x128xf32>
    %1130 = arith.subf %1122, %1129 : vector<2x128xf32>
    %1131 = arith.mulf %1130, %1130 : vector<2x128xf32>
    %cst_437 = arith.constant dense<0.000000e+00> : vector<2xf32>
    %1132 = vector.multi_reduction <add>, %1131, %cst_437 [1] : vector<2x128xf32> to vector<2xf32>
    %1133 = vector.shape_cast %1132 : vector<2xf32> to vector<2x1xf32>
    %cst_438 = arith.constant 1.280000e+02 : f32
    %1134 = vector.broadcast %cst_438 : f32 to vector<2x1xf32>
    %1135 = arith.divf %1133, %1134 : vector<2x1xf32>
    %1136 = vector.broadcast %1128 : vector<2x1xf32> to vector<2x128xf32>
    %1137 = arith.subf %1122, %1136 : vector<2x128xf32>
    %cst_439 = arith.constant 9.99999974E-6 : f32
    %1138 = vector.broadcast %cst_439 : f32 to vector<2x1xf32>
    %1139 = arith.addf %1135, %1138 : vector<2x1xf32>
    %1140 = math.rsqrt %1139 : vector<2x1xf32>
    %1141 = vector.broadcast %1140 : vector<2x1xf32> to vector<2x128xf32>
    %1142 = arith.mulf %1137, %1141 : vector<2x128xf32>
    %1143 = vector.broadcast %1123 : vector<1x128xf32> to vector<2x128xf32>
    %1144 = arith.mulf %1142, %1143 : vector<2x128xf32>
    %1145 = vector.broadcast %1124 : vector<1x128xf32> to vector<2x128xf32>
    %1146 = arith.addf %1144, %1145 : vector<2x128xf32>
    %c3280 = arith.constant 3280 : index
    %c0_440 = arith.constant 0 : index
    %1147 = vector.load %arg2[%c3280, %c0_440] : memref<5104x256xbf16, #tpu.memory_space<vmem>>, vector<16x2xbf16>
    %c3296 = arith.constant 3296 : index
    %c0_441 = arith.constant 0 : index
    %1148 = vector.load %arg2[%c3296, %c0_441] : memref<5104x256xbf16, #tpu.memory_space<vmem>>, vector<2x16xbf16>
    %c920 = arith.constant 920 : index
    %c0_442 = arith.constant 0 : index
    %1149 = vector.load %arg3[%c920, %c0_442] : memref<1168x256xf32, #tpu.memory_space<vmem>>, vector<16x128xf32>
    %1150 = tpu.iota {dimensions = array<i32: 0>} : vector<2x256xi32>
    %c0_i32_443 = arith.constant 0 : i32
    %1151 = vector.broadcast %c0_i32_443 : i32 to vector<2x256xi32>
    %1152 = arith.cmpi eq, %1150, %1151 : vector<2x256xi32>
    %c1_i32_444 = arith.constant 1 : i32
    %1153 = vector.broadcast %c1_i32_444 : i32 to vector<2x256xi32>
    %1154 = arith.cmpi eq, %1150, %1153 : vector<2x256xi32>
    %c960_445 = arith.constant 960 : index
    %c0_446 = arith.constant 0 : index
    %1155 = vector.load %arg3[%c960_445, %c0_446] : memref<1168x256xf32, #tpu.memory_space<vmem>>, vector<1x128xf32>
    %c968 = arith.constant 968 : index
    %c0_447 = arith.constant 0 : index
    %1156 = vector.load %arg3[%c968, %c0_447] : memref<1168x256xf32, #tpu.memory_space<vmem>>, vector<1x128xf32>
    %cst_448 = arith.constant dense<0.000000e+00> : vector<2xf32>
    %1157 = vector.multi_reduction <add>, %1146, %cst_448 [1] : vector<2x128xf32> to vector<2xf32>
    %1158 = vector.shape_cast %1157 : vector<2xf32> to vector<2x1xf32>
    %cst_449 = arith.constant 1.280000e+02 : f32
    %1159 = vector.broadcast %cst_449 : f32 to vector<2x1xf32>
    %1160 = arith.divf %1158, %1159 : vector<2x1xf32>
    %1161 = vector.broadcast %1160 : vector<2x1xf32> to vector<2x128xf32>
    %1162 = arith.subf %1146, %1161 : vector<2x128xf32>
    %1163 = arith.mulf %1162, %1162 : vector<2x128xf32>
    %cst_450 = arith.constant dense<0.000000e+00> : vector<2xf32>
    %1164 = vector.multi_reduction <add>, %1163, %cst_450 [1] : vector<2x128xf32> to vector<2xf32>
    %1165 = vector.shape_cast %1164 : vector<2xf32> to vector<2x1xf32>
    %cst_451 = arith.constant 1.280000e+02 : f32
    %1166 = vector.broadcast %cst_451 : f32 to vector<2x1xf32>
    %1167 = arith.divf %1165, %1166 : vector<2x1xf32>
    %1168 = vector.broadcast %1160 : vector<2x1xf32> to vector<2x128xf32>
    %1169 = arith.subf %1146, %1168 : vector<2x128xf32>
    %cst_452 = arith.constant 9.99999974E-6 : f32
    %1170 = vector.broadcast %cst_452 : f32 to vector<2x1xf32>
    %1171 = arith.addf %1167, %1170 : vector<2x1xf32>
    %1172 = math.rsqrt %1171 : vector<2x1xf32>
    %1173 = vector.broadcast %1172 : vector<2x1xf32> to vector<2x128xf32>
    %1174 = arith.mulf %1169, %1173 : vector<2x128xf32>
    %1175 = vector.broadcast %1155 : vector<1x128xf32> to vector<2x128xf32>
    %1176 = arith.mulf %1174, %1175 : vector<2x128xf32>
    %1177 = vector.broadcast %1156 : vector<1x128xf32> to vector<2x128xf32>
    %1178 = arith.addf %1176, %1177 : vector<2x128xf32>
    %1179 = arith.truncf %1178 : vector<2x128xf32> to vector<2x128xbf16>
    %c3312 = arith.constant 3312 : index
    %c0_453 = arith.constant 0 : index
    %1180 = vector.load %arg2[%c3312, %c0_453] : memref<5104x256xbf16, #tpu.memory_space<vmem>>, vector<128x128xbf16>
    %cst_454 = arith.constant dense<0.000000e+00> : vector<2x128xf32>
    %1181 = tpu.matmul %1179, %1180, %cst_454 {dimension_numbers = #tpu.dot_dimension_numbers<[1], [0], [0], [1], [0, 0, 1, 1], [], []>} : vector<2x128xbf16>, vector<128x128xbf16>, vector<2x128xf32> -> vector<2x128xf32>
    %c976 = arith.constant 976 : index
    %c0_455 = arith.constant 0 : index
    %1182 = vector.load %arg3[%c976, %c0_455] : memref<1168x256xf32, #tpu.memory_space<vmem>>, vector<1x128xf32>
    %1183 = vector.broadcast %1182 : vector<1x128xf32> to vector<2x128xf32>
    %1184 = arith.addf %1181, %1183 : vector<2x128xf32>
    %c3440 = arith.constant 3440 : index
    %c0_456 = arith.constant 0 : index
    %1185 = vector.load %arg2[%c3440, %c0_456] : memref<5104x256xbf16, #tpu.memory_space<vmem>>, vector<128x128xbf16>
    %cst_457 = arith.constant dense<0.000000e+00> : vector<2x128xf32>
    %1186 = tpu.matmul %1179, %1185, %cst_457 {dimension_numbers = #tpu.dot_dimension_numbers<[1], [0], [0], [1], [0, 0, 1, 1], [], []>} : vector<2x128xbf16>, vector<128x128xbf16>, vector<2x128xf32> -> vector<2x128xf32>
    %c984 = arith.constant 984 : index
    %c0_458 = arith.constant 0 : index
    %1187 = vector.load %arg3[%c984, %c0_458] : memref<1168x256xf32, #tpu.memory_space<vmem>>, vector<1x128xf32>
    %1188 = vector.broadcast %1187 : vector<1x128xf32> to vector<2x128xf32>
    %1189 = arith.addf %1186, %1188 : vector<2x128xf32>
    %c3568 = arith.constant 3568 : index
    %c0_459 = arith.constant 0 : index
    %1190 = vector.load %arg2[%c3568, %c0_459] : memref<5104x256xbf16, #tpu.memory_space<vmem>>, vector<128x128xbf16>
    %cst_460 = arith.constant dense<0.000000e+00> : vector<2x128xf32>
    %1191 = tpu.matmul %1179, %1190, %cst_460 {dimension_numbers = #tpu.dot_dimension_numbers<[1], [0], [0], [1], [0, 0, 1, 1], [], []>} : vector<2x128xbf16>, vector<128x128xbf16>, vector<2x128xf32> -> vector<2x128xf32>
    %c992 = arith.constant 992 : index
    %c0_461 = arith.constant 0 : index
    %1192 = vector.load %arg3[%c992, %c0_461] : memref<1168x256xf32, #tpu.memory_space<vmem>>, vector<1x128xf32>
    %1193 = vector.broadcast %1192 : vector<1x128xf32> to vector<2x128xf32>
    %1194 = arith.addf %1191, %1193 : vector<2x128xf32>
    %1195 = arith.truncf %1184 : vector<2x128xf32> to vector<2x128xbf16>
    %cst_462 = arith.constant dense<0.000000e+00> : vector<16x128xf32>
    %1196 = tpu.matmul %1147, %1195, %cst_462 {dimension_numbers = #tpu.dot_dimension_numbers<[1], [0], [0], [1], [0, 0, 1, 1], [], []>} : vector<16x2xbf16>, vector<2x128xbf16>, vector<16x128xf32> -> vector<16x128xf32>
    %1197 = arith.mulf %1196, %1149 : vector<16x128xf32>
    %1198 = arith.truncf %1197 : vector<16x128xf32> to vector<16x128xbf16>
    %1199 = arith.truncf %1189 : vector<2x128xf32> to vector<2x128xbf16>
    %cst_463 = arith.constant dense<0.000000e+00> : vector<16x2xf32>
    %1200 = tpu.matmul %1198, %1199, %cst_463 {dimension_numbers = #tpu.dot_dimension_numbers<[1], [1], [0], [0], [0, 0, 1, 0], [], []>} : vector<16x128xbf16>, vector<2x128xbf16>, vector<16x2xf32> -> vector<16x2xf32>
    %cst_464 = arith.constant 2.500000e-01 : f32
    %1201 = vector.broadcast %cst_464 : f32 to vector<16x2xf32>
    %1202 = arith.mulf %1200, %1201 : vector<16x2xf32>
    %cst_465 = arith.constant dense<0xFF800000> : vector<16xf32>
    %1203 = vector.multi_reduction <maximumf>, %1202, %cst_465 [1] : vector<16x2xf32> to vector<16xf32>
    %1204 = vector.shape_cast %1203 : vector<16xf32> to vector<16x1xf32>
    %1205 = vector.broadcast %1204 : vector<16x1xf32> to vector<16x2xf32>
    %1206 = arith.subf %1202, %1205 : vector<16x2xf32>
    %1207 = math.exp %1206 : vector<16x2xf32>
    %cst_466 = arith.constant dense<0.000000e+00> : vector<16xf32>
    %1208 = vector.multi_reduction <add>, %1207, %cst_466 [1] : vector<16x2xf32> to vector<16xf32>
    %1209 = vector.shape_cast %1208 : vector<16xf32> to vector<16x1xf32>
    %1210 = tpu.reciprocal %1209 {approx = true} : vector<16x1xf32> -> vector<16x1xf32>
    %1211 = vector.broadcast %1210 : vector<16x1xf32> to vector<16x2xf32>
    %1212 = arith.mulf %1207, %1211 : vector<16x2xf32>
    %1213 = arith.truncf %1212 : vector<16x2xf32> to vector<16x2xbf16>
    %1214 = arith.truncf %1194 : vector<2x128xf32> to vector<2x128xbf16>
    %cst_467 = arith.constant dense<0.000000e+00> : vector<16x128xf32>
    %1215 = tpu.matmul %1213, %1214, %cst_467 {dimension_numbers = #tpu.dot_dimension_numbers<[1], [0], [0], [1], [0, 0, 1, 1], [], []>} : vector<16x2xbf16>, vector<2x128xbf16>, vector<16x128xf32> -> vector<16x128xf32>
    %1216 = arith.mulf %1215, %1149 : vector<16x128xf32>
    %1217 = arith.truncf %1216 : vector<16x128xf32> to vector<16x128xbf16>
    %cst_468 = arith.constant dense<0.000000e+00> : vector<2x128xf32>
    %1218 = tpu.matmul %1148, %1217, %cst_468 {dimension_numbers = #tpu.dot_dimension_numbers<[1], [0], [0], [1], [0, 0, 1, 1], [], []>} : vector<2x16xbf16>, vector<16x128xbf16>, vector<2x128xf32> -> vector<2x128xf32>
    %1219 = arith.truncf %1218 : vector<2x128xf32> to vector<2x128xbf16>
    %c3696 = arith.constant 3696 : index
    %c0_469 = arith.constant 0 : index
    %1220 = vector.load %arg2[%c3696, %c0_469] : memref<5104x256xbf16, #tpu.memory_space<vmem>>, vector<128x128xbf16>
    %cst_470 = arith.constant dense<0.000000e+00> : vector<2x128xf32>
    %1221 = tpu.matmul %1219, %1220, %cst_470 {dimension_numbers = #tpu.dot_dimension_numbers<[1], [0], [0], [1], [0, 0, 1, 1], [], []>} : vector<2x128xbf16>, vector<128x128xbf16>, vector<2x128xf32> -> vector<2x128xf32>
    %1222 = arith.addf %1146, %1221 : vector<2x128xf32>
    %c1000 = arith.constant 1000 : index
    %c0_471 = arith.constant 0 : index
    %1223 = vector.load %arg3[%c1000, %c0_471] : memref<1168x256xf32, #tpu.memory_space<vmem>>, vector<1x128xf32>
    %1224 = vector.broadcast %1223 : vector<1x128xf32> to vector<2x128xf32>
    %1225 = arith.addf %1222, %1224 : vector<2x128xf32>
    %c1008 = arith.constant 1008 : index
    %c0_472 = arith.constant 0 : index
    %1226 = vector.load %arg3[%c1008, %c0_472] : memref<1168x256xf32, #tpu.memory_space<vmem>>, vector<1x128xf32>
    %c1016 = arith.constant 1016 : index
    %c0_473 = arith.constant 0 : index
    %1227 = vector.load %arg3[%c1016, %c0_473] : memref<1168x256xf32, #tpu.memory_space<vmem>>, vector<1x128xf32>
    %cst_474 = arith.constant dense<0.000000e+00> : vector<2xf32>
    %1228 = vector.multi_reduction <add>, %1225, %cst_474 [1] : vector<2x128xf32> to vector<2xf32>
    %1229 = vector.shape_cast %1228 : vector<2xf32> to vector<2x1xf32>
    %cst_475 = arith.constant 1.280000e+02 : f32
    %1230 = vector.broadcast %cst_475 : f32 to vector<2x1xf32>
    %1231 = arith.divf %1229, %1230 : vector<2x1xf32>
    %1232 = vector.broadcast %1231 : vector<2x1xf32> to vector<2x128xf32>
    %1233 = arith.subf %1225, %1232 : vector<2x128xf32>
    %1234 = arith.mulf %1233, %1233 : vector<2x128xf32>
    %cst_476 = arith.constant dense<0.000000e+00> : vector<2xf32>
    %1235 = vector.multi_reduction <add>, %1234, %cst_476 [1] : vector<2x128xf32> to vector<2xf32>
    %1236 = vector.shape_cast %1235 : vector<2xf32> to vector<2x1xf32>
    %cst_477 = arith.constant 1.280000e+02 : f32
    %1237 = vector.broadcast %cst_477 : f32 to vector<2x1xf32>
    %1238 = arith.divf %1236, %1237 : vector<2x1xf32>
    %1239 = vector.broadcast %1231 : vector<2x1xf32> to vector<2x128xf32>
    %1240 = arith.subf %1225, %1239 : vector<2x128xf32>
    %cst_478 = arith.constant 9.99999974E-6 : f32
    %1241 = vector.broadcast %cst_478 : f32 to vector<2x1xf32>
    %1242 = arith.addf %1238, %1241 : vector<2x1xf32>
    %1243 = math.rsqrt %1242 : vector<2x1xf32>
    %1244 = vector.broadcast %1243 : vector<2x1xf32> to vector<2x128xf32>
    %1245 = arith.mulf %1240, %1244 : vector<2x128xf32>
    %1246 = vector.broadcast %1226 : vector<1x128xf32> to vector<2x128xf32>
    %1247 = arith.mulf %1245, %1246 : vector<2x128xf32>
    %1248 = vector.broadcast %1227 : vector<1x128xf32> to vector<2x128xf32>
    %1249 = arith.addf %1247, %1248 : vector<2x128xf32>
    %1250 = arith.truncf %1249 : vector<2x128xf32> to vector<2x128xbf16>
    %c3824 = arith.constant 3824 : index
    %c0_479 = arith.constant 0 : index
    %1251 = vector.load %arg2[%c3824, %c0_479] : memref<5104x256xbf16, #tpu.memory_space<vmem>>, vector<128x256xbf16>
    %cst_480 = arith.constant dense<0.000000e+00> : vector<2x256xf32>
    %1252 = tpu.matmul %1250, %1251, %cst_480 {dimension_numbers = #tpu.dot_dimension_numbers<[1], [0], [0], [1], [0, 0, 1, 1], [], []>} : vector<2x128xbf16>, vector<128x256xbf16>, vector<2x256xf32> -> vector<2x256xf32>
    %c1024_481 = arith.constant 1024 : index
    %c0_482 = arith.constant 0 : index
    %1253 = vector.load %arg3[%c1024_481, %c0_482] : memref<1168x256xf32, #tpu.memory_space<vmem>>, vector<1x256xf32>
    %1254 = vector.broadcast %1253 : vector<1x256xf32> to vector<2x256xf32>
    %1255 = arith.addf %1252, %1254 : vector<2x256xf32>
    %c1_i32_483 = arith.constant 1 : i32
    %1256 = tpu.dynamic_rotate %1255 by %c1_i32_483 dim 0 : vector<2x256xf32>, i32 -> vector<2x256xf32>
    %cst_484 = arith.constant 0.000000e+00 : f32
    %1257 = vector.broadcast %cst_484 : f32 to vector<2x256xf32>
    %1258 = arith.select %1152, %1257, %1256 : vector<2x256xi1>, vector<2x256xf32>
    %c1_i32_485 = arith.constant 1 : i32
    %1259 = tpu.dynamic_rotate %1255 by %c1_i32_485 dim 0 : vector<2x256xf32>, i32 -> vector<2x256xf32>
    %cst_486 = arith.constant 0.000000e+00 : f32
    %1260 = vector.broadcast %cst_486 : f32 to vector<2x256xf32>
    %1261 = arith.select %1154, %1260, %1259 : vector<2x256xi1>, vector<2x256xf32>
    %c1032 = arith.constant 1032 : index
    %c0_487 = arith.constant 0 : index
    %1262 = vector.load %arg3[%c1032, %c0_487] : memref<1168x256xf32, #tpu.memory_space<vmem>>, vector<3x256xf32>
    %1263 = vector.extract_strided_slice %1262 {offsets = [0, 0], sizes = [1, 256], strides = [1, 1]} : vector<3x256xf32> to vector<1x256xf32>
    %1264 = vector.broadcast %1263 : vector<1x256xf32> to vector<2x256xf32>
    %1265 = arith.mulf %1258, %1264 : vector<2x256xf32>
    %1266 = vector.extract_strided_slice %1262 {offsets = [1, 0], sizes = [1, 256], strides = [1, 1]} : vector<3x256xf32> to vector<1x256xf32>
    %1267 = vector.broadcast %1266 : vector<1x256xf32> to vector<2x256xf32>
    %1268 = arith.mulf %1255, %1267 : vector<2x256xf32>
    %1269 = arith.addf %1265, %1268 : vector<2x256xf32>
    %1270 = vector.extract_strided_slice %1262 {offsets = [2, 0], sizes = [1, 256], strides = [1, 1]} : vector<3x256xf32> to vector<1x256xf32>
    %1271 = vector.broadcast %1270 : vector<1x256xf32> to vector<2x256xf32>
    %1272 = arith.mulf %1261, %1271 : vector<2x256xf32>
    %1273 = arith.addf %1269, %1272 : vector<2x256xf32>
    %c1040 = arith.constant 1040 : index
    %c0_488 = arith.constant 0 : index
    %1274 = vector.load %arg3[%c1040, %c0_488] : memref<1168x256xf32, #tpu.memory_space<vmem>>, vector<1x256xf32>
    %1275 = vector.broadcast %1274 : vector<1x256xf32> to vector<2x256xf32>
    %1276 = arith.addf %1273, %1275 : vector<2x256xf32>
    %cst_489 = arith.constant 5.000000e-01 : f32
    %1277 = vector.broadcast %cst_489 : f32 to vector<2x256xf32>
    %1278 = arith.mulf %1277, %1276 : vector<2x256xf32>
    %cst_490 = arith.constant 4.471500e-02 : f32
    %1279 = vector.broadcast %cst_490 : f32 to vector<2x256xf32>
    %1280 = arith.mulf %1279, %1276 : vector<2x256xf32>
    %1281 = arith.mulf %1280, %1276 : vector<2x256xf32>
    %1282 = arith.mulf %1281, %1276 : vector<2x256xf32>
    %1283 = arith.addf %1276, %1282 : vector<2x256xf32>
    %cst_491 = arith.constant 0.797884583 : f32
    %1284 = vector.broadcast %cst_491 : f32 to vector<2x256xf32>
    %1285 = arith.mulf %1284, %1283 : vector<2x256xf32>
    %1286 = math.tanh %1285 : vector<2x256xf32>
    %cst_492 = arith.constant 1.000000e+00 : f32
    %1287 = vector.broadcast %cst_492 : f32 to vector<2x256xf32>
    %1288 = arith.addf %1287, %1286 : vector<2x256xf32>
    %1289 = arith.mulf %1278, %1288 : vector<2x256xf32>
    %1290 = arith.truncf %1289 : vector<2x256xf32> to vector<2x256xbf16>
    %c3952 = arith.constant 3952 : index
    %c0_493 = arith.constant 0 : index
    %1291 = vector.load %arg2[%c3952, %c0_493] : memref<5104x256xbf16, #tpu.memory_space<vmem>>, vector<256x128xbf16>
    %cst_494 = arith.constant dense<0.000000e+00> : vector<2x128xf32>
    %1292 = tpu.matmul %1290, %1291, %cst_494 {dimension_numbers = #tpu.dot_dimension_numbers<[1], [0], [0], [1], [0, 0, 1, 1], [], []>} : vector<2x256xbf16>, vector<256x128xbf16>, vector<2x128xf32> -> vector<2x128xf32>
    %1293 = arith.addf %1225, %1292 : vector<2x128xf32>
    %c1048 = arith.constant 1048 : index
    %c0_495 = arith.constant 0 : index
    %1294 = vector.load %arg3[%c1048, %c0_495] : memref<1168x256xf32, #tpu.memory_space<vmem>>, vector<1x128xf32>
    %1295 = vector.broadcast %1294 : vector<1x128xf32> to vector<2x128xf32>
    %1296 = arith.addf %1293, %1295 : vector<2x128xf32>
    %c1056 = arith.constant 1056 : index
    %c0_496 = arith.constant 0 : index
    %1297 = vector.load %arg3[%c1056, %c0_496] : memref<1168x256xf32, #tpu.memory_space<vmem>>, vector<1x128xf32>
    %c1064 = arith.constant 1064 : index
    %c0_497 = arith.constant 0 : index
    %1298 = vector.load %arg3[%c1064, %c0_497] : memref<1168x256xf32, #tpu.memory_space<vmem>>, vector<1x128xf32>
    %cst_498 = arith.constant dense<0.000000e+00> : vector<2xf32>
    %1299 = vector.multi_reduction <add>, %1296, %cst_498 [1] : vector<2x128xf32> to vector<2xf32>
    %1300 = vector.shape_cast %1299 : vector<2xf32> to vector<2x1xf32>
    %cst_499 = arith.constant 1.280000e+02 : f32
    %1301 = vector.broadcast %cst_499 : f32 to vector<2x1xf32>
    %1302 = arith.divf %1300, %1301 : vector<2x1xf32>
    %1303 = vector.broadcast %1302 : vector<2x1xf32> to vector<2x128xf32>
    %1304 = arith.subf %1296, %1303 : vector<2x128xf32>
    %1305 = arith.mulf %1304, %1304 : vector<2x128xf32>
    %cst_500 = arith.constant dense<0.000000e+00> : vector<2xf32>
    %1306 = vector.multi_reduction <add>, %1305, %cst_500 [1] : vector<2x128xf32> to vector<2xf32>
    %1307 = vector.shape_cast %1306 : vector<2xf32> to vector<2x1xf32>
    %cst_501 = arith.constant 1.280000e+02 : f32
    %1308 = vector.broadcast %cst_501 : f32 to vector<2x1xf32>
    %1309 = arith.divf %1307, %1308 : vector<2x1xf32>
    %1310 = vector.broadcast %1302 : vector<2x1xf32> to vector<2x128xf32>
    %1311 = arith.subf %1296, %1310 : vector<2x128xf32>
    %cst_502 = arith.constant 9.99999974E-6 : f32
    %1312 = vector.broadcast %cst_502 : f32 to vector<2x1xf32>
    %1313 = arith.addf %1309, %1312 : vector<2x1xf32>
    %1314 = math.rsqrt %1313 : vector<2x1xf32>
    %1315 = vector.broadcast %1314 : vector<2x1xf32> to vector<2x128xf32>
    %1316 = arith.mulf %1311, %1315 : vector<2x128xf32>
    %1317 = vector.broadcast %1297 : vector<1x128xf32> to vector<2x128xf32>
    %1318 = arith.mulf %1316, %1317 : vector<2x128xf32>
    %1319 = vector.broadcast %1298 : vector<1x128xf32> to vector<2x128xf32>
    %1320 = arith.addf %1318, %1319 : vector<2x128xf32>
    %1321 = arith.truncf %1320 : vector<2x128xf32> to vector<2x128xbf16>
    %c4208 = arith.constant 4208 : index
    %c0_503 = arith.constant 0 : index
    %1322 = vector.load %arg2[%c4208, %c0_503] : memref<5104x256xbf16, #tpu.memory_space<vmem>>, vector<128x128xbf16>
    %cst_504 = arith.constant dense<0.000000e+00> : vector<2x128xf32>
    %1323 = tpu.matmul %1321, %1322, %cst_504 {dimension_numbers = #tpu.dot_dimension_numbers<[1], [0], [0], [1], [0, 0, 1, 1], [], []>} : vector<2x128xbf16>, vector<128x128xbf16>, vector<2x128xf32> -> vector<2x128xf32>
    %c1072 = arith.constant 1072 : index
    %c0_505 = arith.constant 0 : index
    %1324 = vector.load %arg3[%c1072, %c0_505] : memref<1168x256xf32, #tpu.memory_space<vmem>>, vector<1x128xf32>
    %1325 = vector.broadcast %1324 : vector<1x128xf32> to vector<2x128xf32>
    %1326 = arith.addf %1323, %1325 : vector<2x128xf32>
    %c4336 = arith.constant 4336 : index
    %c0_506 = arith.constant 0 : index
    %1327 = vector.load %arg2[%c4336, %c0_506] : memref<5104x256xbf16, #tpu.memory_space<vmem>>, vector<128x128xbf16>
    %cst_507 = arith.constant dense<0.000000e+00> : vector<2x128xf32>
    %1328 = tpu.matmul %1321, %1327, %cst_507 {dimension_numbers = #tpu.dot_dimension_numbers<[1], [0], [0], [1], [0, 0, 1, 1], [], []>} : vector<2x128xbf16>, vector<128x128xbf16>, vector<2x128xf32> -> vector<2x128xf32>
    %c1080 = arith.constant 1080 : index
    %c0_508 = arith.constant 0 : index
    %1329 = vector.load %arg3[%c1080, %c0_508] : memref<1168x256xf32, #tpu.memory_space<vmem>>, vector<1x128xf32>
    %1330 = vector.broadcast %1329 : vector<1x128xf32> to vector<2x128xf32>
    %1331 = arith.addf %1328, %1330 : vector<2x128xf32>
    %c4464 = arith.constant 4464 : index
    %c0_509 = arith.constant 0 : index
    %1332 = vector.load %arg2[%c4464, %c0_509] : memref<5104x256xbf16, #tpu.memory_space<vmem>>, vector<128x128xbf16>
    %cst_510 = arith.constant dense<0.000000e+00> : vector<2x128xf32>
    %1333 = tpu.matmul %1321, %1332, %cst_510 {dimension_numbers = #tpu.dot_dimension_numbers<[1], [0], [0], [1], [0, 0, 1, 1], [], []>} : vector<2x128xbf16>, vector<128x128xbf16>, vector<2x128xf32> -> vector<2x128xf32>
    %c1088_511 = arith.constant 1088 : index
    %c0_512 = arith.constant 0 : index
    %1334 = vector.load %arg3[%c1088_511, %c0_512] : memref<1168x256xf32, #tpu.memory_space<vmem>>, vector<1x128xf32>
    %1335 = vector.broadcast %1334 : vector<1x128xf32> to vector<2x128xf32>
    %1336 = arith.addf %1333, %1335 : vector<2x128xf32>
    %1337 = arith.truncf %1326 : vector<2x128xf32> to vector<2x128xbf16>
    %cst_513 = arith.constant dense<0.000000e+00> : vector<16x128xf32>
    %1338 = tpu.matmul %1147, %1337, %cst_513 {dimension_numbers = #tpu.dot_dimension_numbers<[1], [0], [0], [1], [0, 0, 1, 1], [], []>} : vector<16x2xbf16>, vector<2x128xbf16>, vector<16x128xf32> -> vector<16x128xf32>
    %1339 = arith.mulf %1338, %1149 : vector<16x128xf32>
    %1340 = arith.truncf %1339 : vector<16x128xf32> to vector<16x128xbf16>
    %1341 = arith.truncf %1331 : vector<2x128xf32> to vector<2x128xbf16>
    %cst_514 = arith.constant dense<0.000000e+00> : vector<16x2xf32>
    %1342 = tpu.matmul %1340, %1341, %cst_514 {dimension_numbers = #tpu.dot_dimension_numbers<[1], [1], [0], [0], [0, 0, 1, 0], [], []>} : vector<16x128xbf16>, vector<2x128xbf16>, vector<16x2xf32> -> vector<16x2xf32>
    %cst_515 = arith.constant 2.500000e-01 : f32
    %1343 = vector.broadcast %cst_515 : f32 to vector<16x2xf32>
    %1344 = arith.mulf %1342, %1343 : vector<16x2xf32>
    %cst_516 = arith.constant dense<0xFF800000> : vector<16xf32>
    %1345 = vector.multi_reduction <maximumf>, %1344, %cst_516 [1] : vector<16x2xf32> to vector<16xf32>
    %1346 = vector.shape_cast %1345 : vector<16xf32> to vector<16x1xf32>
    %1347 = vector.broadcast %1346 : vector<16x1xf32> to vector<16x2xf32>
    %1348 = arith.subf %1344, %1347 : vector<16x2xf32>
    %1349 = math.exp %1348 : vector<16x2xf32>
    %cst_517 = arith.constant dense<0.000000e+00> : vector<16xf32>
    %1350 = vector.multi_reduction <add>, %1349, %cst_517 [1] : vector<16x2xf32> to vector<16xf32>
    %1351 = vector.shape_cast %1350 : vector<16xf32> to vector<16x1xf32>
    %1352 = tpu.reciprocal %1351 {approx = true} : vector<16x1xf32> -> vector<16x1xf32>
    %1353 = vector.broadcast %1352 : vector<16x1xf32> to vector<16x2xf32>
    %1354 = arith.mulf %1349, %1353 : vector<16x2xf32>
    %1355 = arith.truncf %1354 : vector<16x2xf32> to vector<16x2xbf16>
    %1356 = arith.truncf %1336 : vector<2x128xf32> to vector<2x128xbf16>
    %cst_518 = arith.constant dense<0.000000e+00> : vector<16x128xf32>
    %1357 = tpu.matmul %1355, %1356, %cst_518 {dimension_numbers = #tpu.dot_dimension_numbers<[1], [0], [0], [1], [0, 0, 1, 1], [], []>} : vector<16x2xbf16>, vector<2x128xbf16>, vector<16x128xf32> -> vector<16x128xf32>
    %1358 = arith.mulf %1357, %1149 : vector<16x128xf32>
    %1359 = arith.truncf %1358 : vector<16x128xf32> to vector<16x128xbf16>
    %cst_519 = arith.constant dense<0.000000e+00> : vector<2x128xf32>
    %1360 = tpu.matmul %1148, %1359, %cst_519 {dimension_numbers = #tpu.dot_dimension_numbers<[1], [0], [0], [1], [0, 0, 1, 1], [], []>} : vector<2x16xbf16>, vector<16x128xbf16>, vector<2x128xf32> -> vector<2x128xf32>
    %1361 = arith.truncf %1360 : vector<2x128xf32> to vector<2x128xbf16>
    %c4592 = arith.constant 4592 : index
    %c0_520 = arith.constant 0 : index
    %1362 = vector.load %arg2[%c4592, %c0_520] : memref<5104x256xbf16, #tpu.memory_space<vmem>>, vector<128x128xbf16>
    %cst_521 = arith.constant dense<0.000000e+00> : vector<2x128xf32>
    %1363 = tpu.matmul %1361, %1362, %cst_521 {dimension_numbers = #tpu.dot_dimension_numbers<[1], [0], [0], [1], [0, 0, 1, 1], [], []>} : vector<2x128xbf16>, vector<128x128xbf16>, vector<2x128xf32> -> vector<2x128xf32>
    %1364 = arith.addf %1296, %1363 : vector<2x128xf32>
    %c1096 = arith.constant 1096 : index
    %c0_522 = arith.constant 0 : index
    %1365 = vector.load %arg3[%c1096, %c0_522] : memref<1168x256xf32, #tpu.memory_space<vmem>>, vector<1x128xf32>
    %1366 = vector.broadcast %1365 : vector<1x128xf32> to vector<2x128xf32>
    %1367 = arith.addf %1364, %1366 : vector<2x128xf32>
    %c1104 = arith.constant 1104 : index
    %c0_523 = arith.constant 0 : index
    %1368 = vector.load %arg3[%c1104, %c0_523] : memref<1168x256xf32, #tpu.memory_space<vmem>>, vector<1x128xf32>
    %c1112 = arith.constant 1112 : index
    %c0_524 = arith.constant 0 : index
    %1369 = vector.load %arg3[%c1112, %c0_524] : memref<1168x256xf32, #tpu.memory_space<vmem>>, vector<1x128xf32>
    %cst_525 = arith.constant dense<0.000000e+00> : vector<2xf32>
    %1370 = vector.multi_reduction <add>, %1367, %cst_525 [1] : vector<2x128xf32> to vector<2xf32>
    %1371 = vector.shape_cast %1370 : vector<2xf32> to vector<2x1xf32>
    %cst_526 = arith.constant 1.280000e+02 : f32
    %1372 = vector.broadcast %cst_526 : f32 to vector<2x1xf32>
    %1373 = arith.divf %1371, %1372 : vector<2x1xf32>
    %1374 = vector.broadcast %1373 : vector<2x1xf32> to vector<2x128xf32>
    %1375 = arith.subf %1367, %1374 : vector<2x128xf32>
    %1376 = arith.mulf %1375, %1375 : vector<2x128xf32>
    %cst_527 = arith.constant dense<0.000000e+00> : vector<2xf32>
    %1377 = vector.multi_reduction <add>, %1376, %cst_527 [1] : vector<2x128xf32> to vector<2xf32>
    %1378 = vector.shape_cast %1377 : vector<2xf32> to vector<2x1xf32>
    %cst_528 = arith.constant 1.280000e+02 : f32
    %1379 = vector.broadcast %cst_528 : f32 to vector<2x1xf32>
    %1380 = arith.divf %1378, %1379 : vector<2x1xf32>
    %1381 = vector.broadcast %1373 : vector<2x1xf32> to vector<2x128xf32>
    %1382 = arith.subf %1367, %1381 : vector<2x128xf32>
    %cst_529 = arith.constant 9.99999974E-6 : f32
    %1383 = vector.broadcast %cst_529 : f32 to vector<2x1xf32>
    %1384 = arith.addf %1380, %1383 : vector<2x1xf32>
    %1385 = math.rsqrt %1384 : vector<2x1xf32>
    %1386 = vector.broadcast %1385 : vector<2x1xf32> to vector<2x128xf32>
    %1387 = arith.mulf %1382, %1386 : vector<2x128xf32>
    %1388 = vector.broadcast %1368 : vector<1x128xf32> to vector<2x128xf32>
    %1389 = arith.mulf %1387, %1388 : vector<2x128xf32>
    %1390 = vector.broadcast %1369 : vector<1x128xf32> to vector<2x128xf32>
    %1391 = arith.addf %1389, %1390 : vector<2x128xf32>
    %1392 = arith.truncf %1391 : vector<2x128xf32> to vector<2x128xbf16>
    %c4720 = arith.constant 4720 : index
    %c0_530 = arith.constant 0 : index
    %1393 = vector.load %arg2[%c4720, %c0_530] : memref<5104x256xbf16, #tpu.memory_space<vmem>>, vector<128x256xbf16>
    %cst_531 = arith.constant dense<0.000000e+00> : vector<2x256xf32>
    %1394 = tpu.matmul %1392, %1393, %cst_531 {dimension_numbers = #tpu.dot_dimension_numbers<[1], [0], [0], [1], [0, 0, 1, 1], [], []>} : vector<2x128xbf16>, vector<128x256xbf16>, vector<2x256xf32> -> vector<2x256xf32>
    %c1120 = arith.constant 1120 : index
    %c0_532 = arith.constant 0 : index
    %1395 = vector.load %arg3[%c1120, %c0_532] : memref<1168x256xf32, #tpu.memory_space<vmem>>, vector<1x256xf32>
    %1396 = vector.broadcast %1395 : vector<1x256xf32> to vector<2x256xf32>
    %1397 = arith.addf %1394, %1396 : vector<2x256xf32>
    %c1_i32_533 = arith.constant 1 : i32
    %1398 = tpu.dynamic_rotate %1397 by %c1_i32_533 dim 0 : vector<2x256xf32>, i32 -> vector<2x256xf32>
    %cst_534 = arith.constant 0.000000e+00 : f32
    %1399 = vector.broadcast %cst_534 : f32 to vector<2x256xf32>
    %1400 = arith.select %1152, %1399, %1398 : vector<2x256xi1>, vector<2x256xf32>
    %c1_i32_535 = arith.constant 1 : i32
    %1401 = tpu.dynamic_rotate %1397 by %c1_i32_535 dim 0 : vector<2x256xf32>, i32 -> vector<2x256xf32>
    %cst_536 = arith.constant 0.000000e+00 : f32
    %1402 = vector.broadcast %cst_536 : f32 to vector<2x256xf32>
    %1403 = arith.select %1154, %1402, %1401 : vector<2x256xi1>, vector<2x256xf32>
    %c1128 = arith.constant 1128 : index
    %c0_537 = arith.constant 0 : index
    %1404 = vector.load %arg3[%c1128, %c0_537] : memref<1168x256xf32, #tpu.memory_space<vmem>>, vector<3x256xf32>
    %1405 = vector.extract_strided_slice %1404 {offsets = [0, 0], sizes = [1, 256], strides = [1, 1]} : vector<3x256xf32> to vector<1x256xf32>
    %1406 = vector.broadcast %1405 : vector<1x256xf32> to vector<2x256xf32>
    %1407 = arith.mulf %1400, %1406 : vector<2x256xf32>
    %1408 = vector.extract_strided_slice %1404 {offsets = [1, 0], sizes = [1, 256], strides = [1, 1]} : vector<3x256xf32> to vector<1x256xf32>
    %1409 = vector.broadcast %1408 : vector<1x256xf32> to vector<2x256xf32>
    %1410 = arith.mulf %1397, %1409 : vector<2x256xf32>
    %1411 = arith.addf %1407, %1410 : vector<2x256xf32>
    %1412 = vector.extract_strided_slice %1404 {offsets = [2, 0], sizes = [1, 256], strides = [1, 1]} : vector<3x256xf32> to vector<1x256xf32>
    %1413 = vector.broadcast %1412 : vector<1x256xf32> to vector<2x256xf32>
    %1414 = arith.mulf %1403, %1413 : vector<2x256xf32>
    %1415 = arith.addf %1411, %1414 : vector<2x256xf32>
    %c1136 = arith.constant 1136 : index
    %c0_538 = arith.constant 0 : index
    %1416 = vector.load %arg3[%c1136, %c0_538] : memref<1168x256xf32, #tpu.memory_space<vmem>>, vector<1x256xf32>
    %1417 = vector.broadcast %1416 : vector<1x256xf32> to vector<2x256xf32>
    %1418 = arith.addf %1415, %1417 : vector<2x256xf32>
    %cst_539 = arith.constant 5.000000e-01 : f32
    %1419 = vector.broadcast %cst_539 : f32 to vector<2x256xf32>
    %1420 = arith.mulf %1419, %1418 : vector<2x256xf32>
    %cst_540 = arith.constant 4.471500e-02 : f32
    %1421 = vector.broadcast %cst_540 : f32 to vector<2x256xf32>
    %1422 = arith.mulf %1421, %1418 : vector<2x256xf32>
    %1423 = arith.mulf %1422, %1418 : vector<2x256xf32>
    %1424 = arith.mulf %1423, %1418 : vector<2x256xf32>
    %1425 = arith.addf %1418, %1424 : vector<2x256xf32>
    %cst_541 = arith.constant 0.797884583 : f32
    %1426 = vector.broadcast %cst_541 : f32 to vector<2x256xf32>
    %1427 = arith.mulf %1426, %1425 : vector<2x256xf32>
    %1428 = math.tanh %1427 : vector<2x256xf32>
    %cst_542 = arith.constant 1.000000e+00 : f32
    %1429 = vector.broadcast %cst_542 : f32 to vector<2x256xf32>
    %1430 = arith.addf %1429, %1428 : vector<2x256xf32>
    %1431 = arith.mulf %1420, %1430 : vector<2x256xf32>
    %1432 = arith.truncf %1431 : vector<2x256xf32> to vector<2x256xbf16>
    %c4848 = arith.constant 4848 : index
    %c0_543 = arith.constant 0 : index
    %1433 = vector.load %arg2[%c4848, %c0_543] : memref<5104x256xbf16, #tpu.memory_space<vmem>>, vector<256x128xbf16>
    %cst_544 = arith.constant dense<0.000000e+00> : vector<2x128xf32>
    %1434 = tpu.matmul %1432, %1433, %cst_544 {dimension_numbers = #tpu.dot_dimension_numbers<[1], [0], [0], [1], [0, 0, 1, 1], [], []>} : vector<2x256xbf16>, vector<256x128xbf16>, vector<2x128xf32> -> vector<2x128xf32>
    %1435 = arith.addf %1367, %1434 : vector<2x128xf32>
    %c1144 = arith.constant 1144 : index
    %c0_545 = arith.constant 0 : index
    %1436 = vector.load %arg3[%c1144, %c0_545] : memref<1168x256xf32, #tpu.memory_space<vmem>>, vector<1x128xf32>
    %1437 = vector.broadcast %1436 : vector<1x128xf32> to vector<2x128xf32>
    %1438 = arith.addf %1435, %1437 : vector<2x128xf32>
    %c1152_546 = arith.constant 1152 : index
    %c0_547 = arith.constant 0 : index
    %1439 = vector.load %arg3[%c1152_546, %c0_547] : memref<1168x256xf32, #tpu.memory_space<vmem>>, vector<1x128xf32>
    %c1160 = arith.constant 1160 : index
    %c0_548 = arith.constant 0 : index
    %1440 = vector.load %arg3[%c1160, %c0_548] : memref<1168x256xf32, #tpu.memory_space<vmem>>, vector<1x128xf32>
    %cst_549 = arith.constant dense<0.000000e+00> : vector<2xf32>
    %1441 = vector.multi_reduction <add>, %1438, %cst_549 [1] : vector<2x128xf32> to vector<2xf32>
    %1442 = vector.shape_cast %1441 : vector<2xf32> to vector<2x1xf32>
    %cst_550 = arith.constant 1.280000e+02 : f32
    %1443 = vector.broadcast %cst_550 : f32 to vector<2x1xf32>
    %1444 = arith.divf %1442, %1443 : vector<2x1xf32>
    %1445 = vector.broadcast %1444 : vector<2x1xf32> to vector<2x128xf32>
    %1446 = arith.subf %1438, %1445 : vector<2x128xf32>
    %1447 = arith.mulf %1446, %1446 : vector<2x128xf32>
    %cst_551 = arith.constant dense<0.000000e+00> : vector<2xf32>
    %1448 = vector.multi_reduction <add>, %1447, %cst_551 [1] : vector<2x128xf32> to vector<2xf32>
    %1449 = vector.shape_cast %1448 : vector<2xf32> to vector<2x1xf32>
    %cst_552 = arith.constant 1.280000e+02 : f32
    %1450 = vector.broadcast %cst_552 : f32 to vector<2x1xf32>
    %1451 = arith.divf %1449, %1450 : vector<2x1xf32>
    %1452 = vector.broadcast %1444 : vector<2x1xf32> to vector<2x128xf32>
    %1453 = arith.subf %1438, %1452 : vector<2x128xf32>
    %cst_553 = arith.constant 9.99999974E-6 : f32
    %1454 = vector.broadcast %cst_553 : f32 to vector<2x1xf32>
    %1455 = arith.addf %1451, %1454 : vector<2x1xf32>
    %1456 = math.rsqrt %1455 : vector<2x1xf32>
    %1457 = vector.broadcast %1456 : vector<2x1xf32> to vector<2x128xf32>
    %1458 = arith.mulf %1453, %1457 : vector<2x128xf32>
    %1459 = vector.broadcast %1439 : vector<1x128xf32> to vector<2x128xf32>
    %1460 = arith.mulf %1458, %1459 : vector<2x128xf32>
    %1461 = vector.broadcast %1440 : vector<1x128xf32> to vector<2x128xf32>
    %1462 = arith.addf %1460, %1461 : vector<2x128xf32>
    %c0_554 = arith.constant 0 : index
    %c0_555 = arith.constant 0 : index
    %c0_556 = arith.constant 0 : index
    %1463 = vector.load %arg7[%c0_554, %c0_555, %c0_556] : memref<1x2x128xf32, #tpu.memory_space<vmem>>, vector<1x2x128xf32>
    %1464 = vector.shape_cast %1463 : vector<1x2x128xf32> to vector<2x128xf32>
    %1465 = vector.shape_cast %1462 : vector<2x128xf32> to vector<1x2x128xf32>
    tpu.vector_store %arg7[%c0_554, %c0_555, %c0_556], %1465 {strides = array<i32>} : memref<1x2x128xf32, #tpu.memory_space<vmem>>, vector<1x2x128xf32>,
    return
  }
  func.func @transform_0(%arg0: i32) -> (i32, i32, i32) {
    %c0_i32 = arith.constant 0 : i32
    %c0_i32_0 = arith.constant 0 : i32
    %c0_i32_1 = arith.constant 0 : i32
    return %arg0, %c0_i32, %c0_i32_0 : i32, i32, i32
  }
  func.func @transform_1(%arg0: i32) -> (i32, i32) {
    %c0_i32 = arith.constant 0 : i32
    %c0_i32_0 = arith.constant 0 : i32
    %c0_i32_1 = arith.constant 0 : i32
    return %c0_i32, %c0_i32_0 : i32, i32
  }
  func.func @transform_2(%arg0: i32) -> (i32, i32) {
    %c0_i32 = arith.constant 0 : i32
    %c0_i32_0 = arith.constant 0 : i32
    %c0_i32_1 = arith.constant 0 : i32
    return %c0_i32, %c0_i32_0 : i32, i32
  }
  func.func @transform_3(%arg0: i32) -> (i32, i32, i32) {
    %c0_i32 = arith.constant 0 : i32
    %c0_i32_0 = arith.constant 0 : i32
    %c0_i32_1 = arith.constant 0 : i32
    return %arg0, %c0_i32, %c0_i32_0 : i32, i32, i32
  }
  func.func @transform_4(%arg0: i32) -> (i32, i32, i32) {
    %c0_i32 = arith.constant 0 : i32
    %c0_i32_0 = arith.constant 0 : i32
    %c0_i32_1 = arith.constant 0 : i32
    return %arg0, %c0_i32, %c0_i32_0 : i32, i32, i32
  }
  func.func @transform_5(%arg0: i32) -> (i32, i32, i32) {
    %c0_i32 = arith.constant 0 : i32
    %c0_i32_0 = arith.constant 0 : i32
    %c0_i32_1 = arith.constant 0 : i32
    return %arg0, %c0_i32, %c0_i32_0 : i32, i32, i32
  }
  func.func @transform_6(%arg0: i32) -> (i32, i32, i32) {
    %c0_i32 = arith.constant 0 : i32
    %c0_i32_0 = arith.constant 0 : i32
    %c0_i32_1 = arith.constant 0 : i32
    return %arg0, %c0_i32, %c0_i32_0 : i32, i32, i32
  }
}

</mosaic_0001>

<bundles_post_ra>
// kernel: _lambda_.1
= control target key start
LH: loop header
LB: loop body
LE: loop exit
PB: predicated region body
PF: predicated region fallthrough
CT: control target
= control target key end

     0   :  { %s11489_s0 = inlined_call_operand.hbm [shape: f32[2,16,32], index: 0, kind: input, shape index: {}]   ;;  %s11490_s1 = inlined_call_operand.hbm [shape: bf16[5104,256], index: 1, kind: input, shape index: {}]   ;;  %s11491_s2 = inlined_call_operand.hbm [shape: f32[1168,256], index: 2, kind: input, shape index: {}]   ;;  %s11492_s3 = inlined_call_operand.hbm [shape: f32[2,16,32], index: 3, kind: output, shape index: {0}]   ;;  %s11493_s4 = inlined_call_operand.hbm [shape: f32[2,8,64], index: 4, kind: output, shape index: {1}]   ;;  %s11494_s5 = inlined_call_operand.hbm [shape: f32[2,4,64], index: 5, kind: output, shape index: {2}]   ;;  %s11495_s6 = inlined_call_operand.hbm [shape: f32[2,2,128], index: 6, kind: output, shape index: {3}]  }
   0x1   :  { %11499 = sst [smem:[#allocation19_spill]] %s11489_s0 }
   0x2   :  { %11500 = sst [smem:[#allocation20_spill]] %s11490_s1 }
   0x3   :  { %11501 = sst [smem:[#allocation21_spill]] %s11491_s2 }
   0x4   :  { %11502 = sst [smem:[#allocation22_spill]] %s11493_s4 }
   0x5   :  { %12 = vsyncpa [#allocation3], 0 }
   0x6   :  { %14 = vsyncpa [#allocation3 + $0x1], 0 }
   0x7   :  { %15 = vsyncpa [#allocation6], 0 }
   0x8   :  { %16 = vsyncpa [#allocation4], 0 }
   0x9   :  { %18 = vsyncpa [#allocation4 + $0x1], 0 }
   0xa   :  { %19 = vsyncpa [#allocation10], 0 }
   0xb   :  { %21 = vsyncpa [#allocation10 + $0x1], 0 }
   0xc   :  { %22 = vsyncpa [#allocation13], 0 }
   0xd   :  { %24 = vsyncpa [#allocation13 + $0x1], 0  ;;  %s10155_s21 = smov 0   ;;  %s10157_s22 = smov 0  }
   0xe   :  { %s10159_s23 = smov 0   ;;  %s10161_s24 = smov 0  }
   0xf LB: > { %s10176_s25 = sadd.s32 4294967295, %s10107_s24   ;;  %s11496_s26 = sadd.s32 4294967294, %s10107_s24   ;;  %s10107_s24 = sphi %s10161_s24, %s11519_s24   ;;  %s10103_s23 = sphi %s10159_s23, %s11518_s23   ;;  %s10099_s22 = sphi %s10157_s22, %s11517_s22   ;;  %s10095_s21 = sphi %s10155_s21, %s11516_s21  }
  0x10   : > { %p50_p0 = scmp.ne.s32.totalorder %s10099_s22, %s10095_s21  ;;  %p51_p1 = scmp.eq.s32.totalorder %s10176_s25, 0 }
  0x11   : > { %p116_p2 = scmp.eq.s32.totalorder %s10176_s25, 1  ;;  %p122_p3 = scmp.eq.s32.totalorder %s11496_s26, 1 }
  0x12   : > { %p10187_p4 = por %p51_p1, %p50_p0  ;;  %p7615_p5 = scmp.ge.s32.totalorder %s10107_s24, 1 }
  0x13   : > { %p10192_p6 = por %p122_p3, %p50_p0  ;;  %p207_p7 = scmp.lt.s32.totalorder %s10107_s24, 3 }
  0x14   : > { %s11505_s1 = sld [smem:[#allocation20_spill]]  ;;  %s10109_s9 = smov [#allocation5]  }
  0x15   : > { %p10200_p8 = pnand %p7615_p5, %p207_p7  ;;  %s220_s10 = sshll.u32 %s10109_s9, 4  ;;  %s221_s10 = int_to_ptr.vmem [resolvable:$true] %s220_s10 }
  0x16   : > { %s11507_s2 = sld [smem:[#allocation21_spill]]  ;;  %s11497_s14 = smov 128  }
  0x17   : > { %p9426_p9 = pneg %p10200_p8  ;;  %s11498_s15 = smov 8  }
  0x18   : > { %s10112_s16 = smov [#allocation7]   ;;  %s10113_s18 = smov 256  }
  0x19   : > { %p9427_p10 = pnand %p9426_p9, %p51_p1  ;;  %s234_s17 = sshll.u32 %s10112_s16, 4  ;;  %s235_s17 = int_to_ptr.vmem [resolvable:$true] %s234_s17 }
  0x1a   : > { %s218_s7 = sshll.u32 %s11505_s1, 4  ;;  %s10114_s19 = smov 16   ;;  %s219_s7 = int_to_ptr.hbm [resolvable:$true] %s218_s7 }
  0x1b   : > { %9429 = dma.hbm_to_vmem [thread:$0]  (!%p9427_p10), %s219_s7, 81664, %s221_s10, [#allocation6], %s11497_s14, %s11497_s14, %s11498_s15  }
  0x1c   : > { %s232_s13 = sshll.u32 %s11507_s2, 4  ;;  %s10216_s20 = sadd.s32 1, %s10107_s24   ;;  %s233_s13 = int_to_ptr.hbm [resolvable:$true] %s232_s13 }
  0x1d   : > { %9432 = dma.hbm_to_vmem [thread:$0]  (!%p9427_p10), %s233_s13, 37376, %s235_s17, [#allocation6], %s10113_s18, %s10113_s18, %s10114_s19  }
  0x1e   : > { %s34_s29 = ssub.s32 %s10107_s24, %s10216_s20  ;;  %s37_s30 = sadd.s32 1, %s10103_s23 }
  0x1f   : > { %p35_p12 = scmp.eq.s32.totalorder %s34_s29, 0  ;;  %p44_p13 = scmp.ne.s32.totalorder %s10103_s23, %s10099_s22 }
  0x20   : > { %p45_p0 = scmp.eq.s32.totalorder %s10107_s24, 0  ;;  %p9452_p7 = scmp.lt.s32.totalorder %s10107_s24, 2 }
  0x21   : > { %s10225_s9 = scalar_select %p35_p12, %s10103_s23, %s37_s30  }
  0x22   : > { %p46_p3 = por %p45_p0, %p44_p13  ;;  %p10229_p5 = por %p116_p2, %p44_p13 }
  0x23   : > { %s248_s10 = sand.u32 1, %s10103_s23   ;;  %s9083_s12 = sshll.u32 %s10107_s24, 4 }
  0x24   : > { %s7619_s11 = sshll.u32 %s248_s10, 4  ;;  %s11509_s0 = sld [smem:[#allocation19_spill]] }
  0x25   : > { %s252_s18 = scalar_lea.vmem [#allocation2], %s7619_s11  ;;  %p10239_p9 = pnand %p9452_p7, %p46_p3 }
  0x26   : > { %s260_s19 = sshll.u32 %s252_s18, 4  ;;  %s249_s26 = scalar_lea.sflag [#allocation3], %s248_s10  ;;  %s261_s19 = int_to_ptr.vmem [resolvable:$true] %s260_s19 }
  0x27   : > { %p9919_p10 = pneg %p10239_p9 }
  0x2a   : > { %s257_s17 = scalar_lea.hbm %s11509_s0, %s9083_s12  ;;  %s9922_s13 = scalar_lea.hbm %s11509_s0, 32 }
  0x2b   : > { %s258_s29 = sshll.u32 %s257_s17, 4  ;;  %s259_s29 = int_to_ptr.hbm [resolvable:$true] %s258_s29 }
  0x2c   : > { %s9915_s14 = sshra.s32 %s259_s29, 4  ;;  %s9916_s14 = int_to_ptr.hbm [resolvable:$true] %s9915_s14 }
  0x2d   : > { %s9917_s15 = scalar_lea.hbm %s9916_s14, 16  ;;  %p9923_p0 = scmp.lt.s32.totalorder %s9916_s14, %s11509_s0 }
  0x2e   : > { %p9918_p2 = scmp.ne.s32.totalorder %s9916_s14, %s9917_s15  ;;  %p9924_p3 = scmp.lt.s32.totalorder %s9922_s13, %s9917_s15 }
  0x30   : > { %p9920_p12 = pnand %p9919_p10, %p9918_p2  ;;  %p9925_p7 = por %p9924_p3, %p9923_p0 }
  0x32   : > { %p9921_p13 = pneg %p9920_p12 }
  0x34   : > { %p9926_p11 = pnand %p9925_p7, %p9921_p13 }
  0x36   : > { %9929 = shalt.err (!%p9926_p11)
}
  0x37   : > { %s11511_s10 = smov 8   ;;  %s11512_s18 = smov 128  }
  0x38   : > { %9436 = dma.hbm_to_vmem [thread:$0]  (!%p10239_p9), %s259_s29, 256, %s261_s19, %s249_s26, %s11512_s18, %s11512_s18, %s11511_s10  }
  0x39   : > { %272 = sbr.rel (%p10200_p8) target bundleno = 19511 (0x4c37), region = 32  ;;  %s10259_s12 = sand.u32 (!%p10200_p8), 1, %s10099_s22  }
  0x3a   : > { %s7623_s14 = sshll.u32 (!%p10200_p8), %s10259_s12, 4  ;;  %s275_s15 = scalar_lea.sflag (!%p10200_p8), [#allocation3], %s10259_s12 }
  0x3b   : > { %s278_s11 = scalar_lea.vmem (!%p10200_p8), [#allocation2], %s7623_s14 }
  0x3e   : > { %10074 = dma.done.wait (%p10187_p4), %s275_s15, 256  }
  0x3f   : > { %10076 = vsyncadd (%p10187_p4), %s275_s15, 4294967040 }
  0x40   : > { %10078 = dma.done.wait (%p51_p1), [#allocation6], 119040  }
  0x41   : > { %10080 = vsyncadd (%p51_p1), [#allocation6], 4294848256  ;;  %v334_v0 = vld [vmem:[%s278_s11] sm:$0xff]  ;;  %v335_v1 = vld [vmem:[%s278_s11 + $0x8] sm:$0xff]  ;;  %vm346_vm0 = vcmask 130048   ;;  %vm381_vm1 = vcmask 261120  }
  0x42   : > { %v7632_v2 = vld [vmem:[#allocation5] sm:$0xf]  ;;  %v336_v3 = vpack.c.bf16 %v335_v1, %v334_v0  ;;  %v9084_v4 = vld [vmem:[#allocation5 + $0x4] sm:$0xf0]  ;;  %v7646_v5 = vld [vmem:[#allocation5 + $0x10] sm:$0xf] }
  0x43   : > { %v9087_v6 = vld [vmem:[#allocation5 + $0x14] sm:$0xf0]  ;;  %v7633_v7 = vor.u32 %v9084_v4, %v7632_v2  ;;  %v7660_v9 = vld [vmem:[#allocation5 + $0x20] sm:$0xf]  ;;  %v9090_v10 = vld [vmem:[#allocation5 + $0x24] sm:$0xf0] }
  0x44   : > { %v7647_v8 = vor.u32 %v9087_v6, %v7646_v5  ;;  %357 = vmatpush.bf16.msra.mxu0 %v336_v3  ;;  %418 = vmatpush.bf16.msra.mxu2 %v336_v3  ;;  %v7661_v11 = vor.u32 %v9090_v10, %v7660_v9  ;;  %v7641_v12 = vld [vmem:[#allocation5 + $0x40] sm:$0xf]  ;;  %v9086_v13 = vld [vmem:[#allocation5 + $0x44] sm:$0xf0]  ;;  %v7637_v15 = vld [vmem:[#allocation5 + $0x30] sm:$0xf] }
  0x45   : > { %v7642_v14 = vor.u32 %v9086_v13, %v7641_v12  ;;  %v9085_v16 = vld [vmem:[#allocation5 + $0x34] sm:$0xf0]  ;;  %v7655_v18 = vld [vmem:[#allocation5 + $0x60] sm:$0xf]  ;;  %v9089_v19 = vld [vmem:[#allocation5 + $0x64] sm:$0xf0] }
  0x46   : > { %v7638_v17 = vor.u32 %v9085_v16, %v7637_v15  ;;  %v7669_v20 = vld [vmem:[#allocation5 + $0x80] sm:$0xf]  ;;  %v7656_v21 = vor.u32 %v9089_v19, %v7655_v18  ;;  %v9092_v22 = vld [vmem:[#allocation5 + $0x84] sm:$0xf0]  ;;  %v7651_v23 = vld [vmem:[#allocation5 + $0x50] sm:$0xf] }
  0x47   : > { %7634 = vmatmul.msk.bf16.vlgmr.msra.gmra.mxu0 %vm346_vm0, %v7633_v7  ;;  %7648 = vmatmul.msk.bf16.vlgmr.msra.gmra.mxu2 %vm346_vm0, %v7647_v8  ;;  %v9088_v24 = vld [vmem:[#allocation5 + $0x54] sm:$0xf0]  ;;  %v7670_v25 = vor.u32 %v9092_v22, %v7669_v20  ;;  %v7665_v27 = vld [vmem:[#allocation5 + $0x70] sm:$0xf]  ;;  %v10115_v54 = vmov 32.0   ;;  %s10886_s26 = scalar_lea.vmem [#allocation8], %s7623_s14 }
  0x48   : > { %478 = vmatpush.bf16.msrb.mxu0 %v336_v3  ;;  %391 = vmatpush.bf16.msra.mxu3 %v7642_v14  ;;  %v7652_v26 = vor.u32 %v9088_v24, %v7651_v23  ;;  %v9091_v28 = vld [vmem:[#allocation5 + $0x74] sm:$0xf0]  ;;  %v337_v41 = vld [vmem:[#allocation7 + $0x100] ss:$0 sm:$0xff]  ;;  %9499 = vrcp.f32 %v10115_v54  ;;  %v521_v22 = vld [vmem:[#allocation7 + $0x110] ss:$0 sm:$0xff] }
  0x49   : > { %511 = vmatpush.bf16.msrb.mxu2 %v7670_v25  ;;  %v7666_v29 = vor.u32 %v9091_v28, %v7665_v27  ;;  %s7627_s27 = sshll.u32 %s10259_s12, 3  ;;  %s7628_s19 = sshll.u32 %s10259_s12, 2 }
  0x4a   : > { %s11098_s8 = scalar_lea.vmem [#allocation9], %s7627_s27  ;;  %s11259_s29 = scalar_lea.vmem [#allocation11], %s7628_s19 }
  0x4b   : > { %s7358_s30 = sand.u32 1, %s10176_s25   ;;  %s9078_s13 = sshll.u32 %s10176_s25, 3 }
  0x4c   : > { %392 = vmatpush.bf16.msra.mxu3 %v7638_v17  ;;  %s11513_s4 = sld [smem:[#allocation22_spill]]  ;;  %s7398_s18 = sshll.u32 %s11098_s8, 4  ;;  %s7399_s18 = int_to_ptr.vmem [resolvable:$true] %s7398_s18 }
  0x4d   : > { %512 = vmatpush.bf16.msrb.mxu2 %v7666_v29  ;;  %s11406_s15 = scalar_lea.sflag [#allocation10], %s7358_s30 }
  0x4e   : > { %v9500_v55 = vpop.eup %9499 }
  0x4f   : > { %v530_v56 = vmul.f32 32.0, %v9500_v55  ;;  %vm534_vm2 = vweird.f32 %v9500_v55 }
  0x50   : > { %451 = vmatpush.bf16.msrb.mxu3 %v7656_v21 }
  0x51   : > { %v531_v57 = vsub.f32 1.0, %v530_v56  ;;  %v7674_v56 = vld [vmem:[#allocation5 + $0x120] sm:$0xf] }
  0x52   : > { %s7396_s10 = scalar_lea.hbm %s11513_s4, %s9078_s13  ;;  %s9965_s1 = scalar_lea.hbm %s11513_s4, 16 }
  0x53   : > { %v532_v58 = vmul.f32 %v9500_v55, %v531_v57  ;;  %v9102_v57 = vld [vmem:[#allocation5 + $0x124] sm:$0xf0]  ;;  %s7400_s14 = sshll.u32 %s7396_s10, 4  ;;  %s7401_s14 = int_to_ptr.hbm [resolvable:$true] %s7400_s14 }
  0x54   : > { %452 = vmatpush.bf16.msrb.mxu3 %v7652_v26  ;;  %v522_v26 = vld [vmem:[#allocation7 + $0x120] ss:$0 sm:$0xff]  ;;  %s9959_s11 = sshra.s32 %s7401_s14, 4  ;;  %s9960_s11 = int_to_ptr.hbm [resolvable:$true] %s9959_s11 }
  0x55   : > { %v533_v59 = vadd.f32 %v9500_v55, %v532_v58  ;;  %v7683_v58 = vld [vmem:[#allocation5 + $0x140] sm:$0xf]  ;;  %s9961_s27 = scalar_lea.hbm %s9960_s11, 8  ;;  %p9966_p11 = scmp.lt.s32.totalorder %s9960_s11, %s11513_s4 }
  0x56   : > { %p9962_p1 = scmp.ne.s32.totalorder %s9960_s11, %s9961_s27  ;;  %p9967_p9 = scmp.lt.s32.totalorder %s9965_s1, %s9961_s27 }
  0x57   : > { %7662 = vmatmul.msk.bf16.vlgmr.msrb.gmra.mxu0 %vm346_vm0, %v7661_v11  ;;  %v10281_v60 = vsel %vm534_vm2, %v9500_v55, %v533_v59 }
  0x58   : > { %p9963_p4 = pnand %p9962_p1, %p10229_p5  ;;  %p9968_p2 = por %p9967_p9, %p9966_p11 }
  0x5a   : > { %p9964_p8 = pneg %p9963_p4 }
  0x5c   : > { %p9969_p10 = pnand %p9968_p2, %p9964_p8 }
  0xc4   : > { %v359_v30 = vpop.f32.mrf.mxu0 }
  0xca   : > { %v420_v33 = vpop.f32.mrf.mxu2 }
  0xcc   : > { %v361_v31 = vpop.f32.mrf.mxu0 }
  0xcd   : > { %v364_v32 = vpack.c.bf16 %v361_v31, %v359_v30 }
  0xcf   : > { %7643 = vmatmul.msk.bf16.vlgmr.msra.gmra.mxu3 %vm381_vm1, %v364_v32 }
  0xd2   : > { %v422_v35 = vpop.f32.mrf.mxu2 }
  0xd3   : > { %v425_v37 = vpack.c.bf16 %v422_v35, %v420_v33 }
  0xd4   : > { %v480_v34 = vpop.f32.mrf.mxu0 }
  0xdc   : > { %v482_v36 = vpop.f32.mrf.mxu0 }
  0xdd   : > { %v485_v38 = vpack.c.bf16 %v482_v36, %v480_v34 }
  0xdf   : > { %7657 = vmatmul.msk.bf16.vlgmr.msrb.gmra.mxu3 %vm381_vm1, %v425_v37  ;;  %7671 = vmatmul.msk.bf16.vlgmr.msrb.gmra.mxu2 %vm381_vm1, %v485_v38 }
 0x152   : > { %v394_v39 = vpop.f32.mrf.mxu3 }
 0x153   : > { %v399_v42 = vadd.f32 %v394_v39, %v337_v41 }
 0x15a   : > { %v396_v40 = vpop.f32.mrf.mxu3 }
 0x15b   : > { %v400_v48 = vadd.f32 %v396_v40, %v337_v41 }
 0x162   : > { %v454_v43 = vpop.f32.mrf.mxu3  ;;  %v514_v44 = vpop.f32.mrf.mxu2 }
 0x163   : > { %v459_v45 = vadd.f32 %v454_v43, %v399_v42 }
 0x165   : > { %v519_v46 = vadd.f32 %v514_v44, %v459_v45 }
 0x167   : > { %v523_v47 = vsel %vm381_vm1, %v519_v46, 0.0 }
 0x168   : > { %524 = vadd.xlane.f32.xlu0 %v523_v47  ;;  %v7678_v47 = vld [vmem:[#allocation5 + $0x130] sm:$0xf] }
 0x16a   : > { %v456_v49 = vpop.f32.mrf.mxu3  ;;  %v516_v51 = vpop.f32.mrf.mxu2 }
 0x16b   : > { %v460_v50 = vadd.f32 %v456_v49, %v400_v48  ;;  %v9103_v48 = vld [vmem:[#allocation5 + $0x134] sm:$0xf0]  ;;  %v7687_v49 = vld [vmem:[#allocation5 + $0x150] sm:$0xf] }
 0x16d   : > { %v520_v52 = vadd.f32 %v516_v51, %v460_v50  ;;  %v7679_v50 = vor.u32 %v9103_v48, %v7678_v47  ;;  %v9105_v51 = vld [vmem:[#allocation5 + $0x154] sm:$0xf0]  ;;  %v708_v47 = vld [vmem:[#allocation7 + $0x160] ss:$0 sm:$0xff] }
 0x16e   : > { %v7688_v54 = vor.u32 %v9105_v51, %v7687_v49 }
 0x16f   : > { %v526_v53 = vsel %vm381_vm1, %v520_v52, 0.0  ;;  %696 = vmatpush.bf16.msra.mxu1 %v7679_v50 }
 0x170   : > { %527 = vadd.xlane.f32.xlu0 %v526_v53  ;;  %v9107_v53 = vld [vmem:[#allocation5 + $0x174] sm:$0xf0]  ;;  %727 = vmatpush.bf16.msra.mxu3 %v7688_v54 }
 0x1db   : > { %v525_v61 = vpop.xlane.xlu0 %524 }
 0x1dc   : > { %v536_v62 = vmul.f32 %v10281_v60, %v525_v61  ;;  %v7675_v61 = vor.u32 %v9102_v57, %v7674_v56  ;;  %v9094_v56 = vld [vmem:[#allocation5 + $0xa4] sm:$0xf0] }
 0x1de   : > { %v538_v63 = vsub.f32 %v519_v46, %v536_v62  ;;  %v9104_v62 = vld [vmem:[#allocation5 + $0x144] sm:$0xf0]  ;;  %697 = vmatpush.bf16.msra.mxu1 %v7675_v61 }
 0x1e0   : > { %v540_v0 = vmul.f32 %v538_v63, %v538_v63 }
 0x1e2   : > { %v542_v1 = vsel %vm381_vm1, %v540_v0, 0.0  ;;  %v9106_v0 = vld [vmem:[#allocation5 + $0x164] sm:$0xf0] }
 0x1e3   : > { %543 = vadd.xlane.f32.xlu1 %v542_v1  ;;  %v528_v2 = vpop.xlane.xlu0 %527 }
 0x1e4   : > { %v537_v3 = vmul.f32 %v10281_v60, %v528_v2  ;;  %v7684_v2 = vor.u32 %v9104_v62, %v7683_v58  ;;  %v7709_v58 = vld [vmem:[#allocation5 + $0xb0] sm:$0xf]  ;;  %v7713_v62 = vld [vmem:[#allocation5 + $0xc0] sm:$0xf] }
 0x1e6   : > { %v539_v4 = vsub.f32 %v520_v52, %v537_v3  ;;  %v7696_v52 = vld [vmem:[#allocation5 + $0x170] sm:$0xf]  ;;  %728 = vmatpush.bf16.msra.mxu3 %v7684_v2  ;;  %v9097_v2 = vld [vmem:[#allocation5 + $0xd4] sm:$0xf0] }
 0x1e7   : > { %v7697_v55 = vor.u32 %v9107_v53, %v7696_v52 }
 0x1e8   : > { %v541_v5 = vmul.f32 %v539_v4, %v539_v4 }
 0x1e9   : > { %758 = vmatpush.bf16.msra.mxu0 %v7697_v55  ;;  %v7705_v55 = vld [vmem:[#allocation5 + $0xa0] sm:$0xf] }
 0x1ea   : > { %v545_v6 = vsel %vm381_vm1, %v541_v5, 0.0  ;;  %v10313_v57 = vor.u32 %v9094_v56, %v7705_v55 }
 0x1eb   : > { %546 = vadd.xlane.f32.xlu1 %v545_v6 }
 0x256   : > { %v544_v7 = vpop.xlane.xlu1 %543 }
 0x257   : > { %v548_v8 = vmul.f32 %v544_v7, %v10281_v60 }
 0x259   : > { %v550_v9 = vadd.f32 1e-05, %v548_v8 }
 0x25b   : > { %9501 = vrsqrt.f32 %v550_v9  ;;  %vm558_vm4 = vweird.f32 %v550_v9 }
 0x25e   : > { %v547_v10 = vpop.xlane.xlu1 %546 }
 0x25f   : > { %v549_v11 = vmul.f32 %v547_v10, %v10281_v60 }
 0x261   : > { %v9502_v12 = vpop.eup %9501  ;;  %v551_v13 = vadd.f32 1e-05, %v549_v11 }
 0x262   : > { %v553_v14 = vmul.f32 %v9502_v12, %v550_v9  ;;  %vm559_vm3 = vweird.f32 %v9502_v12 }
 0x263   : > { %9503 = vrsqrt.f32 %v551_v13  ;;  %vm560_vm5 = vmor %vm558_vm4, %vm559_vm3  ;;  %vm568_vm7 = vweird.f32 %v551_v13 }
 0x264   : > { %v554_v15 = vmul.f32 %v9502_v12, %v553_v14 }
 0x266   : > { %v555_v16 = vmul.f32 0.5, %v554_v15 }
 0x268   : > { %v556_v17 = vsub.f32 1.5, %v555_v16 }
 0x269   : > { %v9504_v18 = vpop.eup %9503 }
 0x26a   : > { %v557_v19 = vmul.f32 %v9502_v12, %v556_v17  ;;  %v563_v20 = vmul.f32 %v9504_v18, %v551_v13  ;;  %vm569_vm6 = vweird.f32 %v9504_v18 }
 0x26b   : > { %vm570_vm8 = vmor %vm568_vm7, %vm569_vm6 }
 0x26c   : > { %v564_v21 = vmul.f32 %v9504_v18, %v563_v20  ;;  %v561_v23 = vsel %vm560_vm5, %v9502_v12, %v557_v19 }
 0x26d   : > { %v572_v24 = vmul.f32 %v561_v23, %v538_v63  ;;  %v7692_v63 = vld [vmem:[#allocation5 + $0x160] sm:$0xf] }
 0x26e   : > { %v565_v25 = vmul.f32 0.5, %v564_v21  ;;  %v7693_v3 = vor.u32 %v9106_v0, %v7692_v63  ;;  %v9096_v63 = vld [vmem:[#allocation5 + $0xc4] sm:$0xf0] }
 0x26f   : > { %v574_v27 = vmul.f32 %v572_v24, %v521_v22  ;;  %v10321_v0 = vor.u32 %v9096_v63, %v7713_v62  ;;  %v10383_v62 = vld [vmem:[#allocation7 + $0xc0] sm:$0xff]  ;;  %v10385_v63 = vld [vmem:[#allocation7 + $0xd0] sm:$0xff] }
 0x270   : > { %v566_v28 = vsub.f32 1.5, %v565_v25  ;;  %759 = vmatpush.bf16.msra.mxu0 %v7693_v3 }
 0x271   : > { %v10289_v29 = vadd.f32 %v574_v27, %v522_v26 }
 0x272   : > { %v567_v30 = vmul.f32 %v9504_v18, %v566_v28 }
 0x273   : > { %v621_v31 = vsel %vm381_vm1, %v10289_v29, 0.0 }
 0x274   : > { %622 = vadd.xlane.f32.xlu2 %v621_v31  ;;  %v571_v32 = vsel %vm570_vm8, %v9504_v18, %v567_v30 }
 0x275   : > { %v573_v33 = vmul.f32 %v571_v32, %v539_v4 }
 0x277   : > { %v575_v34 = vmul.f32 %v573_v33, %v521_v22  ;;  %v619_v22 = vld [vmem:[#allocation7 + $0x130] ss:$0 sm:$0xff] }
 0x279   : > { %v10293_v35 = vadd.f32 %v575_v34, %v522_v26  ;;  %v620_v26 = vld [vmem:[#allocation7 + $0x140] ss:$0 sm:$0xff]  ;;  %v674_v34 = vld [vmem:[#allocation7 + $0x150] ss:$0 sm:$0xff] }
 0x27b   : > { %v624_v36 = vsel %vm381_vm1, %v10293_v35, 0.0 }
 0x27c   : > { %625 = vadd.xlane.f32.xlu2 %v624_v36 }
 0x2e7   : > { %v623_v37 = vpop.xlane.xlu2 %622 }
 0x2e8   : > { %v627_v38 = vmul.f32 %v623_v37, %v10281_v60  ;;  %v739_v37 = vld [vmem:[#allocation7 + $0x170] ss:$0 sm:$0xff] }
 0x2ea   : > { %v629_v39 = vsub.f32 %v10289_v29, %v627_v38 }
 0x2ec   : > { %v631_v40 = vmul.f32 %v629_v39, %v629_v39 }
 0x2ee   : > { %v633_v41 = vsel %vm381_vm1, %v631_v40, 0.0 }
 0x2ef   : > { %634 = vadd.xlane.f32.xlu0 %v633_v41  ;;  %v626_v42 = vpop.xlane.xlu2 %625 }
 0x2f0   : > { %v628_v43 = vmul.f32 %v626_v42, %v10281_v60  ;;  %v7701_v42 = vld [vmem:[#allocation5 + $0x90] sm:$0xf] }
 0x2f2   : > { %v630_v44 = vsub.f32 %v10293_v35, %v628_v43  ;;  %v9093_v43 = vld [vmem:[#allocation5 + $0x94] sm:$0xf0] }
 0x2f3   : > { %v10308_v49 = vor.u32 %v9093_v43, %v7701_v42 }
 0x2f4   : > { %v632_v45 = vmul.f32 %v630_v44, %v630_v44 }
 0x2f6   : > { %v636_v46 = vsel %vm381_vm1, %v632_v45, 0.0 }
 0x2f7   : > { %637 = vadd.xlane.f32.xlu1 %v636_v46 }
 0x362   : > { %v635_v59 = vpop.xlane.xlu0 %634 }
 0x363   : > { %v639_v1 = vmul.f32 %v635_v59, %v10281_v60  ;;  %v9095_v59 = vld [vmem:[#allocation5 + $0xb4] sm:$0xf0] }
 0x364   : > { %v10317_v61 = vor.u32 %v9095_v59, %v7709_v58 }
 0x365   : > { %v641_v4 = vadd.f32 1e-05, %v639_v1  ;;  %v7717_v1 = vld [vmem:[#allocation5 + $0xd0] sm:$0xf] }
 0x366   : > { %v10325_v3 = vor.u32 %v9097_v2, %v7717_v1 }
 0x367   : > { %9505 = vrsqrt.f32 %v641_v4  ;;  %vm649_vm10 = vweird.f32 %v641_v4 }
 0x36a   : > { %v638_v5 = vpop.xlane.xlu1 %637 }
 0x36b   : > { %v640_v6 = vmul.f32 %v638_v5, %v10281_v60  ;;  %v9098_v5 = vld [vmem:[#allocation5 + $0xe4] sm:$0xf0] }
 0x36d   : > { %v9506_v7 = vpop.eup %9505  ;;  %v642_v8 = vadd.f32 1e-05, %v640_v6 }
 0x36e   : > { %v644_v9 = vmul.f32 %v9506_v7, %v641_v4  ;;  %vm650_vm9 = vweird.f32 %v9506_v7  ;;  %v7721_v4 = vld [vmem:[#allocation5 + $0xe0] sm:$0xf] }
 0x36f   : > { %9507 = vrsqrt.f32 %v642_v8  ;;  %vm651_vm11 = vmor %vm649_vm10, %vm650_vm9  ;;  %vm659_vm13 = vweird.f32 %v642_v8  ;;  %v10329_v6 = vor.u32 %v9098_v5, %v7721_v4 }
 0x370   : > { %v645_v10 = vmul.f32 %v9506_v7, %v644_v9 }
 0x372   : > { %v646_v11 = vmul.f32 0.5, %v645_v10  ;;  %v7729_v10 = vld [vmem:[#allocation5 + $0x100] sm:$0xf] }
 0x374   : > { %v647_v12 = vsub.f32 1.5, %v646_v11  ;;  %v9100_v11 = vld [vmem:[#allocation5 + $0x104] sm:$0xf0] }
 0x375   : > { %v9508_v13 = vpop.eup %9507 }
 0x376   : > { %v648_v14 = vmul.f32 %v9506_v7, %v647_v12  ;;  %v654_v15 = vmul.f32 %v9508_v13, %v642_v8  ;;  %vm660_vm12 = vweird.f32 %v9508_v13  ;;  %v9099_v8 = vld [vmem:[#allocation5 + $0xf4] sm:$0xf0]  ;;  %v10337_v12 = vor.u32 %v9100_v11, %v7729_v10  ;;  %v10392_v10 = vld [vmem:[#allocation7 + $0xf0] sm:$0xff] }
 0x377   : > { %vm661_vm14 = vmor %vm659_vm13, %vm660_vm12 }
 0x378   : > { %v655_v16 = vmul.f32 %v9508_v13, %v654_v15  ;;  %v652_v17 = vsel %vm651_vm11, %v9506_v7, %v648_v14  ;;  %v7725_v7 = vld [vmem:[#allocation5 + $0xf0] sm:$0xf]  ;;  %v10343_v15 = vld [vmem:[#allocation7 + $0x10] sm:$0xff]  ;;  %vm1505_vm11 = vcmask 523264  }
 0x379   : > { %v663_v20 = vmul.f32 %v652_v17, %v629_v39  ;;  %v10333_v9 = vor.u32 %v9099_v8, %v7725_v7  ;;  %v10341_v14 = vld [vmem:[#allocation7] sm:$0xff] }
 0x37a   : > { %v656_v18 = vmul.f32 0.5, %v655_v16  ;;  %v10390_v8 = vld [vmem:[#allocation7 + $0xe0] sm:$0xff] }
 0x37b   : > { %v665_v25 = vmul.f32 %v663_v20, %v619_v22 }
 0x37c   : > { %v657_v19 = vsub.f32 1.5, %v656_v18 }
 0x37d   : > { %v667_v28 = vadd.f32 %v665_v25, %v620_v26 }
 0x37e   : > { %v658_v21 = vmul.f32 %v9508_v13, %v657_v19 }
 0x380   : > { %v662_v23 = vsel %vm661_vm14, %v9508_v13, %v658_v21  ;;  %v10348_v21 = vld [vmem:[#allocation7 + $0x20] sm:$0xff] }
 0x381   : > { %v664_v24 = vmul.f32 %v662_v23, %v630_v44 }
 0x383   : > { %v666_v27 = vmul.f32 %v664_v24, %v619_v22  ;;  %v10350_v22 = vld [vmem:[#allocation7 + $0x30] sm:$0xff] }
 0x385   : > { %v668_v30 = vadd.f32 %v666_v27, %v620_v26 }
 0x387   : > { %v669_v31 = vpack.c.bf16 %v668_v30, %v667_v28  ;;  %v10355_v28 = vld [vmem:[#allocation7 + $0x40] sm:$0xff]  ;;  %v10357_v30 = vld [vmem:[#allocation7 + $0x50] sm:$0xff] }
 0x389   : > { %7680 = vmatmul.msk.bf16.vlgmr.msra.gmra.mxu1 %vm381_vm1, %v669_v31  ;;  %7689 = vmatmul.msk.bf16.vlgmr.msra.gmra.mxu3 %vm381_vm1, %v669_v31 }
 0x38a   : > { %7698 = vmatmul.msk.bf16.vlgmr.msra.gmra.mxu0 %vm381_vm1, %v669_v31 }
 0x406   : > { %v699_v32 = vpop.f32.mrf.mxu1 }
 0x407   : > { %v761_v33 = vpop.f32.mrf.mxu0  ;;  %v700_v39 = vadd.f32 %v699_v32, %v674_v34 }
 0x408   : > { %v762_v44 = vadd.f32 %v761_v33, %v739_v37 }
 0x40c   : > { %v730_v36 = vpop.f32.mrf.mxu3 }
 0x40d   : > { %v731_v51 = vadd.f32 %v730_v36, %v708_v47 }
 0x40e   : > { %v701_v38 = vpop.f32.mrf.mxu1 }
 0x40f   : > { %v702_v40 = vadd.f32 %v701_v38, %v674_v34  ;;  %v763_v41 = vpop.f32.mrf.mxu0  ;;  %v10364_v38 = vld [vmem:[#allocation7 + $0x70] sm:$0xff] }
 0x410   : > { %v764_v45 = vadd.f32 %v763_v41, %v739_v37  ;;  %v10362_v37 = vld [vmem:[#allocation7 + $0x60] sm:$0xff] }
 0x411   : > { %v766_v46 = vpack.c.bf16 %v702_v40, %v700_v39 }
 0x412   : > { %v1181_v48 = vpack.c.bf16 %v764_v45, %v762_v44  ;;  %v10369_v44 = vld [vmem:[#allocation7 + $0x80] sm:$0xff]  ;;  %v10371_v45 = vld [vmem:[#allocation7 + $0x90] sm:$0xff] }
 0x413   : > { %838 = vmatpush.bf16.msra.mxu2 %v766_v46 }
 0x414   : > { %1213 = vmatpush.bf16.msrb.mxu3 %v1181_v48  ;;  %v732_v50 = vpop.f32.mrf.mxu3 }
 0x415   : > { %v733_v52 = vadd.f32 %v732_v50, %v708_v47 }
 0x416   : > { %7731 = vmatmul.msk.bf16.vlgmr.msra.gmra.mxu2 %vm346_vm0, %v10308_v49 }
 0x417   : > { %v904_v53 = vpack.c.bf16 %v733_v52, %v731_v51  ;;  %v10376_v52 = vld [vmem:[#allocation7 + $0xa0] sm:$0xff] }
 0x419   : > { %v930_v54 = vsel %vm381_vm1, %v904_v53, 0  ;;  %v10378_v53 = vld [vmem:[#allocation7 + $0xb0] sm:$0xff] }
 0x41a   : > { %939 = vmatpush.bf16.xpose.msrb.mxu1 %v930_v54 }
 0x426   : > { %7732 = vmatmul.msk.bf16.gmra.mxu2 %vm346_vm0, %v10313_v57 }
 0x436   : > { %7733 = vmatmul.msk.bf16.gmra.mxu2 %vm346_vm0, %v10317_v61 }
 0x446   : > { %7734 = vmatmul.msk.bf16.gmra.mxu2 %vm346_vm0, %v10321_v0 }
 0x456   : > { %7735 = vmatmul.msk.bf16.gmra.mxu2 %vm346_vm0, %v10325_v3 }
 0x466   : > { %7736 = vmatmul.msk.bf16.gmra.mxu2 %vm346_vm0, %v10329_v6 }
 0x476   : > { %7737 = vmatmul.msk.bf16.gmra.mxu2 %vm346_vm0, %v10333_v9 }
 0x486   : > { %7738 = vmatmul.msk.bf16.gmra.mxu2 %vm346_vm0, %v10337_v12 }
 0x499   : > { %v840_v13 = vpop.f32.mrf.mxu2 }
 0x49a   : > { %v880_v17 = vmul.f32 %v840_v13, %v10341_v14 }
 0x4a1   : > { %v842_v16 = vpop.f32.mrf.mxu2 }
 0x4a2   : > { %v881_v18 = vmul.f32 %v842_v16, %v10343_v15 }
 0x4a4   : > { %v896_v19 = vpack.c.bf16 %v881_v18, %v880_v17 }
 0x4a6   : > { %7739 = vmatmul.msk.bf16.vlgmr.msrb.gmra.mxu1 %vm381_vm1, %v896_v19 }
 0x4a9   : > { %v845_v20 = vpop.f32.mrf.mxu2 }
 0x4aa   : > { %v882_v24 = vmul.f32 %v845_v20, %v10348_v21 }
 0x4b1   : > { %v847_v23 = vpop.f32.mrf.mxu2 }
 0x4b2   : > { %v883_v25 = vmul.f32 %v847_v23, %v10350_v22 }
 0x4b4   : > { %v897_v26 = vpack.c.bf16 %v883_v25, %v882_v24 }
 0x4b6   : > { %7740 = vmatmul.msk.bf16.gmra.mxu1 %vm381_vm1, %v897_v26 }
 0x4b9   : > { %v850_v27 = vpop.f32.mrf.mxu2 }
 0x4ba   : > { %v884_v32 = vmul.f32 %v850_v27, %v10355_v28 }
 0x4c1   : > { %v852_v31 = vpop.f32.mrf.mxu2 }
 0x4c2   : > { %v885_v33 = vmul.f32 %v852_v31, %v10357_v30 }
 0x4c4   : > { %v898_v34 = vpack.c.bf16 %v885_v33, %v884_v32 }
 0x4c6   : > { %7741 = vmatmul.msk.bf16.gmra.mxu1 %vm381_vm1, %v898_v34 }
 0x4c9   : > { %v855_v36 = vpop.f32.mrf.mxu2 }
 0x4ca   : > { %v886_v40 = vmul.f32 %v855_v36, %v10362_v37 }
 0x4d1   : > { %v857_v39 = vpop.f32.mrf.mxu2 }
 0x4d2   : > { %v887_v41 = vmul.f32 %v857_v39, %v10364_v38 }
 0x4d4   : > { %v899_v42 = vpack.c.bf16 %v887_v41, %v886_v40 }
 0x4d6   : > { %7742 = vmatmul.msk.bf16.gmra.mxu1 %vm381_vm1, %v899_v42 }
 0x4d9   : > { %v860_v43 = vpop.f32.mrf.mxu2 }
 0x4da   : > { %v888_v46 = vmul.f32 %v860_v43, %v10369_v44 }
 0x4e1   : > { %v862_v47 = vpop.f32.mrf.mxu2 }
 0x4e2   : > { %v889_v48 = vmul.f32 %v862_v47, %v10371_v45 }
 0x4e4   : > { %v900_v50 = vpack.c.bf16 %v889_v48, %v888_v46 }
 0x4e6   : > { %7743 = vmatmul.msk.bf16.gmra.mxu1 %vm381_vm1, %v900_v50 }
 0x4e9   : > { %v865_v51 = vpop.f32.mrf.mxu2 }
 0x4ea   : > { %v890_v54 = vmul.f32 %v865_v51, %v10376_v52 }
 0x4f1   : > { %v867_v55 = vpop.f32.mrf.mxu2 }
 0x4f2   : > { %v891_v56 = vmul.f32 %v867_v55, %v10378_v53 }
 0x4f4   : > { %v901_v58 = vpack.c.bf16 %v891_v56, %v890_v54 }
 0x4f6   : > { %7744 = vmatmul.msk.bf16.gmra.mxu1 %vm381_vm1, %v901_v58 }
 0x4f9   : > { %v870_v59 = vpop.f32.mrf.mxu2 }
 0x4fa   : > { %v892_v1 = vmul.f32 %v870_v59, %v10383_v62 }
 0x501   : > { %v872_v2 = vpop.f32.mrf.mxu2 }
 0x502   : > { %v893_v4 = vmul.f32 %v872_v2, %v10385_v63 }
 0x504   : > { %v902_v5 = vpack.c.bf16 %v893_v4, %v892_v1 }
 0x506   : > { %7745 = vmatmul.msk.bf16.gmra.mxu1 %vm381_vm1, %v902_v5 }
 0x509   : > { %v875_v7 = vpop.f32.mrf.mxu2 }
 0x50a   : > { %v894_v11 = vmul.f32 %v875_v7, %v10390_v8 }
 0x511   : > { %v877_v13 = vpop.f32.mrf.mxu2 }
 0x512   : > { %v895_v17 = vmul.f32 %v877_v13, %v10392_v10 }
 0x514   : > { %v903_v19 = vpack.c.bf16 %v895_v17, %v894_v11 }
 0x516   : > { %7746 = vmatmul.msk.bf16.gmra.mxu1 %vm381_vm1, %v903_v19 }
 0x523   : > { %v941_v16 = vpop.f32.mrf.mxu1 }
 0x524   : > { %v981_v18 = vmul.f32 0.5, %v941_v16 }
 0x526   : > { %v997_v20 = vsel %vm346_vm0, %v981_v18, -inf }
 0x527   : > { %998 = vmax.xlane.f32.xlu2 %v997_v20 }
 0x52b   : > { %v943_v23 = vpop.f32.mrf.mxu1 }
 0x52c   : > { %v982_v24 = vmul.f32 0.5, %v943_v23 }
 0x52e   : > { %v1000_v25 = vsel %vm346_vm0, %v982_v24, -inf }
 0x52f   : > { %1001 = vmax.xlane.f32.xlu0 %v1000_v25 }
 0x533   : > { %v946_v26 = vpop.f32.mrf.mxu1 }
 0x534   : > { %v983_v27 = vmul.f32 0.5, %v946_v26 }
 0x536   : > { %v1003_v31 = vsel %vm346_vm0, %v983_v27, -inf }
 0x537   : > { %1004 = vmax.xlane.f32.xlu1 %v1003_v31 }
 0x53b   : > { %v948_v32 = vpop.f32.mrf.mxu1 }
 0x53c   : > { %v984_v33 = vmul.f32 0.5, %v948_v32 }
 0x53e   : > { %v1006_v34 = vsel %vm346_vm0, %v984_v33, -inf }
 0x53f   : > { %1007 = vmax.xlane.f32.xlu2 %v1006_v34 }
 0x543   : > { %v951_v36 = vpop.f32.mrf.mxu1 }
 0x544   : > { %v985_v39 = vmul.f32 0.5, %v951_v36 }
 0x546   : > { %v1009_v40 = vsel %vm346_vm0, %v985_v39, -inf }
 0x547   : > { %1010 = vmax.xlane.f32.xlu0 %v1009_v40 }
 0x54b   : > { %v953_v41 = vpop.f32.mrf.mxu1 }
 0x54c   : > { %v10402_v42 = vmul.f32 0.5, %v953_v41 }
 0x54e   : > { %v1012_v43 = vsel %vm346_vm0, %v10402_v42, -inf }
 0x54f   : > { %1013 = vmax.xlane.f32.xlu1 %v1012_v43 }
 0x553   : > { %v956_v46 = vpop.f32.mrf.mxu1 }
 0x554   : > { %v10406_v47 = vmul.f32 0.5, %v956_v46 }
 0x556   : > { %v1015_v48 = vsel %vm346_vm0, %v10406_v47, -inf }
 0x557   : > { %1016 = vmax.xlane.f32.xlu2 %v1015_v48 }
 0x55b   : > { %v958_v50 = vpop.f32.mrf.mxu1 }
 0x55c   : > { %v10410_v51 = vmul.f32 0.5, %v958_v50 }
 0x55e   : > { %v1018_v54 = vsel %vm346_vm0, %v10410_v51, -inf }
 0x55f   : > { %1019 = vmax.xlane.f32.xlu0 %v1018_v54 }
 0x563   : > { %v961_v55 = vpop.f32.mrf.mxu1 }
 0x564   : > { %v10414_v56 = vmul.f32 0.5, %v961_v55 }
 0x566   : > { %v1021_v58 = vsel %vm346_vm0, %v10414_v56, -inf }
 0x567   : > { %1022 = vmax.xlane.f32.xlu0 %v1021_v58 }
 0x56b   : > { %v963_v2 = vpop.f32.mrf.mxu1 }
 0x56c   : > { %v10422_v19 = vmul.f32 0.5, %v963_v2 }
 0x573   : > { %v966_v16 = vpop.f32.mrf.mxu1 }
 0x574   : > { %v10430_v32 = vmul.f32 0.5, %v966_v16 }
 0x576   : > { %v1027_v43 = vsel %vm346_vm0, %v10430_v32, -inf }
 0x57b   : > { %v968_v31 = vpop.f32.mrf.mxu1 }
 0x57c   : > { %v10438_v48 = vmul.f32 0.5, %v968_v31 }
 0x583   : > { %v971_v46 = vpop.f32.mrf.mxu1 }
 0x59a   : > { %v999_v59 = vpop.xlane.xlu2 %998 }
 0x59b   : > { %v1045_v1 = vsub.f32 %v981_v18, %v999_v59  ;;  %v1030_v59 = vsel %vm346_vm0, %v10438_v48, -inf }
 0x59d   : > { %v1061_v4 = vmul.f32 1.442695, %v1045_v1  ;;  %v10446_v1 = vmul.f32 0.5, %v971_v46 }
 0x59f   : > { %9509 = vpow2.f32 %v1061_v4  ;;  %v973_v4 = vpop.f32.mrf.mxu1  ;;  %v1033_v16 = vsel %vm346_vm0, %v10446_v1, -inf }
 0x5a2   : > { %v1002_v5 = vpop.xlane.xlu0 %1001 }
 0x5a3   : > { %v1046_v7 = vsub.f32 %v982_v24, %v1002_v5  ;;  %v1024_v24 = vsel %vm346_vm0, %v10422_v19, -inf }
 0x5a5   : > { %v10418_v11 = vpop.eup %9509  ;;  %v1063_v13 = vmul.f32 1.442695, %v1046_v7 }
 0x5a6   : > { %v1093_v17 = vsel %vm346_vm0, %v10418_v11, 0.0 }
 0x5a7   : > { %9511 = vpow2.f32 %v1063_v13  ;;  %1094 = vadd.xlane.f32.xlu1 %v1093_v17  ;;  %v10455_v17 = vmul.f32 0.5, %v973_v4 }
 0x5a9   : > { %v1036_v31 = vsel %vm346_vm0, %v10455_v17, -inf }
 0x5aa   : > { %v1005_v20 = vpop.xlane.xlu1 %1004 }
 0x5ab   : > { %v1047_v23 = vsub.f32 %v983_v27, %v1005_v20 }
 0x5ad   : > { %v10424_v25 = vpop.eup %9511  ;;  %v1065_v18 = vmul.f32 1.442695, %v1047_v23 }
 0x5ae   : > { %v1096_v26 = vsel %vm346_vm0, %v10424_v25, 0.0 }
 0x5af   : > { %9513 = vpow2.f32 %v1065_v18  ;;  %1097 = vadd.xlane.f32.xlu2 %v1096_v26  ;;  %1025 = vmax.xlane.f32.xlu1 %v1024_v24 }
 0x5b2   : > { %v1008_v34 = vpop.xlane.xlu2 %1007 }
 0x5b3   : > { %v1048_v36 = vsub.f32 %v984_v33, %v1008_v34 }
 0x5b5   : > { %v10432_v40 = vpop.eup %9513  ;;  %v1067_v27 = vmul.f32 1.442695, %v1048_v36 }
 0x5b6   : > { %v1099_v41 = vsel %vm346_vm0, %v10432_v40, 0.0 }
 0x5b7   : > { %9515 = vpow2.f32 %v1067_v27  ;;  %1100 = vadd.xlane.f32.xlu2 %v1099_v41  ;;  %1028 = vmax.xlane.f32.xlu1 %v1027_v43 }
 0x5ba   : > { %v1011_v50 = vpop.xlane.xlu0 %1010 }
 0x5bb   : > { %v1049_v54 = vsub.f32 %v985_v39, %v1011_v50 }
 0x5bd   : > { %v10440_v55 = vpop.eup %9515  ;;  %v1069_v33 = vmul.f32 1.442695, %v1049_v54 }
 0x5be   : > { %v1102_v58 = vsel %vm346_vm0, %v10440_v55, 0.0 }
 0x5bf   : > { %9517 = vpow2.f32 %v1069_v33  ;;  %1103 = vadd.xlane.f32.xlu0 %v1102_v58  ;;  %1031 = vmax.xlane.f32.xlu2 %v1030_v59 }
 0x5c2   : > { %v1014_v2 = vpop.xlane.xlu1 %1013 }
 0x5c3   : > { %v1050_v5 = vsub.f32 %v10402_v42, %v1014_v2  ;;  %v976_v42 = vpop.f32.mrf.mxu1 }
 0x5c4   : > { %v10464_v34 = vmul.f32 0.5, %v976_v42 }
 0x5c5   : > { %v10449_v7 = vpop.eup %9517  ;;  %v1071_v39 = vmul.f32 1.442695, %v1050_v5 }
 0x5c6   : > { %v1105_v13 = vsel %vm346_vm0, %v10449_v7, 0.0  ;;  %v1039_v46 = vsel %vm346_vm0, %v10464_v34, -inf }
 0x5c7   : > { %9519 = vpow2.f32 %v1071_v39  ;;  %1106 = vadd.xlane.f32.xlu0 %v1105_v13  ;;  %1034 = vmax.xlane.f32.xlu2 %v1033_v16 }
 0x5ca   : > { %v1017_v20 = vpop.xlane.xlu2 %1016 }
 0x5cb   : > { %v1051_v23 = vsub.f32 %v10406_v47, %v1017_v20  ;;  %v978_v50 = vpop.f32.mrf.mxu1 }
 0x5cc   : > { %v10473_v54 = vmul.f32 0.5, %v978_v50 }
 0x5cd   : > { %v10458_v18 = vpop.eup %9519  ;;  %v1073_v26 = vmul.f32 1.442695, %v1051_v23 }
 0x5ce   : > { %v1108_v24 = vsel %vm346_vm0, %v10458_v18, 0.0  ;;  %v1042_v4 = vsel %vm346_vm0, %v10473_v54, -inf }
 0x5cf   : > { %9521 = vpow2.f32 %v1073_v26  ;;  %1109 = vadd.xlane.f32.xlu1 %v1108_v24  ;;  %1037 = vmax.xlane.f32.xlu0 %v1036_v31 }
 0x5d2   : > { %v1020_v36 = vpop.xlane.xlu0 %1019 }
 0x5d3   : > { %v1052_v27 = vsub.f32 %v10410_v51, %v1020_v36 }
 0x5d5   : > { %v10467_v41 = vpop.eup %9521  ;;  %v1075_v47 = vmul.f32 1.442695, %v1052_v27 }
 0x5d6   : > { %v1111_v43 = vsel %vm346_vm0, %v10467_v41, 0.0 }
 0x5d7   : > { %9523 = vpow2.f32 %v1075_v47  ;;  %1112 = vadd.xlane.f32.xlu1 %v1111_v43  ;;  %1040 = vmax.xlane.f32.xlu0 %v1039_v46 }
 0x5da   : > { %v1023_v33 = vpop.xlane.xlu0 %1022 }
 0x5db   : > { %v1053_v58 = vsub.f32 %v10414_v56, %v1023_v33 }
 0x5dd   : > { %v10476_v59 = vpop.eup %9523  ;;  %v1077_v51 = vmul.f32 1.442695, %v1053_v58 }
 0x5de   : > { %v1114_v2 = vsel %vm346_vm0, %v10476_v59, 0.0 }
 0x5df   : > { %9525 = vpow2.f32 %v1077_v51  ;;  %1115 = vadd.xlane.f32.xlu2 %v1114_v2  ;;  %1043 = vmax.xlane.f32.xlu1 %v1042_v4 }
 0x5e5   : > { %v10482_v5 = vpop.eup %9525 }
 0x5e6   : > { %v1117_v39 = vsel %vm346_vm0, %v10482_v5, 0.0 }
 0x5e7   : > { %1118 = vadd.xlane.f32.xlu2 %v1117_v39 }
 0x61a   : > { %v1095_v13 = vpop.xlane.xlu1 %1094 }
 0x61b   : > { %9527 = vrcp.f32 %v1095_v13 }
 0x621   : > { %v9528_v42 = vpop.eup %9527 }
 0x622   : > { %v1098_v56 = vpop.xlane.xlu2 %1097  ;;  %v1026_v16 = vpop.xlane.xlu1 %1025  ;;  %v1157_v24 = vmul.f32 %v9528_v42, %v10418_v11 }
 0x623   : > { %9529 = vrcp.f32 %v1098_v56  ;;  %v1054_v20 = vsub.f32 %v10422_v19, %v1026_v16 }
 0x625   : > { %v1079_v23 = vmul.f32 1.442695, %v1054_v20 }
 0x627   : > { %9531 = vpow2.f32 %v1079_v23 }
 0x629   : > { %v9530_v26 = vpop.eup %9529 }
 0x62a   : > { %v1158_v31 = vmul.f32 %v9530_v26, %v10424_v25  ;;  %v1101_v36 = vpop.xlane.xlu2 %1100  ;;  %v1029_v27 = vpop.xlane.xlu1 %1028 }
 0x62b   : > { %v1055_v47 = vsub.f32 %v10430_v32, %v1029_v27 }
 0x62c   : > { %v1173_v43 = vpack.c.bf16 %v1158_v31, %v1157_v24 }
 0x62d   : > { %v10490_v46 = vpop.eup %9531  ;;  %v1081_v50 = vmul.f32 1.442695, %v1055_v47 }
 0x62e   : > { %7747 = vmatmul.msk.bf16.vlgmr.msrb.gmra.mxu3 %vm346_vm0, %v1173_v43  ;;  %v1120_v19 = vsel %vm346_vm0, %v10490_v46, 0.0 }
 0x62f   : > { %9533 = vpow2.f32 %v1081_v50  ;;  %1121 = vadd.xlane.f32.xlu0 %v1120_v19 }
 0x630   : > { %9535 = vrcp.f32 %v1101_v36 }
 0x632   : > { %v1104_v33 = vpop.xlane.xlu0 %1103  ;;  %v1032_v11 = vpop.xlane.xlu2 %1031 }
 0x633   : > { %9537 = vrcp.f32 %v1104_v33  ;;  %v1056_v25 = vsub.f32 %v10438_v48, %v1032_v11 }
 0x635   : > { %v10496_v58 = vpop.eup %9533  ;;  %v1083_v32 = vmul.f32 1.442695, %v1056_v25 }
 0x636   : > { %v1123_v51 = vsel %vm346_vm0, %v10496_v58, 0.0  ;;  %v9536_v2 = vpop.eup %9535 }
 0x637   : > { %9539 = vpow2.f32 %v1083_v32  ;;  %1124 = vadd.xlane.f32.xlu1 %v1123_v51  ;;  %v1159_v56 = vmul.f32 %v9536_v2, %v10432_v40 }
 0x639   : > { %v9538_v4 = vpop.eup %9537 }
 0x63a   : > { %v1107_v39 = vpop.xlane.xlu0 %1106  ;;  %v1035_v13 = vpop.xlane.xlu2 %1034  ;;  %v1160_v16 = vmul.f32 %v9538_v4, %v10440_v55 }
 0x63b   : > { %v1057_v20 = vsub.f32 %v10446_v1, %v1035_v13 }
 0x63c   : > { %v1174_v23 = vpack.c.bf16 %v1160_v16, %v1159_v56 }
 0x63d   : > { %v10503_v48 = vpop.eup %9539  ;;  %v1085_v42 = vmul.f32 1.442695, %v1057_v20 }
 0x63e   : > { %7748 = vmatmul.msk.bf16.gmra.mxu3 %vm346_vm0, %v1174_v23  ;;  %v1126_v26 = vsel %vm346_vm0, %v10503_v48, 0.0 }
 0x63f   : > { %9541 = vpow2.f32 %v1085_v42  ;;  %1127 = vadd.xlane.f32.xlu2 %v1126_v26 }
 0x640   : > { %9543 = vrcp.f32 %v1107_v39 }
 0x642   : > { %v1110_v24 = vpop.xlane.xlu1 %1109  ;;  %v1038_v31 = vpop.xlane.xlu0 %1037 }
 0x643   : > { %9545 = vrcp.f32 %v1110_v24  ;;  %v1058_v40 = vsub.f32 %v10455_v17, %v1038_v31 }
 0x645   : > { %v10509_v55 = vpop.eup %9541  ;;  %v1087_v1 = vmul.f32 1.442695, %v1058_v40 }
 0x646   : > { %v1129_v36 = vsel %vm346_vm0, %v10509_v55, 0.0  ;;  %v9544_v27 = vpop.eup %9543 }
 0x647   : > { %9547 = vpow2.f32 %v1087_v1  ;;  %1130 = vadd.xlane.f32.xlu0 %v1129_v36  ;;  %v1161_v19 = vmul.f32 %v9544_v27, %v10449_v7 }
 0x649   : > { %v9546_v47 = vpop.eup %9545 }
 0x64a   : > { %v1113_v43 = vpop.xlane.xlu1 %1112  ;;  %v1041_v50 = vpop.xlane.xlu0 %1040  ;;  %v1162_v33 = vmul.f32 %v9546_v47, %v10458_v18 }
 0x64b   : > { %v1059_v11 = vsub.f32 %v10464_v34, %v1041_v50 }
 0x64c   : > { %v1175_v25 = vpack.c.bf16 %v1162_v33, %v1161_v19 }
 0x64d   : > { %v9548_v17 = vpop.eup %9547  ;;  %v1089_v32 = vmul.f32 1.442695, %v1059_v11 }
 0x64e   : > { %7749 = vmatmul.msk.bf16.gmra.mxu3 %vm346_vm0, %v1175_v25  ;;  %v1132_v51 = vsel %vm346_vm0, %v9548_v17, 0.0 }
 0x64f   : > { %9549 = vpow2.f32 %v1089_v32  ;;  %1133 = vadd.xlane.f32.xlu1 %v1132_v51 }
 0x650   : > { %9551 = vrcp.f32 %v1113_v43 }
 0x652   : > { %v1116_v2 = vpop.xlane.xlu2 %1115  ;;  %v1044_v4 = vpop.xlane.xlu1 %1043 }
 0x653   : > { %9553 = vrcp.f32 %v1116_v2  ;;  %v1060_v39 = vsub.f32 %v10473_v54, %v1044_v4 }
 0x655   : > { %v9550_v7 = vpop.eup %9549  ;;  %v1091_v13 = vmul.f32 1.442695, %v1060_v39 }
 0x656   : > { %v1135_v18 = vsel %vm346_vm0, %v9550_v7, 0.0  ;;  %v9552_v34 = vpop.eup %9551 }
 0x657   : > { %9555 = vpow2.f32 %v1091_v13  ;;  %1136 = vadd.xlane.f32.xlu2 %v1135_v18  ;;  %v1163_v16 = vmul.f32 %v9552_v34, %v10467_v41 }
 0x659   : > { %v9554_v56 = vpop.eup %9553 }
 0x65a   : > { %v1164_v20 = vmul.f32 %v9554_v56, %v10476_v59  ;;  %v1119_v54 = vpop.xlane.xlu2 %1118 }
 0x65b   : > { %9557 = vrcp.f32 %v1119_v54 }
 0x65c   : > { %v1176_v23 = vpack.c.bf16 %v1164_v20, %v1163_v16 }
 0x65d   : > { %v9556_v42 = vpop.eup %9555 }
 0x65e   : > { %7750 = vmatmul.msk.bf16.gmra.mxu3 %vm346_vm0, %v1176_v23  ;;  %v1138_v26 = vsel %vm346_vm0, %v9556_v42, 0.0 }
 0x65f   : > { %1139 = vadd.xlane.f32.xlu0 %v1138_v26 }
 0x661   : > { %v9558_v31 = vpop.eup %9557 }
 0x662   : > { %v1165_v1 = vmul.f32 %v9558_v31, %v10482_v5 }
 0x6a2   : > { %v1122_v24 = vpop.xlane.xlu0 %1121 }
 0x6a3   : > { %9559 = vrcp.f32 %v1122_v24 }
 0x6a9   : > { %v9560_v40 = vpop.eup %9559 }
 0x6aa   : > { %v1166_v36 = vmul.f32 %v9560_v40, %v10490_v46  ;;  %v1125_v27 = vpop.xlane.xlu1 %1124 }
 0x6ab   : > { %9561 = vrcp.f32 %v1125_v27 }
 0x6ac   : > { %v1177_v41 = vpack.c.bf16 %v1166_v36, %v1165_v1 }
 0x6ae   : > { %7751 = vmatmul.msk.bf16.gmra.mxu3 %vm346_vm0, %v1177_v41 }
 0x6b1   : > { %v9562_v47 = vpop.eup %9561  ;;  %v1215_v56 = vpop.f32.mrf.mxu3 }
 0x6b2   : > { %v1128_v59 = vpop.xlane.xlu2 %1127  ;;  %v1167_v50 = vmul.f32 %v9562_v47, %v10496_v58 }
 0x6b3   : > { %9563 = vrcp.f32 %v1128_v59 }
 0x6b9   : > { %v9564_v43 = vpop.eup %9563  ;;  %v1217_v16 = vpop.f32.mrf.mxu3 }
 0x6ba   : > { %v1168_v19 = vmul.f32 %v9564_v43, %v10503_v48  ;;  %v1131_v11 = vpop.xlane.xlu0 %1130 }
 0x6bb   : > { %9565 = vrcp.f32 %v1131_v11 }
 0x6bc   : > { %v1178_v33 = vpack.c.bf16 %v1168_v19, %v1167_v50 }
 0x6be   : > { %7752 = vmatmul.msk.bf16.gmra.mxu3 %vm346_vm0, %v1178_v33 }
 0x6c1   : > { %v9566_v46 = vpop.eup %9565  ;;  %v1220_v20 = vpop.f32.mrf.mxu3 }
 0x6c2   : > { %v1134_v5 = vpop.xlane.xlu1 %1133  ;;  %v1169_v32 = vmul.f32 %v9566_v46, %v10509_v55 }
 0x6c3   : > { %9567 = vrcp.f32 %v1134_v5 }
 0x6c9   : > { %v9568_v25 = vpop.eup %9567  ;;  %v1222_v23 = vpop.f32.mrf.mxu3 }
 0x6ca   : > { %v1170_v51 = vmul.f32 %v9568_v25, %v9548_v17  ;;  %v1137_v4 = vpop.xlane.xlu2 %1136 }
 0x6cb   : > { %9569 = vrcp.f32 %v1137_v4  ;;  %v9101_v4 = vld [vmem:[#allocation5 + $0x114] sm:$0xf0] }
 0x6cc   : > { %v1179_v2 = vpack.c.bf16 %v1170_v51, %v1169_v32 }
 0x6ce   : > { %7753 = vmatmul.msk.bf16.gmra.mxu3 %vm346_vm0, %v1179_v2 }
 0x6d1   : > { %v9570_v48 = vpop.eup %9569  ;;  %v1225_v55 = vpop.f32.mrf.mxu3 }
 0x6d2   : > { %v1140_v58 = vpop.xlane.xlu0 %1139  ;;  %v1171_v13 = vmul.f32 %v9570_v48, %v9550_v7 }
 0x6d3   : > { %9571 = vrcp.f32 %v1140_v58 }
 0x6d9   : > { %v9572_v39 = vpop.eup %9571  ;;  %v1227_v17 = vpop.f32.mrf.mxu3 }
 0x6da   : > { %v1172_v18 = vmul.f32 %v9572_v39, %v9556_v42  ;;  %v9108_v39 = vld [vmem:[#allocation5 + $0x184] sm:$0xf0] }
 0x6dc   : > { %v1180_v34 = vpack.c.bf16 %v1172_v18, %v1171_v13 }
 0x6de   : > { %7754 = vmatmul.msk.bf16.gmra.mxu3 %vm346_vm0, %v1180_v34 }
 0x6e1   : > { %v1230_v26 = vpop.f32.mrf.mxu3 }
 0x6e9   : > { %v1232_v54 = vpop.f32.mrf.mxu3 }
 0x731   : > { %v1235_v24 = vpop.f32.mrf.mxu3 }
 0x732   : > { %v1263_v25 = vmul.f32 %v1235_v24, %v10369_v44  ;;  %v1256_v44 = vmul.f32 %v1217_v16, %v10343_v15 }
 0x739   : > { %v1237_v31 = vpop.f32.mrf.mxu3 }
 0x73a   : > { %v1264_v5 = vmul.f32 %v1237_v31, %v10371_v45  ;;  %v1257_v45 = vmul.f32 %v1220_v20, %v10348_v21  ;;  %v7761_v21 = vld [vmem:[#allocation5 + $0x180] sm:$0xf] }
 0x73b   : > { %v7762_v13 = vor.u32 %v9108_v39, %v7761_v21  ;;  %v1339_v39 = vld [vmem:[#allocation7 + $0x1a0] ss:$0 sm:$0xff] }
 0x741   : > { %v1240_v40 = vpop.f32.mrf.mxu3 }
 0x742   : > { %v1265_v11 = vmul.f32 %v1240_v40, %v10376_v52  ;;  %v1258_v52 = vmul.f32 %v1222_v23, %v10350_v22  ;;  %v9109_v22 = vld [vmem:[#allocation5 + $0x194] sm:$0xf0] }
 0x744   : > { %v1272_v2 = vpack.c.bf16 %v1258_v52, %v1257_v45 }
 0x749   : > { %v1242_v1 = vpop.f32.mrf.mxu3 }
 0x74a   : > { %v1266_v19 = vmul.f32 %v1242_v1, %v10378_v53  ;;  %v1259_v53 = vmul.f32 %v1225_v55, %v10355_v28  ;;  %v7765_v28 = vld [vmem:[#allocation5 + $0x190] sm:$0xf] }
 0x74b   : > { %v7766_v48 = vor.u32 %v9109_v22, %v7765_v28 }
 0x74c   : > { %v1276_v46 = vpack.c.bf16 %v1266_v19, %v1265_v11  ;;  %v7770_v19 = vld [vmem:[#allocation5 + $0x1a0] sm:$0xf] }
 0x751   : > { %v1245_v36 = vpop.f32.mrf.mxu3 }
 0x752   : > { %v1267_v50 = vmul.f32 %v1245_v36, %v10383_v62  ;;  %v1260_v62 = vmul.f32 %v1227_v17, %v10357_v30 }
 0x754   : > { %v1273_v51 = vpack.c.bf16 %v1260_v62, %v1259_v53 }
 0x759   : > { %v1247_v41 = vpop.f32.mrf.mxu3 }
 0x75a   : > { %v1268_v47 = vmul.f32 %v1247_v41, %v10385_v63  ;;  %v1261_v63 = vmul.f32 %v1230_v26, %v10362_v37  ;;  %v7757_v37 = vld [vmem:[#allocation5 + $0x110] sm:$0xf] }
 0x75b   : > { %v10549_v30 = vor.u32 %v9101_v4, %v7757_v37 }
 0x75c   : > { %v1277_v33 = vpack.c.bf16 %v1268_v47, %v1267_v50 }
 0x761   : > { %v1250_v27 = vpop.f32.mrf.mxu3 }
 0x762   : > { %v1269_v42 = vmul.f32 %v1250_v27, %v10390_v8  ;;  %v1262_v8 = vmul.f32 %v1232_v54, %v10364_v38  ;;  %v1255_v38 = vmul.f32 %v1215_v56, %v10341_v14  ;;  %v1335_v56 = vld [vmem:[#allocation7 + $0x180] ss:$0 sm:$0xff] }
 0x764   : > { %v1274_v32 = vpack.c.bf16 %v1262_v8, %v1261_v63  ;;  %v1271_v58 = vpack.c.bf16 %v1256_v44, %v1255_v38 }
 0x769   : > { %v1252_v7 = vpop.f32.mrf.mxu3 }
 0x76a   : > { %v1270_v59 = vmul.f32 %v1252_v7, %v10392_v10  ;;  %v1275_v10 = vpack.c.bf16 %v1264_v5, %v1263_v25 }
 0x76c   : > { %v1278_v43 = vpack.c.bf16 %v1270_v59, %v1269_v42  ;;  %v7774_v42 = vld [vmem:[#allocation5 + $0x1b0] sm:$0xf]  ;;  %v9111_v59 = vld [vmem:[#allocation5 + $0x1b4] sm:$0xf0] }
 0x76d   : > { %v7775_v47 = vor.u32 %v9111_v59, %v7774_v42 }
 0x76e   : > { %1285 = vmatpush.bf16.msrb.mxu0 %v1278_v43 }
 0x772   : > { %1286 = vmatpush.bf16.msrb.mxu0 %v1277_v33  ;;  %v9110_v33 = vld [vmem:[#allocation5 + $0x1a4] sm:$0xf0] }
 0x773   : > { %v7771_v5 = vor.u32 %v9110_v33, %v7770_v19 }
 0x776   : > { %1287 = vmatpush.bf16.msrb.mxu0 %v1276_v46 }
 0x77a   : > { %1288 = vmatpush.bf16.msrb.mxu0 %v1275_v10 }
 0x77e   : > { %1289 = vmatpush.bf16.msrb.mxu0 %v1274_v32 }
 0x782   : > { %1290 = vmatpush.bf16.msrb.mxu0 %v1273_v51 }
 0x786   : > { %1291 = vmatpush.bf16.msrb.mxu0 %v1272_v2 }
 0x78a   : > { %1292 = vmatpush.bf16.msrb.mxu0 %v1271_v58  ;;  %v1338_v58 = vld [vmem:[#allocation7 + $0x190] ss:$0 sm:$0xff] }
 0x78d   : > { %1293 = vmatmul.bf16.vlgmr.msrb.gmra.mxu0 %v10549_v30 }
 0x78e   : > { %1325 = vmatpush.bf16.msra.mxu0 %v7766_v48 }
 0x792   : > { %1326 = vmatpush.bf16.msra.mxu0 %v7762_v13 }
 0x796   : > { %1415 = vmatpush.bf16.msrb.mxu0 %v7775_v47 }
 0x79a   : > { %1416 = vmatpush.bf16.msrb.mxu0 %v7771_v5 }
 0x80a   : > { %v1294_v15 = vpop.f32.mrf.mxu0 }
 0x812   : > { %v1296_v18 = vpop.f32.mrf.mxu0 }
 0x813   : > { %v1299_v14 = vpack.c.bf16 %v1296_v18, %v1294_v15 }
 0x815   : > { %7767 = vmatmul.msk.bf16.vlgmr.msra.gmra.mxu0 %vm381_vm1, %v1299_v14 }
 0x892   : > { %v1328_v34 = vpop.f32.mrf.mxu0 }
 0x893   : > { %v1333_v16 = vadd.f32 %v1328_v34, %v10289_v29  ;;  %v7791_v34 = vld [vmem:[#allocation5 + $0x1f0] sm:$0xf] }
 0x895   : > { %v10554_v20 = vadd.f32 %v1335_v56, %v1333_v16  ;;  %v7787_v16 = vld [vmem:[#allocation5 + $0x1e0] sm:$0xf] }
 0x897   : > { %v1340_v23 = vsel %vm381_vm1, %v10554_v20, 0.0 }
 0x898   : > { %1341 = vadd.xlane.f32.xlu1 %v1340_v23 }
 0x89a   : > { %v1330_v55 = vpop.f32.mrf.mxu0 }
 0x89b   : > { %v1334_v17 = vadd.f32 %v1330_v55, %v10293_v35  ;;  %v9114_v55 = vld [vmem:[#allocation5 + $0x1e4] sm:$0xf0] }
 0x89d   : > { %v10559_v26 = vadd.f32 %v1335_v56, %v1334_v17  ;;  %v9115_v56 = vld [vmem:[#allocation5 + $0x1f4] sm:$0xf0]  ;;  %v7788_v17 = vor.u32 %v9114_v55, %v7787_v16 }
 0x89e   : > { %v7792_v23 = vor.u32 %v9115_v56, %v7791_v34 }
 0x89f   : > { %v1343_v54 = vsel %vm381_vm1, %v10559_v26, 0.0 }
 0x8a0   : > { %1344 = vadd.xlane.f32.xlu2 %v1343_v54  ;;  %1513 = vmatpush.bf16.msra.mxu0 %v7792_v23  ;;  %v7783_v54 = vld [vmem:[#allocation5 + $0x1d0] sm:$0xf] }
 0x8a4   : > { %1514 = vmatpush.bf16.msra.mxu0 %v7788_v17 }
 0x90b   : > { %v1342_v24 = vpop.xlane.xlu1 %1341 }
 0x90c   : > { %v1346_v31 = vmul.f32 %v1342_v24, %v10281_v60  ;;  %v9113_v24 = vld [vmem:[#allocation5 + $0x1d4] sm:$0xf0] }
 0x90e   : > { %v1348_v29 = vsub.f32 %v10554_v20, %v1346_v31  ;;  %v7784_v31 = vor.u32 %v9113_v24, %v7783_v54 }
 0x910   : > { %v1350_v40 = vmul.f32 %v1348_v29, %v1348_v29  ;;  %1515 = vmatpush.bf16.msra.mxu0 %v7784_v31 }
 0x912   : > { %v1352_v1 = vsel %vm381_vm1, %v1350_v40, 0.0  ;;  %v9112_v40 = vld [vmem:[#allocation5 + $0x1c4] sm:$0xf0] }
 0x913   : > { %1353 = vadd.xlane.f32.xlu0 %v1352_v1  ;;  %v1345_v36 = vpop.xlane.xlu2 %1344  ;;  %v612_v1 = vlaneseq }
 0x914   : > { %v1347_v41 = vmul.f32 %v1345_v36, %v10281_v60 }
 0x916   : > { %v1349_v35 = vsub.f32 %v10559_v26, %v1347_v41 }
 0x918   : > { %v1351_v27 = vmul.f32 %v1349_v35, %v1349_v35 }
 0x91a   : > { %v1355_v7 = vsel %vm381_vm1, %v1351_v27, 0.0  ;;  %v1393_v27 = vld [vmem:[#allocation7 + $0x1b0] ss:$0 sm:$0xff] }
 0x91b   : > { %1356 = vadd.xlane.f32.xlu1 %v1355_v7  ;;  %v1437_v7 = vld [vmem:[#allocation7 + $0x1c0] sm:$0x7] }
 0x91c   : > { %v1446_v19 = vperm.slane %v1437_v7, 2 }
 0x986   : > { %v1354_v43 = vpop.xlane.xlu0 %1353 }
 0x987   : > { %v1358_v50 = vmul.f32 %v1354_v43, %v10281_v60  ;;  %v1438_v43 = vperm.slane %v1437_v7, 0 }
 0x989   : > { %v1360_v11 = vadd.f32 1e-05, %v1358_v50  ;;  %v1441_v50 = vperm.slane %v1437_v7, 1  ;;  %v1525_v7 = vld [vmem:[#allocation7 + $0x1e0] ss:$0 sm:$0xff] }
 0x98b   : > { %9573 = vrsqrt.f32 %v1360_v11  ;;  %vm1368_vm2 = vweird.f32 %v1360_v11 }
 0x98e   : > { %v1357_v46 = vpop.xlane.xlu1 %1356 }
 0x98f   : > { %v1359_v25 = vmul.f32 %v1357_v46, %v10281_v60 }
 0x991   : > { %v9574_v8 = vpop.eup %9573  ;;  %v1361_v10 = vadd.f32 1e-05, %v1359_v25 }
 0x992   : > { %v1363_v63 = vmul.f32 %v9574_v8, %v1360_v11  ;;  %vm1369_vm15 = vweird.f32 %v9574_v8 }
 0x993   : > { %9575 = vrsqrt.f32 %v1361_v10  ;;  %vm1370_vm3 = vmor %vm1368_vm2, %vm1369_vm15  ;;  %vm1378_vm5 = vweird.f32 %v1361_v10 }
 0x994   : > { %v1364_v62 = vmul.f32 %v9574_v8, %v1363_v63 }
 0x996   : > { %v1365_v32 = vmul.f32 0.5, %v1364_v62 }
 0x998   : > { %v1366_v53 = vsub.f32 1.5, %v1365_v32 }
 0x999   : > { %v9576_v52 = vpop.eup %9575 }
 0x99a   : > { %v1367_v51 = vmul.f32 %v9574_v8, %v1366_v53  ;;  %v1373_v45 = vmul.f32 %v9576_v52, %v1361_v10  ;;  %vm1379_vm4 = vweird.f32 %v9576_v52 }
 0x99b   : > { %vm1380_vm6 = vmor %vm1378_vm5, %vm1379_vm4 }
 0x99c   : > { %v1374_v44 = vmul.f32 %v9576_v52, %v1373_v45  ;;  %v1371_v2 = vsel %vm1370_vm3, %v9574_v8, %v1367_v51 }
 0x99d   : > { %v1382_v4 = vmul.f32 %v1371_v2, %v1348_v29  ;;  %v7779_v29 = vld [vmem:[#allocation5 + $0x1c0] sm:$0xf] }
 0x99e   : > { %v1375_v38 = vmul.f32 0.5, %v1374_v44  ;;  %v7780_v41 = vor.u32 %v9112_v40, %v7779_v29 }
 0x99f   : > { %v1384_v48 = vmul.f32 %v1382_v4, %v1338_v58 }
 0x9a0   : > { %v1376_v37 = vsub.f32 1.5, %v1375_v38  ;;  %1516 = vmatpush.bf16.msra.mxu0 %v7780_v41 }
 0x9a1   : > { %v1386_v15 = vadd.f32 %v1384_v48, %v1339_v39 }
 0x9a2   : > { %v1377_v28 = vmul.f32 %v9576_v52, %v1376_v37 }
 0x9a4   : > { %v1381_v22 = vsel %vm1380_vm6, %v9576_v52, %v1377_v28 }
 0x9a5   : > { %v1383_v21 = vmul.f32 %v1381_v22, %v1349_v35  ;;  %v10572_v35 = vshrl.u32 %v612_v1, 7 }
 0x9a7   : > { %v1385_v13 = vmul.f32 %v1383_v21, %v1338_v58  ;;  %v10575_v42 = vadd.s32 8, %v10572_v35  ;;  %vm615_vm7 = vcmp.eq.s32.totalorder %v10572_v35, 0  ;;  %vm1425_vm9 = vcmp.lt.s32.totalorder %v10572_v35, 1  ;;  %v1451_v58 = vld [vmem:[#allocation7 + $0x1d0] ss:$0 sm:$0xff] }
 0x9a8   : > { %vm1432_vm10 = vcmp.lt.s32.totalorder %v10572_v35, 7 }
 0x9a9   : > { %v1387_v18 = vadd.f32 %v1385_v13, %v1339_v39  ;;  %vm618_vm8 = vcmp.eq.s32.totalorder %v10575_v42, 15 }
 0x9ab   : > { %v1388_v14 = vpack.c.bf16 %v1387_v18, %v1386_v15 }
 0x9ad   : > { %7776 = vmatmul.msk.bf16.vlgmr.msrb.gmra.mxu0 %vm381_vm1, %v1388_v14 }
 0xa2a   : > { %v1418_v36 = vpop.f32.mrf.mxu0 }
 0xa2b   : > { %v1419_v59 = vadd.f32 %v1418_v36, %v1393_v27 }
 0xa2d   : > { %v1423_v11 = vrot.slane %v1419_v59, 7  ;;  %v1430_v5 = vrot.slane %v1419_v59, 1  ;;  %v1442_v45 = vmul.f32 %v1441_v50, %v1419_v59 }
 0xa32   : > { %v1420_v47 = vpop.f32.mrf.mxu0 }
 0xa33   : > { %v1421_v33 = vadd.f32 %v1420_v47, %v1393_v27 }
 0xa35   : > { %v1424_v46 = vrot.slane %v1421_v33, 7  ;;  %v1431_v25 = vrot.slane %v1421_v33, 1  ;;  %v1443_v62 = vmul.f32 %v1441_v50, %v1421_v33 }
 0xa37   : > { %v1426_v8 = vsel %vm1425_vm9, %v1423_v11, %v1424_v46  ;;  %v1427_v10 = vsel %vm1425_vm9, %v1424_v46, %v1423_v11  ;;  %v1434_v63 = vsel %vm1432_vm10, %v1431_v25, %v1430_v5  ;;  %v1433_v53 = vsel %vm1432_vm10, %v1430_v5, %v1431_v25 }
 0xa38   : > { %v1428_v32 = vsel %vm615_vm7, 0.0, %v1427_v10  ;;  %v1436_v52 = vsel %vm618_vm8, 0.0, %v1434_v63  ;;  %v1440_v51 = vmul.f32 %v1438_v43, %v1426_v8  ;;  %v1447_v4 = vmul.f32 %v1446_v19, %v1433_v53  ;;  %v7800_v53 = vld [vmem:[#allocation5 + $0x210] sm:$0xf] }
 0xa39   : > { %v1439_v44 = vmul.f32 %v1438_v43, %v1428_v32  ;;  %v1448_v2 = vmul.f32 %v1446_v19, %v1436_v52  ;;  %v9117_v52 = vld [vmem:[#allocation5 + $0x214] sm:$0xf0] }
 0xa3a   : > { %v1445_v38 = vadd.f32 %v1443_v62, %v1440_v51  ;;  %v7801_v51 = vor.u32 %v9117_v52, %v7800_v53 }
 0xa3b   : > { %v1444_v37 = vadd.f32 %v1442_v45, %v1439_v44 }
 0xa3c   : > { %v1450_v28 = vadd.f32 %v1448_v2, %v1445_v38  ;;  %1605 = vmatpush.bf16.msrb.mxu0 %v7801_v51  ;;  %v7796_v2 = vld [vmem:[#allocation5 + $0x200] sm:$0xf]  ;;  %v9116_v38 = vld [vmem:[#allocation5 + $0x204] sm:$0xf0] }
 0xa3d   : > { %v1449_v22 = vadd.f32 %v1447_v4, %v1444_v37  ;;  %v7797_v4 = vor.u32 %v9116_v38, %v7796_v2 }
 0xa3e   : > { %v1453_v48 = vadd.f32 %v1451_v58, %v1450_v28  ;;  %v9119_v28 = vld [vmem:[#allocation5 + $0x234] sm:$0xf0] }
 0xa3f   : > { %v1452_v21 = vadd.f32 %v1451_v58, %v1449_v22  ;;  %v7809_v58 = vld [vmem:[#allocation5 + $0x230] sm:$0xf]  ;;  %v7805_v22 = vld [vmem:[#allocation5 + $0x220] sm:$0xf] }
 0xa40   : > { %v1457_v39 = vmul.f32 0.044715, %v1453_v48  ;;  %v1455_v24 = vmul.f32 0.5, %v1453_v48  ;;  %1606 = vmatpush.bf16.msrb.mxu0 %v7797_v4 }
 0xa41   : > { %v1456_v13 = vmul.f32 0.044715, %v1452_v21  ;;  %v1454_v29 = vmul.f32 0.5, %v1452_v21 }
 0xa42   : > { %v1459_v15 = vmul.f32 %v1457_v39, %v1453_v48  ;;  %v9118_v39 = vld [vmem:[#allocation5 + $0x224] sm:$0xf0] }
 0xa43   : > { %v1458_v18 = vmul.f32 %v1456_v13, %v1452_v21 }
 0xa44   : > { %v1461_v14 = vmul.f32 %v1459_v15, %v1453_v48  ;;  %v7806_v15 = vor.u32 %v9118_v39, %v7805_v22  ;;  %v1648_v22 = vld [vmem:[#allocation7 + $0x230] ss:$0 sm:$0xff] }
 0xa45   : > { %v1460_v34 = vmul.f32 %v1458_v18, %v1452_v21 }
 0xa46   : > { %v1463_v56 = vadd.f32 %v1461_v14, %v1453_v48 }
 0xa47   : > { %v1462_v16 = vadd.f32 %v1460_v34, %v1452_v21  ;;  %v7810_v21 = vor.u32 %v9119_v28, %v7809_v58 }
 0xa48   : > { %v1465_v23 = vmul.f32 0.7978846, %v1463_v56 }
 0xa49   : > { %v1464_v55 = vmul.f32 0.7978846, %v1462_v16 }
 0xa4a   : > { %9577 = vtanh.f32 %v1465_v23 }
 0xa4b   : > { %9579 = vtanh.f32 %v1464_v55 }
 0xa50   : > { %v9578_v17 = vpop.eup %9577 }
 0xa51   : > { %v9580_v54 = vpop.eup %9579  ;;  %v1469_v31 = vadd.f32 1.0, %v9578_v17 }
 0xa52   : > { %v1468_v40 = vadd.f32 1.0, %v9580_v54 }
 0xa53   : > { %v1471_v1 = vmul.f32 %v1469_v31, %v1455_v24 }
 0xa54   : > { %v1470_v36 = vmul.f32 %v1468_v40, %v1454_v29 }
 0xa56   : > { %v1472_v41 = vpack.c.bf16 %v1471_v1, %v1470_v36  ;;  %v1528_v36 = vld [vmem:[#allocation7 + $0x1f0] ss:$0 sm:$0xff] }
 0xa58   : > { %7793 = vmatmul.msk.bf16.vlgmr.msra.gmra.mxu0 %vm1505_vm11, %v1472_v41 }
 0xa59   : > { %1636 = vmatpush.bf16.msra.mxu0 %v7810_v21 }
 0xa5d   : > { %1637 = vmatpush.bf16.msra.mxu0 %v7806_v15  ;;  %v10632_v15 = vld [vmem:[#allocation7] sm:$0xff] }
 0xad5   : > { %v1518_v27 = vpop.f32.mrf.mxu0 }
 0xad6   : > { %v1523_v59 = vadd.f32 %v1518_v27, %v10554_v20 }
 0xad8   : > { %v10595_v47 = vadd.f32 %v1525_v7, %v1523_v59 }
 0xada   : > { %v1530_v43 = vsel %vm381_vm1, %v10595_v47, 0.0 }
 0xadb   : > { %1531 = vadd.xlane.f32.xlu2 %v1530_v43  ;;  %v1529_v43 = vld [vmem:[#allocation7 + $0x200] ss:$0 sm:$0xff] }
 0xadd   : > { %v1520_v50 = vpop.f32.mrf.mxu0 }
 0xade   : > { %v1524_v19 = vadd.f32 %v1520_v50, %v10559_v26 }
 0xae0   : > { %v10600_v33 = vadd.f32 %v1525_v7, %v1524_v19  ;;  %v7818_v19 = vld [vmem:[#allocation5 + $0x250] sm:$0xf] }
 0xae2   : > { %v1533_v11 = vsel %vm381_vm1, %v10600_v33, 0.0 }
 0xae3   : > { %1534 = vadd.xlane.f32.xlu0 %v1533_v11  ;;  %v9121_v11 = vld [vmem:[#allocation5 + $0x254] sm:$0xf0] }
 0xb4e   : > { %v1532_v5 = vpop.xlane.xlu2 %1531 }
 0xb4f   : > { %v1536_v46 = vmul.f32 %v1532_v5, %v10281_v60 }
 0xb51   : > { %v1538_v20 = vsub.f32 %v10595_v47, %v1536_v46 }
 0xb53   : > { %v1540_v25 = vmul.f32 %v1538_v20, %v1538_v20 }
 0xb55   : > { %v1542_v8 = vsel %vm381_vm1, %v1540_v25, 0.0  ;;  %v7819_v25 = vor.u32 %v9121_v11, %v7818_v19 }
 0xb56   : > { %1543 = vadd.xlane.f32.xlu1 %v1542_v8  ;;  %v1535_v10 = vpop.xlane.xlu0 %1534 }
 0xb57   : > { %v1537_v63 = vmul.f32 %v1535_v10, %v10281_v60  ;;  %v7814_v10 = vld [vmem:[#allocation5 + $0x240] sm:$0xf] }
 0xb59   : > { %v1539_v26 = vsub.f32 %v10600_v33, %v1537_v63  ;;  %v9120_v63 = vld [vmem:[#allocation5 + $0x244] sm:$0xf0] }
 0xb5b   : > { %v1541_v62 = vmul.f32 %v1539_v26, %v1539_v26 }
 0xb5d   : > { %v1545_v32 = vsel %vm381_vm1, %v1541_v62, 0.0  ;;  %v1583_v62 = vld [vmem:[#allocation7 + $0x210] ss:$0 sm:$0xff] }
 0xb5e   : > { %1546 = vadd.xlane.f32.xlu2 %v1545_v32 }
 0xbc9   : > { %v1544_v45 = vpop.xlane.xlu1 %1543 }
 0xbca   : > { %v1548_v44 = vmul.f32 %v1544_v45, %v10281_v60 }
 0xbcc   : > { %v1550_v37 = vadd.f32 1e-05, %v1548_v44  ;;  %v1617_v44 = vld [vmem:[#allocation7 + $0x220] ss:$0 sm:$0xff] }
 0xbce   : > { %9581 = vrsqrt.f32 %v1550_v37  ;;  %vm1558_vm13 = vweird.f32 %v1550_v37 }
 0xbd1   : > { %v1547_v48 = vpop.xlane.xlu2 %1546 }
 0xbd2   : > { %v1549_v13 = vmul.f32 %v1547_v48, %v10281_v60 }
 0xbd4   : > { %v9582_v18 = vpop.eup %9581  ;;  %v1551_v14 = vadd.f32 1e-05, %v1549_v13 }
 0xbd5   : > { %v1553_v34 = vmul.f32 %v9582_v18, %v1550_v37  ;;  %vm1559_vm12 = vweird.f32 %v9582_v18 }
 0xbd6   : > { %9583 = vrsqrt.f32 %v1551_v14  ;;  %vm1560_vm14 = vmor %vm1558_vm13, %vm1559_vm12  ;;  %vm1568_vm2 = vweird.f32 %v1551_v14 }
 0xbd7   : > { %v1554_v56 = vmul.f32 %v9582_v18, %v1553_v34  ;;  %v10639_v34 = vld [vmem:[#allocation7 + $0x20] sm:$0xff] }
 0xbd9   : > { %v1555_v16 = vmul.f32 0.5, %v1554_v56 }
 0xbdb   : > { %v1556_v23 = vsub.f32 1.5, %v1555_v16 }
 0xbdc   : > { %v9584_v55 = vpop.eup %9583 }
 0xbdd   : > { %v1557_v17 = vmul.f32 %v9582_v18, %v1556_v23  ;;  %v1563_v54 = vmul.f32 %v9584_v55, %v1551_v14  ;;  %vm1569_vm15 = vweird.f32 %v9584_v55 }
 0xbde   : > { %vm1570_vm3 = vmor %vm1568_vm2, %vm1569_vm15 }
 0xbdf   : > { %v1564_v24 = vmul.f32 %v9584_v55, %v1563_v54  ;;  %v1561_v31 = vsel %vm1560_vm14, %v9582_v18, %v1557_v17  ;;  %v10635_v18 = vld [vmem:[#allocation7 + $0x10] sm:$0xff]  ;;  %v10646_v17 = vld [vmem:[#allocation7 + $0x40] sm:$0xff] }
 0xbe0   : > { %v1572_v1 = vmul.f32 %v1561_v31, %v1538_v20  ;;  %v7815_v20 = vor.u32 %v9120_v63, %v7814_v10  ;;  %v10667_v63 = vld [vmem:[#allocation7 + $0xa0] sm:$0xff] }
 0xbe1   : > { %v1565_v29 = vmul.f32 0.5, %v1564_v24  ;;  %v10649_v24 = vld [vmem:[#allocation7 + $0x50] sm:$0xff] }
 0xbe2   : > { %v1574_v7 = vmul.f32 %v1572_v1, %v1528_v36 }
 0xbe3   : > { %v1566_v40 = vsub.f32 1.5, %v1565_v29 }
 0xbe4   : > { %v1576_v5 = vadd.f32 %v1574_v7, %v1529_v43 }
 0xbe5   : > { %v1567_v41 = vmul.f32 %v9584_v55, %v1566_v40 }
 0xbe7   : > { %v1571_v27 = vsel %vm1570_vm3, %v9584_v55, %v1567_v41 }
 0xbe8   : > { %v1573_v59 = vmul.f32 %v1571_v27, %v1539_v26  ;;  %v10656_v27 = vld [vmem:[#allocation7 + $0x70] sm:$0xff] }
 0xbea   : > { %v1575_v50 = vmul.f32 %v1573_v59, %v1528_v36  ;;  %v10653_v36 = vld [vmem:[#allocation7 + $0x60] sm:$0xff] }
 0xbec   : > { %v1577_v46 = vadd.f32 %v1575_v50, %v1529_v43  ;;  %v10660_v50 = vld [vmem:[#allocation7 + $0x80] sm:$0xff] }
 0xbee   : > { %v1578_v8 = vpack.c.bf16 %v1577_v46, %v1576_v5  ;;  %v10663_v5 = vld [vmem:[#allocation7 + $0x90] sm:$0xff] }
 0xbf0   : > { %7802 = vmatmul.msk.bf16.vlgmr.msrb.gmra.mxu0 %vm381_vm1, %v1578_v8 }
 0xbf1   : > { %1667 = vmatpush.bf16.msrb.mxu0 %v7819_v25 }
 0xbf5   : > { %1668 = vmatpush.bf16.msrb.mxu0 %v7815_v20 }
 0xc00   : > { %7811 = vmatmul.msk.bf16.vlgmr.msra.gmra.mxu0 %vm381_vm1, %v1578_v8 }
 0xc10   : > { %7820 = vmatmul.msk.bf16.vlgmr.msrb.gmra.mxu0 %vm381_vm1, %v1578_v8 }
 0xc6d   : > { %v1608_v26 = vpop.f32.mrf.mxu0 }
 0xc6e   : > { %v1609_v53 = vadd.f32 %v1608_v26, %v1583_v62  ;;  %v10670_v26 = vld [vmem:[#allocation7 + $0xb0] sm:$0xff] }
 0xc75   : > { %v1610_v32 = vpop.f32.mrf.mxu0 }
 0xc76   : > { %v1611_v52 = vadd.f32 %v1610_v32, %v1583_v62 }
 0xc78   : > { %v1675_v51 = vpack.c.bf16 %v1611_v52, %v1609_v53 }
 0xc7a   : > { %1683 = vmatpush.bf16.msrb.mxu2 %v1675_v51  ;;  %v10674_v51 = vld [vmem:[#allocation7 + $0xc0] sm:$0xff] }
 0xc7d   : > { %v1639_v45 = vpop.f32.mrf.mxu0  ;;  %7821 = vmatmul.msk.bf16.vlgmr.msrb.gmra.mxu2 %vm346_vm0, %v10308_v49 }
 0xc7e   : > { %v1640_v38 = vadd.f32 %v1639_v45, %v1617_v44 }
 0xc85   : > { %v1641_v2 = vpop.f32.mrf.mxu0 }
 0xc86   : > { %v1642_v37 = vadd.f32 %v1641_v2, %v1617_v44  ;;  %v10677_v44 = vld [vmem:[#allocation7 + $0xd0] sm:$0xff] }
 0xc88   : > { %v1749_v4 = vpack.c.bf16 %v1642_v37, %v1640_v38 }
 0xc8a   : > { %v1775_v58 = vsel %vm381_vm1, %v1749_v4, 0 }
 0xc8b   : > { %1784 = vmatpush.bf16.xpose.msra.mxu1 %v1775_v58 }
 0xc8d   : > { %v1670_v28 = vpop.f32.mrf.mxu0  ;;  %7822 = vmatmul.msk.bf16.gmra.mxu2 %vm346_vm0, %v10313_v57 }
 0xc8e   : > { %v1671_v21 = vadd.f32 %v1670_v28, %v1648_v22  ;;  %v10681_v28 = vld [vmem:[#allocation7 + $0xe0] sm:$0xff] }
 0xc95   : > { %v1672_v48 = vpop.f32.mrf.mxu0 }
 0xc96   : > { %v1673_v39 = vadd.f32 %v1672_v48, %v1648_v22  ;;  %v10684_v48 = vld [vmem:[#allocation7 + $0xf0] sm:$0xff] }
 0xc98   : > { %v2026_v13 = vpack.c.bf16 %v1673_v39, %v1671_v21 }
 0xc9a   : > { %2058 = vmatpush.bf16.msra.mxu3 %v2026_v13 }
 0xc9d   : > { %7823 = vmatmul.msk.bf16.gmra.mxu2 %vm346_vm0, %v10317_v61 }
 0xcad   : > { %7824 = vmatmul.msk.bf16.gmra.mxu2 %vm346_vm0, %v10321_v0 }
 0xcbd   : > { %7825 = vmatmul.msk.bf16.gmra.mxu2 %vm346_vm0, %v10325_v3 }
 0xccd   : > { %7826 = vmatmul.msk.bf16.gmra.mxu2 %vm346_vm0, %v10329_v6 }
 0xcdd   : > { %7827 = vmatmul.msk.bf16.gmra.mxu2 %vm346_vm0, %v10333_v9 }
 0xced   : > { %7828 = vmatmul.msk.bf16.gmra.mxu2 %vm346_vm0, %v10337_v12  ;;  %v10642_v12 = vld [vmem:[#allocation7 + $0x30] sm:$0xff] }
 0xd00   : > { %v1685_v49 = vpop.f32.mrf.mxu2 }
 0xd01   : > { %v1725_v61 = vmul.f32 %v10632_v15, %v1685_v49 }
 0xd08   : > { %v1687_v57 = vpop.f32.mrf.mxu2 }
 0xd09   : > { %v1726_v0 = vmul.f32 %v10635_v18, %v1687_v57 }
 0xd0b   : > { %v1741_v3 = vpack.c.bf16 %v1726_v0, %v1725_v61 }
 0xd0d   : > { %7829 = vmatmul.msk.bf16.vlgmr.msra.gmra.mxu1 %vm381_vm1, %v1741_v3 }
 0xd10   : > { %v1690_v6 = vpop.f32.mrf.mxu2 }
 0xd11   : > { %v1727_v9 = vmul.f32 %v10639_v34, %v1690_v6 }
 0xd18   : > { %v1692_v14 = vpop.f32.mrf.mxu2 }
 0xd19   : > { %v1728_v56 = vmul.f32 %v10642_v12, %v1692_v14 }
 0xd1b   : > { %v1742_v16 = vpack.c.bf16 %v1728_v56, %v1727_v9 }
 0xd1d   : > { %7830 = vmatmul.msk.bf16.gmra.mxu1 %vm381_vm1, %v1742_v16 }
 0xd20   : > { %v1695_v23 = vpop.f32.mrf.mxu2 }
 0xd21   : > { %v1729_v54 = vmul.f32 %v10646_v17, %v1695_v23 }
 0xd28   : > { %v1697_v55 = vpop.f32.mrf.mxu2 }
 0xd29   : > { %v1730_v31 = vmul.f32 %v10649_v24, %v1697_v55 }
 0xd2b   : > { %v1743_v29 = vpack.c.bf16 %v1730_v31, %v1729_v54 }
 0xd2d   : > { %7831 = vmatmul.msk.bf16.gmra.mxu1 %vm381_vm1, %v1743_v29 }
 0xd30   : > { %v1700_v40 = vpop.f32.mrf.mxu2 }
 0xd31   : > { %v1731_v41 = vmul.f32 %v10653_v36, %v1700_v40 }
 0xd38   : > { %v1702_v1 = vpop.f32.mrf.mxu2 }
 0xd39   : > { %v1732_v7 = vmul.f32 %v10656_v27, %v1702_v1 }
 0xd3b   : > { %v1744_v59 = vpack.c.bf16 %v1732_v7, %v1731_v41 }
 0xd3d   : > { %7832 = vmatmul.msk.bf16.gmra.mxu1 %vm381_vm1, %v1744_v59 }
 0xd40   : > { %v1705_v43 = vpop.f32.mrf.mxu2 }
 0xd41   : > { %v1733_v19 = vmul.f32 %v10660_v50, %v1705_v43 }
 0xd48   : > { %v1707_v11 = vpop.f32.mrf.mxu2 }
 0xd49   : > { %v1734_v46 = vmul.f32 %v10663_v5, %v1707_v11 }
 0xd4b   : > { %v1745_v25 = vpack.c.bf16 %v1734_v46, %v1733_v19 }
 0xd4d   : > { %7833 = vmatmul.msk.bf16.gmra.mxu1 %vm381_vm1, %v1745_v25 }
 0xd50   : > { %v1710_v8 = vpop.f32.mrf.mxu2 }
 0xd51   : > { %v1735_v20 = vmul.f32 %v10667_v63, %v1710_v8 }
 0xd58   : > { %v1712_v10 = vpop.f32.mrf.mxu2 }
 0xd59   : > { %v1736_v62 = vmul.f32 %v10670_v26, %v1712_v10 }
 0xd5b   : > { %v1746_v32 = vpack.c.bf16 %v1736_v62, %v1735_v20 }
 0xd5d   : > { %7834 = vmatmul.msk.bf16.gmra.mxu1 %vm381_vm1, %v1746_v32 }
 0xd60   : > { %v1715_v53 = vpop.f32.mrf.mxu2 }
 0xd61   : > { %v1737_v45 = vmul.f32 %v10674_v51, %v1715_v53 }
 0xd68   : > { %v1717_v52 = vpop.f32.mrf.mxu2 }
 0xd69   : > { %v1738_v2 = vmul.f32 %v10677_v44, %v1717_v52 }
 0xd6b   : > { %v1747_v38 = vpack.c.bf16 %v1738_v2, %v1737_v45 }
 0xd6d   : > { %7835 = vmatmul.msk.bf16.gmra.mxu1 %vm381_vm1, %v1747_v38 }
 0xd70   : > { %v1720_v37 = vpop.f32.mrf.mxu2 }
 0xd71   : > { %v1739_v22 = vmul.f32 %v10681_v28, %v1720_v37 }
 0xd78   : > { %v1722_v4 = vpop.f32.mrf.mxu2 }
 0xd79   : > { %v1740_v21 = vmul.f32 %v10684_v48, %v1722_v4 }
 0xd7b   : > { %v1748_v13 = vpack.c.bf16 %v1740_v21, %v1739_v22 }
 0xd7d   : > { %7836 = vmatmul.msk.bf16.gmra.mxu1 %vm381_vm1, %v1748_v13 }
 0xd8a   : > { %v1786_v58 = vpop.f32.mrf.mxu1 }
 0xd8b   : > { %v1826_v39 = vmul.f32 0.5, %v1786_v58 }
 0xd8d   : > { %v1842_v49 = vsel %vm346_vm0, %v1826_v39, -inf }
 0xd8e   : > { %1843 = vmax.xlane.f32.xlu0 %v1842_v49 }
 0xd92   : > { %v1788_v57 = vpop.f32.mrf.mxu1 }
 0xd93   : > { %v1827_v61 = vmul.f32 0.5, %v1788_v57 }
 0xd95   : > { %v1845_v0 = vsel %vm346_vm0, %v1827_v61, -inf }
 0xd96   : > { %1846 = vmax.xlane.f32.xlu1 %v1845_v0 }
 0xd9a   : > { %v1791_v3 = vpop.f32.mrf.mxu1 }
 0xd9b   : > { %v1828_v6 = vmul.f32 0.5, %v1791_v3 }
 0xd9d   : > { %v1848_v14 = vsel %vm346_vm0, %v1828_v6, -inf }
 0xd9e   : > { %1849 = vmax.xlane.f32.xlu2 %v1848_v14 }
 0xda2   : > { %v1793_v9 = vpop.f32.mrf.mxu1 }
 0xda3   : > { %v1829_v56 = vmul.f32 0.5, %v1793_v9 }
 0xda5   : > { %v1851_v16 = vsel %vm346_vm0, %v1829_v56, -inf }
 0xda6   : > { %1852 = vmax.xlane.f32.xlu0 %v1851_v16 }
 0xdaa   : > { %v1796_v23 = vpop.f32.mrf.mxu1 }
 0xdab   : > { %v1830_v55 = vmul.f32 0.5, %v1796_v23 }
 0xdad   : > { %v1854_v54 = vsel %vm346_vm0, %v1830_v55, -inf }
 0xdae   : > { %1855 = vmax.xlane.f32.xlu1 %v1854_v54 }
 0xdb2   : > { %v1798_v31 = vpop.f32.mrf.mxu1 }
 0xdb3   : > { %v10693_v29 = vmul.f32 0.5, %v1798_v31 }
 0xdb5   : > { %v1857_v40 = vsel %vm346_vm0, %v10693_v29, -inf }
 0xdb6   : > { %1858 = vmax.xlane.f32.xlu2 %v1857_v40 }
 0xdba   : > { %v1801_v1 = vpop.f32.mrf.mxu1 }
 0xdbb   : > { %v10697_v41 = vmul.f32 0.5, %v1801_v1 }
 0xdbd   : > { %v1860_v7 = vsel %vm346_vm0, %v10697_v41, -inf }
 0xdbe   : > { %1861 = vmax.xlane.f32.xlu0 %v1860_v7 }
 0xdc2   : > { %v1803_v59 = vpop.f32.mrf.mxu1 }
 0xdc3   : > { %v10701_v43 = vmul.f32 0.5, %v1803_v59 }
 0xdc5   : > { %v1863_v19 = vsel %vm346_vm0, %v10701_v43, -inf }
 0xdc6   : > { %1864 = vmax.xlane.f32.xlu1 %v1863_v19 }
 0xdca   : > { %v1806_v11 = vpop.f32.mrf.mxu1 }
 0xdcb   : > { %v10705_v46 = vmul.f32 0.5, %v1806_v11 }
 0xdcd   : > { %v1866_v25 = vsel %vm346_vm0, %v10705_v46, -inf }
 0xdce   : > { %1867 = vmax.xlane.f32.xlu1 %v1866_v25 }
 0xdd2   : > { %v1808_v20 = vpop.f32.mrf.mxu1 }
 0xdd3   : > { %v10713_v4 = vmul.f32 0.5, %v1808_v20 }
 0xdd5   : > { %v1869_v13 = vsel %vm346_vm0, %v10713_v4, -inf }
 0xdda   : > { %v1811_v2 = vpop.f32.mrf.mxu1 }
 0xde2   : > { %v1813_v49 = vpop.f32.mrf.mxu1 }
 0xde3   : > { %v10729_v54 = vmul.f32 0.5, %v1813_v49 }
 0xde5   : > { %v1875_v7 = vsel %vm346_vm0, %v10729_v54, -inf }
 0xdea   : > { %v1816_v16 = vpop.f32.mrf.mxu1 }
 0xdeb   : > { %v10737_v19 = vmul.f32 0.5, %v1816_v16 }
 0xded   : > { %v1878_v20 = vsel %vm346_vm0, %v10737_v19, -inf }
 0xdf2   : > { %v1818_v25 = vpop.f32.mrf.mxu1 }
 0xe01   : > { %v1844_v8 = vpop.xlane.xlu0 %1843 }
 0xe02   : > { %v1890_v10 = vsub.f32 %v1826_v39, %v1844_v8 }
 0xe04   : > { %v1906_v62 = vmul.f32 1.442695, %v1890_v10 }
 0xe06   : > { %9585 = vpow2.f32 %v1906_v62 }
 0xe09   : > { %v1847_v32 = vpop.xlane.xlu1 %1846 }
 0xe0a   : > { %v1891_v53 = vsub.f32 %v1827_v61, %v1847_v32  ;;  %v10721_v61 = vmul.f32 0.5, %v1811_v2  ;;  %v10746_v32 = vmul.f32 0.5, %v1818_v25  ;;  %v1821_v2 = vpop.f32.mrf.mxu1 }
 0xe0c   : > { %v10709_v52 = vpop.eup %9585  ;;  %v1908_v45 = vmul.f32 1.442695, %v1891_v53  ;;  %v1872_v9 = vsel %vm346_vm0, %v10721_v61, -inf }
 0xe0d   : > { %v1938_v38 = vsel %vm346_vm0, %v10709_v52, 0.0 }
 0xe0e   : > { %9587 = vpow2.f32 %v1908_v45  ;;  %1939 = vadd.xlane.f32.xlu2 %v1938_v38 }
 0xe11   : > { %v1850_v37 = vpop.xlane.xlu2 %1849 }
 0xe12   : > { %v1892_v58 = vsub.f32 %v1828_v6, %v1850_v37  ;;  %v1881_v37 = vsel %vm346_vm0, %v10746_v32, -inf }
 0xe14   : > { %v10715_v22 = vpop.eup %9587  ;;  %v1910_v21 = vmul.f32 1.442695, %v1892_v58 }
 0xe15   : > { %v1941_v39 = vsel %vm346_vm0, %v10715_v22, 0.0 }
 0xe16   : > { %9589 = vpow2.f32 %v1910_v21  ;;  %1942 = vadd.xlane.f32.xlu0 %v1941_v39  ;;  %1870 = vmax.xlane.f32.xlu2 %v1869_v13  ;;  %v10755_v21 = vmul.f32 0.5, %v1821_v2 }
 0xe19   : > { %v1853_v57 = vpop.xlane.xlu0 %1852 }
 0xe1a   : > { %v1893_v0 = vsub.f32 %v1829_v56, %v1853_v57  ;;  %v1884_v57 = vsel %vm346_vm0, %v10755_v21, -inf }
 0xe1c   : > { %v10723_v3 = vpop.eup %9589  ;;  %v1912_v6 = vmul.f32 1.442695, %v1893_v0  ;;  %v1823_v0 = vpop.f32.mrf.mxu1 }
 0xe1d   : > { %v1944_v14 = vsel %vm346_vm0, %v10723_v3, 0.0 }
 0xe1e   : > { %9591 = vpow2.f32 %v1912_v6  ;;  %1945 = vadd.xlane.f32.xlu0 %v1944_v14  ;;  %1873 = vmax.xlane.f32.xlu2 %v1872_v9  ;;  %v10764_v14 = vmul.f32 0.5, %v1823_v0 }
 0xe21   : > { %v1856_v23 = vpop.xlane.xlu1 %1855 }
 0xe22   : > { %v1894_v31 = vsub.f32 %v1830_v55, %v1856_v23 }
 0xe24   : > { %v10731_v40 = vpop.eup %9591  ;;  %v1914_v56 = vmul.f32 1.442695, %v1894_v31  ;;  %v1887_v31 = vsel %vm346_vm0, %v10764_v14, -inf }
 0xe25   : > { %v1947_v1 = vsel %vm346_vm0, %v10731_v40, 0.0 }
 0xe26   : > { %9593 = vpow2.f32 %v1914_v56  ;;  %1948 = vadd.xlane.f32.xlu1 %v1947_v1  ;;  %1876 = vmax.xlane.f32.xlu0 %v1875_v7 }
 0xe29   : > { %v1859_v59 = vpop.xlane.xlu2 %1858 }
 0xe2a   : > { %v1895_v11 = vsub.f32 %v10693_v29, %v1859_v59 }
 0xe2c   : > { %v10740_v8 = vpop.eup %9593  ;;  %v1916_v55 = vmul.f32 1.442695, %v1895_v11 }
 0xe2d   : > { %v1950_v10 = vsel %vm346_vm0, %v10740_v8, 0.0 }
 0xe2e   : > { %9595 = vpow2.f32 %v1916_v55  ;;  %1951 = vadd.xlane.f32.xlu1 %v1950_v10  ;;  %1879 = vmax.xlane.f32.xlu0 %v1878_v20 }
 0xe31   : > { %v1862_v62 = vpop.xlane.xlu0 %1861 }
 0xe32   : > { %v1896_v53 = vsub.f32 %v10697_v41, %v1862_v62 }
 0xe34   : > { %v10749_v45 = vpop.eup %9595  ;;  %v1918_v29 = vmul.f32 1.442695, %v1896_v53 }
 0xe35   : > { %v1953_v38 = vsel %vm346_vm0, %v10749_v45, 0.0 }
 0xe36   : > { %9597 = vpow2.f32 %v1918_v29  ;;  %1954 = vadd.xlane.f32.xlu2 %v1953_v38  ;;  %1882 = vmax.xlane.f32.xlu1 %v1881_v37 }
 0xe39   : > { %v1865_v58 = vpop.xlane.xlu1 %1864 }
 0xe3a   : > { %v1897_v39 = vsub.f32 %v10701_v43, %v1865_v58 }
 0xe3c   : > { %v10758_v13 = vpop.eup %9597  ;;  %v1920_v41 = vmul.f32 1.442695, %v1897_v39 }
 0xe3d   : > { %v1956_v49 = vsel %vm346_vm0, %v10758_v13, 0.0 }
 0xe3e   : > { %9599 = vpow2.f32 %v1920_v41  ;;  %1957 = vadd.xlane.f32.xlu2 %v1956_v49  ;;  %1885 = vmax.xlane.f32.xlu1 %v1884_v57 }
 0xe41   : > { %v1868_v6 = vpop.xlane.xlu1 %1867 }
 0xe42   : > { %v1898_v9 = vsub.f32 %v10705_v46, %v1868_v6 }
 0xe44   : > { %v10767_v16 = vpop.eup %9599  ;;  %v1922_v43 = vmul.f32 1.442695, %v1898_v9 }
 0xe45   : > { %v1959_v23 = vsel %vm346_vm0, %v10767_v16, 0.0 }
 0xe46   : > { %9601 = vpow2.f32 %v1922_v43  ;;  %1960 = vadd.xlane.f32.xlu0 %v1959_v23  ;;  %1888 = vmax.xlane.f32.xlu2 %v1887_v31 }
 0xe4c   : > { %v10773_v56 = vpop.eup %9601 }
 0xe4d   : > { %v1962_v1 = vsel %vm346_vm0, %v10773_v56, 0.0 }
 0xe4e   : > { %1963 = vadd.xlane.f32.xlu0 %v1962_v1 }
 0xe81   : > { %v1940_v7 = vpop.xlane.xlu2 %1939 }
 0xe82   : > { %9603 = vrcp.f32 %v1940_v7 }
 0xe88   : > { %v9604_v55 = vpop.eup %9603 }
 0xe89   : > { %v1943_v46 = vpop.xlane.xlu0 %1942  ;;  %v1871_v59 = vpop.xlane.xlu2 %1870  ;;  %v2002_v20 = vmul.f32 %v9604_v55, %v10709_v52 }
 0xe8a   : > { %9605 = vrcp.f32 %v1943_v46  ;;  %v1899_v11 = vsub.f32 %v10713_v4, %v1871_v59 }
 0xe8c   : > { %v1924_v25 = vmul.f32 1.442695, %v1899_v11 }
 0xe8e   : > { %9607 = vpow2.f32 %v1924_v25 }
 0xe90   : > { %v9606_v10 = vpop.eup %9605 }
 0xe91   : > { %v2003_v62 = vmul.f32 %v9606_v10, %v10715_v22  ;;  %v1946_v53 = vpop.xlane.xlu0 %1945  ;;  %v1874_v29 = vpop.xlane.xlu2 %1873 }
 0xe92   : > { %v1900_v2 = vsub.f32 %v10721_v61, %v1874_v29 }
 0xe93   : > { %v2018_v38 = vpack.c.bf16 %v2003_v62, %v2002_v20 }
 0xe94   : > { %v10781_v37 = vpop.eup %9607  ;;  %v1926_v58 = vmul.f32 1.442695, %v1900_v2 }
 0xe95   : > { %7837 = vmatmul.msk.bf16.vlgmr.msra.gmra.mxu3 %vm346_vm0, %v2018_v38  ;;  %v1965_v4 = vsel %vm346_vm0, %v10781_v37, 0.0 }
 0xe96   : > { %9609 = vpow2.f32 %v1926_v58  ;;  %1966 = vadd.xlane.f32.xlu1 %v1965_v4 }
 0xe97   : > { %9611 = vrcp.f32 %v1946_v53 }
 0xe99   : > { %v1949_v39 = vpop.xlane.xlu1 %1948  ;;  %v1877_v52 = vpop.xlane.xlu0 %1876 }
 0xe9a   : > { %9613 = vrcp.f32 %v1949_v39  ;;  %v1901_v22 = vsub.f32 %v10729_v54, %v1877_v52 }
 0xe9c   : > { %v10787_v41 = vpop.eup %9609  ;;  %v1928_v61 = vmul.f32 1.442695, %v1901_v22 }
 0xe9d   : > { %v1968_v49 = vsel %vm346_vm0, %v10787_v41, 0.0  ;;  %v9612_v57 = vpop.eup %9611 }
 0xe9e   : > { %9615 = vpow2.f32 %v1928_v61  ;;  %1969 = vadd.xlane.f32.xlu2 %v1968_v49  ;;  %v2004_v6 = vmul.f32 %v9612_v57, %v10723_v3 }
 0xea0   : > { %v9614_v0 = vpop.eup %9613 }
 0xea1   : > { %v2005_v9 = vmul.f32 %v9614_v0, %v10731_v40  ;;  %v1952_v43 = vpop.xlane.xlu1 %1951  ;;  %v1880_v23 = vpop.xlane.xlu0 %1879 }
 0xea2   : > { %v1902_v31 = vsub.f32 %v10737_v19, %v1880_v23 }
 0xea3   : > { %v2019_v1 = vpack.c.bf16 %v2005_v9, %v2004_v6 }
 0xea4   : > { %v10794_v54 = vpop.eup %9615  ;;  %v1930_v7 = vmul.f32 1.442695, %v1902_v31 }
 0xea5   : > { %7838 = vmatmul.msk.bf16.gmra.mxu3 %vm346_vm0, %v2019_v1  ;;  %v1971_v46 = vsel %vm346_vm0, %v10794_v54, 0.0 }
 0xea6   : > { %9617 = vpow2.f32 %v1930_v7  ;;  %1972 = vadd.xlane.f32.xlu0 %v1971_v46 }
 0xea7   : > { %9619 = vrcp.f32 %v1952_v43 }
 0xea9   : > { %v1955_v59 = vpop.xlane.xlu2 %1954  ;;  %v1883_v3 = vpop.xlane.xlu1 %1882 }
 0xeaa   : > { %9621 = vrcp.f32 %v1955_v59  ;;  %v1903_v40 = vsub.f32 %v10746_v32, %v1883_v3 }
 0xeac   : > { %v10800_v11 = vpop.eup %9617  ;;  %v1932_v19 = vmul.f32 1.442695, %v1903_v40 }
 0xead   : > { %v1974_v25 = vsel %vm346_vm0, %v10800_v11, 0.0  ;;  %v9620_v55 = vpop.eup %9619 }
 0xeae   : > { %9623 = vpow2.f32 %v1932_v19  ;;  %1975 = vadd.xlane.f32.xlu1 %v1974_v25  ;;  %v2006_v20 = vmul.f32 %v9620_v55, %v10740_v8 }
 0xeb0   : > { %v9622_v10 = vpop.eup %9621 }
 0xeb1   : > { %v2007_v62 = vmul.f32 %v9622_v10, %v10749_v45  ;;  %v1958_v53 = vpop.xlane.xlu2 %1957  ;;  %v1886_v29 = vpop.xlane.xlu1 %1885 }
 0xeb2   : > { %v1904_v2 = vsub.f32 %v10755_v21, %v1886_v29 }
 0xeb3   : > { %v2020_v38 = vpack.c.bf16 %v2007_v62, %v2006_v20 }
 0xeb4   : > { %v9624_v32 = vpop.eup %9623  ;;  %v1934_v58 = vmul.f32 1.442695, %v1904_v2 }
 0xeb5   : > { %7839 = vmatmul.msk.bf16.gmra.mxu3 %vm346_vm0, %v2020_v38  ;;  %v1977_v4 = vsel %vm346_vm0, %v9624_v32, 0.0 }
 0xeb6   : > { %9625 = vpow2.f32 %v1934_v58  ;;  %1978 = vadd.xlane.f32.xlu2 %v1977_v4 }
 0xeb7   : > { %9627 = vrcp.f32 %v1958_v53 }
 0xeb9   : > { %v1961_v39 = vpop.xlane.xlu0 %1960  ;;  %v1889_v52 = vpop.xlane.xlu2 %1888 }
 0xeba   : > { %9629 = vrcp.f32 %v1961_v39  ;;  %v1905_v8 = vsub.f32 %v10764_v14, %v1889_v52 }
 0xebc   : > { %v9626_v45 = vpop.eup %9625  ;;  %v1936_v22 = vmul.f32 1.442695, %v1905_v8 }
 0xebd   : > { %v1980_v61 = vsel %vm346_vm0, %v9626_v45, 0.0  ;;  %v9628_v21 = vpop.eup %9627 }
 0xebe   : > { %9631 = vpow2.f32 %v1936_v22  ;;  %1981 = vadd.xlane.f32.xlu0 %v1980_v61  ;;  %v2008_v57 = vmul.f32 %v9628_v21, %v10758_v13 }
 0xec0   : > { %v9630_v49 = vpop.eup %9629 }
 0xec1   : > { %v2009_v0 = vmul.f32 %v9630_v49, %v10767_v16  ;;  %v1964_v14 = vpop.xlane.xlu0 %1963 }
 0xec2   : > { %9633 = vrcp.f32 %v1964_v14 }
 0xec3   : > { %v2021_v6 = vpack.c.bf16 %v2009_v0, %v2008_v57 }
 0xec4   : > { %v9632_v9 = vpop.eup %9631 }
 0xec5   : > { %7840 = vmatmul.msk.bf16.gmra.mxu3 %vm346_vm0, %v2021_v6  ;;  %v1983_v43 = vsel %vm346_vm0, %v9632_v9, 0.0 }
 0xec6   : > { %1984 = vadd.xlane.f32.xlu1 %v1983_v43 }
 0xec8   : > { %v9634_v31 = vpop.eup %9633 }
 0xec9   : > { %v2010_v7 = vmul.f32 %v9634_v31, %v10773_v56 }
 0xf09   : > { %v1967_v23 = vpop.xlane.xlu1 %1966 }
 0xf0a   : > { %9635 = vrcp.f32 %v1967_v23 }
 0xf10   : > { %v9636_v1 = vpop.eup %9635 }
 0xf11   : > { %v2011_v46 = vmul.f32 %v9636_v1, %v10781_v37  ;;  %v1970_v59 = vpop.xlane.xlu2 %1969 }
 0xf12   : > { %9637 = vrcp.f32 %v1970_v59 }
 0xf13   : > { %v2022_v13 = vpack.c.bf16 %v2011_v46, %v2010_v7 }
 0xf15   : > { %7841 = vmatmul.msk.bf16.gmra.mxu3 %vm346_vm0, %v2022_v13 }
 0xf18   : > { %v9638_v3 = vpop.eup %9637  ;;  %v2060_v52 = vpop.f32.mrf.mxu3 }
 0xf19   : > { %v1973_v16 = vpop.xlane.xlu0 %1972  ;;  %v2012_v19 = vmul.f32 %v9638_v3, %v10787_v41 }
 0xf1a   : > { %9639 = vrcp.f32 %v1973_v16 }
 0xf20   : > { %v9640_v40 = vpop.eup %9639  ;;  %v2062_v8 = vpop.f32.mrf.mxu3 }
 0xf21   : > { %v2013_v25 = vmul.f32 %v9640_v40, %v10794_v54  ;;  %v1976_v10 = vpop.xlane.xlu1 %1975 }
 0xf22   : > { %9641 = vrcp.f32 %v1976_v10 }
 0xf23   : > { %v2023_v55 = vpack.c.bf16 %v2013_v25, %v2012_v19 }
 0xf25   : > { %7842 = vmatmul.msk.bf16.gmra.mxu3 %vm346_vm0, %v2023_v55 }
 0xf28   : > { %v9642_v37 = vpop.eup %9641  ;;  %v2065_v22 = vpop.f32.mrf.mxu3 }
 0xf29   : > { %v1979_v56 = vpop.xlane.xlu2 %1978  ;;  %v2014_v62 = vmul.f32 %v9642_v37, %v10800_v11  ;;  %v9123_v37 = vld [vmem:[#allocation5 + $0x274] sm:$0xf0] }
 0xf2a   : > { %9643 = vrcp.f32 %v1979_v56 }
 0xf30   : > { %v9644_v20 = vpop.eup %9643  ;;  %v2067_v61 = vpop.f32.mrf.mxu3 }
 0xf31   : > { %v2015_v53 = vmul.f32 %v9644_v20, %v9624_v32  ;;  %v1982_v2 = vpop.xlane.xlu0 %1981  ;;  %v7847_v20 = vld [vmem:[#allocation5 + $0x260] sm:$0xf] }
 0xf32   : > { %9645 = vrcp.f32 %v1982_v2 }
 0xf33   : > { %v2024_v29 = vpack.c.bf16 %v2015_v53, %v2014_v62 }
 0xf35   : > { %7843 = vmatmul.msk.bf16.gmra.mxu3 %vm346_vm0, %v2024_v29 }
 0xf38   : > { %v9646_v54 = vpop.eup %9645  ;;  %v2070_v11 = vpop.f32.mrf.mxu3 }
 0xf39   : > { %v1985_v41 = vpop.xlane.xlu1 %1984  ;;  %v2016_v58 = vmul.f32 %v9646_v54, %v9626_v45 }
 0xf3a   : > { %9647 = vrcp.f32 %v1985_v41 }
 0xf40   : > { %v9648_v38 = vpop.eup %9647  ;;  %v2072_v32 = vpop.f32.mrf.mxu3 }
 0xf41   : > { %v2017_v4 = vmul.f32 %v9648_v38, %v9632_v9 }
 0xf43   : > { %v2025_v39 = vpack.c.bf16 %v2017_v4, %v2016_v58 }
 0xf45   : > { %7844 = vmatmul.msk.bf16.gmra.mxu3 %vm346_vm0, %v2025_v39 }
 0xf48   : > { %v2075_v21 = vpop.f32.mrf.mxu3 }
 0xf50   : > { %v2077_v49 = vpop.f32.mrf.mxu3 }
 0xf98   : > { %v2080_v57 = vpop.f32.mrf.mxu3 }
 0xf99   : > { %v2108_v25 = vmul.f32 %v10660_v50, %v2080_v57  ;;  %v2101_v50 = vmul.f32 %v10635_v18, %v2062_v8  ;;  %v9125_v57 = vld [vmem:[#allocation5 + $0x294] sm:$0xf0] }
 0xfa0   : > { %v2082_v0 = vpop.f32.mrf.mxu3 }
 0xfa1   : > { %v2109_v40 = vmul.f32 %v10663_v5, %v2082_v0  ;;  %v2102_v5 = vmul.f32 %v10639_v34, %v2065_v22 }
 0xfa8   : > { %v2085_v6 = vpop.f32.mrf.mxu3 }
 0xfa9   : > { %v2110_v3 = vmul.f32 %v10667_v63, %v2085_v6  ;;  %v2103_v63 = vmul.f32 %v10642_v12, %v2067_v61  ;;  %v9122_v12 = vld [vmem:[#allocation5 + $0x264] sm:$0xf0] }
 0xfaa   : > { %v7848_v62 = vor.u32 %v9122_v12, %v7847_v20  ;;  %v9129_v20 = vld [vmem:[#allocation5 + $0x2d4] sm:$0xf0]  ;;  %v7873_v12 = vld [vmem:[#allocation5 + $0x2c0] sm:$0xf] }
 0xfab   : > { %v2117_v56 = vpack.c.bf16 %v2103_v63, %v2102_v5 }
 0xfb0   : > { %v2087_v43 = vpop.f32.mrf.mxu3 }
 0xfb1   : > { %v2111_v59 = vmul.f32 %v10670_v26, %v2087_v43  ;;  %v2104_v26 = vmul.f32 %v10646_v17, %v2070_v11 }
 0xfb3   : > { %v2121_v19 = vpack.c.bf16 %v2111_v59, %v2110_v3 }
 0xfb8   : > { %v2090_v14 = vpop.f32.mrf.mxu3 }
 0xfb9   : > { %v2112_v13 = vmul.f32 %v10674_v51, %v2090_v14  ;;  %v2105_v51 = vmul.f32 %v10649_v24, %v2072_v32  ;;  %v7851_v24 = vld [vmem:[#allocation5 + $0x270] sm:$0xf]  ;;  %v7856_v14 = vld [vmem:[#allocation5 + $0x280] sm:$0xf] }
 0xfba   : > { %v7852_v17 = vor.u32 %v9123_v37, %v7851_v24 }
 0xfbb   : > { %v2118_v10 = vpack.c.bf16 %v2105_v51, %v2104_v26  ;;  %v2177_v26 = vld [vmem:[#allocation7 + $0x250] ss:$0 sm:$0xff] }
 0xfc0   : > { %v2092_v23 = vpop.f32.mrf.mxu3 }
 0xfc1   : > { %v2113_v7 = vmul.f32 %v10677_v44, %v2092_v23  ;;  %v2106_v44 = vmul.f32 %v10653_v36, %v2075_v21  ;;  %v9124_v23 = vld [vmem:[#allocation5 + $0x284] sm:$0xf0] }
 0xfc3   : > { %v2122_v16 = vpack.c.bf16 %v2113_v7, %v2112_v13 }
 0xfc8   : > { %v2095_v31 = vpop.f32.mrf.mxu3 }
 0xfc9   : > { %v2114_v9 = vmul.f32 %v10681_v28, %v2095_v31  ;;  %v2107_v28 = vmul.f32 %v10656_v27, %v2077_v49  ;;  %v2100_v27 = vmul.f32 %v10632_v15, %v2060_v52  ;;  %v2174_v15 = vld [vmem:[#allocation7 + $0x240] ss:$0 sm:$0xff] }
 0xfca   : > { %v7860_v49 = vld [vmem:[#allocation5 + $0x290] sm:$0xf] }
 0xfcb   : > { %v2119_v55 = vpack.c.bf16 %v2107_v28, %v2106_v44  ;;  %v2116_v36 = vpack.c.bf16 %v2101_v50, %v2100_v27  ;;  %v7861_v0 = vor.u32 %v9125_v57, %v7860_v49 }
 0xfd0   : > { %v2097_v45 = vpop.f32.mrf.mxu3 }
 0xfd1   : > { %v2115_v1 = vmul.f32 %v10684_v48, %v2097_v45  ;;  %v2120_v48 = vpack.c.bf16 %v2109_v40, %v2108_v25  ;;  %v7857_v45 = vor.u32 %v9124_v23, %v7856_v14 }
 0xfd3   : > { %v2123_v46 = vpack.c.bf16 %v2115_v1, %v2114_v9 }
 0xfd5   : > { %2124 = vmatpush.bf16.msra.mxu0 %v2123_v46 }
 0xfd9   : > { %2125 = vmatpush.bf16.msra.mxu0 %v2122_v16 }
 0xfdd   : > { %2126 = vmatpush.bf16.msra.mxu0 %v2121_v19 }
 0xfe1   : > { %2127 = vmatpush.bf16.msra.mxu0 %v2120_v48 }
 0xfe5   : > { %2128 = vmatpush.bf16.msra.mxu0 %v2119_v55 }
 0xfe9   : > { %2129 = vmatpush.bf16.msra.mxu0 %v2118_v10 }
 0xfed   : > { %2130 = vmatpush.bf16.msra.mxu0 %v2117_v56  ;;  %v2178_v56 = vld [vmem:[#allocation7 + $0x260] ss:$0 sm:$0xff] }
 0xff1   : > { %2131 = vmatpush.bf16.msra.mxu0 %v2116_v36 }
 0xff4   : > { %2132 = vmatmul.bf16.vlgmr.msra.gmra.mxu0 %v10549_v30 }
 0xff5   : > { %2164 = vmatpush.bf16.msrb.mxu0 %v7852_v17  ;;  %v7877_v17 = vld [vmem:[#allocation5 + $0x2d0] sm:$0xf] }
 0xff9   : > { %2165 = vmatpush.bf16.msrb.mxu0 %v7848_v62  ;;  %v7878_v62 = vor.u32 %v9129_v20, %v7877_v17 }
 0xffd   : > { %2254 = vmatpush.bf16.msra.mxu0 %v7861_v0 }
0x1001   : > { %2255 = vmatpush.bf16.msra.mxu0 %v7857_v45 }
0x1071   : > { %v2133_v34 = vpop.f32.mrf.mxu0 }
0x1079   : > { %v2135_v53 = vpop.f32.mrf.mxu0 }
0x107a   : > { %v2138_v29 = vpack.c.bf16 %v2135_v53, %v2133_v34  ;;  %v9128_v34 = vld [vmem:[#allocation5 + $0x2c4] sm:$0xf0] }
0x107b   : > { %v7874_v53 = vor.u32 %v9128_v34, %v7873_v12  ;;  %v2361_v34 = vld [vmem:[#allocation7 + $0x2a0] ss:$0 sm:$0xff] }
0x107c   : > { %7853 = vmatmul.msk.bf16.vlgmr.msrb.gmra.mxu0 %vm381_vm1, %v2138_v29  ;;  %v7869_v29 = vld [vmem:[#allocation5 + $0x2b0] sm:$0xf] }
0x107d   : > { %2349 = vmatpush.bf16.msrb.mxu0 %v7878_v62 }
0x1081   : > { %2350 = vmatpush.bf16.msrb.mxu0 %v7874_v53 }
0x10f9   : > { %v2167_v18 = vpop.f32.mrf.mxu0 }
0x10fa   : > { %v2172_v2 = vadd.f32 %v2167_v18, %v10595_v47  ;;  %v9127_v18 = vld [vmem:[#allocation5 + $0x2b4] sm:$0xf0] }
0x10fc   : > { %v10843_v41 = vadd.f32 %v2174_v15, %v2172_v2  ;;  %v7870_v2 = vor.u32 %v9127_v18, %v7869_v29 }
0x10fe   : > { %v2179_v30 = vsel %vm381_vm1, %v10843_v41, 0.0  ;;  %2351 = vmatpush.bf16.msrb.mxu0 %v7870_v2 }
0x10ff   : > { %2180 = vadd.xlane.f32.xlu2 %v2179_v30  ;;  %v7865_v30 = vld [vmem:[#allocation5 + $0x2a0] sm:$0xf] }
0x1101   : > { %v2169_v54 = vpop.f32.mrf.mxu0 }
0x1102   : > { %v2173_v38 = vadd.f32 %v2169_v54, %v10600_v33  ;;  %v9126_v54 = vld [vmem:[#allocation5 + $0x2a4] sm:$0xf0] }
0x1104   : > { %v10848_v58 = vadd.f32 %v2174_v15, %v2173_v38  ;;  %v2232_v38 = vld [vmem:[#allocation7 + $0x270] ss:$0 sm:$0xff] }
0x1106   : > { %v2182_v4 = vsel %vm381_vm1, %v10848_v58, 0.0 }
0x1107   : > { %2183 = vadd.xlane.f32.xlu0 %v2182_v4  ;;  %v7866_v4 = vor.u32 %v9126_v54, %v7865_v30 }
0x1109   : > { %2352 = vmatpush.bf16.msrb.mxu0 %v7866_v4 }
0x1172   : > { %v2181_v39 = vpop.xlane.xlu2 %2180 }
0x1173   : > { %v2185_v52 = vmul.f32 %v2181_v39, %v10281_v60 }
0x1175   : > { %v2187_v47 = vsub.f32 %v10843_v41, %v2185_v52  ;;  %v2274_v52 = vld [vmem:[#allocation7 + $0x280] sm:$0x7] }
0x1177   : > { %v2189_v8 = vmul.f32 %v2187_v47, %v2187_v47 }
0x1179   : > { %v2191_v22 = vsel %vm381_vm1, %v2189_v8, 0.0 }
0x117a   : > { %2192 = vadd.xlane.f32.xlu1 %v2191_v22  ;;  %v2184_v61 = vpop.xlane.xlu0 %2183  ;;  %v2275_v22 = vperm.slane %v2274_v52, 0 }
0x117b   : > { %v2186_v11 = vmul.f32 %v2184_v61, %v10281_v60  ;;  %v2278_v61 = vperm.slane %v2274_v52, 1 }
0x117d   : > { %v2188_v33 = vsub.f32 %v10848_v58, %v2186_v11  ;;  %v2283_v11 = vperm.slane %v2274_v52, 2 }
0x117f   : > { %v2190_v32 = vmul.f32 %v2188_v33, %v2188_v33 }
0x1181   : > { %v2194_v21 = vsel %vm381_vm1, %v2190_v32, 0.0 }
0x1182   : > { %2195 = vadd.xlane.f32.xlu2 %v2194_v21 }
0x11ed   : > { %v2193_v6 = vpop.xlane.xlu1 %2192 }
0x11ee   : > { %v2197_v43 = vmul.f32 %v2193_v6, %v10281_v60 }
0x11f0   : > { %v2199_v31 = vadd.f32 1e-05, %v2197_v43 }
0x11f2   : > { %9649 = vrsqrt.f32 %v2199_v31  ;;  %vm2207_vm5 = vweird.f32 %v2199_v31 }
0x11f5   : > { %v2196_v9 = vpop.xlane.xlu2 %2195 }
0x11f6   : > { %v2198_v1 = vmul.f32 %v2196_v9, %v10281_v60 }
0x11f8   : > { %v9650_v7 = vpop.eup %9649  ;;  %v2200_v46 = vadd.f32 1e-05, %v2198_v1 }
0x11f9   : > { %v2202_v13 = vmul.f32 %v9650_v7, %v2199_v31  ;;  %vm2208_vm4 = vweird.f32 %v9650_v7 }
0x11fa   : > { %9651 = vrsqrt.f32 %v2200_v46  ;;  %vm2209_vm6 = vmor %vm2207_vm5, %vm2208_vm4  ;;  %vm2217_vm13 = vweird.f32 %v2200_v46 }
0x11fb   : > { %v2203_v59 = vmul.f32 %v9650_v7, %v2202_v13 }
0x11fd   : > { %v2204_v16 = vmul.f32 0.5, %v2203_v59 }
0x11ff   : > { %v2205_v3 = vsub.f32 1.5, %v2204_v16  ;;  %v2288_v16 = vld [vmem:[#allocation7 + $0x290] ss:$0 sm:$0xff] }
0x1200   : > { %v9652_v40 = vpop.eup %9651 }
0x1201   : > { %v2206_v19 = vmul.f32 %v9650_v7, %v2205_v3  ;;  %v2212_v25 = vmul.f32 %v9652_v40, %v2200_v46  ;;  %vm2218_vm12 = vweird.f32 %v9652_v40 }
0x1202   : > { %vm2219_vm14 = vmor %vm2217_vm13, %vm2218_vm12 }
0x1203   : > { %v2213_v28 = vmul.f32 %v9652_v40, %v2212_v25  ;;  %v2210_v48 = vsel %vm2209_vm6, %v9650_v7, %v2206_v19 }
0x1204   : > { %v2221_v55 = vmul.f32 %v2210_v48, %v2187_v47 }
0x1205   : > { %v2214_v44 = vmul.f32 0.5, %v2213_v28 }
0x1206   : > { %v2223_v5 = vmul.f32 %v2221_v55, %v2177_v26 }
0x1207   : > { %v2215_v51 = vsub.f32 1.5, %v2214_v44 }
0x1208   : > { %v2225_v36 = vadd.f32 %v2223_v5, %v2178_v56 }
0x1209   : > { %v2216_v63 = vmul.f32 %v9652_v40, %v2215_v51 }
0x120b   : > { %v2220_v10 = vsel %vm2219_vm14, %v9652_v40, %v2216_v63 }
0x120c   : > { %v2222_v50 = vmul.f32 %v2220_v10, %v2188_v33 }
0x120e   : > { %v2224_v27 = vmul.f32 %v2222_v50, %v2177_v26 }
0x1210   : > { %v2226_v24 = vadd.f32 %v2224_v27, %v2178_v56 }
0x1212   : > { %v2227_v37 = vpack.c.bf16 %v2226_v24, %v2225_v36 }
0x1214   : > { %7862 = vmatmul.msk.bf16.vlgmr.msra.gmra.mxu0 %vm381_vm1, %v2227_v37 }
0x1291   : > { %v2257_v15 = vpop.f32.mrf.mxu0 }
0x1292   : > { %v2258_v39 = vadd.f32 %v2257_v15, %v2232_v38 }
0x1294   : > { %v2262_v33 = vrot.slane %v2258_v39, 7  ;;  %v2268_v32 = vrot.slane %v2258_v39, 1  ;;  %v2279_v9 = vmul.f32 %v2278_v61, %v2258_v39 }
0x1299   : > { %v2259_v47 = vpop.f32.mrf.mxu0 }
0x129a   : > { %v2260_v8 = vadd.f32 %v2259_v47, %v2232_v38 }
0x129c   : > { %v2263_v21 = vrot.slane %v2260_v8, 7  ;;  %v2269_v49 = vrot.slane %v2260_v8, 1  ;;  %v2280_v43 = vmul.f32 %v2278_v61, %v2260_v8 }
0x129e   : > { %v2264_v57 = vsel %vm1425_vm9, %v2262_v33, %v2263_v21  ;;  %v2265_v0 = vsel %vm1425_vm9, %v2263_v21, %v2262_v33  ;;  %v2271_v6 = vsel %vm1432_vm10, %v2269_v49, %v2268_v32  ;;  %v2270_v23 = vsel %vm1432_vm10, %v2268_v32, %v2269_v49 }
0x129f   : > { %v2266_v14 = vsel %vm615_vm7, 0.0, %v2265_v0  ;;  %v2273_v31 = vsel %vm618_vm8, 0.0, %v2271_v6  ;;  %v2277_v45 = vmul.f32 %v2275_v22, %v2264_v57  ;;  %v2284_v59 = vmul.f32 %v2283_v11, %v2270_v23 }
0x12a0   : > { %v2276_v1 = vmul.f32 %v2275_v22, %v2266_v14  ;;  %v2285_v7 = vmul.f32 %v2283_v11, %v2273_v31 }
0x12a1   : > { %v2282_v46 = vadd.f32 %v2280_v43, %v2277_v45 }
0x12a2   : > { %v2281_v13 = vadd.f32 %v2279_v9, %v2276_v1 }
0x12a3   : > { %v2287_v3 = vadd.f32 %v2285_v7, %v2282_v46  ;;  %v2364_v46 = vld [vmem:[#allocation7 + $0x2b0] ss:$0 sm:$0xff] }
0x12a4   : > { %v2286_v40 = vadd.f32 %v2284_v59, %v2281_v13 }
0x12a5   : > { %v2290_v19 = vadd.f32 %v2288_v16, %v2287_v3 }
0x12a6   : > { %v2289_v25 = vadd.f32 %v2288_v16, %v2286_v40 }
0x12a7   : > { %v2294_v28 = vmul.f32 0.044715, %v2290_v19  ;;  %v2292_v27 = vmul.f32 0.5, %v2290_v19 }
0x12a8   : > { %v2293_v48 = vmul.f32 0.044715, %v2289_v25  ;;  %v2291_v24 = vmul.f32 0.5, %v2289_v25 }
0x12a9   : > { %v2296_v44 = vmul.f32 %v2294_v28, %v2290_v19 }
0x12aa   : > { %v2295_v51 = vmul.f32 %v2293_v48, %v2289_v25 }
0x12ab   : > { %v2298_v55 = vmul.f32 %v2296_v44, %v2290_v19  ;;  %v7887_v44 = vld [vmem:[#allocation5 + $0x320] sm:$0xf] }
0x12ac   : > { %v2297_v26 = vmul.f32 %v2295_v51, %v2289_v25  ;;  %v9131_v51 = vld [vmem:[#allocation5 + $0x324] sm:$0xf0] }
0x12ad   : > { %v2300_v42 = vadd.f32 %v2298_v55, %v2290_v19 }
0x12ae   : > { %v2299_v63 = vadd.f32 %v2297_v26, %v2289_v25  ;;  %v7888_v26 = vor.u32 %v9131_v51, %v7887_v44 }
0x12af   : > { %v2302_v10 = vmul.f32 0.7978846, %v2300_v42 }
0x12b0   : > { %v2301_v5 = vmul.f32 0.7978846, %v2299_v63  ;;  %v7883_v63 = vld [vmem:[#allocation5 + $0x310] sm:$0xf] }
0x12b1   : > { %9653 = vtanh.f32 %v2302_v10  ;;  %v9130_v10 = vld [vmem:[#allocation5 + $0x314] sm:$0xf0] }
0x12b2   : > { %9655 = vtanh.f32 %v2301_v5  ;;  %v2419_v5 = vld [vmem:[#allocation5 + $0x2e0] sm:$0xf] }
0x12b7   : > { %v9654_v50 = vpop.eup %9653 }
0x12b8   : > { %v9656_v56 = vpop.eup %9655  ;;  %v2306_v36 = vadd.f32 1.0, %v9654_v50  ;;  %v7884_v50 = vor.u32 %v9130_v10, %v7883_v63 }
0x12b9   : > { %v2305_v37 = vadd.f32 1.0, %v9656_v56  ;;  %v2521_v56 = vld [vmem:[#allocation5 + $0x300] sm:$0xf] }
0x12ba   : > { %v2308_v17 = vmul.f32 %v2306_v36, %v2292_v27 }
0x12bb   : > { %v2307_v20 = vmul.f32 %v2305_v37, %v2291_v24  ;;  %v2470_v37 = vld [vmem:[#allocation5 + $0x2f0] sm:$0xf] }
0x12bd   : > { %v2309_v12 = vpack.c.bf16 %v2308_v17, %v2307_v20  ;;  %v7907_v17 = vld [vmem:[#allocation5 + $0x360] sm:$0xf]  ;;  %v9135_v20 = vld [vmem:[#allocation5 + $0x364] sm:$0xf0] }
0x12bf   : > { %7879 = vmatmul.msk.bf16.vlgmr.msrb.gmra.mxu0 %vm1505_vm11, %v2309_v12  ;;  %v7908_v12 = vor.u32 %v9135_v20, %v7907_v17  ;;  %v9143_v17 = vld [vmem:[#allocation5 + $0x3f4] sm:$0xf0]  ;;  %v7941_v20 = vld [vmem:[#allocation5 + $0x430] sm:$0xf] }
0x12c1   : > { %2564 = vmatpush.bf16.msrb.mxu3 %v7908_v12 }
0x133c   : > { %v2354_v62 = vpop.f32.mrf.mxu0 }
0x133d   : > { %v2359_v53 = vadd.f32 %v2354_v62, %v10843_v41  ;;  %v7897_v62 = vld [vmem:[#allocation5 + $0x340] sm:$0xf] }
0x133f   : > { %v2362_v29 = vadd.f32 %v2361_v34, %v2359_v53  ;;  %v7903_v53 = vld [vmem:[#allocation5 + $0x350] sm:$0xf] }
0x1341   : > { %v2366_v18 = vsel %vm381_vm1, %v2362_v29, 0.0 }
0x1342   : > { %2367 = vadd.xlane.f32.xlu0 %v2366_v18  ;;  %v9134_v18 = vld [vmem:[#allocation5 + $0x354] sm:$0xf0] }
0x1344   : > { %v2356_v15 = vpop.f32.mrf.mxu0 }
0x1345   : > { %v2360_v2 = vadd.f32 %v2356_v15, %v10848_v58  ;;  %v7904_v15 = vor.u32 %v9134_v18, %v7903_v53  ;;  %v9151_v53 = vld [vmem:[#allocation5 + $0x474] sm:$0xf0] }
0x1347   : > { %v2363_v30 = vadd.f32 %v2361_v34, %v2360_v2  ;;  %v9133_v34 = vld [vmem:[#allocation5 + $0x344] sm:$0xf0]  ;;  %2565 = vmatpush.bf16.msrb.mxu3 %v7904_v15  ;;  %v7920_v15 = vld [vmem:[#allocation5 + $0x3e0] sm:$0xf] }
0x1349   : > { %v2369_v54 = vsel %vm381_vm1, %v2363_v30, 0.0 }
0x134a   : > { %2370 = vadd.xlane.f32.xlu1 %v2369_v54  ;;  %v7893_v54 = vld [vmem:[#allocation5 + $0x330] sm:$0xf] }
0x13b5   : > { %v2368_v38 = vpop.xlane.xlu0 %2367 }
0x13b6   : > { %v2372_v4 = vmul.f32 %v2368_v38, %v10281_v60  ;;  %v9132_v38 = vld [vmem:[#allocation5 + $0x334] sm:$0xf0] }
0x13b8   : > { %v2374_v39 = vsub.f32 %v2362_v29, %v2372_v4  ;;  %v7898_v29 = vor.u32 %v9133_v34, %v7897_v62  ;;  %v7894_v4 = vor.u32 %v9132_v38, %v7893_v54  ;;  %v9147_v62 = vld [vmem:[#allocation5 + $0x434] sm:$0xf0]  ;;  %v7958_v34 = vld [vmem:[#allocation5 + $0x470] sm:$0xf]  ;;  %v9146_v38 = vld [vmem:[#allocation5 + $0x424] sm:$0xf0] }
0x13b9   : > { %v7959_v18 = vor.u32 %v9151_v53, %v7958_v34 }
0x13ba   : > { %v2376_v52 = vmul.f32 %v2374_v39, %v2374_v39  ;;  %2513 = vmatpush.bf16.msra.mxu2 %v7898_v29  ;;  %v7942_v29 = vor.u32 %v9147_v62, %v7941_v20 }
0x13bc   : > { %v2378_v47 = vsel %vm381_vm1, %v2376_v52, 0.0 }
0x13bd   : > { %2379 = vadd.xlane.f32.xlu2 %v2378_v47  ;;  %v2371_v41 = vpop.xlane.xlu1 %2370 }
0x13be   : > { %v2373_v8 = vmul.f32 %v2371_v41, %v10281_v60  ;;  %2514 = vmatpush.bf16.msra.mxu2 %v7894_v4  ;;  %v7954_v4 = vld [vmem:[#allocation5 + $0x460] sm:$0xf] }
0x13c0   : > { %v2375_v22 = vsub.f32 %v2363_v30, %v2373_v8 }
0x13c2   : > { %v2377_v61 = vmul.f32 %v2375_v22, %v2375_v22  ;;  %2736 = vmatpush.bf16.msrb.mxu2 %v7942_v29 }
0x13c4   : > { %v2381_v11 = vsel %vm381_vm1, %v2377_v61, 0.0 }
0x13c5   : > { %2382 = vadd.xlane.f32.xlu0 %v2381_v11 }
0x1430   : > { %v2380_v58 = vpop.xlane.xlu2 %2379 }
0x1431   : > { %v2384_v33 = vmul.f32 %v2380_v58, %v10281_v60  ;;  %v2417_v58 = vld [vmem:[#allocation7 + $0x350] ss:$0 sm:$0xff] }
0x1433   : > { %v2386_v32 = vadd.f32 1e-05, %v2384_v33 }
0x1435   : > { %9657 = vrsqrt.f32 %v2386_v32  ;;  %vm2394_vm9 = vweird.f32 %v2386_v32 }
0x1438   : > { %v2383_v21 = vpop.xlane.xlu0 %2382 }
0x1439   : > { %v2385_v49 = vmul.f32 %v2383_v21, %v10281_v60  ;;  %v2365_v60 = vld [vmem:[#allocation7 + $0x2c0] ss:$0 sm:$0xff] }
0x143b   : > { %v9658_v57 = vpop.eup %9657  ;;  %v2387_v0 = vadd.f32 1e-05, %v2385_v49 }
0x143c   : > { %v2389_v6 = vmul.f32 %v9658_v57, %v2386_v32  ;;  %vm2395_vm8 = vweird.f32 %v9658_v57 }
0x143d   : > { %9659 = vrsqrt.f32 %v2387_v0  ;;  %vm2396_vm10 = vmor %vm2394_vm9, %vm2395_vm8  ;;  %vm2404_vm2 = vweird.f32 %v2387_v0  ;;  %vm2825_vm9 = vcmask 1043456  }
0x143e   : > { %v2390_v43 = vmul.f32 %v9658_v57, %v2389_v6  ;;  %v10116_v6 = vmov 64.0  }
0x143f   : > { %9661 = vrcp.f32 %v10116_v6 }
0x1440   : > { %v2391_v14 = vmul.f32 0.5, %v2390_v43 }
0x1442   : > { %v2392_v23 = vsub.f32 1.5, %v2391_v14 }
0x1443   : > { %v9660_v31 = vpop.eup %9659 }
0x1444   : > { %v2393_v45 = vmul.f32 %v9658_v57, %v2392_v23  ;;  %v2399_v9 = vmul.f32 %v9660_v31, %v2387_v0  ;;  %vm2405_vm15 = vweird.f32 %v9660_v31 }
0x1445   : > { %vm2406_vm3 = vmor %vm2404_vm2, %vm2405_vm15  ;;  %v9662_v43 = vpop.eup %9661 }
0x1446   : > { %v2397_v1 = vsel %vm2396_vm10, %v9658_v57, %v2393_v45  ;;  %v2400_v7 = vmul.f32 %v9660_v31, %v2399_v9  ;;  %v2578_v14 = vmul.f32 64.0, %v9662_v43  ;;  %vm2582_vm4 = vweird.f32 %v9662_v43 }
0x1447   : > { %v2408_v13 = vmul.f32 %v2397_v1, %v2374_v39  ;;  %vm2812_vm10 = vcmask 64512  }
0x1448   : > { %v2401_v59 = vmul.f32 0.5, %v2400_v7  ;;  %v2579_v23 = vsub.f32 1.0, %v2578_v14  ;;  %v7946_v14 = vld [vmem:[#allocation5 + $0x440] sm:$0xf] }
0x1449   : > { %v2410_v16 = vmul.f32 %v2408_v13, %v2364_v46 }
0x144a   : > { %v2402_v3 = vsub.f32 1.5, %v2401_v59 }
0x144b   : > { %v2412_v40 = vadd.f32 %v2410_v16, %v2365_v60 }
0x144c   : > { %v2403_v19 = vmul.f32 %v9660_v31, %v2402_v3 }
0x144d   : > { %2414 = vst.msk [vmem:[%s10886_s26] sm:$0xff] %vm381_vm1, %v2412_v40 }
0x144e   : > { %v2407_v25 = vsel %vm2406_vm3, %v9660_v31, %v2403_v19  ;;  %v2580_v31 = vmul.f32 %v9662_v43, %v2579_v23  ;;  %v9148_v23 = vld [vmem:[#allocation5 + $0x444] sm:$0xf0] }
0x144f   : > { %v2409_v28 = vmul.f32 %v2407_v25, %v2375_v22 }
0x1450   : > { %v2581_v45 = vadd.f32 %v9662_v43, %v2580_v31 }
0x1451   : > { %v2411_v48 = vmul.f32 %v2409_v28, %v2364_v46 }
0x1452   : > { %v10899_v9 = vsel %vm2582_vm4, %v9662_v43, %v2581_v45  ;;  %v9144_v43 = vld [vmem:[#allocation5 + $0x404] sm:$0xf0]  ;;  %v7947_v45 = vor.u32 %v9148_v23, %v7946_v14  ;;  %vm2622_vm4 = vcmp.eq.s32.totalorder %v10572_v35, 7 }
0x1453   : > { %v2413_v55 = vadd.f32 %v2411_v48, %v2365_v60 }
0x1455   : > { %v2416_v42 = vpack.c.bf16 %v2413_v55, %v2412_v40  ;;  %2415 = vst.msk [vmem:[%s10886_s26 + $0x8] sm:$0xff] %vm381_vm1, %v2413_v55  ;;  %v2572_v55 = vld [vmem:[#allocation7 + $0x360] ss:$0 sm:$0xff] }
0x1457   : > { %2430 = vmatpush.bf16.msra.mxu0 %v2416_v42  ;;  %2532 = vmatpush.bf16.msrb.mxu1 %v2416_v42 }
0x145a   : > { %7880 = vmatmul.msk.bf16.vlgmr.msra.gmra.mxu0 %vm346_vm0, %v2419_v5  ;;  %7900 = vmatmul.msk.bf16.vlgmr.msrb.gmra.mxu1 %vm346_vm0, %v2521_v56 }
0x145b   : > { %2462 = vmatpush.bf16.msrb.mxu0 %v7888_v26  ;;  %2782 = vmatpush.bf16.msra.mxu1 %v7959_v18 }
0x145f   : > { %2463 = vmatpush.bf16.msrb.mxu0 %v7884_v50 }
0x1463   : > { %2481 = vmatpush.bf16.msra.mxu0 %v2416_v42  ;;  %v2573_v42 = vld [vmem:[#allocation7 + $0x370] ss:$0 sm:$0xff] }
0x14d7   : > { %v2432_v27 = vpop.f32.mrf.mxu0  ;;  %v2534_v2 = vpop.f32.mrf.mxu1 }
0x14d8   : > { %v2436_v36 = vpack.c.bf16 %v2432_v27, %v2432_v27  ;;  %v2538_v30 = vpack.c.bf16 %v2534_v2, %v2534_v2  ;;  %v9142_v2 = vld [vmem:[#allocation5 + $0x3e4] sm:$0xf0] }
0x14d9   : > { %v7921_v54 = vor.u32 %v9142_v2, %v7920_v15 }
0x14da   : > { %7889 = vmatmul.msk.bf16.vlgmr.msrb.gmra.mxu0 %vm381_vm1, %v2436_v36  ;;  %7909 = vmatmul.msk.bf16.vlgmr.msrb.gmra.mxu3 %vm381_vm1, %v2538_v30  ;;  %v7937_v30 = vld [vmem:[#allocation5 + $0x420] sm:$0xf] }
0x14df   : > { %v2434_v24 = vpop.f32.mrf.mxu0  ;;  %v2536_v39 = vpop.f32.mrf.mxu1 }
0x14e0   : > { %v9150_v39 = vld [vmem:[#allocation5 + $0x464] sm:$0xf0] }
0x14ea   : > { %7890 = vmatmul.msk.bf16.vlgmr.msra.gmra.mxu0 %vm346_vm0, %v2470_v37  ;;  %v7924_v37 = vld [vmem:[#allocation5 + $0x3f0] sm:$0xf] }
0x14eb   : > { %v7925_v12 = vor.u32 %v9143_v17, %v7924_v37  ;;  %v2707_v17 = vld [vmem:[#allocation7 + $0x3b0] ss:$0 sm:$0xff] }
0x14ed   : > { %2690 = vmatpush.bf16.msrb.mxu0 %v7925_v12 }
0x14f1   : > { %2691 = vmatpush.bf16.msrb.mxu0 %v7921_v54  ;;  %v7967_v54 = vld [vmem:[#allocation5 + $0x380] sm:$0xf] }
0x1557   : > { %v2465_v52 = vpop.f32.mrf.mxu0 }
0x1558   : > { %v2469_v33 = vadd.f32 %v2465_v52, %v2417_v58  ;;  %v7938_v52 = vor.u32 %v9146_v38, %v7937_v30  ;;  %v7950_v58 = vld [vmem:[#allocation5 + $0x450] sm:$0xf]  ;;  %v9137_v38 = vld [vmem:[#allocation5 + $0x384] sm:$0xf0] }
0x155a   : > { %2737 = vmatpush.bf16.msrb.mxu2 %v7938_v52  ;;  %v9138_v52 = vld [vmem:[#allocation5 + $0x394] sm:$0xf0] }
0x155d   : > { %v2567_v61 = vpop.f32.mrf.mxu3 }
0x155f   : > { %v2467_v47 = vpop.f32.mrf.mxu0 }
0x1560   : > { %v7955_v47 = vor.u32 %v9150_v39, %v7954_v4  ;;  %v10927_v4 = vor.u32 %v9137_v38, %v7967_v54  ;;  %v7971_v39 = vld [vmem:[#allocation5 + $0x390] sm:$0xf] }
0x1562   : > { %2783 = vmatpush.bf16.msra.mxu1 %v7955_v47  ;;  %v10931_v47 = vor.u32 %v9138_v52, %v7971_v39 }
0x1565   : > { %v2569_v11 = vpop.f32.mrf.mxu3 }
0x1566   : > { %v9145_v11 = vld [vmem:[#allocation5 + $0x414] sm:$0xf0] }
0x1567   : > { %v2483_v41 = vpop.f32.mrf.mxu0 }
0x1568   : > { %v2487_v8 = vpack.c.bf16 %v2483_v41, %v2483_v41  ;;  %v7916_v41 = vld [vmem:[#allocation5 + $0x3d0] sm:$0xf] }
0x156a   : > { %7899 = vmatmul.msk.bf16.vlgmr.msra.gmra.mxu2 %vm381_vm1, %v2487_v8  ;;  %v9141_v8 = vld [vmem:[#allocation5 + $0x3d4] sm:$0xf0] }
0x156f   : > { %v2485_v22 = vpop.f32.mrf.mxu0 }
0x1570   : > { %v7933_v22 = vld [vmem:[#allocation5 + $0x410] sm:$0xf] }
0x15ed   : > { %v2516_v32 = vpop.f32.mrf.mxu2 }
0x15ee   : > { %v2520_v21 = vadd.f32 %v2516_v32, %v2469_v33  ;;  %v9149_v33 = vld [vmem:[#allocation5 + $0x454] sm:$0xf0]  ;;  %v7934_v32 = vor.u32 %v9145_v11, %v7933_v22  ;;  %v10939_v11 = vld [vmem:[#allocation7 + $0x2d0] sm:$0xff] }
0x15f0   : > { %v2571_v49 = vadd.f32 %v2567_v61, %v2520_v21  ;;  %v7917_v61 = vor.u32 %v9141_v8, %v7916_v41  ;;  %v7951_v21 = vor.u32 %v9149_v33, %v7950_v58  ;;  %2738 = vmatpush.bf16.msrb.mxu2 %v7934_v32  ;;  %v7975_v41 = vld [vmem:[#allocation5 + $0x3a0] sm:$0xf]  ;;  %v9139_v8 = vld [vmem:[#allocation5 + $0x3a4] sm:$0xf0]  ;;  %v10941_v58 = vld [vmem:[#allocation7 + $0x2e0] sm:$0xff] }
0x15f1   : > { %v10935_v22 = vor.u32 %v9139_v8, %v7975_v41 }
0x15f2   : > { %v2574_v57 = vsel %vm1505_vm11, %v2571_v49, 0.0  ;;  %2692 = vmatpush.bf16.msrb.mxu0 %v7917_v61  ;;  %2784 = vmatpush.bf16.msra.mxu1 %v7951_v21 }
0x15f3   : > { %2575 = vadd.xlane.f32.xlu1 %v2574_v57  ;;  %v9140_v57 = vld [vmem:[#allocation5 + $0x3c4] sm:$0xf0] }
0x15f5   : > { %v2518_v0 = vpop.f32.mrf.mxu2 }
0x15f6   : > { %v7929_v0 = vld [vmem:[#allocation5 + $0x400] sm:$0xf]  ;;  %2785 = vmatpush.bf16.msra.mxu1 %v7947_v45 }
0x15f7   : > { %v7930_v31 = vor.u32 %v9144_v43, %v7929_v0  ;;  %v10946_v0 = vld [vmem:[#allocation7 + $0x2f0] sm:$0xff] }
0x15f9   : > { %2739 = vmatpush.bf16.msrb.mxu2 %v7930_v31 }
0x1666   : > { %v2576_v1 = vpop.xlane.xlu1 %2575 }
0x1667   : > { %v2584_v7 = vmul.f32 %v10899_v9, %v2576_v1 }
0x1669   : > { %v2585_v46 = vsub.f32 %v2571_v49, %v2584_v7  ;;  %v7912_v49 = vld [vmem:[#allocation5 + $0x3c0] sm:$0xf] }
0x166a   : > { %v7913_v6 = vor.u32 %v9140_v57, %v7912_v49 }
0x166b   : > { %v2586_v13 = vmul.f32 %v2585_v46, %v2585_v46 }
0x166c   : > { %2693 = vmatpush.bf16.msrb.mxu0 %v7913_v6  ;;  %v10948_v6 = vld [vmem:[#allocation7 + $0x300] sm:$0xff] }
0x166d   : > { %v2587_v59 = vsel %vm1505_vm11, %v2586_v13, 0.0 }
0x166e   : > { %2588 = vadd.xlane.f32.xlu2 %v2587_v59 }
0x16e1   : > { %v2589_v60 = vpop.xlane.xlu2 %2588 }
0x16e2   : > { %v2590_v16 = vmul.f32 %v2589_v60, %v10899_v9 }
0x16e4   : > { %v2591_v3 = vadd.f32 1e-05, %v2590_v16 }
0x16e6   : > { %9663 = vrsqrt.f32 %v2591_v3  ;;  %vm2598_vm6 = vweird.f32 %v2591_v3 }
0x16ec   : > { %v9664_v40 = vpop.eup %9663 }
0x16ed   : > { %v2593_v19 = vmul.f32 %v9664_v40, %v2591_v3  ;;  %vm2599_vm5 = vweird.f32 %v9664_v40 }
0x16ee   : > { %vm2600_vm12 = vmor %vm2598_vm6, %vm2599_vm5 }
0x16ef   : > { %v2594_v25 = vmul.f32 %v9664_v40, %v2593_v19  ;;  %v2623_v19 = vld [vmem:[#allocation7 + $0x380] ss:$0 sm:$0xff] }
0x16f1   : > { %v2595_v28 = vmul.f32 0.5, %v2594_v25 }
0x16f3   : > { %v2596_v48 = vsub.f32 1.5, %v2595_v28 }
0x16f5   : > { %v2597_v44 = vmul.f32 %v9664_v40, %v2596_v48  ;;  %v2624_v48 = vld [vmem:[#allocation7 + $0x390] ss:$0 sm:$0xff] }
0x16f7   : > { %v2601_v51 = vsel %vm2600_vm12, %v9664_v40, %v2597_v44 }
0x16f8   : > { %v2602_v26 = vmul.f32 %v2601_v51, %v2585_v46 }
0x16fa   : > { %v2603_v63 = vmul.f32 %v2602_v26, %v2572_v55  ;;  %v2658_v26 = vld [vmem:[#allocation7 + $0x3a0] ss:$0 sm:$0xff] }
0x16fc   : > { %v10904_v10 = vadd.f32 %v2603_v63, %v2573_v42  ;;  %v2753_v42 = vld [vmem:[#allocation7 + $0x3c0] ss:$0 sm:$0xff] }
0x16fe   : > { %v2625_v5 = vsel %vm1505_vm11, %v10904_v10, 0.0 }
0x16ff   : > { %2626 = vadd.xlane.f32.xlu0 %v2625_v5 }
0x1772   : > { %v2627_v50 = vpop.xlane.xlu0 %2626 }
0x1773   : > { %v2628_v56 = vmul.f32 %v2627_v50, %v10899_v9 }
0x1775   : > { %v10910_v27 = vsub.f32 %v10904_v10, %v2628_v56 }
0x1777   : > { %v2630_v36 = vmul.f32 %v10910_v27, %v10910_v27 }
0x1779   : > { %v2631_v24 = vsel %vm1505_vm11, %v2630_v36, 0.0  ;;  %v7963_v36 = vld [vmem:[#allocation5 + $0x370] sm:$0xf] }
0x177a   : > { %2632 = vadd.xlane.f32.xlu1 %v2631_v24  ;;  %v9136_v24 = vld [vmem:[#allocation5 + $0x374] sm:$0xf0] }
0x177b   : > { %v10921_v12 = vor.u32 %v9136_v24, %v7963_v36 }
0x17ed   : > { %v2633_v1 = vpop.xlane.xlu1 %2632 }
0x17ee   : > { %v2634_v7 = vmul.f32 %v2633_v1, %v10899_v9  ;;  %v10953_v1 = vld [vmem:[#allocation7 + $0x310] sm:$0xff] }
0x17f0   : > { %v2635_v46 = vadd.f32 1e-05, %v2634_v7  ;;  %v10955_v7 = vld [vmem:[#allocation7 + $0x320] sm:$0xff] }
0x17f2   : > { %9665 = vrsqrt.f32 %v2635_v46  ;;  %vm2642_vm14 = vweird.f32 %v2635_v46 }
0x17f8   : > { %v9666_v13 = vpop.eup %9665 }
0x17f9   : > { %v2637_v59 = vmul.f32 %v9666_v13, %v2635_v46  ;;  %vm2643_vm13 = vweird.f32 %v9666_v13 }
0x17fa   : > { %vm2644_vm8 = vmor %vm2642_vm14, %vm2643_vm13 }
0x17fb   : > { %v2638_v60 = vmul.f32 %v9666_v13, %v2637_v59 }
0x17fd   : > { %v2639_v16 = vmul.f32 0.5, %v2638_v60 }
0x17ff   : > { %v2640_v3 = vsub.f32 1.5, %v2639_v16 }
0x1801   : > { %v2641_v40 = vmul.f32 %v9666_v13, %v2640_v3  ;;  %v10960_v3 = vld [vmem:[#allocation7 + $0x330] sm:$0xff] }
0x1803   : > { %v2645_v25 = vsel %vm2644_vm8, %v9666_v13, %v2641_v40  ;;  %v10962_v40 = vld [vmem:[#allocation7 + $0x340] sm:$0xff] }
0x1804   : > { %v2646_v28 = vmul.f32 %v2645_v25, %v10910_v27 }
0x1806   : > { %v2647_v44 = vmul.f32 %v2646_v28, %v2623_v19 }
0x1808   : > { %v2648_v51 = vadd.f32 %v2647_v44, %v2624_v48 }
0x180a   : > { %v2649_v55 = vpack.c.bf16 %v2648_v51, %v2648_v51 }
0x180c   : > { %7926 = vmatmul.msk.bf16.vlgmr.msrb.gmra.mxu0 %vm1505_vm11, %v2649_v55  ;;  %7943 = vmatmul.msk.bf16.vlgmr.msrb.gmra.mxu2 %vm1505_vm11, %v2649_v55 }
0x180d   : > { %7960 = vmatmul.msk.bf16.vlgmr.msra.gmra.mxu1 %vm1505_vm11, %v2649_v55 }
0x1889   : > { %v2695_v63 = vpop.f32.mrf.mxu0 }
0x188a   : > { %v2696_v5 = vadd.f32 %v2695_v63, %v2658_v26  ;;  %v2787_v50 = vpop.f32.mrf.mxu1 }
0x188b   : > { %v2788_v56 = vadd.f32 %v2787_v50, %v2753_v42 }
0x188c   : > { %v2791_v27 = vpack.c.bf16 %v2696_v5, %v2696_v5 }
0x188d   : > { %v3015_v37 = vpack.c.bf16 %v2788_v56, %v2788_v56 }
0x188e   : > { %v2827_v20 = vsel %vm2825_vm9, %v2791_v27, 0 }
0x188f   : > { %v3029_v62 = vsel %vm2825_vm9, %v3015_v37, 0  ;;  %v2741_v34 = vpop.f32.mrf.mxu2  ;;  %2836 = vmatpush.bf16.msra.mxu3 %v2827_v20 }
0x1890   : > { %v2742_v53 = vadd.f32 %v2741_v34, %v2707_v17  ;;  %3038 = vmatpush.bf16.msra.mxu2 %v3029_v62 }
0x1891   : > { %v2697_v29 = vpop.f32.mrf.mxu0 }
0x1892   : > { %v2870_v18 = vpack.c.bf16 %v2742_v53, %v2742_v53  ;;  %v2789_v15 = vpop.f32.mrf.mxu1  ;;  %7977 = vmatmul.msk.bf16.vlgmr.msra.gmra.mxu3 %vm2812_vm10, %v10921_v12 }
0x1894   : > { %v2884_v2 = vsel %vm1505_vm11, %v2870_v18, 0 }
0x1895   : > { %2893 = vmatpush.bf16.xpose.msra.mxu0 %v2884_v2 }
0x1897   : > { %v2743_v30 = vpop.f32.mrf.mxu2 }
0x18a2   : > { %7978 = vmatmul.msk.bf16.gmra.mxu3 %vm2812_vm10, %v10927_v4 }
0x18b2   : > { %7979 = vmatmul.msk.bf16.gmra.mxu3 %vm2812_vm10, %v10931_v47 }
0x18c2   : > { %7980 = vmatmul.msk.bf16.gmra.mxu3 %vm2812_vm10, %v10935_v22 }
0x1915   : > { %v2838_v61 = vpop.f32.mrf.mxu3 }
0x1916   : > { %v2858_v32 = vmul.f32 %v2838_v61, %v10939_v11 }
0x191d   : > { %v2840_v33 = vpop.f32.mrf.mxu3 }
0x191e   : > { %v2859_v21 = vmul.f32 %v2840_v33, %v10941_v58 }
0x1920   : > { %v2866_v49 = vpack.c.bf16 %v2859_v21, %v2858_v32 }
0x1922   : > { %7981 = vmatmul.msk.bf16.vlgmr.msra.gmra.mxu0 %vm1505_vm11, %v2866_v49 }
0x1925   : > { %v2843_v57 = vpop.f32.mrf.mxu3 }
0x1926   : > { %v2860_v14 = vmul.f32 %v2843_v57, %v10946_v0 }
0x192d   : > { %v2845_v43 = vpop.f32.mrf.mxu3 }
0x192e   : > { %v2861_v23 = vmul.f32 %v2845_v43, %v10948_v6 }
0x1930   : > { %v2867_v31 = vpack.c.bf16 %v2861_v23, %v2860_v14 }
0x1932   : > { %7982 = vmatmul.msk.bf16.gmra.mxu0 %vm1505_vm11, %v2867_v31 }
0x1935   : > { %v2848_v45 = vpop.f32.mrf.mxu3 }
0x1936   : > { %v2862_v13 = vmul.f32 %v2848_v45, %v10953_v1 }
0x193d   : > { %v2850_v46 = vpop.f32.mrf.mxu3 }
0x193e   : > { %v2863_v59 = vmul.f32 %v2850_v46, %v10955_v7 }
0x1940   : > { %v2868_v60 = vpack.c.bf16 %v2863_v59, %v2862_v13 }
0x1942   : > { %7983 = vmatmul.msk.bf16.gmra.mxu0 %vm1505_vm11, %v2868_v60 }
0x1945   : > { %v2853_v16 = vpop.f32.mrf.mxu3 }
0x1946   : > { %v2864_v25 = vmul.f32 %v2853_v16, %v10960_v3 }
0x194d   : > { %v2855_v19 = vpop.f32.mrf.mxu3 }
0x194e   : > { %v2865_v28 = vmul.f32 %v2855_v19, %v10962_v40 }
0x1950   : > { %v2869_v48 = vpack.c.bf16 %v2865_v28, %v2864_v25 }
0x1952   : > { %7984 = vmatmul.msk.bf16.gmra.mxu0 %vm1505_vm11, %v2869_v48 }
0x199f   : > { %v2895_v44 = vpop.f32.mrf.mxu0 }
0x19a0   : > { %v2915_v51 = vmul.f32 0.35355338, %v2895_v44 }
0x19a2   : > { %v2923_v55 = vsel %vm2812_vm10, %v2915_v51, -inf }
0x19a3   : > { %2924 = vmax.xlane.f32.xlu2 %v2923_v55 }
0x19a7   : > { %v2897_v26 = vpop.f32.mrf.mxu0 }
0x19a8   : > { %v2916_v42 = vmul.f32 0.35355338, %v2897_v26 }
0x19aa   : > { %v2926_v63 = vsel %vm2812_vm10, %v2916_v42, -inf }
0x19ab   : > { %2927 = vmax.xlane.f32.xlu0 %v2926_v63 }
0x19af   : > { %v2900_v5 = vpop.f32.mrf.mxu0 }
0x19b0   : > { %v2917_v50 = vmul.f32 0.35355338, %v2900_v5 }
0x19b2   : > { %v2929_v56 = vsel %vm2812_vm10, %v2917_v50, -inf }
0x19b3   : > { %2930 = vmax.xlane.f32.xlu1 %v2929_v56 }
0x19b7   : > { %v2902_v36 = vpop.f32.mrf.mxu0 }
0x19b8   : > { %v2918_v24 = vmul.f32 0.35355338, %v2902_v36 }
0x19ba   : > { %v2932_v27 = vsel %vm2812_vm10, %v2918_v24, -inf }
0x19bb   : > { %2933 = vmax.xlane.f32.xlu2 %v2932_v27 }
0x19bf   : > { %v2905_v37 = vpop.f32.mrf.mxu0 }
0x19c0   : > { %v2919_v17 = vmul.f32 0.35355338, %v2905_v37 }
0x19c2   : > { %v2935_v20 = vsel %vm2812_vm10, %v2919_v17, -inf }
0x19c3   : > { %2936 = vmax.xlane.f32.xlu0 %v2935_v20 }
0x19c7   : > { %v2907_v62 = vpop.f32.mrf.mxu0 }
0x19c8   : > { %v2920_v34 = vmul.f32 0.35355338, %v2907_v62 }
0x19ca   : > { %v2938_v53 = vsel %vm2812_vm10, %v2920_v34, -inf }
0x19cb   : > { %2939 = vmax.xlane.f32.xlu1 %v2938_v53 }
0x19cf   : > { %v2910_v29 = vpop.f32.mrf.mxu0 }
0x19d0   : > { %v2921_v18 = vmul.f32 0.35355338, %v2910_v29 }
0x19d2   : > { %v2941_v15 = vsel %vm2812_vm10, %v2921_v18, -inf }
0x19d3   : > { %2942 = vmax.xlane.f32.xlu2 %v2941_v15 }
0x19d7   : > { %v2912_v2 = vpop.f32.mrf.mxu0 }
0x19d8   : > { %v2922_v30 = vmul.f32 0.35355338, %v2912_v2 }
0x19da   : > { %v2944_v54 = vsel %vm2812_vm10, %v2922_v30, -inf }
0x19db   : > { %2945 = vmax.xlane.f32.xlu0 %v2944_v54 }
0x1a16   : > { %v2925_v38 = vpop.xlane.xlu2 %2924 }
0x1a17   : > { %v2947_v39 = vsub.f32 %v2915_v51, %v2925_v38 }
0x1a19   : > { %v2955_v52 = vmul.f32 1.442695, %v2947_v39 }
0x1a1b   : > { %9667 = vpow2.f32 %v2955_v52 }
0x1a1e   : > { %v2928_v41 = vpop.xlane.xlu0 %2927 }
0x1a1f   : > { %v2948_v8 = vsub.f32 %v2916_v42, %v2928_v41 }
0x1a21   : > { %v9668_v61 = vpop.eup %9667  ;;  %v2957_v33 = vmul.f32 1.442695, %v2948_v8 }
0x1a22   : > { %v2971_v32 = vsel %vm2812_vm10, %v9668_v61, 0.0 }
0x1a23   : > { %9669 = vpow2.f32 %v2957_v33  ;;  %2972 = vadd.xlane.f32.xlu1 %v2971_v32 }
0x1a26   : > { %v2931_v21 = vpop.xlane.xlu1 %2930 }
0x1a27   : > { %v2949_v49 = vsub.f32 %v2917_v50, %v2931_v21 }
0x1a29   : > { %v9670_v57 = vpop.eup %9669  ;;  %v2959_v43 = vmul.f32 1.442695, %v2949_v49 }
0x1a2a   : > { %v2974_v14 = vsel %vm2812_vm10, %v9670_v57, 0.0 }
0x1a2b   : > { %9671 = vpow2.f32 %v2959_v43  ;;  %2975 = vadd.xlane.f32.xlu2 %v2974_v14 }
0x1a2e   : > { %v2934_v23 = vpop.xlane.xlu2 %2933 }
0x1a2f   : > { %v2950_v31 = vsub.f32 %v2918_v24, %v2934_v23 }
0x1a31   : > { %v9672_v45 = vpop.eup %9671  ;;  %v2961_v46 = vmul.f32 1.442695, %v2950_v31 }
0x1a32   : > { %v2977_v13 = vsel %vm2812_vm10, %v9672_v45, 0.0 }
0x1a33   : > { %9673 = vpow2.f32 %v2961_v46  ;;  %2978 = vadd.xlane.f32.xlu0 %v2977_v13 }
0x1a36   : > { %v2937_v59 = vpop.xlane.xlu0 %2936 }
0x1a37   : > { %v2951_v60 = vsub.f32 %v2919_v17, %v2937_v59 }
0x1a39   : > { %v9674_v16 = vpop.eup %9673  ;;  %v2963_v19 = vmul.f32 1.442695, %v2951_v60 }
0x1a3a   : > { %v2980_v25 = vsel %vm2812_vm10, %v9674_v16, 0.0 }
0x1a3b   : > { %9675 = vpow2.f32 %v2963_v19  ;;  %2981 = vadd.xlane.f32.xlu1 %v2980_v25 }
0x1a3e   : > { %v2940_v28 = vpop.xlane.xlu1 %2939 }
0x1a3f   : > { %v2952_v48 = vsub.f32 %v2920_v34, %v2940_v28 }
0x1a41   : > { %v9676_v44 = vpop.eup %9675  ;;  %v2965_v51 = vmul.f32 1.442695, %v2952_v48 }
0x1a42   : > { %v2983_v55 = vsel %vm2812_vm10, %v9676_v44, 0.0 }
0x1a43   : > { %9677 = vpow2.f32 %v2965_v51  ;;  %2984 = vadd.xlane.f32.xlu2 %v2983_v55 }
0x1a46   : > { %v2943_v26 = vpop.xlane.xlu2 %2942 }
0x1a47   : > { %v2953_v42 = vsub.f32 %v2921_v18, %v2943_v26 }
0x1a49   : > { %v9678_v63 = vpop.eup %9677  ;;  %v2967_v5 = vmul.f32 1.442695, %v2953_v42 }
0x1a4a   : > { %v2986_v50 = vsel %vm2812_vm10, %v9678_v63, 0.0 }
0x1a4b   : > { %9679 = vpow2.f32 %v2967_v5  ;;  %2987 = vadd.xlane.f32.xlu0 %v2986_v50 }
0x1a4e   : > { %v2946_v56 = vpop.xlane.xlu0 %2945 }
0x1a4f   : > { %v2954_v36 = vsub.f32 %v2922_v30, %v2946_v56 }
0x1a51   : > { %v9680_v24 = vpop.eup %9679  ;;  %v2969_v27 = vmul.f32 1.442695, %v2954_v36 }
0x1a52   : > { %v2989_v37 = vsel %vm2812_vm10, %v9680_v24, 0.0 }
0x1a53   : > { %9681 = vpow2.f32 %v2969_v27  ;;  %2990 = vadd.xlane.f32.xlu1 %v2989_v37  ;;  %v8004_v37 = vld [vmem:[#allocation5 + $0x4b0] sm:$0xf] }
0x1a59   : > { %v9682_v17 = vpop.eup %9681 }
0x1a5a   : > { %v2992_v20 = vsel %vm2812_vm10, %v9682_v17, 0.0 }
0x1a5b   : > { %2993 = vadd.xlane.f32.xlu2 %v2992_v20 }
0x1a96   : > { %v2973_v62 = vpop.xlane.xlu1 %2972 }
0x1a97   : > { %9683 = vrcp.f32 %v2973_v62 }
0x1a9d   : > { %v9684_v53 = vpop.eup %9683 }
0x1a9e   : > { %v2976_v34 = vpop.xlane.xlu2 %2975  ;;  %v3003_v18 = vmul.f32 %v9684_v53, %v9668_v61  ;;  %v8000_v53 = vld [vmem:[#allocation5 + $0x4a0] sm:$0xf] }
0x1a9f   : > { %9685 = vrcp.f32 %v2976_v34 }
0x1aa5   : > { %v9686_v29 = vpop.eup %9685 }
0x1aa6   : > { %v3004_v15 = vmul.f32 %v9686_v29, %v9670_v57  ;;  %v2979_v30 = vpop.xlane.xlu0 %2978  ;;  %v9154_v29 = vld [vmem:[#allocation5 + $0x4a4] sm:$0xf0] }
0x1aa7   : > { %9687 = vrcp.f32 %v2979_v30  ;;  %v9153_v30 = vld [vmem:[#allocation5 + $0x494] sm:$0xf0] }
0x1aa8   : > { %v3011_v2 = vpack.c.bf16 %v3004_v15, %v3003_v18  ;;  %v10995_v18 = vld [vmem:[#allocation5 + $0x3b0] sm:$0xf]  ;;  %v8001_v15 = vor.u32 %v9154_v29, %v8000_v53 }
0x1aaa   : > { %7985 = vmatmul.msk.bf16.vlgmr.msra.gmra.mxu2 %vm2812_vm10, %v3011_v2  ;;  %v7996_v2 = vld [vmem:[#allocation5 + $0x490] sm:$0xf] }
0x1aad   : > { %v9688_v38 = vpop.eup %9687 }
0x1aae   : > { %v2982_v54 = vpop.xlane.xlu1 %2981  ;;  %v3005_v52 = vmul.f32 %v9688_v38, %v9672_v45  ;;  %v7992_v38 = vld [vmem:[#allocation5 + $0x480] sm:$0xf] }
0x1aaf   : > { %9689 = vrcp.f32 %v2982_v54  ;;  %v7997_v54 = vor.u32 %v9153_v30, %v7996_v2  ;;  %v9167_v2 = vld [vmem:[#allocation5 + $0x574] sm:$0xf0] }
0x1ab5   : > { %v9690_v39 = vpop.eup %9689 }
0x1ab6   : > { %v3006_v41 = vmul.f32 %v9690_v39, %v9674_v16  ;;  %v2985_v33 = vpop.xlane.xlu2 %2984  ;;  %v9152_v39 = vld [vmem:[#allocation5 + $0x484] sm:$0xf0] }
0x1ab7   : > { %9691 = vrcp.f32 %v2985_v33 }
0x1ab8   : > { %v3012_v8 = vpack.c.bf16 %v3006_v41, %v3005_v52  ;;  %v7993_v52 = vor.u32 %v9152_v39, %v7992_v38  ;;  %v9166_v38 = vld [vmem:[#allocation5 + $0x564] sm:$0xf0] }
0x1aba   : > { %7986 = vmatmul.msk.bf16.gmra.mxu2 %vm2812_vm10, %v3012_v8 }
0x1abd   : > { %v9692_v61 = vpop.eup %9691 }
0x1abe   : > { %v2988_v32 = vpop.xlane.xlu0 %2987  ;;  %v3007_v49 = vmul.f32 %v9692_v61, %v9676_v44  ;;  %v3138_v61 = vld [vmem:[#allocation7 + $0x3d0] ss:$0 sm:$0xff] }
0x1abf   : > { %9693 = vrcp.f32 %v2988_v32 }
0x1ac5   : > { %v9694_v21 = vpop.eup %9693 }
0x1ac6   : > { %v3008_v57 = vmul.f32 %v9694_v21, %v9678_v63  ;;  %v2991_v14 = vpop.xlane.xlu1 %2990 }
0x1ac7   : > { %9695 = vrcp.f32 %v2991_v14 }
0x1ac8   : > { %v3013_v43 = vpack.c.bf16 %v3008_v57, %v3007_v49 }
0x1aca   : > { %7987 = vmatmul.msk.bf16.gmra.mxu2 %vm2812_vm10, %v3013_v43 }
0x1acd   : > { %v9696_v31 = vpop.eup %9695 }
0x1ace   : > { %v2994_v23 = vpop.xlane.xlu2 %2993  ;;  %v3009_v46 = vmul.f32 %v9696_v31, %v9680_v24 }
0x1acf   : > { %9697 = vrcp.f32 %v2994_v23 }
0x1ad5   : > { %v9698_v45 = vpop.eup %9697 }
0x1ad6   : > { %v3010_v13 = vmul.f32 %v9698_v45, %v9682_v17  ;;  %v9155_v17 = vld [vmem:[#allocation5 + $0x4b4] sm:$0xf0] }
0x1ad7   : > { %v8005_v62 = vor.u32 %v9155_v17, %v8004_v37  ;;  %v3140_v37 = vld [vmem:[#allocation7 + $0x3e0] ss:$0 sm:$0xff] }
0x1ad8   : > { %v3014_v59 = vpack.c.bf16 %v3010_v13, %v3009_v46  ;;  %v8021_v13 = vld [vmem:[#allocation5 + $0x4f0] sm:$0xf] }
0x1ada   : > { %7988 = vmatmul.msk.bf16.gmra.mxu2 %vm2812_vm10, %v3014_v59  ;;  %v9159_v59 = vld [vmem:[#allocation5 + $0x4f4] sm:$0xf0] }
0x1b2d   : > { %v3040_v60 = vpop.f32.mrf.mxu2 }
0x1b2e   : > { %v3060_v20 = vmul.f32 %v3040_v60, %v10939_v11  ;;  %v8022_v60 = vor.u32 %v9159_v59, %v8021_v13  ;;  %v8026_v59 = vld [vmem:[#allocation5 + $0x500] sm:$0xf] }
0x1b35   : > { %v3042_v16 = vpop.f32.mrf.mxu2 }
0x1b36   : > { %v3061_v24 = vmul.f32 %v3042_v16, %v10941_v58  ;;  %v9158_v16 = vld [vmem:[#allocation5 + $0x4e4] sm:$0xf0] }
0x1b38   : > { %v3068_v34 = vpack.c.bf16 %v3061_v24, %v3060_v20 }
0x1b3d   : > { %v3045_v19 = vpop.f32.mrf.mxu2 }
0x1b3e   : > { %v3062_v36 = vmul.f32 %v3045_v19, %v10946_v0 }
0x1b45   : > { %v3047_v25 = vpop.f32.mrf.mxu2 }
0x1b46   : > { %v3063_v50 = vmul.f32 %v3047_v25, %v10948_v6  ;;  %v8013_v25 = vld [vmem:[#allocation5 + $0x4d0] sm:$0xf] }
0x1b48   : > { %v3069_v27 = vpack.c.bf16 %v3063_v50, %v3062_v36 }
0x1b4d   : > { %v3050_v28 = vpop.f32.mrf.mxu2 }
0x1b4e   : > { %v3064_v5 = vmul.f32 %v3050_v28, %v10953_v1  ;;  %v9157_v28 = vld [vmem:[#allocation5 + $0x4d4] sm:$0xf0] }
0x1b55   : > { %v3052_v48 = vpop.f32.mrf.mxu2 }
0x1b56   : > { %v3065_v42 = vmul.f32 %v3052_v48, %v10955_v7  ;;  %v8014_v48 = vor.u32 %v9157_v28, %v8013_v25 }
0x1b58   : > { %v3070_v56 = vpack.c.bf16 %v3065_v42, %v3064_v5 }
0x1b5d   : > { %v3055_v44 = vpop.f32.mrf.mxu2 }
0x1b5e   : > { %v3066_v55 = vmul.f32 %v3055_v44, %v10960_v3  ;;  %v8009_v44 = vld [vmem:[#allocation5 + $0x4c0] sm:$0xf] }
0x1b65   : > { %v3057_v51 = vpop.f32.mrf.mxu2 }
0x1b66   : > { %v3067_v26 = vmul.f32 %v3057_v51, %v10962_v40  ;;  %v9156_v51 = vld [vmem:[#allocation5 + $0x4c4] sm:$0xf0] }
0x1b68   : > { %v3071_v63 = vpack.c.bf16 %v3067_v26, %v3066_v55  ;;  %v8010_v55 = vor.u32 %v9156_v51, %v8009_v44 }
0x1b6a   : > { %3079 = vmatpush.bf16.msrb.mxu1 %v3071_v63 }
0x1b6e   : > { %3080 = vmatpush.bf16.msrb.mxu1 %v3070_v56 }
0x1b72   : > { %3081 = vmatpush.bf16.msrb.mxu1 %v3069_v27 }
0x1b76   : > { %3082 = vmatpush.bf16.msrb.mxu1 %v3068_v34 }
0x1b79   : > { %7989 = vmatmul.msk.bf16.vlgmr.msrb.gmra.mxu1 %vm1505_vm11, %v10995_v18 }
0x1b7a   : > { %3128 = vmatpush.bf16.msra.mxu1 %v8005_v62  ;;  %v3141_v62 = vld [vmem:[#allocation7 + $0x3f0] ss:$0 sm:$0xff] }
0x1b7e   : > { %3129 = vmatpush.bf16.msra.mxu1 %v8001_v15  ;;  %v8054_v15 = vld [vmem:[#allocation5 + $0x570] sm:$0xf] }
0x1b7f   : > { %v8055_v30 = vor.u32 %v9167_v2, %v8054_v15 }
0x1b81   : > { %3305 = vmatpush.bf16.msrb.mxu3 %v8055_v30 }
0x1b82   : > { %3130 = vmatpush.bf16.msra.mxu1 %v7997_v54  ;;  %v8050_v54 = vld [vmem:[#allocation5 + $0x560] sm:$0xf] }
0x1b83   : > { %v8051_v39 = vor.u32 %v9166_v38, %v8050_v54 }
0x1b85   : > { %3306 = vmatpush.bf16.msrb.mxu3 %v8051_v39 }
0x1b86   : > { %3131 = vmatpush.bf16.msra.mxu1 %v7993_v52  ;;  %v8046_v52 = vld [vmem:[#allocation5 + $0x550] sm:$0xf] }
0x1b8a   : > { %3207 = vmatpush.bf16.msrb.mxu1 %v8022_v60  ;;  %v9160_v60 = vld [vmem:[#allocation5 + $0x504] sm:$0xf0] }
0x1bf6   : > { %v3084_v41 = vpop.f32.mrf.mxu1 }
0x1bf7   : > { %v3088_v8 = vpack.c.bf16 %v3084_v41, %v3084_v41  ;;  %v9165_v41 = vld [vmem:[#allocation5 + $0x554] sm:$0xf0] }
0x1bf9   : > { %8006 = vmatmul.msk.bf16.vlgmr.msra.gmra.mxu1 %vm1505_vm11, %v3088_v8  ;;  %v8042_v8 = vld [vmem:[#allocation5 + $0x540] sm:$0xf] }
0x1bfe   : > { %v3086_v33 = vpop.f32.mrf.mxu1 }
0x1bff   : > { %v8047_v33 = vor.u32 %v9165_v41, %v8046_v52  ;;  %v3319_v52 = vld [vmem:[#allocation7 + $0x430] ss:$0 sm:$0xff] }
0x1c01   : > { %3307 = vmatpush.bf16.msrb.mxu3 %v8047_v33 }
0x1c76   : > { %v3133_v32 = vpop.f32.mrf.mxu1 }
0x1c77   : > { %v3137_v21 = vadd.f32 %v3133_v32, %v10904_v10  ;;  %v8017_v10 = vld [vmem:[#allocation5 + $0x4e0] sm:$0xf]  ;;  %v9164_v32 = vld [vmem:[#allocation5 + $0x544] sm:$0xf0] }
0x1c78   : > { %v8018_v19 = vor.u32 %v9158_v16, %v8017_v10  ;;  %v3175_v10 = vld [vmem:[#allocation7 + $0x400] ss:$0 sm:$0xff]  ;;  %v3220_v16 = vld [vmem:[#allocation7 + $0x410] sm:$0x7] }
0x1c79   : > { %v11001_v49 = vadd.f32 %v3138_v61, %v3137_v21  ;;  %v8043_v61 = vor.u32 %v9164_v32, %v8042_v8  ;;  %v8038_v21 = vld [vmem:[#allocation5 + $0x530] sm:$0xf]  ;;  %v3223_v44 = vperm.slane %v3220_v16, 1 }
0x1c7a   : > { %3208 = vmatpush.bf16.msrb.mxu1 %v8018_v19  ;;  %v8027_v19 = vor.u32 %v9160_v60, %v8026_v59  ;;  %v9179_v59 = vld [vmem:[#allocation5 + $0x634] sm:$0xf0] }
0x1c7b   : > { %v3142_v57 = vsel %vm1505_vm11, %v11001_v49, 0.0  ;;  %3308 = vmatpush.bf16.msrb.mxu3 %v8043_v61 }
0x1c7c   : > { %3143 = vadd.xlane.f32.xlu0 %v3142_v57  ;;  %v9163_v57 = vld [vmem:[#allocation5 + $0x534] sm:$0xf0] }
0x1c7e   : > { %v3135_v43 = vpop.f32.mrf.mxu1  ;;  %3209 = vmatpush.bf16.msrb.mxu1 %v8014_v48  ;;  %v3221_v48 = vperm.slane %v3220_v16, 0 }
0x1c7f   : > { %v8039_v43 = vor.u32 %v9163_v57, %v8038_v21 }
0x1c81   : > { %3309 = vmatpush.bf16.msrb.mxu3 %v8039_v43 }
0x1c82   : > { %3210 = vmatpush.bf16.msrb.mxu1 %v8010_v55 }
0x1cef   : > { %v3144_v14 = vpop.xlane.xlu0 %3143 }
0x1cf0   : > { %v3145_v23 = vmul.f32 %v3144_v14, %v10899_v9  ;;  %v8034_v14 = vld [vmem:[#allocation5 + $0x520] sm:$0xf] }
0x1cf2   : > { %v3146_v31 = vsub.f32 %v11001_v49, %v3145_v23  ;;  %v9162_v23 = vld [vmem:[#allocation5 + $0x524] sm:$0xf0] }
0x1cf4   : > { %v3147_v45 = vmul.f32 %v3146_v31, %v3146_v31 }
0x1cf6   : > { %v3148_v46 = vsel %vm1505_vm11, %v3147_v45, 0.0  ;;  %v8030_v45 = vld [vmem:[#allocation5 + $0x510] sm:$0xf] }
0x1cf7   : > { %3149 = vadd.xlane.f32.xlu1 %v3148_v46  ;;  %v9161_v46 = vld [vmem:[#allocation5 + $0x514] sm:$0xf0] }
0x1cf8   : > { %v8031_v13 = vor.u32 %v9161_v46, %v8030_v45  ;;  %v9175_v46 = vld [vmem:[#allocation5 + $0x5f4] sm:$0xf0] }
0x1d6a   : > { %v3150_v26 = vpop.xlane.xlu1 %3149 }
0x1d6b   : > { %v3151_v42 = vmul.f32 %v3150_v26, %v10899_v9  ;;  %v3226_v26 = vperm.slane %v3220_v16, 2  ;;  %v8066_v16 = vld [vmem:[#allocation5 + $0x5a0] sm:$0xf] }
0x1d6d   : > { %v3152_v63 = vadd.f32 1e-05, %v3151_v42 }
0x1d6f   : > { %9699 = vrsqrt.f32 %v3152_v63  ;;  %vm3159_vm2 = vweird.f32 %v3152_v63 }
0x1d75   : > { %v9700_v5 = vpop.eup %9699 }
0x1d76   : > { %v3154_v50 = vmul.f32 %v9700_v5, %v3152_v63  ;;  %vm3160_vm15 = vweird.f32 %v9700_v5 }
0x1d77   : > { %vm3161_vm3 = vmor %vm3159_vm2, %vm3160_vm15 }
0x1d78   : > { %v3155_v56 = vmul.f32 %v9700_v5, %v3154_v50 }
0x1d7a   : > { %v3156_v36 = vmul.f32 0.5, %v3155_v56 }
0x1d7c   : > { %v3157_v24 = vsub.f32 1.5, %v3156_v36 }
0x1d7e   : > { %v3158_v27 = vmul.f32 %v9700_v5, %v3157_v24 }
0x1d80   : > { %v3162_v17 = vsel %vm3161_vm3, %v9700_v5, %v3158_v27  ;;  %v3229_v27 = vld [vmem:[#allocation7 + $0x420] ss:$0 sm:$0xff] }
0x1d81   : > { %v3163_v20 = vmul.f32 %v3162_v17, %v3146_v31  ;;  %v8035_v31 = vor.u32 %v9162_v23, %v8034_v14  ;;  %v9171_v23 = vld [vmem:[#allocation5 + $0x5b4] sm:$0xf0] }
0x1d83   : > { %v3164_v34 = vmul.f32 %v3163_v20, %v3140_v37  ;;  %3310 = vmatpush.bf16.msrb.mxu3 %v8035_v31  ;;  %v8087_v31 = vld [vmem:[#allocation5 + $0x5f0] sm:$0xf] }
0x1d84   : > { %v8088_v60 = vor.u32 %v9175_v46, %v8087_v31 }
0x1d85   : > { %v3165_v53 = vadd.f32 %v3164_v34, %v3141_v62 }
0x1d86   : > { %3434 = vmatpush.bf16.msrb.mxu0 %v8088_v60 }
0x1d87   : > { %v3166_v29 = vpack.c.bf16 %v3165_v53, %v3165_v53  ;;  %3311 = vmatpush.bf16.msrb.mxu3 %v8031_v13  ;;  %v8104_v13 = vld [vmem:[#allocation5 + $0x630] sm:$0xf] }
0x1d89   : > { %8023 = vmatmul.msk.bf16.vlgmr.msrb.gmra.mxu1 %vm1505_vm11, %v3166_v29 }
0x1d8b   : > { %3312 = vmatpush.bf16.msrb.mxu3 %v8027_v19  ;;  %v9170_v19 = vld [vmem:[#allocation5 + $0x5a4] sm:$0xf0] }
0x1e06   : > { %v3212_v25 = vpop.f32.mrf.mxu1 }
0x1e07   : > { %v3213_v28 = vadd.f32 %v3212_v25, %v3175_v10  ;;  %v8105_v10 = vor.u32 %v9179_v59, %v8104_v13  ;;  %v8083_v25 = vld [vmem:[#allocation5 + $0x5e0] sm:$0xf]  ;;  %v3356_v13 = vld [vmem:[#allocation7 + $0x460] ss:$0 sm:$0xff] }
0x1e08   : > { %v3405_v59 = vld [vmem:[#allocation7 + $0x470] ss:$0 sm:$0xff] }
0x1e09   : > { %v3216_v51 = vrot.slane %v3213_v28, 7  ;;  %v3218_v55 = vrot.slane %v3213_v28, 1  ;;  %v3224_v50 = vmul.f32 %v3223_v44, %v3213_v28  ;;  %3480 = vmatpush.bf16.msrb.mxu2 %v8105_v10  ;;  %v8067_v28 = vor.u32 %v9170_v19, %v8066_v16  ;;  %v8100_v44 = vld [vmem:[#allocation5 + $0x620] sm:$0xf] }
0x1e0b   : > { %v3217_v42 = vsel %vm615_vm7, 0.0, %v3216_v51  ;;  %v3219_v63 = vsel %vm2622_vm4, 0.0, %v3218_v55  ;;  %v9178_v51 = vld [vmem:[#allocation5 + $0x624] sm:$0xf0] }
0x1e0c   : > { %v3222_v5 = vmul.f32 %v3221_v48, %v3217_v42  ;;  %v3227_v36 = vmul.f32 %v3226_v26, %v3219_v63  ;;  %v9174_v48 = vld [vmem:[#allocation5 + $0x5e4] sm:$0xf0]  ;;  %v8101_v26 = vor.u32 %v9178_v51, %v8100_v44  ;;  %v8062_v42 = vld [vmem:[#allocation5 + $0x590] sm:$0xf]  ;;  %v9169_v63 = vld [vmem:[#allocation5 + $0x594] sm:$0xf0] }
0x1e0d   : > { %v8084_v55 = vor.u32 %v9174_v48, %v8083_v25  ;;  %v3451_v44 = vld [vmem:[#allocation7 + $0x480] ss:$0 sm:$0xff] }
0x1e0e   : > { %v3225_v56 = vadd.f32 %v3224_v50, %v3222_v5  ;;  %v3214_v24 = vpop.f32.mrf.mxu1  ;;  %3481 = vmatpush.bf16.msrb.mxu2 %v8101_v26  ;;  %v8079_v5 = vld [vmem:[#allocation5 + $0x5d0] sm:$0xf]  ;;  %v8063_v50 = vor.u32 %v9169_v63, %v8062_v42 }
0x1e0f   : > { %3435 = vmatpush.bf16.msrb.mxu0 %v8084_v55  ;;  %v9177_v24 = vld [vmem:[#allocation5 + $0x614] sm:$0xf0] }
0x1e10   : > { %v3228_v37 = vadd.f32 %v3227_v36, %v3225_v56  ;;  %v9173_v56 = vld [vmem:[#allocation5 + $0x5d4] sm:$0xf0]  ;;  %v8096_v36 = vld [vmem:[#allocation5 + $0x610] sm:$0xf] }
0x1e12   : > { %v3230_v17 = vadd.f32 %v3229_v27, %v3228_v37  ;;  %v8080_v27 = vor.u32 %v9173_v56, %v8079_v5  ;;  %v8097_v37 = vor.u32 %v9177_v24, %v8096_v36 }
0x1e14   : > { %v3232_v20 = vmul.f32 0.044715, %v3230_v17  ;;  %v3231_v2 = vmul.f32 0.5, %v3230_v17  ;;  %3436 = vmatpush.bf16.msrb.mxu0 %v8080_v27  ;;  %3482 = vmatpush.bf16.msrb.mxu2 %v8097_v37 }
0x1e16   : > { %v3233_v62 = vmul.f32 %v3232_v20, %v3230_v17  ;;  %v9168_v20 = vld [vmem:[#allocation5 + $0x584] sm:$0xf0] }
0x1e18   : > { %v3234_v34 = vmul.f32 %v3233_v62, %v3230_v17  ;;  %v8075_v62 = vld [vmem:[#allocation5 + $0x5c0] sm:$0xf] }
0x1e1a   : > { %v3235_v53 = vadd.f32 %v3234_v34, %v3230_v17  ;;  %v8058_v17 = vld [vmem:[#allocation5 + $0x580] sm:$0xf] }
0x1e1b   : > { %v8059_v34 = vor.u32 %v9168_v20, %v8058_v17 }
0x1e1c   : > { %v3236_v29 = vmul.f32 0.7978846, %v3235_v53  ;;  %v9172_v53 = vld [vmem:[#allocation5 + $0x5c4] sm:$0xf0] }
0x1e1e   : > { %9701 = vtanh.f32 %v3236_v29  ;;  %v8092_v29 = vld [vmem:[#allocation5 + $0x600] sm:$0xf] }
0x1e24   : > { %v9702_v15 = vpop.eup %9701 }
0x1e25   : > { %v3238_v30 = vadd.f32 1.0, %v9702_v15  ;;  %v9176_v15 = vld [vmem:[#allocation5 + $0x604] sm:$0xf0] }
0x1e27   : > { %v3239_v54 = vmul.f32 %v3238_v30, %v3231_v2  ;;  %v8076_v2 = vor.u32 %v9172_v53, %v8075_v62  ;;  %v8093_v30 = vor.u32 %v9176_v15, %v8092_v29 }
0x1e29   : > { %v3240_v38 = vpack.c.bf16 %v3239_v54, %v3239_v54  ;;  %3437 = vmatpush.bf16.msrb.mxu0 %v8076_v2  ;;  %3483 = vmatpush.bf16.msrb.mxu2 %v8093_v30 }
0x1e2b   : > { %3313 = vmatmul.bf16.vlgmr.msrb.gmra.mxu3 %v3240_v38 }
0x1eae   : > { %v3314_v39 = vpop.f32.mrf.mxu3 }
0x1eaf   : > { %v3318_v41 = vadd.f32 %v3314_v39, %v11001_v49  ;;  %v8070_v49 = vld [vmem:[#allocation5 + $0x5b0] sm:$0xf] }
0x1eb0   : > { %v8071_v45 = vor.u32 %v9171_v23, %v8070_v49  ;;  %v3322_v23 = vld [vmem:[#allocation7 + $0x450] ss:$0 sm:$0xff] }
0x1eb1   : > { %v11016_v8 = vadd.f32 %v3319_v52, %v3318_v41 }
0x1eb2   : > { %3388 = vmatpush.bf16.msra.mxu1 %v8071_v45 }
0x1eb3   : > { %v3323_v33 = vsel %vm1505_vm11, %v11016_v8, 0.0 }
0x1eb4   : > { %3324 = vadd.xlane.f32.xlu2 %v3323_v33 }
0x1eb6   : > { %v3316_v32 = vpop.f32.mrf.mxu3  ;;  %3389 = vmatpush.bf16.msra.mxu1 %v8067_v28 }
0x1eba   : > { %3390 = vmatpush.bf16.msra.mxu1 %v8063_v50 }
0x1ebe   : > { %3391 = vmatpush.bf16.msra.mxu1 %v8059_v34 }
0x1f27   : > { %v3325_v61 = vpop.xlane.xlu2 %3324 }
0x1f28   : > { %v3326_v21 = vmul.f32 %v3325_v61, %v10899_v9 }
0x1f2a   : > { %v11022_v57 = vsub.f32 %v11016_v8, %v3326_v21 }
0x1f2c   : > { %v3328_v43 = vmul.f32 %v11022_v57, %v11022_v57 }
0x1f2e   : > { %v3329_v14 = vsel %vm1505_vm11, %v3328_v43, 0.0  ;;  %v3321_v43 = vld [vmem:[#allocation7 + $0x440] ss:$0 sm:$0xff] }
0x1f2f   : > { %3330 = vadd.xlane.f32.xlu0 %v3329_v14 }
0x1fa2   : > { %v3331_v54 = vpop.xlane.xlu0 %3330 }
0x1fa3   : > { %v3332_v38 = vmul.f32 %v3331_v54, %v10899_v9 }
0x1fa5   : > { %v3333_v39 = vadd.f32 1e-05, %v3332_v38 }
0x1fa7   : > { %9703 = vrsqrt.f32 %v3333_v39  ;;  %vm3340_vm6 = vweird.f32 %v3333_v39 }
0x1fad   : > { %v9704_v52 = vpop.eup %9703 }
0x1fae   : > { %v3335_v41 = vmul.f32 %v9704_v52, %v3333_v39  ;;  %vm3341_vm5 = vweird.f32 %v9704_v52 }
0x1faf   : > { %vm3342_vm12 = vmor %vm3340_vm6, %vm3341_vm5 }
0x1fb0   : > { %v3336_v33 = vmul.f32 %v9704_v52, %v3335_v41 }
0x1fb2   : > { %v3337_v32 = vmul.f32 0.5, %v3336_v33 }
0x1fb4   : > { %v3338_v61 = vsub.f32 1.5, %v3337_v32 }
0x1fb6   : > { %v3339_v21 = vmul.f32 %v9704_v52, %v3338_v61 }
0x1fb8   : > { %v3343_v14 = vsel %vm3342_vm12, %v9704_v52, %v3339_v21 }
0x1fb9   : > { %v3344_v49 = vmul.f32 %v3343_v14, %v11022_v57 }
0x1fbb   : > { %v3345_v31 = vmul.f32 %v3344_v49, %v3321_v43 }
0x1fbd   : > { %v3346_v45 = vadd.f32 %v3345_v31, %v3322_v23 }
0x1fbf   : > { %v3347_v46 = vpack.c.bf16 %v3346_v45, %v3346_v45 }
0x1fc1   : > { %8072 = vmatmul.msk.bf16.vlgmr.msra.gmra.mxu1 %vm1505_vm11, %v3347_v46  ;;  %8089 = vmatmul.msk.bf16.vlgmr.msrb.gmra.mxu0 %vm1505_vm11, %v3347_v46 }
0x1fc2   : > { %8106 = vmatmul.msk.bf16.vlgmr.msrb.gmra.mxu2 %vm1505_vm11, %v3347_v46 }
0x203e   : > { %v3393_v60 = vpop.f32.mrf.mxu1  ;;  %v3439_v10 = vpop.f32.mrf.mxu0 }
0x203f   : > { %v3394_v16 = vadd.f32 %v3393_v60, %v3356_v13  ;;  %v3440_v19 = vadd.f32 %v3439_v10, %v3405_v59 }
0x2041   : > { %v3489_v25 = vpack.c.bf16 %v3394_v16, %v3394_v16  ;;  %v3534_v28 = vpack.c.bf16 %v3440_v19, %v3440_v19 }
0x2043   : > { %v3491_v57 = vsel %vm2825_vm9, %v3489_v25, 0  ;;  %v3548_v48 = vsel %vm1505_vm11, %v3534_v28, 0 }
0x2044   : > { %3500 = vmatpush.bf16.msrb.mxu1 %v3491_v57  ;;  %3557 = vmatpush.bf16.xpose.msra.mxu3 %v3548_v48 }
0x2045   : > { %v3485_v51 = vpop.f32.mrf.mxu2 }
0x2046   : > { %v3486_v55 = vadd.f32 %v3485_v51, %v3451_v44  ;;  %v3395_v26 = vpop.f32.mrf.mxu1  ;;  %v3441_v42 = vpop.f32.mrf.mxu0 }
0x2047   : > { %8107 = vmatmul.msk.bf16.vlgmr.msrb.gmra.mxu1 %vm2812_vm10, %v10921_v12 }
0x2048   : > { %v3679_v63 = vpack.c.bf16 %v3486_v55, %v3486_v55 }
0x204a   : > { %v3693_v5 = vsel %vm2825_vm9, %v3679_v63, 0 }
0x204b   : > { %3702 = vmatpush.bf16.msra.mxu0 %v3693_v5 }
0x204d   : > { %v3487_v50 = vpop.f32.mrf.mxu2 }
0x2057   : > { %8108 = vmatmul.msk.bf16.gmra.mxu1 %vm2812_vm10, %v10927_v4 }
0x2067   : > { %8109 = vmatmul.msk.bf16.gmra.mxu1 %vm2812_vm10, %v10931_v47 }
0x2077   : > { %8110 = vmatmul.msk.bf16.gmra.mxu1 %vm2812_vm10, %v10935_v22 }
0x20c4   : > { %v3502_v56 = vpop.f32.mrf.mxu1 }
0x20c5   : > { %v3522_v24 = vmul.f32 %v3502_v56, %v10939_v11 }
0x20cc   : > { %v3504_v36 = vpop.f32.mrf.mxu1 }
0x20cd   : > { %v3523_v12 = vmul.f32 %v3504_v36, %v10941_v58 }
0x20cf   : > { %v3530_v27 = vpack.c.bf16 %v3523_v12, %v3522_v24 }
0x20d1   : > { %8111 = vmatmul.msk.bf16.vlgmr.msra.gmra.mxu3 %vm1505_vm11, %v3530_v27 }
0x20d4   : > { %v3507_v37 = vpop.f32.mrf.mxu1 }
0x20d5   : > { %v3524_v20 = vmul.f32 %v3507_v37, %v10946_v0 }
0x20dc   : > { %v3509_v17 = vpop.f32.mrf.mxu1 }
0x20dd   : > { %v3525_v4 = vmul.f32 %v3509_v17, %v10948_v6 }
0x20df   : > { %v3531_v62 = vpack.c.bf16 %v3525_v4, %v3524_v20 }
0x20e1   : > { %8112 = vmatmul.msk.bf16.gmra.mxu3 %vm1505_vm11, %v3531_v62 }
0x20e4   : > { %v3512_v47 = vpop.f32.mrf.mxu1 }
0x20e5   : > { %v3526_v34 = vmul.f32 %v3512_v47, %v10953_v1 }
0x20ec   : > { %v3514_v22 = vpop.f32.mrf.mxu1 }
0x20ed   : > { %v3527_v11 = vmul.f32 %v3514_v22, %v10955_v7 }
0x20ef   : > { %v3532_v53 = vpack.c.bf16 %v3527_v11, %v3526_v34 }
0x20f1   : > { %8113 = vmatmul.msk.bf16.gmra.mxu3 %vm1505_vm11, %v3532_v53 }
0x20f4   : > { %v3517_v58 = vpop.f32.mrf.mxu1 }
0x20f5   : > { %v3528_v15 = vmul.f32 %v3517_v58, %v10960_v3 }
0x20fc   : > { %v3519_v29 = vpop.f32.mrf.mxu1 }
0x20fd   : > { %v3529_v0 = vmul.f32 %v3519_v29, %v10962_v40 }
0x20ff   : > { %v3533_v2 = vpack.c.bf16 %v3529_v0, %v3528_v15 }
0x2101   : > { %8114 = vmatmul.msk.bf16.gmra.mxu3 %vm1505_vm11, %v3533_v2 }
0x2154   : > { %v3559_v6 = vpop.f32.mrf.mxu3 }
0x2155   : > { %v3579_v30 = vmul.f32 0.35355338, %v3559_v6 }
0x2157   : > { %v3587_v54 = vsel %vm2812_vm10, %v3579_v30, -inf }
0x2158   : > { %3588 = vmax.xlane.f32.xlu1 %v3587_v54 }
0x215c   : > { %v3561_v1 = vpop.f32.mrf.mxu3 }
0x215d   : > { %v3580_v38 = vmul.f32 0.35355338, %v3561_v1 }
0x215f   : > { %v3590_v7 = vsel %vm2812_vm10, %v3580_v38, -inf }
0x2160   : > { %3591 = vmax.xlane.f32.xlu2 %v3590_v7 }
0x2164   : > { %v3564_v39 = vpop.f32.mrf.mxu3 }
0x2165   : > { %v3581_v52 = vmul.f32 0.35355338, %v3564_v39 }
0x2167   : > { %v3593_v41 = vsel %vm2812_vm10, %v3581_v52, -inf }
0x2168   : > { %3594 = vmax.xlane.f32.xlu0 %v3593_v41 }
0x216c   : > { %v3566_v3 = vpop.f32.mrf.mxu3 }
0x216d   : > { %v3582_v40 = vmul.f32 0.35355338, %v3566_v3 }
0x216f   : > { %v3596_v33 = vsel %vm2812_vm10, %v3582_v40, -inf }
0x2170   : > { %3597 = vmax.xlane.f32.xlu1 %v3596_v33 }
0x2174   : > { %v3569_v32 = vpop.f32.mrf.mxu3 }
0x2175   : > { %v3583_v61 = vmul.f32 0.35355338, %v3569_v32 }
0x2177   : > { %v3599_v21 = vsel %vm2812_vm10, %v3583_v61, -inf }
0x2178   : > { %3600 = vmax.xlane.f32.xlu2 %v3599_v21 }
0x217c   : > { %v3571_v43 = vpop.f32.mrf.mxu3 }
0x217d   : > { %v3584_v14 = vmul.f32 0.35355338, %v3571_v43 }
0x217f   : > { %v3602_v49 = vsel %vm2812_vm10, %v3584_v14, -inf }
0x2180   : > { %3603 = vmax.xlane.f32.xlu0 %v3602_v49 }
0x2184   : > { %v3574_v23 = vpop.f32.mrf.mxu3 }
0x2185   : > { %v3585_v31 = vmul.f32 0.35355338, %v3574_v23 }
0x2187   : > { %v3605_v45 = vsel %vm2812_vm10, %v3585_v31, -inf }
0x2188   : > { %3606 = vmax.xlane.f32.xlu1 %v3605_v45 }
0x218c   : > { %v3576_v46 = vpop.f32.mrf.mxu3 }
0x218d   : > { %v3586_v13 = vmul.f32 0.35355338, %v3576_v46 }
0x218f   : > { %v3608_v59 = vsel %vm2812_vm10, %v3586_v13, -inf }
0x2190   : > { %3609 = vmax.xlane.f32.xlu2 %v3608_v59 }
0x21cb   : > { %v3589_v60 = vpop.xlane.xlu1 %3588 }
0x21cc   : > { %v3611_v10 = vsub.f32 %v3579_v30, %v3589_v60 }
0x21ce   : > { %v3619_v16 = vmul.f32 1.442695, %v3611_v10 }
0x21d0   : > { %9705 = vpow2.f32 %v3619_v16 }
0x21d3   : > { %v3592_v19 = vpop.xlane.xlu2 %3591 }
0x21d4   : > { %v3612_v25 = vsub.f32 %v3580_v38, %v3592_v19 }
0x21d6   : > { %v9706_v28 = vpop.eup %9705  ;;  %v3621_v57 = vmul.f32 1.442695, %v3612_v25 }
0x21d7   : > { %v3635_v48 = vsel %vm2812_vm10, %v9706_v28, 0.0 }
0x21d8   : > { %9707 = vpow2.f32 %v3621_v57  ;;  %3636 = vadd.xlane.f32.xlu0 %v3635_v48 }
0x21db   : > { %v3595_v44 = vpop.xlane.xlu0 %3594 }
0x21dc   : > { %v3613_v51 = vsub.f32 %v3581_v52, %v3595_v44 }
0x21de   : > { %v9708_v55 = vpop.eup %9707  ;;  %v3623_v26 = vmul.f32 1.442695, %v3613_v51 }
0x21df   : > { %v3638_v42 = vsel %vm2812_vm10, %v9708_v55, 0.0 }
0x21e0   : > { %9709 = vpow2.f32 %v3623_v26  ;;  %3639 = vadd.xlane.f32.xlu1 %v3638_v42 }
0x21e3   : > { %v3598_v63 = vpop.xlane.xlu1 %3597 }
0x21e4   : > { %v3614_v5 = vsub.f32 %v3582_v40, %v3598_v63 }
0x21e6   : > { %v9710_v50 = vpop.eup %9709  ;;  %v3625_v56 = vmul.f32 1.442695, %v3614_v5 }
0x21e7   : > { %v3641_v36 = vsel %vm2812_vm10, %v9710_v50, 0.0 }
0x21e8   : > { %9711 = vpow2.f32 %v3625_v56  ;;  %3642 = vadd.xlane.f32.xlu2 %v3641_v36  ;;  %v9845_v56 = vld [vmem:[#allocation7 + $0x330] sm:$0xff] }
0x21eb   : > { %v3601_v24 = vpop.xlane.xlu2 %3600 }
0x21ec   : > { %v3615_v12 = vsub.f32 %v3583_v61, %v3601_v24  ;;  %v9846_v24 = vld [vmem:[#allocation7 + $0x340] sm:$0xff] }
0x21ee   : > { %v9712_v27 = vpop.eup %9711  ;;  %v3627_v37 = vmul.f32 1.442695, %v3615_v12 }
0x21ef   : > { %v3644_v17 = vsel %vm2812_vm10, %v9712_v27, 0.0 }
0x21f0   : > { %9713 = vpow2.f32 %v3627_v37  ;;  %3645 = vadd.xlane.f32.xlu0 %v3644_v17 }
0x21f3   : > { %v3604_v20 = vpop.xlane.xlu0 %3603 }
0x21f4   : > { %v3616_v4 = vsub.f32 %v3584_v14, %v3604_v20  ;;  %v9848_v20 = vld [vmem:[#allocation7 + $0x310] sm:$0xff] }
0x21f6   : > { %v9714_v62 = vpop.eup %9713  ;;  %v3629_v47 = vmul.f32 1.442695, %v3616_v4 }
0x21f7   : > { %v3647_v22 = vsel %vm2812_vm10, %v9714_v62, 0.0 }
0x21f8   : > { %9715 = vpow2.f32 %v3629_v47  ;;  %3648 = vadd.xlane.f32.xlu1 %v3647_v22 }
0x21fb   : > { %v3607_v34 = vpop.xlane.xlu1 %3606 }
0x21fc   : > { %v3617_v11 = vsub.f32 %v3585_v31, %v3607_v34  ;;  %v9850_v34 = vld [vmem:[#allocation7 + $0x2f0] sm:$0xff] }
0x21fe   : > { %v9716_v53 = vpop.eup %9715  ;;  %v3631_v58 = vmul.f32 1.442695, %v3617_v11 }
0x21ff   : > { %v3650_v29 = vsel %vm2812_vm10, %v9716_v53, 0.0 }
0x2200   : > { %9717 = vpow2.f32 %v3631_v58  ;;  %3651 = vadd.xlane.f32.xlu2 %v3650_v29 }
0x2203   : > { %v3610_v15 = vpop.xlane.xlu2 %3609 }
0x2204   : > { %v3618_v0 = vsub.f32 %v3586_v13, %v3610_v15  ;;  %v8134_v15 = vld [vmem:[#allocation5 + $0x670] sm:$0xf] }
0x2206   : > { %v9718_v2 = vpop.eup %9717  ;;  %v3633_v6 = vmul.f32 1.442695, %v3618_v0  ;;  %v9183_v0 = vld [vmem:[#allocation5 + $0x674] sm:$0xf0] }
0x2207   : > { %v3653_v30 = vsel %vm2812_vm10, %v9718_v2, 0.0 }
0x2208   : > { %9719 = vpow2.f32 %v3633_v6  ;;  %3654 = vadd.xlane.f32.xlu0 %v3653_v30  ;;  %v8135_v30 = vor.u32 %v9183_v0, %v8134_v15  ;;  %v8176_v0 = vld [vmem:[#allocation5 + $0x710] sm:$0xf] }
0x220e   : > { %v9720_v54 = vpop.eup %9719 }
0x220f   : > { %v3656_v1 = vsel %vm2812_vm10, %v9720_v54, 0.0 }
0x2210   : > { %3657 = vadd.xlane.f32.xlu1 %v3656_v1  ;;  %v8130_v1 = vld [vmem:[#allocation5 + $0x660] sm:$0xf] }
0x224b   : > { %v3637_v38 = vpop.xlane.xlu0 %3636 }
0x224c   : > { %9721 = vrcp.f32 %v3637_v38  ;;  %v9182_v38 = vld [vmem:[#allocation5 + $0x664] sm:$0xf0] }
0x2252   : > { %v9722_v39 = vpop.eup %9721 }
0x2253   : > { %v3640_v7 = vpop.xlane.xlu1 %3639  ;;  %v3667_v41 = vmul.f32 %v9722_v39, %v9706_v28  ;;  %v8126_v39 = vld [vmem:[#allocation5 + $0x650] sm:$0xf] }
0x2254   : > { %9723 = vrcp.f32 %v3640_v7  ;;  %v8131_v7 = vor.u32 %v9182_v38, %v8130_v1  ;;  %v8168_v38 = vld [vmem:[#allocation5 + $0x6f0] sm:$0xf] }
0x225a   : > { %v9724_v52 = vpop.eup %9723 }
0x225b   : > { %v3668_v3 = vmul.f32 %v9724_v52, %v9708_v55  ;;  %v3643_v33 = vpop.xlane.xlu2 %3642  ;;  %v9181_v52 = vld [vmem:[#allocation5 + $0x654] sm:$0xf0] }
0x225c   : > { %9725 = vrcp.f32 %v3643_v33 }
0x225d   : > { %v3675_v40 = vpack.c.bf16 %v3668_v3, %v3667_v41  ;;  %v8127_v41 = vor.u32 %v9181_v52, %v8126_v39  ;;  %v8122_v3 = vld [vmem:[#allocation5 + $0x640] sm:$0xf] }
0x225e   : > { %v8164_v52 = vld [vmem:[#allocation5 + $0x6e0] sm:$0xf] }
0x225f   : > { %8115 = vmatmul.msk.bf16.vlgmr.msra.gmra.mxu0 %vm2812_vm10, %v3675_v40  ;;  %v9180_v40 = vld [vmem:[#allocation5 + $0x644] sm:$0xf0] }
0x2260   : > { %v8123_v33 = vor.u32 %v9180_v40, %v8122_v3  ;;  %v8160_v40 = vld [vmem:[#allocation5 + $0x6d0] sm:$0xf] }
0x2262   : > { %v9726_v61 = vpop.eup %9725 }
0x2263   : > { %v3646_v32 = vpop.xlane.xlu0 %3645  ;;  %v3669_v43 = vmul.f32 %v9726_v61, %v9710_v50 }
0x2264   : > { %9727 = vrcp.f32 %v3646_v32 }
0x226a   : > { %v9728_v21 = vpop.eup %9727 }
0x226b   : > { %v3670_v14 = vmul.f32 %v9728_v21, %v9712_v27  ;;  %v3649_v23 = vpop.xlane.xlu1 %3648  ;;  %v9847_v27 = vld [vmem:[#allocation7 + $0x320] sm:$0xff] }
0x226c   : > { %9729 = vrcp.f32 %v3649_v23 }
0x226d   : > { %v3676_v49 = vpack.c.bf16 %v3670_v14, %v3669_v43  ;;  %v3799_v14 = vld [vmem:[#allocation7 + $0x490] ss:$0 sm:$0xff] }
0x226f   : > { %8116 = vmatmul.msk.bf16.gmra.mxu0 %vm2812_vm10, %v3676_v49 }
0x2272   : > { %v9730_v45 = vpop.eup %9729 }
0x2273   : > { %v3652_v31 = vpop.xlane.xlu2 %3651  ;;  %v3671_v13 = vmul.f32 %v9730_v45, %v9714_v62  ;;  %v9849_v62 = vld [vmem:[#allocation7 + $0x300] sm:$0xff] }
0x2274   : > { %9731 = vrcp.f32 %v3652_v31 }
0x227a   : > { %v9732_v46 = vpop.eup %9731 }
0x227b   : > { %v3672_v59 = vmul.f32 %v9732_v46, %v9716_v53  ;;  %v3655_v10 = vpop.xlane.xlu0 %3654  ;;  %v9851_v53 = vld [vmem:[#allocation7 + $0x2e0] sm:$0xff] }
0x227c   : > { %9733 = vrcp.f32 %v3655_v10  ;;  %v8151_v10 = vld [vmem:[#allocation5 + $0x6b0] sm:$0xf] }
0x227d   : > { %v3677_v60 = vpack.c.bf16 %v3672_v59, %v3671_v13 }
0x227f   : > { %8117 = vmatmul.msk.bf16.gmra.mxu0 %vm2812_vm10, %v3677_v60 }
0x2282   : > { %v9734_v19 = vpop.eup %9733 }
0x2283   : > { %v3658_v16 = vpop.xlane.xlu1 %3657  ;;  %v3673_v28 = vmul.f32 %v9734_v19, %v9718_v2  ;;  %v9852_v2 = vld [vmem:[#allocation7 + $0x2d0] sm:$0xff] }
0x2284   : > { %9735 = vrcp.f32 %v3658_v16  ;;  %v9187_v16 = vld [vmem:[#allocation5 + $0x6b4] sm:$0xf0] }
0x2285   : > { %v8152_v19 = vor.u32 %v9187_v16, %v8151_v10 }
0x228a   : > { %v9736_v25 = vpop.eup %9735 }
0x228b   : > { %v3674_v57 = vmul.f32 %v9736_v25, %v9720_v54  ;;  %v9186_v25 = vld [vmem:[#allocation5 + $0x6a4] sm:$0xf0] }
0x228d   : > { %v3678_v48 = vpack.c.bf16 %v3674_v57, %v3673_v28  ;;  %v8143_v57 = vld [vmem:[#allocation5 + $0x690] sm:$0xf] }
0x228f   : > { %8118 = vmatmul.msk.bf16.gmra.mxu0 %vm2812_vm10, %v3678_v48  ;;  %v9185_v48 = vld [vmem:[#allocation5 + $0x694] sm:$0xf0] }
0x22dc   : > { %v3704_v44 = vpop.f32.mrf.mxu0 }
0x22dd   : > { %v3724_v6 = vmul.f32 %v9852_v2, %v3704_v44  ;;  %v8144_v44 = vor.u32 %v9185_v48, %v8143_v57  ;;  %v9193_v2 = vld [vmem:[#allocation5 + $0x714] sm:$0xf0]  ;;  %v3890_v48 = vld [vmem:[#allocation7 + $0x4e0] ss:$0 sm:$0xff] }
0x22e4   : > { %v3706_v51 = vpop.f32.mrf.mxu0 }
0x22e5   : > { %v3725_v58 = vmul.f32 %v9851_v53, %v3706_v51  ;;  %v8139_v51 = vld [vmem:[#allocation5 + $0x680] sm:$0xf] }
0x22e7   : > { %v3732_v54 = vpack.c.bf16 %v3725_v58, %v3724_v6  ;;  %v8180_v58 = vld [vmem:[#allocation5 + $0x720] sm:$0xf] }
0x22e8   : > { %v8172_v6 = vld [vmem:[#allocation5 + $0x700] sm:$0xf] }
0x22ec   : > { %v3709_v55 = vpop.f32.mrf.mxu0 }
0x22ed   : > { %v3726_v11 = vmul.f32 %v9850_v34, %v3709_v55  ;;  %v9184_v55 = vld [vmem:[#allocation5 + $0x684] sm:$0xf0]  ;;  %v8184_v34 = vld [vmem:[#allocation5 + $0x730] sm:$0xf] }
0x22f4   : > { %v3711_v26 = vpop.f32.mrf.mxu0 }
0x22f5   : > { %v3727_v47 = vmul.f32 %v9849_v62, %v3711_v26  ;;  %v8140_v26 = vor.u32 %v9184_v55, %v8139_v51 }
0x22f7   : > { %v3733_v29 = vpack.c.bf16 %v3727_v47, %v3726_v11  ;;  %v9195_v11 = vld [vmem:[#allocation5 + $0x734] sm:$0xf0] }
0x22f8   : > { %v8185_v53 = vor.u32 %v9195_v11, %v8184_v34 }
0x22fa   : > { %3966 = vmatpush.bf16.msra.mxu1 %v8185_v53 }
0x22fc   : > { %v3714_v42 = vpop.f32.mrf.mxu0 }
0x22fd   : > { %v3728_v4 = vmul.f32 %v9848_v20, %v3714_v42 }
0x2304   : > { %v3716_v63 = vpop.f32.mrf.mxu0 }
0x2305   : > { %v3729_v37 = vmul.f32 %v9847_v27, %v3716_v63 }
0x2307   : > { %v3734_v22 = vpack.c.bf16 %v3729_v37, %v3728_v4  ;;  %v3801_v37 = vld [vmem:[#allocation7 + $0x4a0] ss:$0 sm:$0xff]  ;;  %v3802_v4 = vld [vmem:[#allocation7 + $0x4b0] ss:$0 sm:$0xff] }
0x230c   : > { %v3719_v5 = vpop.f32.mrf.mxu0 }
0x230d   : > { %v3730_v36 = vmul.f32 %v9845_v56, %v3719_v5 }
0x2314   : > { %v3721_v50 = vpop.f32.mrf.mxu0 }
0x2315   : > { %v3731_v12 = vmul.f32 %v9846_v24, %v3721_v50 }
0x2317   : > { %v3735_v17 = vpack.c.bf16 %v3731_v12, %v3730_v36 }
0x2319   : > { %3740 = vmatpush.bf16.msra.mxu2 %v3735_v17 }
0x231d   : > { %3741 = vmatpush.bf16.msra.mxu2 %v3734_v22 }
0x2321   : > { %3742 = vmatpush.bf16.msra.mxu2 %v3733_v29  ;;  %v9194_v29 = vld [vmem:[#allocation5 + $0x724] sm:$0xf0] }
0x2322   : > { %v8181_v15 = vor.u32 %v9194_v29, %v8180_v58 }
0x2324   : > { %3967 = vmatpush.bf16.msra.mxu1 %v8181_v15 }
0x2325   : > { %3743 = vmatpush.bf16.msra.mxu2 %v3732_v54  ;;  %v9192_v54 = vld [vmem:[#allocation5 + $0x704] sm:$0xf0] }
0x2326   : > { %v8173_v1 = vor.u32 %v9192_v54, %v8172_v6 }
0x2328   : > { %8119 = vmatmul.msk.bf16.vlgmr.msra.gmra.mxu2 %vm1505_vm11, %v10995_v18 }
0x2329   : > { %3789 = vmatpush.bf16.msrb.mxu2 %v8135_v30  ;;  %v8177_v30 = vor.u32 %v9193_v2, %v8176_v0  ;;  %v8201_v0 = vld [vmem:[#allocation5 + $0x7a0] sm:$0xf]  ;;  %v9199_v2 = vld [vmem:[#allocation5 + $0x7a4] sm:$0xf0] }
0x232a   : > { %v8202_v6 = vor.u32 %v9199_v2, %v8201_v0 }
0x232b   : > { %3968 = vmatpush.bf16.msra.mxu1 %v8177_v30  ;;  %v9198_v30 = vld [vmem:[#allocation5 + $0x794] sm:$0xf0] }
0x232c   : > { %4072 = vmatpush.bf16.msrb.mxu3 %v8202_v6  ;;  %v4010_v6 = vld [vmem:[#allocation7 + $0x560] ss:$0 sm:$0xff] }
0x232d   : > { %3790 = vmatpush.bf16.msrb.mxu2 %v8131_v7  ;;  %v9191_v7 = vld [vmem:[#allocation5 + $0x6f4] sm:$0xf0] }
0x232e   : > { %v8169_v39 = vor.u32 %v9191_v7, %v8168_v38  ;;  %v9197_v38 = vld [vmem:[#allocation5 + $0x784] sm:$0xf0] }
0x232f   : > { %3969 = vmatpush.bf16.msra.mxu1 %v8173_v1  ;;  %v8193_v1 = vld [vmem:[#allocation5 + $0x780] sm:$0xf] }
0x2331   : > { %3791 = vmatpush.bf16.msrb.mxu2 %v8127_v41  ;;  %v9190_v41 = vld [vmem:[#allocation5 + $0x6e4] sm:$0xf0] }
0x2332   : > { %v8165_v3 = vor.u32 %v9190_v41, %v8164_v52 }
0x2333   : > { %3970 = vmatpush.bf16.msra.mxu1 %v8169_v39  ;;  %v8194_v39 = vor.u32 %v9197_v38, %v8193_v1 }
0x2335   : > { %3792 = vmatpush.bf16.msrb.mxu2 %v8123_v33  ;;  %v9189_v33 = vld [vmem:[#allocation5 + $0x6d4] sm:$0xf0] }
0x2337   : > { %3971 = vmatpush.bf16.msra.mxu1 %v8165_v3 }
0x2339   : > { %3868 = vmatpush.bf16.msra.mxu2 %v8152_v19 }
0x23ab   : > { %v3745_v32 = vpop.f32.mrf.mxu2 }
0x23ac   : > { %v3749_v61 = vpack.c.bf16 %v3745_v32, %v3745_v32  ;;  %v8161_v32 = vor.u32 %v9189_v33, %v8160_v40 }
0x23ae   : > { %8136 = vmatmul.msk.bf16.vlgmr.msrb.gmra.mxu2 %vm1505_vm11, %v3749_v61  ;;  %v8156_v61 = vld [vmem:[#allocation5 + $0x6c0] sm:$0xf]  ;;  %3972 = vmatpush.bf16.msra.mxu1 %v8161_v32 }
0x23b3   : > { %v3747_v21 = vpop.f32.mrf.mxu2 }
0x23b4   : > { %v9188_v21 = vld [vmem:[#allocation5 + $0x6c4] sm:$0xf0] }
0x2431   : > { %v3794_v43 = vpop.f32.mrf.mxu2 }
0x2432   : > { %v3798_v49 = vadd.f32 %v3794_v43, %v11016_v8  ;;  %v8147_v8 = vld [vmem:[#allocation5 + $0x6a0] sm:$0xf]  ;;  %v3836_v43 = vld [vmem:[#allocation7 + $0x4c0] ss:$0 sm:$0xff] }
0x2433   : > { %v8148_v28 = vor.u32 %v9186_v25, %v8147_v8 }
0x2434   : > { %v11079_v23 = vadd.f32 %v3799_v14, %v3798_v49  ;;  %v3881_v14 = vld [vmem:[#allocation7 + $0x4d0] sm:$0x7]  ;;  %v8157_v49 = vor.u32 %v9188_v21, %v8156_v61  ;;  %v3982_v61 = vld [vmem:[#allocation7 + $0x500] ss:$0 sm:$0xff] }
0x2435   : > { %3869 = vmatpush.bf16.msra.mxu2 %v8148_v28 }
0x2436   : > { %v3803_v18 = vsel %vm1505_vm11, %v11079_v23, 0.0  ;;  %3973 = vmatpush.bf16.msra.mxu1 %v8157_v49 }
0x2437   : > { %3804 = vadd.xlane.f32.xlu2 %v3803_v18 }
0x2439   : > { %v3796_v31 = vpop.f32.mrf.mxu2  ;;  %3870 = vmatpush.bf16.msra.mxu2 %v8144_v44 }
0x243d   : > { %3871 = vmatpush.bf16.msra.mxu2 %v8140_v26 }
0x24aa   : > { %v3805_v45 = vpop.xlane.xlu2 %3804 }
0x24ab   : > { %v3806_v46 = vmul.f32 %v3805_v45, %v10899_v9  ;;  %v3882_v45 = vperm.slane %v3881_v14, 0 }
0x24ad   : > { %v3807_v13 = vsub.f32 %v11079_v23, %v3806_v46  ;;  %v3884_v46 = vperm.slane %v3881_v14, 1 }
0x24af   : > { %v3808_v59 = vmul.f32 %v3807_v13, %v3807_v13 }
0x24b1   : > { %v3809_v60 = vsel %vm1505_vm11, %v3808_v59, 0.0 }
0x24b2   : > { %3810 = vadd.xlane.f32.xlu0 %v3809_v60  ;;  %v3887_v60 = vperm.slane %v3881_v14, 2 }
0x2525   : > { %v3811_v42 = vpop.xlane.xlu0 %3810 }
0x2526   : > { %v3812_v63 = vmul.f32 %v3811_v42, %v10899_v9 }
0x2528   : > { %v3813_v5 = vadd.f32 1e-05, %v3812_v63 }
0x252a   : > { %9737 = vrsqrt.f32 %v3813_v5  ;;  %vm3820_vm14 = vweird.f32 %v3813_v5 }
0x2530   : > { %v9738_v50 = vpop.eup %9737 }
0x2531   : > { %v3815_v56 = vmul.f32 %v9738_v50, %v3813_v5  ;;  %vm3821_vm13 = vweird.f32 %v9738_v50 }
0x2532   : > { %vm3822_vm8 = vmor %vm3820_vm14, %vm3821_vm13  ;;  %vm4439_vm14 = vcmask 1041408  }
0x2533   : > { %v3816_v36 = vmul.f32 %v9738_v50, %v3815_v56 }
0x2535   : > { %v3817_v24 = vmul.f32 0.5, %v3816_v36 }
0x2537   : > { %v3818_v12 = vsub.f32 1.5, %v3817_v24 }
0x2539   : > { %v3819_v27 = vmul.f32 %v9738_v50, %v3818_v12 }
0x253b   : > { %v3823_v17 = vsel %vm3822_vm8, %v9738_v50, %v3819_v27  ;;  %vm4432_vm8 = vcmask 31744  }
0x253c   : > { %v3824_v20 = vmul.f32 %v3823_v17, %v3807_v13 }
0x253e   : > { %v3825_v62 = vmul.f32 %v3824_v20, %v3801_v37  ;;  %v3980_v37 = vld [vmem:[#allocation7 + $0x4f0] ss:$0 sm:$0xff] }
0x2540   : > { %v3826_v47 = vadd.f32 %v3825_v62, %v3802_v4 }
0x2542   : > { %v3827_v22 = vpack.c.bf16 %v3826_v47, %v3826_v47 }
0x2544   : > { %8153 = vmatmul.msk.bf16.vlgmr.msra.gmra.mxu2 %vm1505_vm11, %v3827_v22 }
0x25c7   : > { %v3873_v18 = vpop.f32.mrf.mxu2 }
0x25c8   : > { %v3874_v31 = vadd.f32 %v3873_v18, %v3836_v43  ;;  %v3983_v43 = vld [vmem:[#allocation7 + $0x510] ss:$0 sm:$0xff] }
0x25ca   : > { %v3877_v13 = vrot.slane %v3874_v31, 7  ;;  %v3879_v59 = vrot.slane %v3874_v31, 1  ;;  %v3885_v8 = vmul.f32 %v3884_v46, %v3874_v31  ;;  %v4082_v46 = vld [vmem:[#allocation5 + $0x750] sm:$0x3] }
0x25cc   : > { %v3878_v10 = vsel %vm615_vm7, 0.0, %v3877_v13  ;;  %v3880_v16 = vsel %vm2622_vm4, 0.0, %v3879_v59  ;;  %v4149_v13 = vld [vmem:[#allocation5 + $0x760] sm:$0x3] }
0x25cd   : > { %v3883_v19 = vmul.f32 %v3882_v45, %v3878_v10  ;;  %v3888_v28 = vmul.f32 %v3887_v60, %v3880_v16  ;;  %v4012_v45 = vld [vmem:[#allocation5 + $0x740] sm:$0x3]  ;;  %v9203_v60 = vld [vmem:[#allocation5 + $0x7e4] sm:$0xf0]  ;;  %v8215_v16 = vld [vmem:[#allocation5 + $0x7d0] sm:$0xf] }
0x25ce   : > { %v8219_v59 = vld [vmem:[#allocation5 + $0x7e0] sm:$0xf] }
0x25cf   : > { %v3886_v25 = vadd.f32 %v3885_v8, %v3883_v19  ;;  %v3875_v57 = vpop.f32.mrf.mxu2  ;;  %v8220_v10 = vor.u32 %v9203_v60, %v8219_v59  ;;  %v9202_v19 = vld [vmem:[#allocation5 + $0x7d4] sm:$0xf0]  ;;  %v4216_v59 = vld [vmem:[#allocation7 + $0x570] ss:$0 sm:$0xff] }
0x25d0   : > { %v8216_v8 = vor.u32 %v9202_v19, %v8215_v16 }
0x25d1   : > { %v3889_v44 = vadd.f32 %v3888_v28, %v3886_v25  ;;  %v8211_v25 = vld [vmem:[#allocation5 + $0x7c0] sm:$0xf]  ;;  %v9201_v28 = vld [vmem:[#allocation5 + $0x7c4] sm:$0xf0] }
0x25d2   : > { %v8212_v57 = vor.u32 %v9201_v28, %v8211_v25 }
0x25d3   : > { %v3891_v51 = vadd.f32 %v3890_v48, %v3889_v44  ;;  %v8189_v48 = vld [vmem:[#allocation5 + $0x770] sm:$0xf]  ;;  %v9196_v44 = vld [vmem:[#allocation5 + $0x774] sm:$0xf0] }
0x25d5   : > { %v3893_v55 = vmul.f32 0.044715, %v3891_v51  ;;  %v3892_v56 = vmul.f32 0.5, %v3891_v51 }
0x25d7   : > { %v3894_v26 = vmul.f32 %v3893_v55, %v3891_v51  ;;  %v8207_v55 = vld [vmem:[#allocation5 + $0x7b0] sm:$0xf] }
0x25d9   : > { %v3895_v42 = vmul.f32 %v3894_v26, %v3891_v51  ;;  %v9200_v26 = vld [vmem:[#allocation5 + $0x7b4] sm:$0xf0] }
0x25db   : > { %v3896_v63 = vadd.f32 %v3895_v42, %v3891_v51  ;;  %v8190_v51 = vor.u32 %v9196_v44, %v8189_v48  ;;  %v8208_v42 = vor.u32 %v9200_v26, %v8207_v55  ;;  %v9213_v55 = vld [vmem:[#allocation5 + $0x894] sm:$0xf0]  ;;  %v8271_v26 = vld [vmem:[#allocation5 + $0x8d0] sm:$0xf] }
0x25dd   : > { %v3897_v5 = vmul.f32 0.7978846, %v3896_v63  ;;  %v8237_v63 = vld [vmem:[#allocation5 + $0x820] sm:$0xf] }
0x25df   : > { %9739 = vtanh.f32 %v3897_v5  ;;  %v9207_v5 = vld [vmem:[#allocation5 + $0x824] sm:$0xf0] }
0x25e5   : > { %v9740_v50 = vpop.eup %9739 }
0x25e6   : > { %v3899_v36 = vadd.f32 1.0, %v9740_v50  ;;  %v8238_v50 = vor.u32 %v9207_v5, %v8237_v63  ;;  %v9217_v63 = vld [vmem:[#allocation5 + $0x8d4] sm:$0xf0]  ;;  %v8288_v5 = vld [vmem:[#allocation5 + $0x910] sm:$0xf] }
0x25e8   : > { %v3900_v24 = vmul.f32 %v3899_v36, %v3892_v56  ;;  %v8233_v56 = vld [vmem:[#allocation5 + $0x810] sm:$0xf]  ;;  %v9206_v36 = vld [vmem:[#allocation5 + $0x814] sm:$0xf0] }
0x25ea   : > { %v3901_v12 = vpack.c.bf16 %v3900_v24, %v3900_v24  ;;  %v8234_v24 = vor.u32 %v9206_v36, %v8233_v56  ;;  %v8272_v56 = vor.u32 %v9217_v63, %v8271_v26 }
0x25ec   : > { %3974 = vmatmul.bf16.vlgmr.msra.gmra.mxu1 %v3901_v12  ;;  %v8229_v12 = vld [vmem:[#allocation5 + $0x800] sm:$0xf] }
0x2669   : > { %v3975_v27 = vpop.f32.mrf.mxu1 }
0x266a   : > { %v3979_v17 = vadd.f32 %v3975_v27, %v11079_v23  ;;  %v8197_v23 = vld [vmem:[#allocation5 + $0x790] sm:$0xf]  ;;  %v9205_v27 = vld [vmem:[#allocation5 + $0x804] sm:$0xf0] }
0x266b   : > { %v8198_v54 = vor.u32 %v9198_v30, %v8197_v23 }
0x266c   : > { %v3981_v20 = vadd.f32 %v3980_v37, %v3979_v17  ;;  %v8230_v37 = vor.u32 %v9205_v27, %v8229_v12  ;;  %v8225_v17 = vld [vmem:[#allocation5 + $0x7f0] sm:$0xf]  ;;  %v9212_v12 = vld [vmem:[#allocation5 + $0x884] sm:$0xf0]  ;;  %v8267_v27 = vld [vmem:[#allocation5 + $0x8c0] sm:$0xf] }
0x266d   : > { %4073 = vmatpush.bf16.msrb.mxu3 %v8198_v54 }
0x266e   : > { %v3984_v4 = vsel %vm1505_vm11, %v3981_v20, 0.0 }
0x266f   : > { %3985 = vadd.xlane.f32.xlu1 %v3984_v4 }
0x2671   : > { %v3977_v62 = vpop.f32.mrf.mxu1  ;;  %4074 = vmatpush.bf16.msrb.mxu3 %v8194_v39 }
0x2675   : > { %4075 = vmatpush.bf16.msrb.mxu3 %v8190_v51  ;;  %v8254_v51 = vld [vmem:[#allocation5 + $0x890] sm:$0xf] }
0x2679   : > { %4206 = vmatpush.bf16.msra.mxu3 %v8238_v50  ;;  %v9221_v50 = vld [vmem:[#allocation5 + $0x914] sm:$0xf0] }
0x267a   : > { %v8289_v36 = vor.u32 %v9221_v50, %v8288_v5 }
0x267d   : > { %4207 = vmatpush.bf16.msra.mxu3 %v8234_v24  ;;  %v8250_v24 = vld [vmem:[#allocation5 + $0x880] sm:$0xf] }
0x2681   : > { %4208 = vmatpush.bf16.msra.mxu3 %v8230_v37  ;;  %v8251_v37 = vor.u32 %v9212_v12, %v8250_v24 }
0x26e2   : > { %v3986_v47 = vpop.xlane.xlu1 %3985 }
0x26e3   : > { %v3987_v22 = vmul.f32 %v3986_v47, %v10899_v9 }
0x26e5   : > { %v3988_v34 = vsub.f32 %v3981_v20, %v3987_v22  ;;  %v9204_v20 = vld [vmem:[#allocation5 + $0x7f4] sm:$0xf0] }
0x26e6   : > { %v8226_v4 = vor.u32 %v9204_v20, %v8225_v17  ;;  %v9216_v17 = vld [vmem:[#allocation5 + $0x8c4] sm:$0xf0]  ;;  %v8284_v20 = vld [vmem:[#allocation5 + $0x900] sm:$0xf] }
0x26e7   : > { %v3989_v11 = vmul.f32 %v3988_v34, %v3988_v34 }
0x26e8   : > { %4209 = vmatpush.bf16.msra.mxu3 %v8226_v4  ;;  %v9220_v4 = vld [vmem:[#allocation5 + $0x904] sm:$0xf0] }
0x26e9   : > { %v3990_v53 = vsel %vm1505_vm11, %v3989_v11, 0.0 }
0x26ea   : > { %3991 = vadd.xlane.f32.xlu2 %v3990_v53 }
0x275d   : > { %v3992_v58 = vpop.xlane.xlu2 %3991 }
0x275e   : > { %v3993_v29 = vmul.f32 %v3992_v58, %v10899_v9 }
0x2760   : > { %v3994_v15 = vadd.f32 1e-05, %v3993_v29 }
0x2762   : > { %9741 = vrsqrt.f32 %v3994_v15  ;;  %vm4001_vm2 = vweird.f32 %v3994_v15 }
0x2768   : > { %v9742_v7 = vpop.eup %9741 }
0x2769   : > { %v3996_v52 = vmul.f32 %v9742_v7, %v3994_v15  ;;  %vm4002_vm15 = vweird.f32 %v9742_v7 }
0x276a   : > { %vm4003_vm3 = vmor %vm4001_vm2, %vm4002_vm15 }
0x276b   : > { %v3997_v41 = vmul.f32 %v9742_v7, %v3996_v52 }
0x276d   : > { %v3998_v3 = vmul.f32 0.5, %v3997_v41 }
0x276f   : > { %v3999_v40 = vsub.f32 1.5, %v3998_v3 }
0x2771   : > { %v4000_v33 = vmul.f32 %v9742_v7, %v3999_v40 }
0x2773   : > { %v4004_v32 = vsel %vm4003_vm3, %v9742_v7, %v4000_v33 }
0x2774   : > { %v4005_v21 = vmul.f32 %v4004_v32, %v3988_v34 }
0x2776   : > { %v4006_v14 = vmul.f32 %v4005_v21, %v3982_v61 }
0x2778   : > { %v4007_v49 = vadd.f32 %v4006_v14, %v3983_v43 }
0x277a   : > { %v4009_v18 = vpack.c.bf16 %v4007_v49, %v4007_v49  ;;  %4008 = vst.msk [vmem:[%s11098_s8] sm:$0xff] %vm1505_vm11, %v4007_v49 }
0x277c   : > { %v4017_v31 = vsel %vm2825_vm9, %v4009_v18, 0  ;;  %vm4218_vm9 = vcmask 519168  }
0x277d   : > { %4026 = vmatpush.bf16.msrb.mxu2 %v4017_v31  ;;  %4093 = vmatpush.bf16.msrb.mxu0 %v4017_v31 }
0x277e   : > { %4160 = vmatpush.bf16.msrb.mxu1 %v4017_v31 }
0x2780   : > { %8186 = vmatmul.msk.bf16.vlgmr.msrb.gmra.mxu2 %vm2812_vm10, %v4012_v45  ;;  %8204 = vmatmul.msk.bf16.vlgmr.msrb.gmra.mxu0 %vm2812_vm10, %v4082_v46 }
0x2781   : > { %8222 = vmatmul.msk.bf16.vlgmr.msrb.gmra.mxu1 %vm2812_vm10, %v4149_v13  ;;  %4139 = vmatpush.bf16.msra.mxu2 %v8220_v10  ;;  %v4217_v10 = vld [vmem:[#allocation7 + $0x580] ss:$0 sm:$0xff] }
0x2782   : > { %4412 = vmatpush.bf16.msra.mxu1 %v8289_v36 }
0x2785   : > { %4140 = vmatpush.bf16.msra.mxu2 %v8216_v8 }
0x2789   : > { %4141 = vmatpush.bf16.msra.mxu2 %v8212_v57 }
0x278d   : > { %4142 = vmatpush.bf16.msra.mxu2 %v8208_v42  ;;  %v8255_v42 = vor.u32 %v9213_v55, %v8254_v51  ;;  %v4337_v55 = vld [vmem:[#allocation7 + $0x5c0] ss:$0 sm:$0xff] }
0x278f   : > { %4320 = vmatpush.bf16.msra.mxu0 %v8255_v42 }
0x2791   : > { %4366 = vmatpush.bf16.msrb.mxu2 %v8272_v56 }
0x2793   : > { %4321 = vmatpush.bf16.msra.mxu0 %v8251_v37  ;;  %v8297_v37 = vld [vmem:[#allocation5 + $0x840] sm:$0xf] }
0x27fd   : > { %v4095_v62 = vpop.f32.mrf.mxu0 }
0x27fe   : > { %v4099_v47 = vpack.c.bf16 %v4095_v62, %v4095_v62  ;;  %v4162_v22 = vpop.f32.mrf.mxu1  ;;  %v8268_v62 = vor.u32 %v9216_v17, %v8267_v27  ;;  %v9209_v17 = vld [vmem:[#allocation5 + $0x844] sm:$0xf0] }
0x27ff   : > { %v4166_v15 = vpack.c.bf16 %v4162_v22, %v4162_v22  ;;  %v8246_v22 = vld [vmem:[#allocation5 + $0x870] sm:$0xf] }
0x2800   : > { %8221 = vmatmul.msk.bf16.vlgmr.msra.gmra.mxu2 %vm1505_vm11, %v4099_v47  ;;  %v8285_v47 = vor.u32 %v9220_v4, %v8284_v20  ;;  %v11136_v20 = vor.u32 %v9209_v17, %v8297_v37 }
0x2801   : > { %4367 = vmatpush.bf16.msrb.mxu2 %v8268_v62  ;;  %v11140_v62 = vld [vmem:[#allocation7 + $0x520] sm:$0xff] }
0x2802   : > { %4413 = vmatpush.bf16.msra.mxu1 %v8285_v47  ;;  %v11142_v47 = vld [vmem:[#allocation7 + $0x530] sm:$0xff] }
0x2803   : > { %v4028_v34 = vpop.f32.mrf.mxu2 }
0x2804   : > { %v4032_v11 = vpack.c.bf16 %v4028_v34, %v4028_v34  ;;  %v9211_v34 = vld [vmem:[#allocation5 + $0x874] sm:$0xf0] }
0x2805   : > { %v4097_v53 = vpop.f32.mrf.mxu0 }
0x2806   : > { %8203 = vmatmul.msk.bf16.vlgmr.msrb.gmra.mxu3 %vm1505_vm11, %v4032_v11  ;;  %v4164_v58 = vpop.f32.mrf.mxu1  ;;  %v8263_v11 = vld [vmem:[#allocation5 + $0x8b0] sm:$0xf]  ;;  %v8247_v53 = vor.u32 %v9211_v34, %v8246_v22 }
0x2807   : > { %v9215_v58 = vld [vmem:[#allocation5 + $0x8b4] sm:$0xf0] }
0x2808   : > { %4322 = vmatpush.bf16.msra.mxu0 %v8247_v53 }
0x280b   : > { %v4030_v29 = vpop.f32.mrf.mxu2 }
0x280c   : > { %v8280_v29 = vld [vmem:[#allocation5 + $0x8f0] sm:$0xf] }
0x2816   : > { %8239 = vmatmul.msk.bf16.vlgmr.msra.gmra.mxu3 %vm1505_vm11, %v4166_v15  ;;  %v9219_v15 = vld [vmem:[#allocation5 + $0x8f4] sm:$0xf0] }
0x2883   : > { %v4144_v0 = vpop.f32.mrf.mxu2 }
0x2889   : > { %v4077_v2 = vpop.f32.mrf.mxu3 }
0x288a   : > { %v4081_v54 = vadd.f32 %v4077_v2, %v4010_v6  ;;  %v8281_v2 = vor.u32 %v9219_v15, %v8280_v29  ;;  %v9210_v6 = vld [vmem:[#allocation5 + $0x864] sm:$0xf0]  ;;  %v11147_v29 = vld [vmem:[#allocation7 + $0x540] sm:$0xff]  ;;  %v11149_v15 = vld [vmem:[#allocation7 + $0x550] sm:$0xff] }
0x288b   : > { %v4146_v23 = vpop.f32.mrf.mxu2 }
0x288c   : > { %v4148_v1 = vadd.f32 %v4144_v0, %v4081_v54  ;;  %v8264_v0 = vor.u32 %v9215_v58, %v8263_v11  ;;  %4414 = vmatpush.bf16.msra.mxu1 %v8281_v2  ;;  %v8242_v23 = vld [vmem:[#allocation5 + $0x860] sm:$0xf] }
0x288d   : > { %v8243_v54 = vor.u32 %v9210_v6, %v8242_v23 }
0x288e   : > { %4368 = vmatpush.bf16.msrb.mxu2 %v8264_v0 }
0x288f   : > { %4323 = vmatpush.bf16.msra.mxu0 %v8243_v54 }
0x2891   : > { %v4079_v30 = vpop.f32.mrf.mxu3 }
0x2892   : > { %v8259_v30 = vld [vmem:[#allocation5 + $0x8a0] sm:$0xf] }
0x2899   : > { %v4211_v38 = vpop.f32.mrf.mxu3 }
0x289a   : > { %v4215_v7 = vadd.f32 %v4211_v38, %v4148_v1  ;;  %v9214_v1 = vld [vmem:[#allocation5 + $0x8a4] sm:$0xf0]  ;;  %v8276_v38 = vld [vmem:[#allocation5 + $0x8e0] sm:$0xf] }
0x289c   : > { %v4219_v39 = vsel %vm4218_vm9, %v4215_v7, 0.0 }
0x289d   : > { %4220 = vadd.xlane.f32.xlu0 %v4219_v39  ;;  %v8260_v39 = vor.u32 %v9214_v1, %v8259_v30 }
0x289f   : > { %4369 = vmatpush.bf16.msrb.mxu2 %v8260_v39 }
0x28a1   : > { %v4213_v52 = vpop.f32.mrf.mxu3 }
0x2910   : > { %v4221_v41 = vpop.xlane.xlu0 %4220 }
0x2911   : > { %v4222_v3 = vmul.f32 %v4221_v41, %v10899_v9 }
0x2913   : > { %v4223_v40 = vsub.f32 %v4215_v7, %v4222_v3  ;;  %v9218_v7 = vld [vmem:[#allocation5 + $0x8e4] sm:$0xf0] }
0x2914   : > { %v8277_v52 = vor.u32 %v9218_v7, %v8276_v38 }
0x2915   : > { %v4224_v33 = vmul.f32 %v4223_v40, %v4223_v40 }
0x2916   : > { %4415 = vmatpush.bf16.msra.mxu1 %v8277_v52 }
0x2917   : > { %v4225_v32 = vsel %vm4218_vm9, %v4224_v33, 0.0 }
0x2918   : > { %4226 = vadd.xlane.f32.xlu1 %v4225_v32 }
0x298b   : > { %v4227_v61 = vpop.xlane.xlu1 %4226 }
0x298c   : > { %v4228_v21 = vmul.f32 %v4227_v61, %v10899_v9 }
0x298e   : > { %v4229_v43 = vadd.f32 1e-05, %v4228_v21 }
0x2990   : > { %9743 = vrsqrt.f32 %v4229_v43  ;;  %vm4236_vm4 = vweird.f32 %v4229_v43 }
0x2996   : > { %v9744_v14 = vpop.eup %9743 }
0x2997   : > { %v4231_v49 = vmul.f32 %v9744_v14, %v4229_v43  ;;  %vm4237_vm10 = vweird.f32 %v9744_v14 }
0x2998   : > { %vm4238_vm5 = vmor %vm4236_vm4, %vm4237_vm10  ;;  %vm4726_vm10 = vcmask 1047556   ;;  %vm4252_vm4 = vcmp.eq.s32.totalorder %v10572_v35, 3 }
0x2999   : > { %v4232_v18 = vmul.f32 %v9744_v14, %v4231_v49  ;;  %v4253_v49 = vld [vmem:[#allocation7 + $0x590] ss:$0 sm:$0xff] }
0x299b   : > { %v4233_v31 = vmul.f32 0.5, %v4232_v18 }
0x299d   : > { %v4234_v45 = vsub.f32 1.5, %v4233_v31 }
0x299f   : > { %v4235_v46 = vmul.f32 %v9744_v14, %v4234_v45  ;;  %v4254_v45 = vld [vmem:[#allocation7 + $0x5a0] ss:$0 sm:$0xff] }
0x29a1   : > { %v4239_v13 = vsel %vm4238_vm5, %v9744_v14, %v4235_v46 }
0x29a2   : > { %v4240_v60 = vmul.f32 %v4239_v13, %v4223_v40 }
0x29a4   : > { %v4241_v16 = vmul.f32 %v4240_v60, %v4216_v59  ;;  %v4288_v60 = vld [vmem:[#allocation7 + $0x5b0] ss:$0 sm:$0xff] }
0x29a6   : > { %v11113_v19 = vadd.f32 %v4241_v16, %v4217_v10  ;;  %v4383_v10 = vld [vmem:[#allocation7 + $0x5d0] ss:$0 sm:$0xff] }
0x29a8   : > { %v4255_v8 = vsel %vm4218_vm9, %v11113_v19, 0.0 }
0x29a9   : > { %4256 = vadd.xlane.f32.xlu2 %v4255_v8 }
0x2a1c   : > { %v4257_v25 = vpop.xlane.xlu2 %4256 }
0x2a1d   : > { %v4258_v28 = vmul.f32 %v4257_v25, %v10899_v9 }
0x2a1f   : > { %v11119_v57 = vsub.f32 %v11113_v19, %v4258_v28 }
0x2a21   : > { %v4260_v48 = vmul.f32 %v11119_v57, %v11119_v57 }
0x2a23   : > { %v4261_v44 = vsel %vm4218_vm9, %v4260_v48, 0.0  ;;  %v8293_v48 = vld [vmem:[#allocation5 + $0x830] sm:$0xf] }
0x2a24   : > { %4262 = vadd.xlane.f32.xlu0 %v4261_v44  ;;  %v9208_v44 = vld [vmem:[#allocation5 + $0x834] sm:$0xf0] }
0x2a25   : > { %v11130_v42 = vor.u32 %v9208_v44, %v8293_v48 }
0x2a97   : > { %v4263_v41 = vpop.xlane.xlu0 %4262 }
0x2a98   : > { %v4264_v3 = vmul.f32 %v4263_v41, %v10899_v9 }
0x2a9a   : > { %v4265_v40 = vadd.f32 1e-05, %v4264_v3 }
0x2a9c   : > { %9745 = vrsqrt.f32 %v4265_v40  ;;  %vm4272_vm12 = vweird.f32 %v4265_v40 }
0x2aa2   : > { %v9746_v33 = vpop.eup %9745 }
0x2aa3   : > { %v4267_v32 = vmul.f32 %v9746_v33, %v4265_v40  ;;  %vm4273_vm6 = vweird.f32 %v9746_v33 }
0x2aa4   : > { %vm4274_vm13 = vmor %vm4272_vm12, %vm4273_vm6 }
0x2aa5   : > { %v4268_v61 = vmul.f32 %v9746_v33, %v4267_v32 }
0x2aa7   : > { %v4269_v21 = vmul.f32 0.5, %v4268_v61 }
0x2aa9   : > { %v4270_v43 = vsub.f32 1.5, %v4269_v21 }
0x2aab   : > { %v4271_v14 = vmul.f32 %v9746_v33, %v4270_v43 }
0x2aad   : > { %v4275_v18 = vsel %vm4274_vm13, %v9746_v33, %v4271_v14 }
0x2aae   : > { %v4276_v31 = vmul.f32 %v4275_v18, %v11119_v57 }
0x2ab0   : > { %v4277_v46 = vmul.f32 %v4276_v31, %v4253_v49 }
0x2ab2   : > { %v4278_v13 = vadd.f32 %v4277_v46, %v4254_v45 }
0x2ab4   : > { %v4279_v59 = vpack.c.bf16 %v4278_v13, %v4278_v13 }
0x2ab6   : > { %8256 = vmatmul.msk.bf16.vlgmr.msra.gmra.mxu0 %vm1505_vm11, %v4279_v59  ;;  %8273 = vmatmul.msk.bf16.vlgmr.msrb.gmra.mxu2 %vm1505_vm11, %v4279_v59 }
0x2ab7   : > { %8290 = vmatmul.msk.bf16.vlgmr.msra.gmra.mxu1 %vm1505_vm11, %v4279_v59 }
0x2b33   : > { %v4325_v16 = vpop.f32.mrf.mxu0 }
0x2b34   : > { %v4326_v8 = vadd.f32 %v4325_v16, %v4288_v60  ;;  %v4417_v25 = vpop.f32.mrf.mxu1 }
0x2b35   : > { %v4418_v28 = vadd.f32 %v4417_v25, %v4383_v10 }
0x2b36   : > { %v4421_v57 = vpack.c.bf16 %v4326_v8, %v4326_v8 }
0x2b37   : > { %v4547_v51 = vpack.c.bf16 %v4418_v28, %v4418_v28 }
0x2b38   : > { %v4441_v26 = vsel %vm4439_vm14, %v4421_v57, 0 }
0x2b39   : > { %v4555_v63 = vsel %vm4439_vm14, %v4547_v51, 0  ;;  %v4371_v5 = vpop.f32.mrf.mxu2  ;;  %4450 = vmatpush.bf16.msrb.mxu3 %v4441_v26 }
0x2b3a   : > { %v4372_v50 = vadd.f32 %v4371_v5, %v4337_v55  ;;  %4564 = vmatpush.bf16.msra.mxu2 %v4555_v63 }
0x2b3b   : > { %v4327_v56 = vpop.f32.mrf.mxu0 }
0x2b3c   : > { %v4468_v36 = vpack.c.bf16 %v4372_v50, %v4372_v50  ;;  %v4419_v24 = vpop.f32.mrf.mxu1  ;;  %8299 = vmatmul.msk.bf16.vlgmr.msrb.gmra.mxu3 %vm4432_vm8, %v11130_v42 }
0x2b3e   : > { %v4476_v12 = vsel %vm1505_vm11, %v4468_v36, 0 }
0x2b3f   : > { %4485 = vmatpush.bf16.xpose.msrb.mxu0 %v4476_v12 }
0x2b41   : > { %v4373_v27 = vpop.f32.mrf.mxu2 }
0x2b4c   : > { %8300 = vmatmul.msk.bf16.gmra.mxu3 %vm4432_vm8, %v11136_v20 }
0x2bbf   : > { %v4452_v4 = vpop.f32.mrf.mxu3 }
0x2bc0   : > { %v4462_v34 = vmul.f32 %v4452_v4, %v11140_v62 }
0x2bc7   : > { %v4454_v22 = vpop.f32.mrf.mxu3 }
0x2bc8   : > { %v4463_v11 = vmul.f32 %v4454_v22, %v11142_v47 }
0x2bca   : > { %v4466_v53 = vpack.c.bf16 %v4463_v11, %v4462_v34 }
0x2bcc   : > { %8301 = vmatmul.msk.bf16.vlgmr.msrb.gmra.mxu0 %vm1505_vm11, %v4466_v53 }
0x2bcf   : > { %v4457_v58 = vpop.f32.mrf.mxu3 }
0x2bd0   : > { %v4464_v2 = vmul.f32 %v4457_v58, %v11147_v29 }
0x2bd7   : > { %v4459_v0 = vpop.f32.mrf.mxu3 }
0x2bd8   : > { %v4465_v23 = vmul.f32 %v4459_v0, %v11149_v15 }
0x2bda   : > { %v4467_v6 = vpack.c.bf16 %v4465_v23, %v4464_v2 }
0x2bdc   : > { %8302 = vmatmul.msk.bf16.gmra.mxu0 %vm1505_vm11, %v4467_v6  ;;  %v8320_v6 = vld [vmem:[#allocation5 + $0x950] sm:$0xf] }
0x2c49   : > { %v4487_v30 = vpop.f32.mrf.mxu0 }
0x2c4a   : > { %v4497_v54 = vmul.f32 0.35355338, %v4487_v30  ;;  %v9225_v30 = vld [vmem:[#allocation5 + $0x954] sm:$0xf0] }
0x2c4c   : > { %v4501_v1 = vsel %vm4432_vm8, %v4497_v54, -inf }
0x2c4d   : > { %4502 = vmax.xlane.f32.xlu1 %v4501_v1  ;;  %v8321_v1 = vor.u32 %v9225_v30, %v8320_v6  ;;  %v8370_v30 = vld [vmem:[#allocation5 + $0xa10] sm:$0xf] }
0x2c51   : > { %v4489_v38 = vpop.f32.mrf.mxu0 }
0x2c52   : > { %v4498_v7 = vmul.f32 0.35355338, %v4489_v38 }
0x2c54   : > { %v4504_v39 = vsel %vm4432_vm8, %v4498_v7, -inf }
0x2c55   : > { %4505 = vmax.xlane.f32.xlu2 %v4504_v39  ;;  %v9224_v39 = vld [vmem:[#allocation5 + $0x944] sm:$0xf0] }
0x2c59   : > { %v4492_v52 = vpop.f32.mrf.mxu0 }
0x2c5a   : > { %v4499_v41 = vmul.f32 0.35355338, %v4492_v52  ;;  %v11168_v52 = vld [vmem:[#allocation5 + $0x850] sm:$0x3] }
0x2c5c   : > { %v4507_v3 = vsel %vm4432_vm8, %v4499_v41, -inf }
0x2c5d   : > { %4508 = vmax.xlane.f32.xlu0 %v4507_v3  ;;  %v8312_v3 = vld [vmem:[#allocation5 + $0x930] sm:$0xf] }
0x2c61   : > { %v4494_v40 = vpop.f32.mrf.mxu0 }
0x2c62   : > { %v4500_v33 = vmul.f32 0.35355338, %v4494_v40  ;;  %v9223_v40 = vld [vmem:[#allocation5 + $0x934] sm:$0xf0] }
0x2c64   : > { %v4510_v32 = vsel %vm4432_vm8, %v4500_v33, -inf }
0x2c65   : > { %4511 = vmax.xlane.f32.xlu1 %v4510_v32  ;;  %v8308_v32 = vld [vmem:[#allocation5 + $0x920] sm:$0xf] }
0x2cc0   : > { %v4503_v61 = vpop.xlane.xlu1 %4502 }
0x2cc1   : > { %v4513_v21 = vsub.f32 %v4497_v54, %v4503_v61  ;;  %v9222_v61 = vld [vmem:[#allocation5 + $0x924] sm:$0xf0] }
0x2cc3   : > { %v4517_v43 = vmul.f32 1.442695, %v4513_v21  ;;  %v8309_v21 = vor.u32 %v9222_v61, %v8308_v32  ;;  %v9234_v32 = vld [vmem:[#allocation5 + $0x9e4] sm:$0xf0] }
0x2cc5   : > { %9747 = vpow2.f32 %v4517_v43 }
0x2cc8   : > { %v4506_v14 = vpop.xlane.xlu2 %4505 }
0x2cc9   : > { %v4514_v49 = vsub.f32 %v4498_v7, %v4506_v14  ;;  %v8316_v7 = vld [vmem:[#allocation5 + $0x940] sm:$0xf] }
0x2ccb   : > { %v9748_v18 = vpop.eup %9747  ;;  %v4519_v31 = vmul.f32 1.442695, %v4514_v49 }
0x2ccc   : > { %v4525_v45 = vsel %vm4432_vm8, %v9748_v18, 0.0 }
0x2ccd   : > { %9749 = vpow2.f32 %v4519_v31  ;;  %4526 = vadd.xlane.f32.xlu2 %v4525_v45  ;;  %v4648_v31 = vld [vmem:[#allocation7 + $0x5e0] ss:$0 sm:$0xff] }
0x2cd0   : > { %v4509_v46 = vpop.xlane.xlu0 %4508 }
0x2cd1   : > { %v4515_v13 = vsub.f32 %v4499_v41, %v4509_v46  ;;  %v8317_v41 = vor.u32 %v9224_v39, %v8316_v7  ;;  %v9236_v7 = vld [vmem:[#allocation5 + $0xa04] sm:$0xf0] }
0x2cd3   : > { %v9750_v59 = vpop.eup %9749  ;;  %v4521_v60 = vmul.f32 1.442695, %v4515_v13 }
0x2cd4   : > { %v4528_v10 = vsel %vm4432_vm8, %v9750_v59, 0.0 }
0x2cd5   : > { %9751 = vpow2.f32 %v4521_v60  ;;  %4529 = vadd.xlane.f32.xlu0 %v4528_v10 }
0x2cd8   : > { %v4512_v16 = vpop.xlane.xlu1 %4511 }
0x2cd9   : > { %v4516_v8 = vsub.f32 %v4500_v33, %v4512_v16  ;;  %v8313_v33 = vor.u32 %v9223_v40, %v8312_v3  ;;  %v9235_v3 = vld [vmem:[#allocation5 + $0x9f4] sm:$0xf0]  ;;  %v8358_v40 = vld [vmem:[#allocation5 + $0x9e0] sm:$0xf] }
0x2cda   : > { %v8359_v61 = vor.u32 %v9234_v32, %v8358_v40 }
0x2cdb   : > { %v9752_v25 = vpop.eup %9751  ;;  %v4523_v28 = vmul.f32 1.442695, %v4516_v8 }
0x2cdc   : > { %v4531_v48 = vsel %vm4432_vm8, %v9752_v25, 0.0 }
0x2cdd   : > { %9753 = vpow2.f32 %v4523_v28  ;;  %4532 = vadd.xlane.f32.xlu1 %v4531_v48  ;;  %v8337_v28 = vld [vmem:[#allocation5 + $0x990] sm:$0xf]  ;;  %v9229_v48 = vld [vmem:[#allocation5 + $0x994] sm:$0xf0] }
0x2ce3   : > { %v9754_v44 = vpop.eup %9753 }
0x2ce4   : > { %v4534_v57 = vsel %vm4432_vm8, %v9754_v44, 0.0 }
0x2ce5   : > { %4535 = vadd.xlane.f32.xlu2 %v4534_v57  ;;  %v9228_v57 = vld [vmem:[#allocation5 + $0x984] sm:$0xf0] }
0x2d40   : > { %v4527_v51 = vpop.xlane.xlu2 %4526 }
0x2d41   : > { %9755 = vrcp.f32 %v4527_v51 }
0x2d47   : > { %v9756_v26 = vpop.eup %9755 }
0x2d48   : > { %v4530_v55 = vpop.xlane.xlu0 %4529  ;;  %v4541_v5 = vmul.f32 %v9756_v26, %v9748_v18  ;;  %v9227_v26 = vld [vmem:[#allocation5 + $0x974] sm:$0xf0] }
0x2d49   : > { %9757 = vrcp.f32 %v4530_v55  ;;  %v8329_v55 = vld [vmem:[#allocation5 + $0x970] sm:$0xf] }
0x2d4f   : > { %v9758_v63 = vpop.eup %9757 }
0x2d50   : > { %v4542_v50 = vmul.f32 %v9758_v63, %v9750_v59  ;;  %v4533_v36 = vpop.xlane.xlu1 %4532  ;;  %v8330_v63 = vor.u32 %v9227_v26, %v8329_v55 }
0x2d51   : > { %9759 = vrcp.f32 %v4533_v36 }
0x2d52   : > { %v4545_v56 = vpack.c.bf16 %v4542_v50, %v4541_v5  ;;  %v8325_v5 = vld [vmem:[#allocation5 + $0x960] sm:$0xf]  ;;  %v9226_v50 = vld [vmem:[#allocation5 + $0x964] sm:$0xf0] }
0x2d54   : > { %8303 = vmatmul.msk.bf16.vlgmr.msra.gmra.mxu2 %vm4432_vm8, %v4545_v56  ;;  %v8326_v56 = vor.u32 %v9226_v50, %v8325_v5 }
0x2d57   : > { %v9760_v12 = vpop.eup %9759 }
0x2d58   : > { %v4536_v24 = vpop.xlane.xlu2 %4535  ;;  %v4543_v37 = vmul.f32 %v9760_v12, %v9752_v25 }
0x2d59   : > { %9761 = vrcp.f32 %v4536_v24 }
0x2d5f   : > { %v9762_v27 = vpop.eup %9761 }
0x2d60   : > { %v4544_v17 = vmul.f32 %v9762_v27, %v9754_v44  ;;  %v8338_v44 = vor.u32 %v9229_v48, %v8337_v28 }
0x2d62   : > { %v4546_v4 = vpack.c.bf16 %v4544_v17, %v4543_v37  ;;  %4717 = vmatpush.bf16.msra.mxu3 %v8338_v44  ;;  %v4738_v44 = vld [vmem:[#allocation7 + $0x620] sm:$0x7] }
0x2d63   : > { %v4739_v55 = vperm.slane %v4738_v44, 0  ;;  %v4741_v26 = vperm.slane %v4738_v44, 1 }
0x2d64   : > { %8304 = vmatmul.msk.bf16.gmra.mxu2 %vm4432_vm8, %v4546_v4 }
0x2dd7   : > { %v4566_v22 = vpop.f32.mrf.mxu2 }
0x2dd8   : > { %v4576_v54 = vmul.f32 %v4566_v22, %v11140_v62 }
0x2ddf   : > { %v4568_v34 = vpop.f32.mrf.mxu2 }
0x2de0   : > { %v4577_v2 = vmul.f32 %v4568_v34, %v11142_v47 }
0x2de2   : > { %v4580_v38 = vpack.c.bf16 %v4577_v2, %v4576_v54  ;;  %v9237_v54 = vld [vmem:[#allocation5 + $0xa14] sm:$0xf0] }
0x2de7   : > { %v4571_v11 = vpop.f32.mrf.mxu2 }
0x2de8   : > { %v4578_v58 = vmul.f32 %v4571_v11, %v11147_v29  ;;  %v4650_v11 = vld [vmem:[#allocation7 + $0x5f0] ss:$0 sm:$0xff] }
0x2def   : > { %v4573_v53 = vpop.f32.mrf.mxu2 }
0x2df0   : > { %v4579_v0 = vmul.f32 %v4573_v53, %v11149_v15 }
0x2df2   : > { %v4581_v23 = vpack.c.bf16 %v4579_v0, %v4578_v58  ;;  %v4651_v0 = vld [vmem:[#allocation7 + $0x600] ss:$0 sm:$0xff] }
0x2df4   : > { %4591 = vmatpush.bf16.msrb.mxu1 %v4581_v23 }
0x2df8   : > { %4592 = vmatpush.bf16.msrb.mxu1 %v4580_v38  ;;  %v8366_v38 = vld [vmem:[#allocation5 + $0xa00] sm:$0xf] }
0x2df9   : > { %v8367_v39 = vor.u32 %v9236_v7, %v8366_v38  ;;  %v4837_v7 = vld [vmem:[#allocation7 + $0x640] ss:$0 sm:$0xff] }
0x2dfb   : > { %8305 = vmatmul.msk.bf16.vlgmr.msrb.gmra.mxu1 %vm381_vm1, %v11168_v52 }
0x2dfc   : > { %4638 = vmatpush.bf16.msra.mxu1 %v8321_v1  ;;  %v8371_v1 = vor.u32 %v9237_v54, %v8370_v30 }
0x2dfe   : > { %4823 = vmatpush.bf16.msra.mxu0 %v8371_v1 }
0x2e00   : > { %4639 = vmatpush.bf16.msra.mxu1 %v8317_v41  ;;  %v8362_v41 = vld [vmem:[#allocation5 + $0x9f0] sm:$0xf] }
0x2e02   : > { %4824 = vmatpush.bf16.msra.mxu0 %v8367_v39 }
0x2e04   : > { %4640 = vmatpush.bf16.msra.mxu1 %v8313_v33  ;;  %v8363_v33 = vor.u32 %v9235_v3, %v8362_v41 }
0x2e06   : > { %4825 = vmatpush.bf16.msra.mxu0 %v8363_v33 }
0x2e08   : > { %4641 = vmatpush.bf16.msra.mxu1 %v8309_v21  ;;  %v8354_v21 = vld [vmem:[#allocation5 + $0x9d0] sm:$0xf] }
0x2e0a   : > { %4826 = vmatpush.bf16.msra.mxu0 %v8359_v61 }
0x2e78   : > { %v4594_v43 = vpop.f32.mrf.mxu1 }
0x2e79   : > { %v4598_v14 = vpack.c.bf16 %v4594_v43, %v4594_v43  ;;  %v9233_v43 = vld [vmem:[#allocation5 + $0x9d4] sm:$0xf0] }
0x2e7b   : > { %8322 = vmatmul.msk.bf16.vlgmr.msra.gmra.mxu1 %vm1505_vm11, %v4598_v14  ;;  %v8355_v14 = vor.u32 %v9233_v43, %v8354_v21 }
0x2e7d   : > { %4827 = vmatpush.bf16.msra.mxu0 %v8355_v14  ;;  %v9241_v14 = vld [vmem:[#allocation5 + $0xa54] sm:$0xf0] }
0x2e80   : > { %v4596_v49 = vpop.f32.mrf.mxu1 }
0x2e81   : > { %v8350_v49 = vld [vmem:[#allocation5 + $0x9c0] sm:$0xf] }
0x2ef8   : > { %v4643_v18 = vpop.f32.mrf.mxu1 }
0x2ef9   : > { %v4647_v45 = vadd.f32 %v4643_v18, %v11113_v19  ;;  %v8333_v19 = vld [vmem:[#allocation5 + $0x980] sm:$0xf]  ;;  %v9232_v18 = vld [vmem:[#allocation5 + $0x9c4] sm:$0xf0] }
0x2efa   : > { %v8334_v51 = vor.u32 %v9228_v57, %v8333_v19 }
0x2efb   : > { %v11174_v46 = vadd.f32 %v4648_v31, %v4647_v45  ;;  %v8351_v31 = vor.u32 %v9232_v18, %v8350_v49  ;;  %v4685_v45 = vld [vmem:[#allocation7 + $0x610] ss:$0 sm:$0xff]  ;;  %v8403_v49 = vld [vmem:[#allocation5 + $0xa90] sm:$0xf] }
0x2efc   : > { %4718 = vmatpush.bf16.msra.mxu3 %v8334_v51 }
0x2efd   : > { %v4652_v13 = vsel %vm4218_vm9, %v11174_v46, 0.0  ;;  %4828 = vmatpush.bf16.msra.mxu0 %v8351_v31  ;;  %v9245_v31 = vld [vmem:[#allocation5 + $0xa94] sm:$0xf0] }
0x2efe   : > { %4653 = vadd.xlane.f32.xlu0 %v4652_v13  ;;  %v8346_v13 = vld [vmem:[#allocation5 + $0x9b0] sm:$0xf] }
0x2f00   : > { %v4645_v59 = vpop.f32.mrf.mxu1  ;;  %4719 = vmatpush.bf16.msra.mxu3 %v8330_v63 }
0x2f01   : > { %v9231_v59 = vld [vmem:[#allocation5 + $0x9b4] sm:$0xf0] }
0x2f04   : > { %4720 = vmatpush.bf16.msra.mxu3 %v8326_v56  ;;  %v4744_v56 = vperm.slane %v4738_v44, 2  ;;  %v9248_v44 = vld [vmem:[#allocation5 + $0xac4] sm:$0xf0] }
0x2f71   : > { %v4654_v60 = vpop.xlane.xlu0 %4653 }
0x2f72   : > { %v4655_v10 = vmul.f32 %v4654_v60, %v10899_v9 }
0x2f74   : > { %v4656_v16 = vsub.f32 %v11174_v46, %v4655_v10 }
0x2f76   : > { %v4657_v8 = vmul.f32 %v4656_v16, %v4656_v16 }
0x2f78   : > { %v4658_v25 = vsel %vm4218_vm9, %v4657_v8, 0.0  ;;  %v8342_v8 = vld [vmem:[#allocation5 + $0x9a0] sm:$0xf] }
0x2f79   : > { %4659 = vadd.xlane.f32.xlu1 %v4658_v25  ;;  %v9230_v25 = vld [vmem:[#allocation5 + $0x9a4] sm:$0xf0] }
0x2f7a   : > { %v8343_v19 = vor.u32 %v9230_v25, %v8342_v8  ;;  %v8399_v8 = vld [vmem:[#allocation5 + $0xa80] sm:$0xf] }
0x2fec   : > { %v4660_v36 = vpop.xlane.xlu1 %4659 }
0x2fed   : > { %v4661_v24 = vmul.f32 %v4660_v36, %v10899_v9 }
0x2fef   : > { %v4662_v12 = vadd.f32 1e-05, %v4661_v24 }
0x2ff1   : > { %9763 = vrsqrt.f32 %v4662_v12  ;;  %vm4669_vm2 = vweird.f32 %v4662_v12 }
0x2ff7   : > { %v9764_v27 = vpop.eup %9763 }
0x2ff8   : > { %v4664_v37 = vmul.f32 %v9764_v27, %v4662_v12  ;;  %vm4670_vm15 = vweird.f32 %v9764_v27 }
0x2ff9   : > { %vm4671_vm3 = vmor %vm4669_vm2, %vm4670_vm15 }
0x2ffa   : > { %v4665_v17 = vmul.f32 %v9764_v27, %v4664_v37 }
0x2ffc   : > { %v4666_v4 = vmul.f32 0.5, %v4665_v17 }
0x2ffe   : > { %v4667_v22 = vsub.f32 1.5, %v4666_v4  ;;  %v4747_v4 = vld [vmem:[#allocation7 + $0x630] ss:$0 sm:$0xff] }
0x3000   : > { %v4668_v34 = vmul.f32 %v9764_v27, %v4667_v22 }
0x3002   : > { %v4672_v53 = vsel %vm4671_vm3, %v9764_v27, %v4668_v34 }
0x3003   : > { %v4673_v58 = vmul.f32 %v4672_v53, %v4656_v16  ;;  %v8347_v16 = vor.u32 %v9231_v59, %v8346_v13  ;;  %v9249_v13 = vld [vmem:[#allocation5 + $0xad4] sm:$0xf0]  ;;  %v8404_v59 = vor.u32 %v9245_v31, %v8403_v49 }
0x3005   : > { %v4674_v2 = vmul.f32 %v4673_v58, %v4650_v11  ;;  %4829 = vmatpush.bf16.msra.mxu0 %v8347_v16  ;;  %4952 = vmatpush.bf16.msrb.mxu1 %v8404_v59  ;;  %v9240_v16 = vld [vmem:[#allocation5 + $0xa44] sm:$0xf0] }
0x3007   : > { %v4675_v23 = vadd.f32 %v4674_v2, %v4651_v0 }
0x3009   : > { %v4676_v6 = vpack.c.bf16 %v4675_v23, %v4675_v23  ;;  %4830 = vmatpush.bf16.msra.mxu0 %v8343_v19 }
0x300b   : > { %8339 = vmatmul.msk.bf16.vlgmr.msra.gmra.mxu3 %vm1505_vm11, %v4676_v6 }
0x308e   : > { %v4722_v60 = vpop.f32.mrf.mxu3 }
0x308f   : > { %v4723_v10 = vadd.f32 %v4722_v60, %v4685_v45  ;;  %v8420_v45 = vld [vmem:[#allocation5 + $0xad0] sm:$0xf] }
0x3090   : > { %v8421_v60 = vor.u32 %v9249_v13, %v8420_v45  ;;  %v4969_v45 = vld [vmem:[#allocation7 + $0x690] ss:$0 sm:$0xff] }
0x3091   : > { %v4727_v28 = vrot.slane %v4723_v10, 4  ;;  %v4742_v27 = vmul.f32 %v4741_v26, %v4723_v10  ;;  %v8395_v26 = vld [vmem:[#allocation5 + $0xa70] sm:$0xf] }
0x3092   : > { %4998 = vmatpush.bf16.msrb.mxu3 %v8421_v60 }
0x3093   : > { %v4728_v48 = vsel %vm4726_vm10, %v4727_v28, %v4723_v10  ;;  %v9244_v28 = vld [vmem:[#allocation5 + $0xa84] sm:$0xf0] }
0x3094   : > { %v4729_v57 = vrot.slane %v4728_v48, 4  ;;  %v8416_v48 = vld [vmem:[#allocation5 + $0xac0] sm:$0xf]  ;;  %v8400_v19 = vor.u32 %v9244_v28, %v8399_v8 }
0x3096   : > { %v4730_v51 = vsel %vm4726_vm10, %v4729_v57, %v4723_v10  ;;  %v4724_v63 = vpop.f32.mrf.mxu3  ;;  %v8382_v10 = vld [vmem:[#allocation5 + $0xa40] sm:$0xf]  ;;  %v8417_v57 = vor.u32 %v9248_v44, %v8416_v48  ;;  %4953 = vmatpush.bf16.msrb.mxu1 %v8400_v19 }
0x3097   : > { %v4732_v5 = vrot.slane %v4730_v51, 3  ;;  %v4735_v50 = vrot.slane %v4730_v51, 1  ;;  %v8383_v25 = vor.u32 %v9240_v16, %v8382_v10  ;;  %v8378_v51 = vld [vmem:[#allocation5 + $0xa30] sm:$0xf] }
0x3098   : > { %4999 = vmatpush.bf16.msrb.mxu3 %v8417_v57 }
0x3099   : > { %v4734_v36 = vsel %vm615_vm7, 0.0, %v4732_v5  ;;  %v4737_v24 = vsel %vm4252_vm4, 0.0, %v4735_v50  ;;  %v9243_v5 = vld [vmem:[#allocation5 + $0xa74] sm:$0xf0]  ;;  %v8412_v50 = vld [vmem:[#allocation5 + $0xab0] sm:$0xf] }
0x309a   : > { %v4740_v12 = vmul.f32 %v4739_v55, %v4734_v36  ;;  %v4745_v17 = vmul.f32 %v4744_v56, %v4737_v24  ;;  %v9239_v55 = vld [vmem:[#allocation5 + $0xa34] sm:$0xf0]  ;;  %v8396_v36 = vor.u32 %v9243_v5, %v8395_v26 }
0x309b   : > { %v8379_v63 = vor.u32 %v9239_v55, %v8378_v51  ;;  %v9247_v56 = vld [vmem:[#allocation5 + $0xab4] sm:$0xf0] }
0x309c   : > { %v4743_v37 = vadd.f32 %v4742_v27, %v4740_v12  ;;  %v8413_v24 = vor.u32 %v9247_v56, %v8412_v50  ;;  %4954 = vmatpush.bf16.msrb.mxu1 %v8396_v36  ;;  %v8374_v12 = vld [vmem:[#allocation5 + $0xa20] sm:$0xf]  ;;  %v9238_v27 = vld [vmem:[#allocation5 + $0xa24] sm:$0xf0] }
0x309e   : > { %v4746_v22 = vadd.f32 %v4745_v17, %v4743_v37  ;;  %5000 = vmatpush.bf16.msrb.mxu3 %v8413_v24  ;;  %v8391_v37 = vld [vmem:[#allocation5 + $0xa60] sm:$0xf]  ;;  %v8375_v17 = vor.u32 %v9238_v27, %v8374_v12 }
0x30a0   : > { %v4748_v34 = vadd.f32 %v4747_v4, %v4746_v22  ;;  %v9242_v4 = vld [vmem:[#allocation5 + $0xa64] sm:$0xf0]  ;;  %v8408_v22 = vld [vmem:[#allocation5 + $0xaa0] sm:$0xf] }
0x30a2   : > { %v4750_v11 = vmul.f32 0.044715, %v4748_v34  ;;  %v4749_v6 = vmul.f32 0.5, %v4748_v34 }
0x30a4   : > { %v4751_v53 = vmul.f32 %v4750_v11, %v4748_v34  ;;  %v8392_v11 = vor.u32 %v9242_v4, %v8391_v37 }
0x30a6   : > { %v4752_v58 = vmul.f32 %v4751_v53, %v4748_v34  ;;  %4955 = vmatpush.bf16.msrb.mxu1 %v8392_v11 }
0x30a8   : > { %v4753_v0 = vadd.f32 %v4752_v58, %v4748_v34  ;;  %v9246_v34 = vld [vmem:[#allocation5 + $0xaa4] sm:$0xf0] }
0x30a9   : > { %v8409_v53 = vor.u32 %v9246_v34, %v8408_v22 }
0x30aa   : > { %v4754_v2 = vmul.f32 0.7978846, %v4753_v0 }
0x30ab   : > { %5001 = vmatpush.bf16.msrb.mxu3 %v8409_v53 }
0x30ac   : > { %9765 = vtanh.f32 %v4754_v2 }
0x30b2   : > { %v9766_v23 = vpop.eup %9765 }
0x30b3   : > { %v4756_v30 = vadd.f32 1.0, %v9766_v23 }
0x30b5   : > { %v4757_v54 = vmul.f32 %v4756_v30, %v4749_v6 }
0x30b7   : > { %v4758_v1 = vpack.c.bf16 %v4757_v54, %v4757_v54 }
0x30b9   : > { %4831 = vmatmul.bf16.vlgmr.msra.gmra.mxu0 %v4758_v1 }
0x3136   : > { %v4832_v38 = vpop.f32.mrf.mxu0 }
0x3137   : > { %v4836_v39 = vadd.f32 %v4832_v38, %v11174_v46  ;;  %v8386_v46 = vld [vmem:[#allocation5 + $0xa50] sm:$0xf] }
0x3138   : > { %v8387_v18 = vor.u32 %v9241_v14, %v8386_v46 }
0x3139   : > { %v11191_v41 = vadd.f32 %v4837_v7, %v4836_v39  ;;  %v4839_v7 = vld [vmem:[#allocation7 + $0x650] ss:$0 sm:$0xff] }
0x313a   : > { %4906 = vmatpush.bf16.msrb.mxu2 %v8387_v18  ;;  %v4874_v18 = vld [vmem:[#allocation7 + $0x670] ss:$0 sm:$0xff] }
0x313b   : > { %v4841_v3 = vsel %vm4218_vm9, %v11191_v41, 0.0 }
0x313c   : > { %4842 = vadd.xlane.f32.xlu2 %v4841_v3 }
0x313e   : > { %v4834_v40 = vpop.f32.mrf.mxu0  ;;  %4907 = vmatpush.bf16.msrb.mxu2 %v8383_v25 }
0x313f   : > { %v4840_v40 = vld [vmem:[#allocation7 + $0x660] ss:$0 sm:$0xff] }
0x3142   : > { %4908 = vmatpush.bf16.msrb.mxu2 %v8379_v63 }
0x3146   : > { %4909 = vmatpush.bf16.msrb.mxu2 %v8375_v17 }
0x31af   : > { %v4843_v33 = vpop.xlane.xlu2 %4842 }
0x31b0   : > { %v4844_v32 = vmul.f32 %v4843_v33, %v10899_v9 }
0x31b2   : > { %v11197_v61 = vsub.f32 %v11191_v41, %v4844_v32 }
0x31b4   : > { %v4846_v21 = vmul.f32 %v11197_v61, %v11197_v61 }
0x31b6   : > { %v4847_v43 = vsel %vm4218_vm9, %v4846_v21, 0.0 }
0x31b7   : > { %4848 = vadd.xlane.f32.xlu0 %v4847_v43  ;;  %v4923_v43 = vld [vmem:[#allocation7 + $0x680] ss:$0 sm:$0xff] }
0x322a   : > { %v4849_v58 = vpop.xlane.xlu0 %4848 }
0x322b   : > { %v4850_v0 = vmul.f32 %v4849_v58, %v10899_v9 }
0x322d   : > { %v4851_v2 = vadd.f32 1e-05, %v4850_v0 }
0x322f   : > { %9767 = vrsqrt.f32 %v4851_v2  ;;  %vm4858_vm6 = vweird.f32 %v4851_v2 }
0x3235   : > { %v9768_v23 = vpop.eup %9767 }
0x3236   : > { %v4853_v6 = vmul.f32 %v9768_v23, %v4851_v2  ;;  %vm4859_vm5 = vweird.f32 %v9768_v23 }
0x3237   : > { %vm4860_vm12 = vmor %vm4858_vm6, %vm4859_vm5 }
0x3238   : > { %v4854_v30 = vmul.f32 %v9768_v23, %v4853_v6 }
0x323a   : > { %v4855_v54 = vmul.f32 0.5, %v4854_v30 }
0x323c   : > { %v4856_v1 = vsub.f32 1.5, %v4855_v54 }
0x323e   : > { %v4857_v38 = vmul.f32 %v9768_v23, %v4856_v1 }
0x3240   : > { %v4861_v39 = vsel %vm4860_vm12, %v9768_v23, %v4857_v38 }
0x3241   : > { %v4862_v3 = vmul.f32 %v4861_v39, %v11197_v61 }
0x3243   : > { %v4863_v33 = vmul.f32 %v4862_v3, %v4839_v7 }
0x3245   : > { %v4864_v32 = vadd.f32 %v4863_v33, %v4840_v40 }
0x3247   : > { %v4865_v21 = vpack.c.bf16 %v4864_v32, %v4864_v32 }
0x3249   : > { %8388 = vmatmul.msk.bf16.vlgmr.msrb.gmra.mxu2 %vm1505_vm11, %v4865_v21  ;;  %8405 = vmatmul.msk.bf16.vlgmr.msrb.gmra.mxu1 %vm1505_vm11, %v4865_v21 }
0x324a   : > { %8422 = vmatmul.msk.bf16.vlgmr.msrb.gmra.mxu3 %vm1505_vm11, %v4865_v21 }
0x32c6   : > { %v4957_v46 = vpop.f32.mrf.mxu1 }
0x32c7   : > { %v4958_v14 = vadd.f32 %v4957_v46, %v4923_v43 }
0x32c9   : > { %v5036_v49 = vpack.c.bf16 %v4958_v14, %v4958_v14 }
0x32cb   : > { %v5044_v31 = vsel %vm1505_vm11, %v5036_v49, 0 }
0x32cc   : > { %v4911_v13 = vpop.f32.mrf.mxu2  ;;  %5053 = vmatpush.bf16.xpose.msra.mxu2 %v5044_v31 }
0x32cd   : > { %v4912_v61 = vadd.f32 %v4911_v13, %v4874_v18  ;;  %v5003_v59 = vpop.f32.mrf.mxu3 }
0x32ce   : > { %v5004_v60 = vadd.f32 %v5003_v59, %v4969_v45  ;;  %v4959_v10 = vpop.f32.mrf.mxu1 }
0x32cf   : > { %v5007_v16 = vpack.c.bf16 %v4912_v61, %v4912_v61 }
0x32d0   : > { %v5115_v8 = vpack.c.bf16 %v5004_v60, %v5004_v60 }
0x32d1   : > { %v5009_v25 = vsel %vm4439_vm14, %v5007_v16, 0 }
0x32d2   : > { %v5123_v28 = vsel %vm4439_vm14, %v5115_v8, 0  ;;  %5018 = vmatpush.bf16.msrb.mxu0 %v5009_v25 }
0x32d3   : > { %5132 = vmatpush.bf16.msra.mxu1 %v5123_v28 }
0x32d4   : > { %v4913_v48 = vpop.f32.mrf.mxu2 }
0x32d5   : > { %v5005_v44 = vpop.f32.mrf.mxu3  ;;  %8423 = vmatmul.msk.bf16.vlgmr.msrb.gmra.mxu0 %vm4432_vm8, %v11130_v42 }
0x32e5   : > { %8424 = vmatmul.msk.bf16.gmra.mxu0 %vm4432_vm8, %v11136_v20 }
0x3352   : > { %v5020_v19 = vpop.f32.mrf.mxu0 }
0x3353   : > { %v5030_v51 = vmul.f32 %v5020_v19, %v11140_v62 }
0x335a   : > { %v5022_v57 = vpop.f32.mrf.mxu0 }
0x335b   : > { %v5031_v55 = vmul.f32 %v5022_v57, %v11142_v47 }
0x335d   : > { %v5034_v26 = vpack.c.bf16 %v5031_v55, %v5030_v51 }
0x335f   : > { %8425 = vmatmul.msk.bf16.vlgmr.msra.gmra.mxu2 %vm1505_vm11, %v5034_v26 }
0x3362   : > { %v5025_v63 = vpop.f32.mrf.mxu0 }
0x3363   : > { %v5032_v50 = vmul.f32 %v5025_v63, %v11147_v29 }
0x336a   : > { %v5027_v5 = vpop.f32.mrf.mxu0 }
0x336b   : > { %v5033_v56 = vmul.f32 %v5027_v5, %v11149_v15 }
0x336d   : > { %v5035_v36 = vpack.c.bf16 %v5033_v56, %v5032_v50  ;;  %v8444_v56 = vld [vmem:[#allocation5 + $0xb10] sm:$0xf] }
0x336f   : > { %8426 = vmatmul.msk.bf16.gmra.mxu2 %vm1505_vm11, %v5035_v36  ;;  %v9253_v36 = vld [vmem:[#allocation5 + $0xb14] sm:$0xf0] }
0x33e2   : > { %v5055_v42 = vpop.f32.mrf.mxu2 }
0x33e3   : > { %v5065_v20 = vmul.f32 0.35355338, %v5055_v42 }
0x33e5   : > { %v5069_v24 = vsel %vm4432_vm8, %v5065_v20, -inf }
0x33e6   : > { %5070 = vmax.xlane.f32.xlu1 %v5069_v24 }
0x33ea   : > { %v5057_v12 = vpop.f32.mrf.mxu2 }
0x33eb   : > { %v5066_v27 = vmul.f32 0.35355338, %v5057_v12  ;;  %v8440_v12 = vld [vmem:[#allocation5 + $0xb00] sm:$0xf] }
0x33ed   : > { %v5072_v37 = vsel %vm4432_vm8, %v5066_v27, -inf }
0x33ee   : > { %5073 = vmax.xlane.f32.xlu2 %v5072_v37 }
0x33f2   : > { %v5060_v17 = vpop.f32.mrf.mxu2 }
0x33f3   : > { %v5067_v4 = vmul.f32 0.35355338, %v5060_v17  ;;  %v8436_v17 = vld [vmem:[#allocation5 + $0xaf0] sm:$0xf] }
0x33f5   : > { %v5075_v22 = vsel %vm4432_vm8, %v5067_v4, -inf }
0x33f6   : > { %5076 = vmax.xlane.f32.xlu0 %v5075_v22 }
0x33fa   : > { %v5062_v34 = vpop.f32.mrf.mxu2 }
0x33fb   : > { %v5068_v11 = vmul.f32 0.35355338, %v5062_v34 }
0x33fd   : > { %v5078_v53 = vsel %vm4432_vm8, %v5068_v11, -inf }
0x33fe   : > { %5079 = vmax.xlane.f32.xlu1 %v5078_v53 }
0x3459   : > { %v5071_v58 = vpop.xlane.xlu1 %5070 }
0x345a   : > { %v5081_v0 = vsub.f32 %v5065_v20, %v5071_v58  ;;  %v8445_v20 = vor.u32 %v9253_v36, %v8444_v56  ;;  %v5213_v58 = vld [vmem:[#allocation7 + $0x6a0] ss:$0 sm:$0xff]  ;;  %v9263_v36 = vld [vmem:[#allocation5 + $0xbb4] sm:$0xf0] }
0x345b   : > { %v8486_v56 = vld [vmem:[#allocation5 + $0xbb0] sm:$0xf] }
0x345c   : > { %v5085_v2 = vmul.f32 1.442695, %v5081_v0 }
0x345e   : > { %9769 = vpow2.f32 %v5085_v2 }
0x3461   : > { %v5074_v23 = vpop.xlane.xlu2 %5073 }
0x3462   : > { %v5082_v6 = vsub.f32 %v5066_v27, %v5074_v23  ;;  %v9252_v27 = vld [vmem:[#allocation5 + $0xb04] sm:$0xf0] }
0x3463   : > { %v8441_v37 = vor.u32 %v9252_v27, %v8440_v12  ;;  %v8478_v27 = vld [vmem:[#allocation5 + $0xb90] sm:$0xf] }
0x3464   : > { %v9770_v30 = vpop.eup %9769  ;;  %v5087_v54 = vmul.f32 1.442695, %v5082_v6 }
0x3465   : > { %v5093_v1 = vsel %vm4432_vm8, %v9770_v30, 0.0 }
0x3466   : > { %9771 = vpow2.f32 %v5087_v54  ;;  %5094 = vadd.xlane.f32.xlu2 %v5093_v1 }
0x3469   : > { %v5077_v38 = vpop.xlane.xlu0 %5076 }
0x346a   : > { %v5083_v7 = vsub.f32 %v5067_v4, %v5077_v38  ;;  %v9251_v4 = vld [vmem:[#allocation5 + $0xaf4] sm:$0xf0] }
0x346c   : > { %v9772_v39 = vpop.eup %9771  ;;  %v5089_v3 = vmul.f32 1.442695, %v5083_v7  ;;  %v8461_v7 = vld [vmem:[#allocation5 + $0xb50] sm:$0xf] }
0x346d   : > { %v5096_v40 = vsel %vm4432_vm8, %v9772_v39, 0.0 }
0x346e   : > { %9773 = vpow2.f32 %v5089_v3  ;;  %5097 = vadd.xlane.f32.xlu0 %v5096_v40  ;;  %v9256_v40 = vld [vmem:[#allocation5 + $0xb44] sm:$0xf0] }
0x3471   : > { %v5080_v33 = vpop.xlane.xlu1 %5079 }
0x3472   : > { %v5084_v32 = vsub.f32 %v5068_v11, %v5080_v33 }
0x3474   : > { %v9774_v21 = vpop.eup %9773  ;;  %v5091_v43 = vmul.f32 1.442695, %v5084_v32  ;;  %v8453_v32 = vld [vmem:[#allocation5 + $0xb30] sm:$0xf] }
0x3475   : > { %v5099_v46 = vsel %vm4432_vm8, %v9774_v21, 0.0 }
0x3476   : > { %9775 = vpow2.f32 %v5091_v43  ;;  %5100 = vadd.xlane.f32.xlu1 %v5099_v46  ;;  %v8449_v46 = vld [vmem:[#allocation5 + $0xb20] sm:$0xf] }
0x347c   : > { %v9776_v14 = vpop.eup %9775 }
0x347d   : > { %v5102_v49 = vsel %vm4432_vm8, %v9776_v14, 0.0 }
0x347e   : > { %5103 = vadd.xlane.f32.xlu2 %v5102_v49 }
0x34d9   : > { %v5095_v18 = vpop.xlane.xlu2 %5094 }
0x34da   : > { %9777 = vrcp.f32 %v5095_v18 }
0x34e0   : > { %v9778_v45 = vpop.eup %9777 }
0x34e1   : > { %v5098_v31 = vpop.xlane.xlu0 %5097  ;;  %v5109_v61 = vmul.f32 %v9778_v45, %v9770_v30 }
0x34e2   : > { %9779 = vrcp.f32 %v5098_v31 }
0x34e8   : > { %v9780_v13 = vpop.eup %9779 }
0x34e9   : > { %v5110_v59 = vmul.f32 %v9780_v13, %v9772_v39  ;;  %v5101_v10 = vpop.xlane.xlu1 %5100  ;;  %v9257_v39 = vld [vmem:[#allocation5 + $0xb54] sm:$0xf0] }
0x34ea   : > { %9781 = vrcp.f32 %v5101_v10  ;;  %v8462_v3 = vor.u32 %v9257_v39, %v8461_v7 }
0x34eb   : > { %v5113_v60 = vpack.c.bf16 %v5110_v59, %v5109_v61 }
0x34ec   : > { %5282 = vmatpush.bf16.msra.mxu0 %v8462_v3 }
0x34ed   : > { %8427 = vmatmul.msk.bf16.vlgmr.msra.gmra.mxu1 %vm4432_vm8, %v5113_v60 }
0x34f0   : > { %v9782_v8 = vpop.eup %9781 }
0x34f1   : > { %v5104_v16 = vpop.xlane.xlu2 %5103  ;;  %v5111_v28 = vmul.f32 %v9782_v8, %v9774_v21  ;;  %v9255_v21 = vld [vmem:[#allocation5 + $0xb34] sm:$0xf0]  ;;  %v5215_v8 = vld [vmem:[#allocation7 + $0x6b0] ss:$0 sm:$0xff] }
0x34f2   : > { %9783 = vrcp.f32 %v5104_v16  ;;  %v8454_v43 = vor.u32 %v9255_v21, %v8453_v32 }
0x34f8   : > { %v9784_v25 = vpop.eup %9783 }
0x34f9   : > { %v5112_v48 = vmul.f32 %v9784_v25, %v9776_v14  ;;  %v9254_v14 = vld [vmem:[#allocation5 + $0xb24] sm:$0xf0] }
0x34fa   : > { %v8450_v49 = vor.u32 %v9254_v14, %v8449_v46 }
0x34fb   : > { %v5114_v44 = vpack.c.bf16 %v5112_v48, %v5111_v28  ;;  %v5216_v48 = vld [vmem:[#allocation7 + $0x6c0] ss:$0 sm:$0xff] }
0x34fd   : > { %8428 = vmatmul.msk.bf16.gmra.mxu1 %vm4432_vm8, %v5114_v44 }
0x356a   : > { %v5134_v19 = vpop.f32.mrf.mxu1 }
0x356b   : > { %v5144_v42 = vmul.f32 %v5134_v19, %v11140_v62 }
0x3572   : > { %v5136_v57 = vpop.f32.mrf.mxu1 }
0x3573   : > { %v5145_v5 = vmul.f32 %v5136_v57, %v11142_v47  ;;  %v8437_v47 = vor.u32 %v9251_v4, %v8436_v17  ;;  %v8474_v4 = vld [vmem:[#allocation5 + $0xb80] sm:$0xf] }
0x3575   : > { %v5148_v24 = vpack.c.bf16 %v5145_v5, %v5144_v42  ;;  %v9264_v5 = vld [vmem:[#allocation5 + $0xbc4] sm:$0xf0]  ;;  %v8482_v42 = vld [vmem:[#allocation5 + $0xba0] sm:$0xf] }
0x357a   : > { %v5139_v51 = vpop.f32.mrf.mxu1 }
0x357b   : > { %v5146_v26 = vmul.f32 %v5139_v51, %v11147_v29  ;;  %v8432_v29 = vld [vmem:[#allocation5 + $0xae0] sm:$0xf]  ;;  %v8494_v51 = vld [vmem:[#allocation5 + $0xbd0] sm:$0xf] }
0x3582   : > { %v5141_v55 = vpop.f32.mrf.mxu1 }
0x3583   : > { %v5147_v63 = vmul.f32 %v5141_v55, %v11149_v15  ;;  %v9250_v15 = vld [vmem:[#allocation5 + $0xae4] sm:$0xf0]  ;;  %v9265_v55 = vld [vmem:[#allocation5 + $0xbd4] sm:$0xf0] }
0x3584   : > { %v8433_v22 = vor.u32 %v9250_v15, %v8432_v29  ;;  %v5250_v15 = vld [vmem:[#allocation7 + $0x6d0] ss:$0 sm:$0xff] }
0x3585   : > { %v5149_v50 = vpack.c.bf16 %v5147_v63, %v5146_v26  ;;  %v8495_v26 = vor.u32 %v9265_v55, %v8494_v51  ;;  %v8490_v63 = vld [vmem:[#allocation5 + $0xbc0] sm:$0xf] }
0x3587   : > { %5156 = vmatpush.bf16.msra.mxu3 %v5149_v50  ;;  %5387 = vmatpush.bf16.msrb.mxu2 %v8495_v26  ;;  %v8491_v50 = vor.u32 %v9264_v5, %v8490_v63 }
0x358b   : > { %5157 = vmatpush.bf16.msra.mxu3 %v5148_v24  ;;  %5388 = vmatpush.bf16.msrb.mxu2 %v8491_v50  ;;  %v9262_v24 = vld [vmem:[#allocation5 + $0xba4] sm:$0xf0] }
0x358c   : > { %v8483_v12 = vor.u32 %v9262_v24, %v8482_v42 }
0x358e   : > { %8429 = vmatmul.msk.bf16.vlgmr.msra.gmra.mxu3 %vm381_vm1, %v11168_v52 }
0x358f   : > { %5203 = vmatpush.bf16.msrb.mxu3 %v8445_v20  ;;  %v8487_v20 = vor.u32 %v9263_v36, %v8486_v56 }
0x3591   : > { %5389 = vmatpush.bf16.msrb.mxu2 %v8487_v20 }
0x3593   : > { %5204 = vmatpush.bf16.msrb.mxu3 %v8441_v37  ;;  %v9261_v37 = vld [vmem:[#allocation5 + $0xb94] sm:$0xf0] }
0x3594   : > { %v8479_v17 = vor.u32 %v9261_v37, %v8478_v27 }
0x3595   : > { %5390 = vmatpush.bf16.msrb.mxu2 %v8483_v12 }
0x3597   : > { %5205 = vmatpush.bf16.msrb.mxu3 %v8437_v47  ;;  %v9260_v47 = vld [vmem:[#allocation5 + $0xb84] sm:$0xf0] }
0x3598   : > { %v8475_v29 = vor.u32 %v9260_v47, %v8474_v4  ;;  %v9269_v4 = vld [vmem:[#allocation5 + $0xc44] sm:$0xf0]  ;;  %v8507_v47 = vld [vmem:[#allocation5 + $0xc30] sm:$0xf] }
0x3599   : > { %5391 = vmatpush.bf16.msrb.mxu2 %v8479_v17  ;;  %v8511_v17 = vld [vmem:[#allocation5 + $0xc40] sm:$0xf] }
0x359b   : > { %5206 = vmatpush.bf16.msrb.mxu3 %v8433_v22  ;;  %v8470_v22 = vld [vmem:[#allocation5 + $0xb70] sm:$0xf] }
0x359d   : > { %5392 = vmatpush.bf16.msrb.mxu2 %v8475_v29 }
0x3611   : > { %v5159_v62 = vpop.f32.mrf.mxu3 }
0x3612   : > { %v5163_v34 = vpack.c.bf16 %v5159_v62, %v5159_v62  ;;  %v9259_v62 = vld [vmem:[#allocation5 + $0xb74] sm:$0xf0] }
0x3614   : > { %8446 = vmatmul.msk.bf16.vlgmr.msrb.gmra.mxu3 %vm1505_vm11, %v5163_v34 }
0x3619   : > { %v5161_v11 = vpop.f32.mrf.mxu3 }
0x3697   : > { %v5208_v53 = vpop.f32.mrf.mxu3 }
0x3698   : > { %v5212_v0 = vadd.f32 %v5208_v53, %v11191_v41  ;;  %v8457_v41 = vld [vmem:[#allocation5 + $0xb40] sm:$0xf]  ;;  %v8471_v53 = vor.u32 %v9259_v62, %v8470_v22  ;;  %v9268_v22 = vld [vmem:[#allocation5 + $0xc34] sm:$0xf0] }
0x3699   : > { %v8458_v33 = vor.u32 %v9256_v40, %v8457_v41 }
0x369a   : > { %v11238_v2 = vadd.f32 %v5213_v58, %v5212_v0  ;;  %v8466_v58 = vld [vmem:[#allocation5 + $0xb60] sm:$0xf]  ;;  %v9258_v0 = vld [vmem:[#allocation5 + $0xb64] sm:$0xf0]  ;;  %5393 = vmatpush.bf16.msrb.mxu2 %v8471_v53 }
0x369b   : > { %5283 = vmatpush.bf16.msra.mxu0 %v8458_v33  ;;  %v8503_v53 = vld [vmem:[#allocation5 + $0xc20] sm:$0xf] }
0x369c   : > { %v5217_v52 = vsel %vm4218_vm9, %v11238_v2, 0.0 }
0x369d   : > { %5218 = vadd.xlane.f32.xlu0 %v5217_v52 }
0x369f   : > { %v5210_v23 = vpop.f32.mrf.mxu3  ;;  %5284 = vmatpush.bf16.msra.mxu0 %v8454_v43 }
0x36a3   : > { %5285 = vmatpush.bf16.msra.mxu0 %v8450_v49  ;;  %v5311_v49 = vld [vmem:[#allocation7 + $0x6f0] ss:$0 sm:$0xff] }
0x3710   : > { %v5219_v6 = vpop.xlane.xlu0 %5218 }
0x3711   : > { %v5220_v30 = vmul.f32 %v5219_v6, %v10899_v9  ;;  %v5302_v6 = vld [vmem:[#allocation7 + $0x6e0] sm:$0x7] }
0x3712   : > { %v5305_v7 = vperm.slane %v5302_v6, 1  ;;  %v5308_v40 = vperm.slane %v5302_v6, 2 }
0x3713   : > { %v5221_v54 = vsub.f32 %v11238_v2, %v5220_v30  ;;  %v8467_v30 = vor.u32 %v9258_v0, %v8466_v58  ;;  %v9267_v58 = vld [vmem:[#allocation5 + $0xc24] sm:$0xf0]  ;;  %v5404_v0 = vld [vmem:[#allocation7 + $0x720] ss:$0 sm:$0xff] }
0x3715   : > { %v5222_v1 = vmul.f32 %v5221_v54, %v5221_v54  ;;  %5394 = vmatpush.bf16.msrb.mxu2 %v8467_v30 }
0x3717   : > { %v5223_v38 = vsel %vm4218_vm9, %v5222_v1, 0.0 }
0x3718   : > { %5224 = vadd.xlane.f32.xlu1 %v5223_v38  ;;  %v5303_v38 = vperm.slane %v5302_v6, 0 }
0x378b   : > { %v5225_v18 = vpop.xlane.xlu1 %5224 }
0x378c   : > { %v5226_v31 = vmul.f32 %v5225_v18, %v10899_v9 }
0x378e   : > { %v5227_v45 = vadd.f32 1e-05, %v5226_v31 }
0x3790   : > { %9785 = vrsqrt.f32 %v5227_v45  ;;  %vm5234_vm13 = vweird.f32 %v5227_v45 }
0x3796   : > { %v9786_v13 = vpop.eup %9785 }
0x3797   : > { %v5229_v61 = vmul.f32 %v9786_v13, %v5227_v45  ;;  %vm5235_vm1 = vweird.f32 %v9786_v13 }
0x3798   : > { %vm5236_vm15 = vmor %vm5234_vm13, %vm5235_vm1  ;;  %vm5947_vm1 = vcmask 1040384   ;;  %vm5943_vm13 = vcmask 15360  }
0x3799   : > { %v5230_v59 = vmul.f32 %v9786_v13, %v5229_v61 }
0x379b   : > { %v5231_v60 = vmul.f32 0.5, %v5230_v59 }
0x379d   : > { %v5232_v10 = vsub.f32 1.5, %v5231_v60 }
0x379f   : > { %v5233_v16 = vmul.f32 %v9786_v13, %v5232_v10 }
0x37a1   : > { %v5237_v25 = vsel %vm5236_vm15, %v9786_v13, %v5233_v16 }
0x37a2   : > { %v5238_v28 = vmul.f32 %v5237_v25, %v5221_v54 }
0x37a4   : > { %v5239_v44 = vmul.f32 %v5238_v28, %v5215_v8 }
0x37a6   : > { %v5240_v19 = vadd.f32 %v5239_v44, %v5216_v48  ;;  %v5401_v44 = vld [vmem:[#allocation7 + $0x700] ss:$0 sm:$0xff] }
0x37a8   : > { %v5241_v57 = vpack.c.bf16 %v5240_v19, %v5240_v19 }
0x37aa   : > { %8463 = vmatmul.msk.bf16.vlgmr.msra.gmra.mxu0 %vm1505_vm11, %v5241_v57 }
0x3827   : > { %v5287_v34 = vpop.f32.mrf.mxu0 }
0x3828   : > { %v5288_v11 = vadd.f32 %v5287_v34, %v5250_v15  ;;  %v8512_v15 = vor.u32 %v9269_v4, %v8511_v17  ;;  %v5403_v34 = vld [vmem:[#allocation7 + $0x710] ss:$0 sm:$0xff] }
0x382a   : > { %v5291_v52 = vrot.slane %v5288_v11, 4  ;;  %v5306_v43 = vmul.f32 %v5305_v7, %v5288_v11  ;;  %5493 = vmatpush.bf16.msra.mxu3 %v8512_v15  ;;  %v5570_v7 = vld [vmem:[#allocation5 + $0xc00] sm:$0x1] }
0x382c   : > { %v5292_v23 = vsel %vm4726_vm10, %v5291_v52, %v5288_v11 }
0x382d   : > { %v5293_v54 = vrot.slane %v5292_v23, 4  ;;  %v8504_v23 = vor.u32 %v9267_v58, %v8503_v53 }
0x382f   : > { %v5294_v1 = vsel %vm4726_vm10, %v5293_v54, %v5288_v11  ;;  %v5289_v39 = vpop.f32.mrf.mxu0 }
0x3830   : > { %v5296_v3 = vrot.slane %v5294_v1, 3  ;;  %v5299_v41 = vrot.slane %v5294_v1, 1  ;;  %v5433_v1 = vld [vmem:[#allocation5 + $0xbe0] sm:$0x1] }
0x3831   : > { %v8529_v39 = vld [vmem:[#allocation5 + $0xc80] sm:$0xf] }
0x3832   : > { %v5298_v33 = vsel %vm615_vm7, 0.0, %v5296_v3  ;;  %v5301_v32 = vsel %vm4252_vm4, 0.0, %v5299_v41  ;;  %v9273_v3 = vld [vmem:[#allocation5 + $0xc84] sm:$0xf0] }
0x3833   : > { %v5304_v21 = vmul.f32 %v5303_v38, %v5298_v33  ;;  %v5309_v14 = vmul.f32 %v5308_v40, %v5301_v32  ;;  %v5503_v38 = vld [vmem:[#allocation5 + $0xbf0] sm:$0x1]  ;;  %v8530_v41 = vor.u32 %v9273_v3, %v8529_v39  ;;  %v9272_v33 = vld [vmem:[#allocation5 + $0xc74] sm:$0xf0] }
0x3834   : > { %v8525_v40 = vld [vmem:[#allocation5 + $0xc70] sm:$0xf] }
0x3835   : > { %v5307_v46 = vadd.f32 %v5306_v43, %v5304_v21  ;;  %5560 = vmatpush.bf16.msra.mxu2 %v8530_v41  ;;  %v8526_v32 = vor.u32 %v9272_v33, %v8525_v40  ;;  %v8521_v21 = vld [vmem:[#allocation5 + $0xc60] sm:$0xf]  ;;  %v9271_v43 = vld [vmem:[#allocation5 + $0xc64] sm:$0xf0] }
0x3837   : > { %v5310_v18 = vadd.f32 %v5309_v14, %v5307_v46  ;;  %v8522_v46 = vor.u32 %v9271_v43, %v8521_v21  ;;  %v8499_v14 = vld [vmem:[#allocation5 + $0xc10] sm:$0xf] }
0x3838   : > { %v5637_v21 = vld [vmem:[#allocation7 + $0x760] ss:$0 sm:$0xff] }
0x3839   : > { %v5312_v31 = vadd.f32 %v5311_v49, %v5310_v18  ;;  %5561 = vmatpush.bf16.msra.mxu2 %v8526_v32  ;;  %v9266_v49 = vld [vmem:[#allocation5 + $0xc14] sm:$0xf0] }
0x383a   : > { %v8500_v18 = vor.u32 %v9266_v49, %v8499_v14 }
0x383b   : > { %v5314_v45 = vmul.f32 0.044715, %v5312_v31  ;;  %v5313_v16 = vmul.f32 0.5, %v5312_v31 }
0x383d   : > { %v5315_v13 = vmul.f32 %v5314_v45, %v5312_v31  ;;  %5562 = vmatpush.bf16.msra.mxu2 %v8522_v46  ;;  %v9270_v45 = vld [vmem:[#allocation5 + $0xc54] sm:$0xf0]  ;;  %v5638_v46 = vld [vmem:[#allocation7 + $0x770] ss:$0 sm:$0xff] }
0x383f   : > { %v5316_v61 = vmul.f32 %v5315_v13, %v5312_v31 }
0x3841   : > { %v5317_v59 = vadd.f32 %v5316_v61, %v5312_v31  ;;  %v8517_v31 = vld [vmem:[#allocation5 + $0xc50] sm:$0xf]  ;;  %v8547_v61 = vld [vmem:[#allocation5 + $0xcc0] sm:$0xf] }
0x3842   : > { %v8518_v13 = vor.u32 %v9270_v45, %v8517_v31  ;;  %v8580_v31 = vld [vmem:[#allocation5 + $0xd60] sm:$0xf]  ;;  %v9286_v45 = vld [vmem:[#allocation5 + $0xd64] sm:$0xf0] }
0x3843   : > { %v5318_v60 = vmul.f32 0.7978846, %v5317_v59  ;;  %v9277_v59 = vld [vmem:[#allocation5 + $0xcc4] sm:$0xf0] }
0x3844   : > { %5563 = vmatpush.bf16.msra.mxu2 %v8518_v13  ;;  %v8612_v13 = vld [vmem:[#allocation5 + $0xde0] sm:$0xf] }
0x3845   : > { %9787 = vtanh.f32 %v5318_v60  ;;  %v8548_v60 = vor.u32 %v9277_v59, %v8547_v61  ;;  %v8581_v61 = vor.u32 %v9286_v45, %v8580_v31  ;;  %v9294_v59 = vld [vmem:[#allocation5 + $0xde4] sm:$0xf0]  ;;  %v8588_v31 = vld [vmem:[#allocation5 + $0xd80] sm:$0xf] }
0x384b   : > { %v9788_v10 = vpop.eup %9787 }
0x384c   : > { %v5320_v8 = vadd.f32 1.0, %v9788_v10  ;;  %v8543_v10 = vld [vmem:[#allocation5 + $0xcb0] sm:$0xf] }
0x384e   : > { %v5321_v25 = vmul.f32 %v5320_v8, %v5313_v16  ;;  %v9276_v16 = vld [vmem:[#allocation5 + $0xcb4] sm:$0xf0] }
0x384f   : > { %v8544_v8 = vor.u32 %v9276_v16, %v8543_v10  ;;  %v9302_v10 = vld [vmem:[#allocation5 + $0xe64] sm:$0xf0]  ;;  %v8613_v16 = vor.u32 %v9294_v59, %v8612_v13 }
0x3850   : > { %v5322_v28 = vpack.c.bf16 %v5321_v25, %v5321_v25  ;;  %v8539_v25 = vld [vmem:[#allocation5 + $0xca0] sm:$0xf]  ;;  %v9288_v13 = vld [vmem:[#allocation5 + $0xd84] sm:$0xf0] }
0x3851   : > { %v9296_v59 = vld [vmem:[#allocation5 + $0xe04] sm:$0xf0] }
0x3852   : > { %5395 = vmatmul.bf16.vlgmr.msrb.gmra.mxu2 %v5322_v28  ;;  %v9275_v28 = vld [vmem:[#allocation5 + $0xca4] sm:$0xf0] }
0x3853   : > { %5846 = vmatpush.bf16.msrb.mxu2 %v8613_v16  ;;  %v8552_v16 = vld [vmem:[#allocation5 + $0xcf0] sm:$0xf] }
0x38d5   : > { %v5396_v48 = vpop.f32.mrf.mxu2 }
0x38d6   : > { %v5400_v19 = vadd.f32 %v5396_v48, %v11238_v2  ;;  %v8540_v48 = vor.u32 %v9275_v28, %v8539_v25 }
0x38d8   : > { %v5402_v57 = vadd.f32 %v5401_v44, %v5400_v19  ;;  %v8535_v44 = vld [vmem:[#allocation5 + $0xc90] sm:$0xf]  ;;  %v9274_v19 = vld [vmem:[#allocation5 + $0xc94] sm:$0xf0] }
0x38da   : > { %v5405_v51 = vsel %vm4218_vm9, %v5402_v57, 0.0 }
0x38db   : > { %5406 = vadd.xlane.f32.xlu2 %v5405_v51 }
0x38dd   : > { %v5398_v55 = vpop.f32.mrf.mxu2 }
0x394e   : > { %v5407_v26 = vpop.xlane.xlu2 %5406 }
0x394f   : > { %v5408_v63 = vmul.f32 %v5407_v26, %v10899_v9 }
0x3951   : > { %v5409_v5 = vsub.f32 %v5402_v57, %v5408_v63  ;;  %v8536_v57 = vor.u32 %v9274_v19, %v8535_v44 }
0x3953   : > { %v5410_v50 = vmul.f32 %v5409_v5, %v5409_v5 }
0x3955   : > { %v5411_v56 = vsel %vm4218_vm9, %v5410_v50, 0.0 }
0x3956   : > { %5412 = vadd.xlane.f32.xlu0 %v5411_v56 }
0x39c9   : > { %v5413_v36 = vpop.xlane.xlu0 %5412 }
0x39ca   : > { %v5414_v42 = vmul.f32 %v5413_v36, %v10899_v9  ;;  %v8508_v9 = vor.u32 %v9268_v22, %v8507_v47  ;;  %v10117_v22 = vmov 128.0  }
0x39cc   : > { %v5415_v20 = vadd.f32 1e-05, %v5414_v42  ;;  %5494 = vmatpush.bf16.msra.mxu3 %v8508_v9 }
0x39ce   : > { %9789 = vrsqrt.f32 %v5415_v20  ;;  %vm5422_vm3 = vweird.f32 %v5415_v20 }
0x39cf   : > { %9791 = vrcp.f32 %v10117_v22 }
0x39d0   : > { %5495 = vmatpush.bf16.msra.mxu3 %v8504_v23 }
0x39d4   : > { %v9790_v24 = vpop.eup %9789  ;;  %5496 = vmatpush.bf16.msra.mxu3 %v8500_v18 }
0x39d5   : > { %v5417_v2 = vmul.f32 %v9790_v24, %v5415_v20  ;;  %vm5423_vm2 = vweird.f32 %v9790_v24 }
0x39d6   : > { %vm5424_vm10 = vmor %vm5422_vm3, %vm5423_vm2 }
0x39d7   : > { %v5418_v12 = vmul.f32 %v9790_v24, %v5417_v2  ;;  %v5431_v2 = vld [vmem:[#allocation7 + $0x750] ss:$0 sm:$0xff] }
0x39d8   : > { %5627 = vmatpush.bf16.msrb.mxu3 %v8548_v60  ;;  %v8644_v60 = vld [vmem:[#allocation5 + $0xe60] sm:$0xf] }
0x39d9   : > { %v5419_v27 = vmul.f32 0.5, %v5418_v12 }
0x39db   : > { %v5420_v37 = vsub.f32 1.5, %v5419_v27 }
0x39dc   : > { %5628 = vmatpush.bf16.msrb.mxu3 %v8544_v8  ;;  %v8645_v8 = vor.u32 %v9302_v10, %v8644_v60  ;;  %v8589_v60 = vor.u32 %v9288_v13, %v8588_v31 }
0x39dd   : > { %v5421_v29 = vmul.f32 %v9790_v24, %v5420_v37 }
0x39df   : > { %v5425_v62 = vsel %vm5424_vm10, %v9790_v24, %v5421_v29  ;;  %vm6285_vm10 = vcmask 1047554  }
0x39e0   : > { %v5426_v11 = vmul.f32 %v5425_v62, %v5409_v5  ;;  %5629 = vmatpush.bf16.msrb.mxu3 %v8540_v48  ;;  %v9792_v62 = vpop.eup %9791 }
0x39e2   : > { %v5427_v52 = vmul.f32 %v5426_v11, %v5403_v34  ;;  %v5643_v34 = vmul.f32 128.0, %v9792_v62 }
0x39e4   : > { %v5428_v6 = vadd.f32 %v5427_v52, %v5404_v0  ;;  %5630 = vmatpush.bf16.msrb.mxu3 %v8536_v57  ;;  %v5644_v9 = vsub.f32 1.0, %v5643_v34  ;;  %v8576_v57 = vld [vmem:[#allocation5 + $0xd50] sm:$0xf] }
0x39e5   : > { %v8632_v34 = vld [vmem:[#allocation5 + $0xe30] sm:$0xf] }
0x39e6   : > { %v5430_v30 = vpack.c.bf16 %v5428_v6, %v5428_v6  ;;  %5429 = vst.msk [vmem:[%s11259_s29] sm:$0xf] %vm4218_vm9, %v5428_v6  ;;  %v5645_v11 = vmul.f32 %v9792_v62, %v5644_v9  ;;  %v9299_v9 = vld [vmem:[#allocation5 + $0xe34] sm:$0xf0] }
0x39e8   : > { %v5438_v54 = vsel %vm4439_vm14, %v5430_v30, 0  ;;  %v5646_v53 = vadd.f32 %v9792_v62, %v5645_v11 }
0x39e9   : > { %5447 = vmatpush.bf16.msrb.mxu1 %v5438_v54  ;;  %5514 = vmatpush.bf16.msrb.mxu0 %v5438_v54 }
0x39ec   : > { %8496 = vmatmul.msk.bf16.vlgmr.msrb.gmra.mxu1 %vm4432_vm8, %v5433_v1  ;;  %8514 = vmatmul.msk.bf16.vlgmr.msrb.gmra.mxu0 %vm4432_vm8, %v5503_v38 }
0x39ed   : > { %5581 = vmatpush.bf16.msra.mxu1 %v5438_v54  ;;  %5768 = vmatpush.bf16.msra.mxu0 %v8581_v61  ;;  %v8620_v61 = vld [vmem:[#allocation5 + $0xe00] sm:$0xf] }
0x39ee   : > { %v8621_v10 = vor.u32 %v9296_v59, %v8620_v61 }
0x39f1   : > { %5924 = vmatpush.bf16.msrb.mxu1 %v8645_v8  ;;  %v9279_v8 = vld [vmem:[#allocation5 + $0xcf4] sm:$0xf0] }
0x39fc   : > { %8532 = vmatmul.msk.bf16.vlgmr.msra.gmra.mxu1 %vm4432_vm8, %v5570_v7 }
0x3a69   : > { %v5449_v51 = vpop.f32.mrf.mxu1  ;;  %v5516_v55 = vpop.f32.mrf.mxu0 }
0x3a6a   : > { %v5453_v26 = vpack.c.bf16 %v5449_v51, %v5449_v51  ;;  %v5520_v63 = vpack.c.bf16 %v5516_v55, %v5516_v55  ;;  %v9285_v51 = vld [vmem:[#allocation5 + $0xd54] sm:$0xf0]  ;;  %v8608_v55 = vld [vmem:[#allocation5 + $0xdd0] sm:$0xf] }
0x3a6c   : > { %8513 = vmatmul.msk.bf16.vlgmr.msra.gmra.mxu3 %vm1505_vm11, %v5453_v26  ;;  %8531 = vmatmul.msk.bf16.vlgmr.msra.gmra.mxu2 %vm1505_vm11, %v5520_v63  ;;  %v8577_v26 = vor.u32 %v9285_v51, %v8576_v57  ;;  %v9293_v63 = vld [vmem:[#allocation5 + $0xdd4] sm:$0xf0] }
0x3a6d   : > { %v9295_v57 = vld [vmem:[#allocation5 + $0xdf4] sm:$0xf0] }
0x3a6e   : > { %5769 = vmatpush.bf16.msra.mxu0 %v8577_v26 }
0x3a71   : > { %v5451_v5 = vpop.f32.mrf.mxu1  ;;  %v5518_v50 = vpop.f32.mrf.mxu0 }
0x3a72   : > { %v8640_v5 = vld [vmem:[#allocation5 + $0xe50] sm:$0xf]  ;;  %v9301_v50 = vld [vmem:[#allocation5 + $0xe54] sm:$0xf0] }
0x3a79   : > { %v5583_v56 = vpop.f32.mrf.mxu1 }
0x3a7a   : > { %v5587_v36 = vpack.c.bf16 %v5583_v56, %v5583_v56  ;;  %v8609_v56 = vor.u32 %v9293_v63, %v8608_v55 }
0x3a7c   : > { %8549 = vmatmul.msk.bf16.vlgmr.msrb.gmra.mxu3 %vm1505_vm11, %v5587_v36  ;;  %vm5647_vm11 = vweird.f32 %v9792_v62  ;;  %v8641_v36 = vor.u32 %v9301_v50, %v8640_v5  ;;  %5847 = vmatpush.bf16.msrb.mxu2 %v8609_v56 }
0x3a7d   : > { %v11271_v58 = vsel %vm5647_vm11, %v9792_v62, %v5646_v53  ;;  %v9291_v62 = vld [vmem:[#allocation5 + $0xdb4] sm:$0xf0]  ;;  %v8633_v53 = vor.u32 %v9299_v9, %v8632_v34  ;;  %vm5675_vm11 = vcmp.eq.s32.totalorder %v10572_v35, 1 }
0x3a7e   : > { %5925 = vmatpush.bf16.msrb.mxu1 %v8641_v36 }
0x3a81   : > { %v5585_v42 = vpop.f32.mrf.mxu1 }
0x3a82   : > { %v8572_v42 = vld [vmem:[#allocation5 + $0xd40] sm:$0xf] }
0x3aef   : > { %v5498_v20 = vpop.f32.mrf.mxu3  ;;  %v5565_v24 = vpop.f32.mrf.mxu2 }
0x3af0   : > { %v5502_v37 = vadd.f32 %v5498_v20, %v5431_v2  ;;  %v9284_v20 = vld [vmem:[#allocation5 + $0xd44] sm:$0xf0] }
0x3af1   : > { %v8573_v2 = vor.u32 %v9284_v20, %v8572_v42 }
0x3af2   : > { %v5569_v17 = vadd.f32 %v5565_v24, %v5502_v37  ;;  %v8604_v24 = vld [vmem:[#allocation5 + $0xdc0] sm:$0xf]  ;;  %v9300_v37 = vld [vmem:[#allocation5 + $0xe44] sm:$0xf0] }
0x3af3   : > { %5770 = vmatpush.bf16.msra.mxu0 %v8573_v2  ;;  %v5676_v2 = vld [vmem:[#allocation7 + $0x780] ss:$0 sm:$0xff] }
0x3af7   : > { %v5500_v12 = vpop.f32.mrf.mxu3  ;;  %v5567_v27 = vpop.f32.mrf.mxu2 }
0x3af8   : > { %v9292_v12 = vld [vmem:[#allocation5 + $0xdc4] sm:$0xf0]  ;;  %v8636_v27 = vld [vmem:[#allocation5 + $0xe40] sm:$0xf] }
0x3aff   : > { %v5632_v4 = vpop.f32.mrf.mxu3 }
0x3b00   : > { %v5636_v47 = vadd.f32 %v5632_v4, %v5569_v17  ;;  %v8605_v17 = vor.u32 %v9292_v12, %v8604_v24  ;;  %v8637_v4 = vor.u32 %v9300_v37, %v8636_v27  ;;  %v5677_v37 = vld [vmem:[#allocation7 + $0x790] ss:$0 sm:$0xff] }
0x3b02   : > { %v5639_v29 = vsel %vm4439_vm14, %v5636_v47, 0.0  ;;  %5848 = vmatpush.bf16.msrb.mxu2 %v8605_v17  ;;  %5926 = vmatpush.bf16.msrb.mxu1 %v8637_v4 }
0x3b03   : > { %5640 = vadd.xlane.f32.xlu1 %v5639_v29  ;;  %v9283_v29 = vld [vmem:[#allocation5 + $0xd34] sm:$0xf0] }
0x3b06   : > { %5927 = vmatpush.bf16.msrb.mxu1 %v8633_v53  ;;  %v9278_v53 = vld [vmem:[#allocation5 + $0xcd4] sm:$0xf0] }
0x3b07   : > { %v5634_v15 = vpop.f32.mrf.mxu3 }
0x3b08   : > { %v8600_v15 = vld [vmem:[#allocation5 + $0xdb0] sm:$0xf] }
0x3b09   : > { %v8601_v11 = vor.u32 %v9291_v62, %v8600_v15  ;;  %v5875_v15 = vld [vmem:[#allocation7 + $0x7c0] ss:$0 sm:$0xff] }
0x3b0b   : > { %5849 = vmatpush.bf16.msrb.mxu2 %v8601_v11  ;;  %v8648_v11 = vld [vmem:[#allocation5 + $0xcd0] sm:$0xf] }
0x3b76   : > { %v5641_v0 = vpop.xlane.xlu1 %5640 }
0x3b77   : > { %v5649_v52 = vmul.f32 %v11271_v58, %v5641_v0  ;;  %v8564_v0 = vld [vmem:[#allocation5 + $0xd20] sm:$0xf] }
0x3b79   : > { %v5650_v23 = vsub.f32 %v5636_v47, %v5649_v52  ;;  %v8568_v47 = vld [vmem:[#allocation5 + $0xd30] sm:$0xf]  ;;  %v9282_v52 = vld [vmem:[#allocation5 + $0xd24] sm:$0xf0] }
0x3b7a   : > { %v8569_v22 = vor.u32 %v9283_v29, %v8568_v47  ;;  %v5719_v29 = vld [vmem:[#allocation7 + $0x7a0] ss:$0 sm:$0xff] }
0x3b7b   : > { %v5651_v6 = vmul.f32 %v5650_v23, %v5650_v23 }
0x3b7c   : > { %5771 = vmatpush.bf16.msra.mxu0 %v8569_v22 }
0x3b7d   : > { %v5652_v30 = vsel %vm4439_vm14, %v5651_v6, 0.0  ;;  %v8565_v6 = vor.u32 %v9282_v52, %v8564_v0 }
0x3b7e   : > { %5653 = vadd.xlane.f32.xlu2 %v5652_v30  ;;  %v9290_v30 = vld [vmem:[#allocation5 + $0xda4] sm:$0xf0] }
0x3b80   : > { %5772 = vmatpush.bf16.msra.mxu0 %v8565_v6  ;;  %v11290_v6 = vor.u32 %v9278_v53, %v8648_v11  ;;  %v9305_v11 = vld [vmem:[#allocation5 + $0xe94] sm:$0xf0] }
0x3bf1   : > { %v5654_v54 = vpop.xlane.xlu2 %5653 }
0x3bf2   : > { %v5655_v1 = vmul.f32 %v5654_v54, %v11271_v58  ;;  %v8628_v54 = vld [vmem:[#allocation5 + $0xe20] sm:$0xf] }
0x3bf4   : > { %v5656_v38 = vadd.f32 1e-05, %v5655_v1  ;;  %v9298_v1 = vld [vmem:[#allocation5 + $0xe24] sm:$0xf0] }
0x3bf6   : > { %9793 = vrsqrt.f32 %v5656_v38  ;;  %vm5663_vm8 = vweird.f32 %v5656_v38 }
0x3bfc   : > { %v9794_v7 = vpop.eup %9793 }
0x3bfd   : > { %v5658_v39 = vmul.f32 %v9794_v7, %v5656_v38  ;;  %vm5664_vm9 = vweird.f32 %v9794_v7 }
0x3bfe   : > { %vm5665_vm4 = vmor %vm5663_vm8, %vm5664_vm9 }
0x3bff   : > { %v5659_v3 = vmul.f32 %v9794_v7, %v5658_v39  ;;  %v8560_v39 = vld [vmem:[#allocation5 + $0xd10] sm:$0xf] }
0x3c01   : > { %v5660_v41 = vmul.f32 0.5, %v5659_v3  ;;  %v9281_v3 = vld [vmem:[#allocation5 + $0xd14] sm:$0xf0] }
0x3c03   : > { %v5661_v40 = vsub.f32 1.5, %v5660_v41  ;;  %v8592_v41 = vld [vmem:[#allocation5 + $0xd90] sm:$0xf] }
0x3c05   : > { %v5662_v33 = vmul.f32 %v9794_v7, %v5661_v40  ;;  %v8561_v40 = vor.u32 %v9281_v3, %v8560_v39 }
0x3c07   : > { %v5666_v32 = vsel %vm5665_vm4, %v9794_v7, %v5662_v33  ;;  %v8629_v7 = vor.u32 %v9298_v1, %v8628_v54  ;;  %v9289_v33 = vld [vmem:[#allocation5 + $0xd94] sm:$0xf0]  ;;  %5773 = vmatpush.bf16.msra.mxu0 %v8561_v40  ;;  %v11295_v40 = vld [vmem:[#allocation7 + $0x730] sm:$0xff] }
0x3c08   : > { %v5667_v43 = vmul.f32 %v5666_v32, %v5650_v23  ;;  %v8596_v23 = vld [vmem:[#allocation5 + $0xda0] sm:$0xf]  ;;  %v8624_v32 = vld [vmem:[#allocation5 + $0xe10] sm:$0xf] }
0x3c09   : > { %v8597_v38 = vor.u32 %v9290_v30, %v8596_v23  ;;  %5928 = vmatpush.bf16.msrb.mxu1 %v8629_v7  ;;  %v5797_v23 = vld [vmem:[#allocation7 + $0x7b0] ss:$0 sm:$0xff] }
0x3c0a   : > { %v5668_v14 = vmul.f32 %v5667_v43, %v5637_v21  ;;  %v9297_v21 = vld [vmem:[#allocation5 + $0xe14] sm:$0xf0]  ;;  %v8593_v43 = vor.u32 %v9289_v33, %v8592_v41  ;;  %v11297_v33 = vld [vmem:[#allocation7 + $0x740] sm:$0xff] }
0x3c0b   : > { %5850 = vmatpush.bf16.msrb.mxu2 %v8597_v38 }
0x3c0c   : > { %v11276_v49 = vadd.f32 %v5668_v14, %v5638_v46  ;;  %v8625_v46 = vor.u32 %v9297_v21, %v8624_v32  ;;  %v8556_v14 = vld [vmem:[#allocation5 + $0xd00] sm:$0xf] }
0x3c0e   : > { %v5678_v18 = vsel %vm4439_vm14, %v11276_v49, 0.0  ;;  %5929 = vmatpush.bf16.msrb.mxu1 %v8625_v46 }
0x3c0f   : > { %5679 = vadd.xlane.f32.xlu0 %v5678_v18  ;;  %5851 = vmatpush.bf16.msrb.mxu2 %v8593_v43  ;;  %v9280_v18 = vld [vmem:[#allocation5 + $0xd04] sm:$0xf0] }
0x3c10   : > { %v8557_v45 = vor.u32 %v9280_v18, %v8556_v14 }
0x3c12   : > { %5774 = vmatpush.bf16.msra.mxu0 %v8557_v45  ;;  %5930 = vmatpush.bf16.msrb.mxu1 %v8621_v10 }
0x3c13   : > { %5852 = vmatpush.bf16.msrb.mxu2 %v8589_v60 }
0x3c82   : > { %v5680_v25 = vpop.xlane.xlu0 %5679 }
0x3c83   : > { %v5681_v28 = vmul.f32 %v5680_v25, %v11271_v58  ;;  %v8584_v25 = vld [vmem:[#allocation5 + $0xd70] sm:$0xf] }
0x3c85   : > { %v11282_v48 = vsub.f32 %v11276_v49, %v5681_v28  ;;  %v8553_v28 = vor.u32 %v9279_v8, %v8552_v16 }
0x3c87   : > { %v5683_v44 = vmul.f32 %v11282_v48, %v11282_v48  ;;  %5775 = vmatpush.bf16.msra.mxu0 %v8553_v28 }
0x3c89   : > { %v5684_v19 = vsel %vm4439_vm14, %v5683_v44, 0.0  ;;  %v9287_v44 = vld [vmem:[#allocation5 + $0xd74] sm:$0xf0] }
0x3c8a   : > { %5685 = vadd.xlane.f32.xlu1 %v5684_v19  ;;  %v8616_v19 = vld [vmem:[#allocation5 + $0xdf0] sm:$0xf]  ;;  %v8585_v51 = vor.u32 %v9287_v44, %v8584_v25 }
0x3c8b   : > { %v8617_v55 = vor.u32 %v9295_v57, %v8616_v19 }
0x3c8c   : > { %5853 = vmatpush.bf16.msrb.mxu2 %v8585_v51 }
0x3c8d   : > { %5931 = vmatpush.bf16.msrb.mxu1 %v8617_v55 }
0x3cfd   : > { %v5686_v26 = vpop.xlane.xlu1 %5685 }
0x3cfe   : > { %v5687_v63 = vmul.f32 %v5686_v26, %v11271_v58 }
0x3d00   : > { %v5688_v5 = vadd.f32 1e-05, %v5687_v63 }
0x3d02   : > { %9795 = vrsqrt.f32 %v5688_v5  ;;  %vm5695_vm6 = vweird.f32 %v5688_v5 }
0x3d08   : > { %v9796_v50 = vpop.eup %9795 }
0x3d09   : > { %v5690_v56 = vmul.f32 %v9796_v50, %v5688_v5  ;;  %vm5696_vm5 = vweird.f32 %v9796_v50 }
0x3d0a   : > { %vm5697_vm12 = vmor %vm5695_vm6, %vm5696_vm5 }
0x3d0b   : > { %v5691_v36 = vmul.f32 %v9796_v50, %v5690_v56 }
0x3d0d   : > { %v5692_v42 = vmul.f32 0.5, %v5691_v36  ;;  %v8683_v36 = vld [vmem:[#allocation5 + $0xee0] sm:$0xf] }
0x3d0f   : > { %v5693_v20 = vsub.f32 1.5, %v5692_v42  ;;  %v9310_v42 = vld [vmem:[#allocation5 + $0xee4] sm:$0xf0] }
0x3d11   : > { %v5694_v24 = vmul.f32 %v9796_v50, %v5693_v20  ;;  %v8679_v20 = vld [vmem:[#allocation5 + $0xed0] sm:$0xf] }
0x3d13   : > { %v5698_v12 = vsel %vm5697_vm12, %v9796_v50, %v5694_v24  ;;  %v8684_v24 = vor.u32 %v9310_v42, %v8683_v36  ;;  %v8729_v42 = vld [vmem:[#allocation5 + $0xf48] sm:$0xf0] }
0x3d14   : > { %v5699_v27 = vmul.f32 %v5698_v12, %v11282_v48 }
0x3d15   : > { %6113 = vmatpush.bf16.msra.mxu1 %v8684_v24  ;;  %v8719_v24 = vld [vmem:[#allocation5 + $0xf30] sm:$0xf] }
0x3d16   : > { %v5700_v17 = vmul.f32 %v5699_v27, %v5676_v2  ;;  %v9309_v2 = vld [vmem:[#allocation5 + $0xed4] sm:$0xf0]  ;;  %v8675_v27 = vld [vmem:[#allocation5 + $0xec0] sm:$0xf] }
0x3d17   : > { %v8680_v12 = vor.u32 %v9309_v2, %v8679_v20  ;;  %v9320_v2 = vld [vmem:[#allocation5 + $0xf34] sm:$0xf0] }
0x3d18   : > { %v5701_v4 = vadd.f32 %v5700_v17, %v5677_v37  ;;  %v9308_v37 = vld [vmem:[#allocation5 + $0xec4] sm:$0xf0] }
0x3d19   : > { %6114 = vmatpush.bf16.msra.mxu1 %v8680_v12  ;;  %v8676_v17 = vor.u32 %v9308_v37, %v8675_v27  ;;  %v9319_v12 = vld [vmem:[#allocation5 + $0xf34] sm:$0xf]  ;;  %v8720_v27 = vor.u32 %v9320_v2, %v8719_v24  ;;  %v8721_v37 = vld [vmem:[#allocation5 + $0xf38] sm:$0xf0]  ;;  %v9340_v24 = vld [vmem:[#allocation5 + $0x1044] sm:$0xf0] }
0x3d1a   : > { %v5702_v47 = vpack.c.bf16 %v5701_v4, %v5701_v4  ;;  %v8671_v4 = vld [vmem:[#allocation5 + $0xeb0] sm:$0xf] }
0x3d1b   : > { %v8775_v2 = vld [vmem:[#allocation5 + $0xfd0] sm:$0xf] }
0x3d1c   : > { %5776 = vmatmul.bf16.vlgmr.msra.gmra.mxu0 %v5702_v47  ;;  %5854 = vmatmul.bf16.vlgmr.msrb.gmra.mxu2 %v5702_v47 }
0x3d1d   : > { %5932 = vmatmul.bf16.vlgmr.msrb.gmra.mxu1 %v5702_v47  ;;  %v9307_v47 = vld [vmem:[#allocation5 + $0xeb4] sm:$0xf0] }
0x3d1e   : > { %6115 = vmatpush.bf16.msra.mxu1 %v8676_v17  ;;  %v8724_v17 = vor.u32 %v9319_v12, %v8721_v37  ;;  %v9333_v12 = vld [vmem:[#allocation5 + $0xfd4] sm:$0xf0]  ;;  %v8799_v37 = vld [vmem:[#allocation5 + $0x1030] sm:$0xf] }
0x3d99   : > { %v5777_v22 = vpop.f32.mrf.mxu0 }
0x3d9a   : > { %v5778_v62 = vadd.f32 %v5777_v22, %v5719_v29  ;;  %v5933_v34 = vpop.f32.mrf.mxu1  ;;  %v8672_v29 = vor.u32 %v9307_v47, %v8671_v4  ;;  %v9306_v22 = vld [vmem:[#allocation5 + $0xea4] sm:$0xf0]  ;;  %v8711_v4 = vld [vmem:[#allocation5 + $0xf20] sm:$0xf] }
0x3d9b   : > { %v5934_v9 = vadd.f32 %v5933_v34, %v5875_v15  ;;  %v8667_v15 = vld [vmem:[#allocation5 + $0xea0] sm:$0xf]  ;;  %v9318_v47 = vld [vmem:[#allocation5 + $0xf24] sm:$0xf0] }
0x3d9c   : > { %v5937_v0 = vpack.c.bf16 %v5778_v62, %v5778_v62  ;;  %6116 = vmatpush.bf16.msra.mxu1 %v8672_v29  ;;  %v8668_v62 = vor.u32 %v9306_v22, %v8667_v15  ;;  %v9317_v29 = vld [vmem:[#allocation5 + $0xf24] sm:$0xf]  ;;  %v8712_v15 = vor.u32 %v9318_v47, %v8711_v4  ;;  %v8713_v22 = vld [vmem:[#allocation5 + $0xf28] sm:$0xf0] }
0x3d9d   : > { %v6008_v52 = vpack.c.bf16 %v5934_v9, %v5934_v9  ;;  %v8663_v9 = vld [vmem:[#allocation5 + $0xe90] sm:$0xf] }
0x3d9e   : > { %v5949_v48 = vsel %vm5947_vm1, %v5937_v0, 0  ;;  %v8664_v53 = vor.u32 %v9305_v11, %v8663_v9  ;;  %v8659_v0 = vld [vmem:[#allocation5 + $0xe80] sm:$0xf]  ;;  %v9316_v9 = vld [vmem:[#allocation5 + $0xf14] sm:$0xf0] }
0x3d9f   : > { %v6013_v30 = vsel %vm5947_vm1, %v6008_v52, 0  ;;  %v5855_v54 = vpop.f32.mrf.mxu2  ;;  %5958 = vmatpush.bf16.msra.mxu3 %v5949_v48  ;;  %v9304_v52 = vld [vmem:[#allocation5 + $0xe84] sm:$0xf0]  ;;  %v9315_v11 = vld [vmem:[#allocation5 + $0xf14] sm:$0xf] }
0x3da0   : > { %v5856_v1 = vadd.f32 %v5855_v54, %v5797_v23  ;;  %6022 = vmatpush.bf16.msrb.mxu0 %v6013_v30  ;;  %6117 = vmatpush.bf16.msra.mxu1 %v8668_v62  ;;  %v8660_v23 = vor.u32 %v9304_v52, %v8659_v0  ;;  %v8716_v62 = vor.u32 %v9317_v29, %v8713_v22  ;;  %v8705_v0 = vld [vmem:[#allocation5 + $0xf18] sm:$0xf0]  ;;  %v6173_v47 = vld [vmem:[#allocation7 + $0x800] ss:$8 sm:$0x3] }
0x3da1   : > { %v5779_v38 = vpop.f32.mrf.mxu0  ;;  %v8708_v52 = vor.u32 %v9315_v11, %v8705_v0  ;;  %v8771_v29 = vld [vmem:[#allocation5 + $0xfc0] sm:$0xf]  ;;  %v9331_v11 = vld [vmem:[#allocation5 + $0xfb4] sm:$0xf0]  ;;  %v8791_v0 = vld [vmem:[#allocation5 + $0x1010] sm:$0xf] }
0x3da2   : > { %v5968_v7 = vpack.c.bf16 %v5856_v1, %v5856_v1  ;;  %v5935_v39 = vpop.f32.mrf.mxu1  ;;  %8650 = vmatmul.msk.bf16.vlgmr.msra.gmra.mxu3 %vm5943_vm13, %v11290_v6  ;;  %v11308_v38 = vld [vmem:[#allocation5 + $0xce0] sm:$0x1] }
0x3da3   : > { %v9303_v39 = vld [vmem:[#allocation5 + $0xe74] sm:$0xf0]  ;;  %v8795_v22 = vld [vmem:[#allocation5 + $0x1020] sm:$0xf] }
0x3da4   : > { %5976 = vmatpush.bf16.xpose.msrb.mxu3 %v5968_v7  ;;  %6118 = vmatpush.bf16.msra.mxu1 %v8664_v53  ;;  %v8655_v7 = vld [vmem:[#allocation5 + $0xe70] sm:$0xf] }
0x3da7   : > { %v5857_v3 = vpop.f32.mrf.mxu2 }
0x3da8   : > { %6119 = vmatpush.bf16.msra.mxu1 %v8660_v23  ;;  %v8656_v3 = vor.u32 %v9303_v39, %v8655_v7  ;;  %v8695_v23 = vld [vmem:[#allocation5 + $0xf00] sm:$0xf]  ;;  %v8687_v39 = vld [vmem:[#allocation5 + $0xef0] sm:$0xf] }
0x3dac   : > { %6120 = vmatpush.bf16.msra.mxu1 %v8656_v3  ;;  %v9312_v3 = vld [vmem:[#allocation5 + $0xef4] sm:$0xf0] }
0x3e25   : > { %v5960_v41 = vpop.f32.mrf.mxu3 }
0x3e26   : > { %v5965_v21 = vmul.f32 %v5960_v41, %v11295_v40 }
0x3e2d   : > { %v5962_v32 = vpop.f32.mrf.mxu3 }
0x3e2e   : > { %v5966_v43 = vmul.f32 %v5962_v32, %v11297_v33 }
0x3e30   : > { %v5967_v46 = vpack.c.bf16 %v5966_v43, %v5965_v21 }
0x3e32   : > { %5977 = vmatmul.bf16.vlgmr.msrb.gmra.mxu3 %v5967_v46  ;;  %v6127_v46 = vld [vmem:[#allocation7 + $0x7d0] ss:$0 sm:$0xff] }
0x3eb5   : > { %v5978_v14 = vpop.f32.mrf.mxu3 }
0x3eb6   : > { %v5983_v18 = vmul.f32 0.25, %v5978_v14 }
0x3eb8   : > { %v5985_v31 = vsel %vm5943_vm13, %v5983_v18, -inf }
0x3eb9   : > { %5986 = vmax.xlane.f32.xlu2 %v5985_v31 }
0x3ebd   : > { %v5980_v45 = vpop.f32.mrf.mxu3 }
0x3ebe   : > { %v5984_v13 = vmul.f32 0.25, %v5980_v45 }
0x3ec0   : > { %v5988_v61 = vsel %vm5943_vm13, %v5984_v13, -inf }
0x3ec1   : > { %5989 = vmax.xlane.f32.xlu0 %v5988_v61  ;;  %v9326_v61 = vld [vmem:[#allocation5 + $0xf64] sm:$0xf0] }
0x3f2c   : > { %v5987_v59 = vpop.xlane.xlu2 %5986 }
0x3f2d   : > { %v5991_v60 = vsub.f32 %v5983_v18, %v5987_v59  ;;  %v9325_v59 = vld [vmem:[#allocation5 + $0xf64] sm:$0xf] }
0x3f2f   : > { %v5993_v10 = vmul.f32 1.442695, %v5991_v60 }
0x3f31   : > { %9797 = vpow2.f32 %v5993_v10  ;;  %v8745_v10 = vld [vmem:[#allocation5 + $0xf68] sm:$0xf0] }
0x3f34   : > { %v5990_v16 = vpop.xlane.xlu0 %5989 }
0x3f35   : > { %v5992_v8 = vsub.f32 %v5984_v13, %v5990_v16  ;;  %v8743_v13 = vld [vmem:[#allocation5 + $0xf60] sm:$0xf]  ;;  %v8748_v16 = vor.u32 %v9325_v59, %v8745_v10 }
0x3f36   : > { %v8744_v60 = vor.u32 %v9326_v61, %v8743_v13 }
0x3f37   : > { %v9798_v25 = vpop.eup %9797  ;;  %v5995_v28 = vmul.f32 1.442695, %v5992_v8  ;;  %6272 = vmatpush.bf16.msra.mxu0 %v8748_v16  ;;  %v6129_v16 = vld [vmem:[#allocation7 + $0x7e0] ss:$0 sm:$0xff] }
0x3f38   : > { %v5997_v44 = vsel %vm5943_vm13, %v9798_v25, 0.0  ;;  %6259 = vmatpush.bf16.msra.mxu3 %v8744_v60 }
0x3f39   : > { %9799 = vpow2.f32 %v5995_v28  ;;  %5998 = vadd.xlane.f32.xlu1 %v5997_v44 }
0x3f3f   : > { %v9800_v19 = vpop.eup %9799 }
0x3f40   : > { %v6000_v57 = vsel %vm5943_vm13, %v9800_v19, 0.0 }
0x3f41   : > { %6001 = vadd.xlane.f32.xlu2 %v6000_v57  ;;  %v9324_v57 = vld [vmem:[#allocation5 + $0xf54] sm:$0xf0] }
0x3fac   : > { %v5999_v51 = vpop.xlane.xlu1 %5998 }
0x3fad   : > { %9801 = vrcp.f32 %v5999_v51  ;;  %v9323_v51 = vld [vmem:[#allocation5 + $0xf54] sm:$0xf] }
0x3fb3   : > { %v9802_v26 = vpop.eup %9801 }
0x3fb4   : > { %v6002_v55 = vpop.xlane.xlu2 %6001  ;;  %v6005_v5 = vmul.f32 %v9802_v26, %v9798_v25  ;;  %v8737_v26 = vld [vmem:[#allocation5 + $0xf58] sm:$0xf0] }
0x3fb5   : > { %9803 = vrcp.f32 %v6002_v55 }
0x3fbb   : > { %v9804_v63 = vpop.eup %9803 }
0x3fbc   : > { %v6006_v50 = vmul.f32 %v9804_v63, %v9800_v19  ;;  %v8735_v19 = vld [vmem:[#allocation5 + $0xf50] sm:$0xf]  ;;  %v8740_v63 = vor.u32 %v9323_v51, %v8737_v26  ;;  %v8811_v51 = vld [vmem:[#allocation5 + $0x1060] sm:$0xf] }
0x3fbd   : > { %v8736_v55 = vor.u32 %v9324_v57, %v8735_v19 }
0x3fbe   : > { %v6007_v56 = vpack.c.bf16 %v6006_v50, %v6005_v5  ;;  %6273 = vmatpush.bf16.msra.mxu0 %v8740_v63  ;;  %v8727_v5 = vld [vmem:[#allocation5 + $0xf40] sm:$0xf]  ;;  %v9322_v50 = vld [vmem:[#allocation5 + $0xf44] sm:$0xf0]  ;;  %v8807_v63 = vld [vmem:[#allocation5 + $0x1050] sm:$0xf] }
0x3fbf   : > { %6260 = vmatpush.bf16.msra.mxu3 %v8736_v55  ;;  %v8728_v36 = vor.u32 %v9322_v50, %v8727_v5  ;;  %v9342_v55 = vld [vmem:[#allocation5 + $0x1064] sm:$0xf0]  ;;  %v9341_v5 = vld [vmem:[#allocation5 + $0x1054] sm:$0xf0] }
0x3fc0   : > { %8651 = vmatmul.msk.bf16.vlgmr.msrb.gmra.mxu0 %vm5943_vm13, %v6007_v56  ;;  %v9321_v56 = vld [vmem:[#allocation5 + $0xf44] sm:$0xf]  ;;  %v8812_v26 = vor.u32 %v9342_v55, %v8811_v51  ;;  %v8808_v50 = vor.u32 %v9341_v5, %v8807_v63 }
0x3fc1   : > { %v8732_v20 = vor.u32 %v9321_v56, %v8729_v42  ;;  %v8779_v56 = vld [vmem:[#allocation5 + $0xfe0] sm:$0xf] }
0x3fc2   : > { %6492 = vmatpush.bf16.msrb.mxu1 %v8812_v26 }
0x3fc3   : > { %6261 = vmatpush.bf16.msra.mxu3 %v8728_v36  ;;  %6274 = vmatpush.bf16.msra.mxu0 %v8732_v20  ;;  %v9334_v36 = vld [vmem:[#allocation5 + $0xfe4] sm:$0xf0]  ;;  %v8803_v20 = vld [vmem:[#allocation5 + $0x1040] sm:$0xf] }
0x3fc4   : > { %v8780_v42 = vor.u32 %v9334_v36, %v8779_v56  ;;  %v6323_v56 = vld [vmem:[#allocation7 + $0x820] ss:$8 sm:$0x3]  ;;  %v6304_v36 = vld [vmem:[#allocation7 + $0x810] sm:$0x7] }
0x3fc6   : > { %6493 = vmatpush.bf16.msrb.mxu1 %v8808_v50 }
0x3fc7   : > { %6262 = vmatpush.bf16.msra.mxu3 %v8720_v27  ;;  %6275 = vmatpush.bf16.msra.mxu0 %v8724_v17  ;;  %v8776_v27 = vor.u32 %v9333_v12, %v8775_v2  ;;  %v9339_v17 = vld [vmem:[#allocation5 + $0x1034] sm:$0xf0] }
0x3fc8   : > { %v8800_v4 = vor.u32 %v9339_v17, %v8799_v37  ;;  %v9327_v2 = vld [vmem:[#allocation5 + $0xf74] sm:$0xf0] }
0x3fcb   : > { %6263 = vmatpush.bf16.msra.mxu3 %v8712_v15  ;;  %6276 = vmatpush.bf16.msra.mxu0 %v8716_v62  ;;  %v9332_v15 = vld [vmem:[#allocation5 + $0xfc4] sm:$0xf0] }
0x3fcc   : > { %v8772_v62 = vor.u32 %v9332_v15, %v8771_v29 }
0x3fcf   : > { %6277 = vmatpush.bf16.msra.mxu0 %v8708_v52  ;;  %v9337_v52 = vld [vmem:[#allocation5 + $0x1014] sm:$0xf0] }
0x403d   : > { %v6024_v34 = vpop.f32.mrf.mxu0 }
0x403e   : > { %v6029_v30 = vmul.f32 %v6024_v34, %v11295_v40  ;;  %v8703_v34 = vld [vmem:[#allocation5 + $0xf10] sm:$0xf] }
0x403f   : > { %v8704_v53 = vor.u32 %v9316_v9, %v8703_v34  ;;  %v9338_v34 = vld [vmem:[#allocation5 + $0x1024] sm:$0xf0]  ;;  %v8767_v9 = vld [vmem:[#allocation5 + $0xfb0] sm:$0xf] }
0x4041   : > { %6264 = vmatpush.bf16.msra.mxu3 %v8704_v53  ;;  %v8796_v53 = vor.u32 %v9338_v34, %v8795_v22 }
0x4045   : > { %v6026_v48 = vpop.f32.mrf.mxu0 }
0x4046   : > { %v6030_v54 = vmul.f32 %v6026_v48, %v11297_v33  ;;  %v9314_v48 = vld [vmem:[#allocation5 + $0xf04] sm:$0xf0] }
0x4048   : > { %v6031_v1 = vpack.c.bf16 %v6030_v54, %v6029_v30  ;;  %v9313_v30 = vld [vmem:[#allocation5 + $0xf04] sm:$0xf]  ;;  %v8696_v54 = vor.u32 %v9314_v48, %v8695_v23  ;;  %v8768_v23 = vor.u32 %v9331_v11, %v8767_v9  ;;  %v6176_v48 = vperm.slane %v6173_v47, 1 }
0x404a   : > { %6042 = vmatpush.bf16.msra.mxu2 %v6031_v1  ;;  %v8697_v1 = vld [vmem:[#allocation5 + $0xf08] sm:$0xf0]  ;;  %6265 = vmatpush.bf16.msra.mxu3 %v8696_v54  ;;  %v8763_v54 = vld [vmem:[#allocation5 + $0xfa0] sm:$0xf] }
0x404b   : > { %v8700_v7 = vor.u32 %v9313_v30, %v8697_v1  ;;  %v8792_v30 = vor.u32 %v9337_v52, %v8791_v0  ;;  %v9330_v1 = vld [vmem:[#allocation5 + $0xfa4] sm:$0xf0] }
0x404d   : > { %8652 = vmatmul.msk.bf16.vlgmr.msra.gmra.mxu2 %vm346_vm0, %v11308_v38  ;;  %6278 = vmatpush.bf16.msra.mxu0 %v8700_v7  ;;  %v8787_v7 = vld [vmem:[#allocation5 + $0x1000] sm:$0xf] }
0x404e   : > { %6479 = vmatpush.bf16.msrb.mxu2 %v8780_v42 }
0x4052   : > { %6480 = vmatpush.bf16.msrb.mxu2 %v8776_v27 }
0x4056   : > { %6481 = vmatpush.bf16.msrb.mxu2 %v8772_v62  ;;  %v6306_v62 = vperm.slane %v6304_v36, 0 }
0x405a   : > { %6482 = vmatpush.bf16.msrb.mxu2 %v8768_v23 }
0x40d0   : > { %v6044_v41 = vpop.f32.mrf.mxu2 }
0x40d1   : > { %v6048_v32 = vpack.c.bf16 %v6044_v41, %v6044_v41  ;;  %v9311_v41 = vld [vmem:[#allocation5 + $0xef4] sm:$0xf] }
0x40d3   : > { %6121 = vmatmul.bf16.vlgmr.msra.gmra.mxu1 %v6048_v32  ;;  %v8688_v32 = vor.u32 %v9312_v3, %v8687_v39  ;;  %v9336_v39 = vld [vmem:[#allocation5 + $0x1004] sm:$0xf0] }
0x40d5   : > { %6266 = vmatpush.bf16.msra.mxu3 %v8688_v32 }
0x40d8   : > { %v6046_v21 = vpop.f32.mrf.mxu2 }
0x40d9   : > { %v8689_v21 = vld [vmem:[#allocation5 + $0xef8] sm:$0xf0] }
0x4150   : > { %v6122_v43 = vpop.f32.mrf.mxu1 }
0x4151   : > { %v6126_v14 = vadd.f32 %v6122_v43, %v11276_v49  ;;  %v8692_v43 = vor.u32 %v9311_v41, %v8689_v21  ;;  %v8764_v41 = vor.u32 %v9330_v1, %v8763_v54  ;;  %v8788_v21 = vor.u32 %v9336_v39, %v8787_v7 }
0x4152   : > { %v6325_v7 = vperm.slane %v6323_v56, 0 }
0x4153   : > { %v11313_v18 = vadd.f32 %v6127_v46, %v6126_v14  ;;  %6279 = vmatpush.bf16.msra.mxu0 %v8692_v43  ;;  %v8759_v43 = vld [vmem:[#allocation5 + $0xf90] sm:$0xf]  ;;  %6483 = vmatpush.bf16.msrb.mxu2 %v8764_v41 }
0x4155   : > { %v6131_v31 = vsel %vm4439_vm14, %v11313_v18, 0.0 }
0x4156   : > { %6132 = vadd.xlane.f32.xlu0 %v6131_v31 }
0x4158   : > { %v6124_v45 = vpop.f32.mrf.mxu1 }
0x41c9   : > { %v6133_v8 = vpop.xlane.xlu0 %6132 }
0x41ca   : > { %v6134_v25 = vmul.f32 %v6133_v8, %v11271_v58 }
0x41cc   : > { %v11319_v49 = vsub.f32 %v11313_v18, %v6134_v25 }
0x41ce   : > { %v6136_v28 = vmul.f32 %v11319_v49, %v11319_v49 }
0x41d0   : > { %v6137_v44 = vsel %vm4439_vm14, %v6136_v28, 0.0  ;;  %v6130_v28 = vld [vmem:[#allocation7 + $0x7f0] ss:$0 sm:$0xff] }
0x41d1   : > { %6138 = vadd.xlane.f32.xlu1 %v6137_v44 }
0x4244   : > { %v6139_v46 = vpop.xlane.xlu1 %6138 }
0x4245   : > { %v6140_v14 = vmul.f32 %v6139_v46, %v11271_v58  ;;  %v9329_v46 = vld [vmem:[#allocation5 + $0xf94] sm:$0xf0] }
0x4247   : > { %v6141_v31 = vadd.f32 1e-05, %v6140_v14  ;;  %v8783_v14 = vld [vmem:[#allocation5 + $0xff0] sm:$0xf] }
0x4249   : > { %9805 = vrsqrt.f32 %v6141_v31  ;;  %vm6148_vm2 = vweird.f32 %v6141_v31 }
0x424f   : > { %v9806_v45 = vpop.eup %9805 }
0x4250   : > { %v6143_v13 = vmul.f32 %v9806_v45, %v6141_v31  ;;  %vm6149_vm15 = vweird.f32 %v9806_v45  ;;  %v9335_v31 = vld [vmem:[#allocation5 + $0xff4] sm:$0xf0] }
0x4251   : > { %vm6150_vm3 = vmor %vm6148_vm2, %vm6149_vm15 }
0x4252   : > { %v6144_v61 = vmul.f32 %v9806_v45, %v6143_v13  ;;  %v6175_v13 = vperm.slane %v6173_v47, 0  ;;  %v6310_v47 = vperm.slane %v6304_v36, 1 }
0x4254   : > { %v6145_v59 = vmul.f32 0.5, %v6144_v61  ;;  %v8760_v61 = vor.u32 %v9329_v46, %v8759_v43 }
0x4256   : > { %v6146_v60 = vsub.f32 1.5, %v6145_v59  ;;  %6484 = vmatpush.bf16.msrb.mxu2 %v8760_v61 }
0x4258   : > { %v6147_v10 = vmul.f32 %v9806_v45, %v6146_v60  ;;  %v6305_v60 = vld [vmem:[#allocation7 + $0x818] sm:$0x7] }
0x4259   : > { %v6311_v51 = vperm.slane %v6305_v60, 1  ;;  %v6317_v50 = vperm.slane %v6305_v60, 2 }
0x425a   : > { %v6151_v8 = vsel %vm6150_vm3, %v9806_v45, %v6147_v10  ;;  %v8784_v10 = vor.u32 %v9335_v31, %v8783_v14 }
0x425b   : > { %v6152_v25 = vmul.f32 %v6151_v8, %v11319_v49  ;;  %v8804_v49 = vor.u32 %v9340_v24, %v8803_v20  ;;  %v9328_v8 = vld [vmem:[#allocation5 + $0xf84] sm:$0xf0] }
0x425d   : > { %v6153_v44 = vmul.f32 %v6152_v25, %v6129_v16  ;;  %6494 = vmatpush.bf16.msrb.mxu1 %v8804_v49  ;;  %v8755_v16 = vld [vmem:[#allocation5 + $0xf80] sm:$0xf]  ;;  %v8751_v49 = vld [vmem:[#allocation5 + $0xf70] sm:$0xf] }
0x425e   : > { %v8756_v26 = vor.u32 %v9328_v8, %v8755_v16  ;;  %v8752_v17 = vor.u32 %v9327_v2, %v8751_v49  ;;  %v8875_v49 = vld [vmem:[#allocation5 + $0x1160] sm:$0xf] }
0x425f   : > { %v6154_v19 = vadd.f32 %v6153_v44, %v6130_v28 }
0x4260   : > { %6485 = vmatpush.bf16.msrb.mxu2 %v8756_v26 }
0x4261   : > { %v6155_v57 = vpack.c.bf16 %v6154_v19, %v6154_v19  ;;  %6495 = vmatpush.bf16.msrb.mxu1 %v8800_v4  ;;  %v6326_v4 = vperm.slane %v6323_v56, 1 }
0x4263   : > { %6267 = vmatmul.bf16.vlgmr.msra.gmra.mxu3 %v6155_v57  ;;  %6280 = vmatmul.bf16.vlgmr.msra.gmra.mxu0 %v6155_v57  ;;  %v6307_v57 = vperm.slane %v6305_v60, 0 }
0x4264   : > { %6486 = vmatpush.bf16.msrb.mxu2 %v8752_v17 }
0x4265   : > { %6496 = vmatpush.bf16.msrb.mxu1 %v8796_v53  ;;  %v6316_v53 = vperm.slane %v6304_v36, 2 }
0x4269   : > { %6497 = vmatpush.bf16.msrb.mxu1 %v8792_v30 }
0x426d   : > { %6498 = vmatpush.bf16.msrb.mxu1 %v8788_v21 }
0x4271   : > { %6499 = vmatpush.bf16.msrb.mxu1 %v8784_v10 }
0x42e0   : > { %v6281_v3 = vpop.f32.mrf.mxu0 }
0x42e1   : > { %v6282_v32 = vadd.f32 %v6281_v3, %v6176_v48 }
0x42e3   : > { %v6288_v45 = vrot.slane %v6282_v32, 6  ;;  %v6313_v27 = vmul.f32 %v6311_v51, %v6282_v32 }
0x42e5   : > { %v6289_v59 = vsel %vm6285_vm10, %v6288_v45, %v6282_v32 }
0x42e6   : > { %v6291_v25 = vrot.slane %v6289_v59, 6  ;;  %v6268_v28 = vpop.f32.mrf.mxu3 }
0x42e7   : > { %v6269_v44 = vadd.f32 %v6268_v28, %v6175_v13 }
0x42e8   : > { %v6293_v19 = vsel %vm6285_vm10, %v6291_v25, %v6282_v32  ;;  %v6283_v55 = vpop.f32.mrf.mxu0 }
0x42e9   : > { %v6297_v63 = vrot.slane %v6293_v19, 1  ;;  %v6286_v5 = vrot.slane %v6269_v44, 6  ;;  %v6312_v30 = vmul.f32 %v6310_v47, %v6269_v44 }
0x42eb   : > { %v6301_v42 = vsel %vm615_vm7, 0.0, %v6297_v63  ;;  %v6303_v20 = vsel %vm5675_vm11, 0.0, %v6297_v63  ;;  %v6287_v24 = vsel %vm6285_vm10, %v6286_v5, %v6269_v44  ;;  %v6506_v5 = vld [vmem:[#allocation7 + $0x830] ss:$0 sm:$0xff] }
0x42ec   : > { %v6309_v12 = vmul.f32 %v6307_v57, %v6301_v42  ;;  %v6290_v37 = vrot.slane %v6287_v24, 6  ;;  %v6319_v15 = vmul.f32 %v6317_v50, %v6303_v20  ;;  %v8843_v20 = vld [vmem:[#allocation5 + $0x10e0] sm:$0xf]  ;;  %v9350_v24 = vld [vmem:[#allocation5 + $0x10e4] sm:$0xf0] }
0x42ed   : > { %v8844_v2 = vor.u32 %v9350_v24, %v8843_v20 }
0x42ee   : > { %v6315_v29 = vadd.f32 %v6313_v27, %v6309_v12  ;;  %v6292_v22 = vsel %vm6285_vm10, %v6290_v37, %v6269_v44  ;;  %v6270_v34 = vpop.f32.mrf.mxu3  ;;  %v9358_v12 = vld [vmem:[#allocation5 + $0x1164] sm:$0xf0]  ;;  %v8907_v27 = vld [vmem:[#allocation5 + $0x11e0] sm:$0xf] }
0x42ef   : > { %v6296_v9 = vrot.slane %v6292_v22, 1  ;;  %v9366_v37 = vld [vmem:[#allocation5 + $0x11e4] sm:$0xf0]  ;;  %v8876_v17 = vor.u32 %v9358_v12, %v8875_v49  ;;  %6600 = vmatpush.bf16.msrb.mxu3 %v8844_v2  ;;  %v9349_v34 = vld [vmem:[#allocation5 + $0x10d4] sm:$0xf0] }
0x42f0   : > { %v6321_v11 = vadd.f32 %v6319_v15, %v6315_v29  ;;  %v8819_v49 = vld [vmem:[#allocation5 + $0x1080] sm:$0xf]  ;;  %v9344_v2 = vld [vmem:[#allocation5 + $0x1084] sm:$0xf0] }
0x42f1   : > { %v6300_v0 = vsel %vm615_vm7, 0.0, %v6296_v9  ;;  %v6302_v52 = vsel %vm5675_vm11, 0.0, %v6296_v9  ;;  %6678 = vmatpush.bf16.msrb.mxu0 %v8876_v17  ;;  %v8871_v9 = vld [vmem:[#allocation5 + $0x1150] sm:$0xf]  ;;  %v8851_v12 = vld [vmem:[#allocation5 + $0x1100] sm:$0xf] }
0x42f2   : > { %v6330_v23 = vadd.f32 %v6326_v4, %v6321_v11  ;;  %v6308_v48 = vmul.f32 %v6306_v62, %v6300_v0  ;;  %v6318_v1 = vmul.f32 %v6316_v53, %v6302_v52  ;;  %v8908_v4 = vor.u32 %v9366_v37, %v8907_v27  ;;  %v8839_v62 = vld [vmem:[#allocation5 + $0x10d0] sm:$0xf]  ;;  %v9357_v53 = vld [vmem:[#allocation5 + $0x1154] sm:$0xf0]  ;;  %v9352_v37 = vld [vmem:[#allocation5 + $0x1104] sm:$0xf0] }
0x42f3   : > { %v8840_v11 = vor.u32 %v9349_v34, %v8839_v62  ;;  %v8903_v0 = vld [vmem:[#allocation5 + $0x11d0] sm:$0xf]  ;;  %v9365_v52 = vld [vmem:[#allocation5 + $0x11d4] sm:$0xf0]  ;;  %v8820_v27 = vor.u32 %v9344_v2, %v8819_v49  ;;  %v8883_v17 = vld [vmem:[#allocation5 + $0x1180] sm:$0xf] }
0x42f4   : > { %v6314_v54 = vadd.f32 %v6312_v30, %v6308_v48  ;;  %v6334_v39 = vmul.f32 0.044715, %v6330_v23  ;;  %v6332_v60 = vmul.f32 0.5, %v6330_v23  ;;  %6756 = vmatpush.bf16.msra.mxu2 %v8908_v4  ;;  %v8904_v48 = vor.u32 %v9365_v52, %v8903_v0  ;;  %v8835_v30 = vld [vmem:[#allocation5 + $0x10c0] sm:$0xf] }
0x42f5   : > { %6601 = vmatpush.bf16.msrb.mxu3 %v8840_v11  ;;  %v9360_v4 = vld [vmem:[#allocation5 + $0x1184] sm:$0xf0]  ;;  %v8847_v62 = vld [vmem:[#allocation5 + $0x10f0] sm:$0xf] }
0x42f6   : > { %v6320_v3 = vadd.f32 %v6318_v1, %v6314_v54  ;;  %v6336_v41 = vmul.f32 %v6334_v39, %v6330_v23  ;;  %v9348_v54 = vld [vmem:[#allocation5 + $0x10c4] sm:$0xf0]  ;;  %v8867_v1 = vld [vmem:[#allocation5 + $0x1140] sm:$0xf]  ;;  %v8879_v11 = vld [vmem:[#allocation5 + $0x1170] sm:$0xf] }
0x42f7   : > { %v9356_v39 = vld [vmem:[#allocation5 + $0x1144] sm:$0xf0] }
0x42f8   : > { %v6329_v32 = vadd.f32 %v6325_v7, %v6320_v3  ;;  %v6338_v21 = vmul.f32 %v6336_v41, %v6330_v23  ;;  %6757 = vmatpush.bf16.msra.mxu2 %v8904_v48  ;;  %v8836_v7 = vor.u32 %v9348_v54, %v8835_v30  ;;  %v8899_v3 = vld [vmem:[#allocation5 + $0x11c0] sm:$0xf]  ;;  %v9364_v41 = vld [vmem:[#allocation5 + $0x11c4] sm:$0xf0] }
0x42fa   : > { %v6340_v43 = vadd.f32 %v6338_v21, %v6330_v23  ;;  %v6333_v46 = vmul.f32 0.044715, %v6329_v32  ;;  %v6331_v28 = vmul.f32 0.5, %v6329_v32  ;;  %v8872_v23 = vor.u32 %v9357_v53, %v8871_v9  ;;  %6602 = vmatpush.bf16.msrb.mxu3 %v8836_v7  ;;  %v9351_v9 = vld [vmem:[#allocation5 + $0x10f4] sm:$0xf0] }
0x42fb   : > { %v8900_v21 = vor.u32 %v9364_v41, %v8899_v3  ;;  %v9359_v53 = vld [vmem:[#allocation5 + $0x1174] sm:$0xf0]  ;;  %v8848_v0 = vor.u32 %v9351_v9, %v8847_v62 }
0x42fc   : > { %v6342_v14 = vmul.f32 0.7978846, %v6340_v43  ;;  %v6335_v31 = vmul.f32 %v6333_v46, %v6329_v32  ;;  %6679 = vmatpush.bf16.msrb.mxu0 %v8872_v23  ;;  %v8831_v43 = vld [vmem:[#allocation5 + $0x10b0] sm:$0xf]  ;;  %v9347_v46 = vld [vmem:[#allocation5 + $0x10b4] sm:$0xf0]  ;;  %v8880_v52 = vor.u32 %v9359_v53, %v8879_v11 }
0x42fd   : > { %6758 = vmatpush.bf16.msra.mxu2 %v8900_v21 }
0x42fe   : > { %9807 = vtanh.f32 %v6342_v14  ;;  %v6337_v45 = vmul.f32 %v6335_v31, %v6329_v32  ;;  %v8863_v14 = vld [vmem:[#allocation5 + $0x1130] sm:$0xf]  ;;  %v8832_v31 = vor.u32 %v9347_v46, %v8831_v43  ;;  %v6509_v46 = vld [vmem:[#allocation7 + $0x850] ss:$0 sm:$0xff] }
0x4300   : > { %v6339_v13 = vadd.f32 %v6337_v45, %v6329_v32  ;;  %v8868_v32 = vor.u32 %v9356_v39, %v8867_v1  ;;  %v9355_v45 = vld [vmem:[#allocation5 + $0x1134] sm:$0xf0]  ;;  %6603 = vmatpush.bf16.msrb.mxu3 %v8832_v31 }
0x4302   : > { %v6341_v61 = vmul.f32 0.7978846, %v6339_v13  ;;  %6680 = vmatpush.bf16.msrb.mxu0 %v8868_v32  ;;  %v8895_v13 = vld [vmem:[#allocation5 + $0x11b0] sm:$0xf] }
0x4303   : > { %v6508_v32 = vld [vmem:[#allocation7 + $0x840] ss:$0 sm:$0xff] }
0x4304   : > { %v9808_v59 = vpop.eup %9807  ;;  %9809 = vtanh.f32 %v6341_v61  ;;  %v9363_v61 = vld [vmem:[#allocation5 + $0x11b4] sm:$0xf0] }
0x4305   : > { %v6346_v10 = vadd.f32 1.0, %v9808_v59  ;;  %v8864_v59 = vor.u32 %v9355_v45, %v8863_v14 }
0x4307   : > { %v6348_v16 = vmul.f32 %v6346_v10, %v6332_v60  ;;  %v8896_v60 = vor.u32 %v9363_v61, %v8895_v13  ;;  %6681 = vmatpush.bf16.msrb.mxu0 %v8864_v59  ;;  %v8827_v10 = vld [vmem:[#allocation5 + $0x10a0] sm:$0xf] }
0x4308   : > { %v6629_v13 = vld [vmem:[#allocation7 + $0x870] ss:$0 sm:$0xff] }
0x4309   : > { %v6350_v8 = vpack.c.bf16 %v6348_v16, %v6348_v16  ;;  %6759 = vmatpush.bf16.msra.mxu2 %v8896_v60  ;;  %v9346_v16 = vld [vmem:[#allocation5 + $0x10a4] sm:$0xf0] }
0x430a   : > { %v9810_v25 = vpop.eup %9809 }
0x430b   : > { %6500 = vmatmul.bf16.vlgmr.msrb.gmra.mxu1 %v6350_v8  ;;  %v6345_v44 = vadd.f32 1.0, %v9810_v25  ;;  %v8859_v8 = vld [vmem:[#allocation5 + $0x1120] sm:$0xf]  ;;  %v8828_v25 = vor.u32 %v9346_v16, %v8827_v10  ;;  %v6551_v10 = vld [vmem:[#allocation7 + $0x860] ss:$0 sm:$0xff] }
0x430c   : > { %v6707_v16 = vld [vmem:[#allocation7 + $0x880] ss:$0 sm:$0xff] }
0x430d   : > { %v6347_v19 = vmul.f32 %v6345_v44, %v6331_v28  ;;  %v9354_v28 = vld [vmem:[#allocation5 + $0x1124] sm:$0xf0]  ;;  %v8891_v44 = vld [vmem:[#allocation5 + $0x11a0] sm:$0xf]  ;;  %6604 = vmatpush.bf16.msrb.mxu3 %v8828_v25 }
0x430f   : > { %v6349_v57 = vpack.c.bf16 %v6347_v19, %v6347_v19  ;;  %v9362_v19 = vld [vmem:[#allocation5 + $0x11a4] sm:$0xf0] }
0x4311   : > { %6487 = vmatmul.bf16.vlgmr.msrb.gmra.mxu2 %v6349_v57  ;;  %v8860_v57 = vor.u32 %v9354_v28, %v8859_v8 }
0x4313   : > { %6682 = vmatpush.bf16.msrb.mxu0 %v8860_v57 }
0x4388   : > { %v6501_v51 = vpop.f32.mrf.mxu1 }
0x4390   : > { %v6503_v55 = vpop.f32.mrf.mxu1 }
0x4391   : > { %v8823_v55 = vld [vmem:[#allocation5 + $0x1090] sm:$0xf] }
0x4394   : > { %v6488_v26 = vpop.f32.mrf.mxu2 }
0x4395   : > { %v6502_v63 = vadd.f32 %v6501_v51, %v6488_v26  ;;  %v8892_v51 = vor.u32 %v9362_v19, %v8891_v44  ;;  %v9345_v26 = vld [vmem:[#allocation5 + $0x1094] sm:$0xf0] }
0x4397   : > { %v6505_v50 = vadd.f32 %v6502_v63, %v11313_v18  ;;  %6760 = vmatpush.bf16.msra.mxu2 %v8892_v51  ;;  %v8855_v63 = vld [vmem:[#allocation5 + $0x1110] sm:$0xf] }
0x4399   : > { %v11340_v56 = vadd.f32 %v6506_v5, %v6505_v50  ;;  %v8824_v5 = vor.u32 %v9345_v26, %v8823_v55  ;;  %v9353_v50 = vld [vmem:[#allocation5 + $0x1114] sm:$0xf0] }
0x439a   : > { %v8856_v20 = vor.u32 %v9353_v50, %v8855_v63 }
0x439b   : > { %v6510_v36 = vsel %vm4439_vm14, %v11340_v56, 0.0  ;;  %6605 = vmatpush.bf16.msrb.mxu3 %v8824_v5 }
0x439c   : > { %6511 = vadd.xlane.f32.xlu2 %v6510_v36  ;;  %v6490_v42 = vpop.f32.mrf.mxu2  ;;  %v8887_v36 = vld [vmem:[#allocation5 + $0x1190] sm:$0xf]  ;;  %6683 = vmatpush.bf16.msrb.mxu0 %v8856_v20 }
0x439d   : > { %v9361_v42 = vld [vmem:[#allocation5 + $0x1194] sm:$0xf0] }
0x439e   : > { %v8888_v24 = vor.u32 %v9361_v42, %v8887_v36 }
0x439f   : > { %6606 = vmatpush.bf16.msrb.mxu3 %v8820_v27 }
0x43a0   : > { %6761 = vmatpush.bf16.msra.mxu2 %v8888_v24 }
0x440f   : > { %v6512_v18 = vpop.xlane.xlu2 %6511 }
0x4410   : > { %v6513_v47 = vmul.f32 %v6512_v18, %v11271_v58  ;;  %v8852_v18 = vor.u32 %v9352_v37, %v8851_v12 }
0x4412   : > { %v11346_v29 = vsub.f32 %v11340_v56, %v6513_v47  ;;  %v8884_v47 = vor.u32 %v9360_v4, %v8883_v17  ;;  %6684 = vmatpush.bf16.msrb.mxu0 %v8852_v18 }
0x4414   : > { %v6515_v15 = vmul.f32 %v11346_v29, %v11346_v29  ;;  %6762 = vmatpush.bf16.msra.mxu2 %v8884_v47 }
0x4416   : > { %v6516_v22 = vsel %vm4439_vm14, %v6515_v15, 0.0  ;;  %v8815_v15 = vld [vmem:[#allocation5 + $0x1070] sm:$0xf]  ;;  %6685 = vmatpush.bf16.msrb.mxu0 %v8848_v0 }
0x4417   : > { %6517 = vadd.xlane.f32.xlu0 %v6516_v22  ;;  %v9343_v22 = vld [vmem:[#allocation5 + $0x1074] sm:$0xf0] }
0x4418   : > { %v8816_v34 = vor.u32 %v9343_v22, %v8815_v15  ;;  %6763 = vmatpush.bf16.msra.mxu2 %v8880_v52 }
0x441a   : > { %6607 = vmatpush.bf16.msrb.mxu3 %v8816_v34 }
0x448a   : > { %v6518_v23 = vpop.xlane.xlu0 %6517 }
0x448b   : > { %v6519_v48 = vmul.f32 %v6518_v23, %v11271_v58 }
0x448d   : > { %v6520_v30 = vadd.f32 1e-05, %v6519_v48  ;;  %v8942_v48 = vld [vmem:[#allocation5 + $0x1260] sm:$0xf] }
0x448f   : > { %9811 = vrsqrt.f32 %v6520_v30  ;;  %vm6527_vm8 = vweird.f32 %v6520_v30 }
0x4495   : > { %v9812_v54 = vpop.eup %9811 }
0x4496   : > { %v6522_v1 = vmul.f32 %v9812_v54, %v6520_v30  ;;  %vm6528_vm9 = vweird.f32 %v9812_v54  ;;  %v9374_v30 = vld [vmem:[#allocation5 + $0x1264] sm:$0xf0] }
0x4497   : > { %vm6529_vm4 = vmor %vm6527_vm8, %vm6528_vm9 }
0x4498   : > { %v6523_v7 = vmul.f32 %v9812_v54, %v6522_v1  ;;  %v8943_v1 = vor.u32 %v9374_v30, %v8942_v48  ;;  %v8978_v30 = vld [vmem:[#allocation5 + $0x12b0] sm:$0xf] }
0x449a   : > { %v6524_v39 = vmul.f32 0.5, %v6523_v7  ;;  %v9373_v7 = vld [vmem:[#allocation5 + $0x1254] sm:$0xf0] }
0x449c   : > { %v6525_v3 = vsub.f32 1.5, %v6524_v39 }
0x449e   : > { %v6526_v41 = vmul.f32 %v9812_v54, %v6525_v3  ;;  %v8934_v3 = vld [vmem:[#allocation5 + $0x1240] sm:$0xf] }
0x44a0   : > { %v6530_v21 = vsel %vm6529_vm4, %v9812_v54, %v6526_v41  ;;  %v8938_v54 = vld [vmem:[#allocation5 + $0x1250] sm:$0xf]  ;;  %v9372_v41 = vld [vmem:[#allocation5 + $0x1244] sm:$0xf0] }
0x44a1   : > { %v6531_v43 = vmul.f32 %v6530_v21, %v11346_v29  ;;  %v8939_v39 = vor.u32 %v9373_v7, %v8938_v54  ;;  %v8930_v21 = vld [vmem:[#allocation5 + $0x1230] sm:$0xf]  ;;  %v9384_v54 = vld [vmem:[#allocation5 + $0x12b4] sm:$0xf0] }
0x44a2   : > { %v8979_v7 = vor.u32 %v9384_v54, %v8978_v30  ;;  %v9058_v30 = vld [vmem:[#allocation5 + $0x13b0] sm:$0xf]  ;;  %v9403_v54 = vld [vmem:[#allocation5 + $0x13b4] sm:$0xf0] }
0x44a3   : > { %v6532_v14 = vmul.f32 %v6531_v43, %v6508_v32  ;;  %v8935_v32 = vor.u32 %v9372_v41, %v8934_v3  ;;  %v9371_v43 = vld [vmem:[#allocation5 + $0x1234] sm:$0xf0]  ;;  %v8970_v41 = vld [vmem:[#allocation5 + $0x12a0] sm:$0xf] }
0x44a5   : > { %v6533_v31 = vadd.f32 %v6532_v14, %v6509_v46  ;;  %v8931_v46 = vor.u32 %v9371_v43, %v8930_v21  ;;  %v8926_v14 = vld [vmem:[#allocation5 + $0x1220] sm:$0xf]  ;;  %v9381_v21 = vld [vmem:[#allocation5 + $0x12a4] sm:$0xf] }
0x44a7   : > { %v6534_v45 = vpack.c.bf16 %v6533_v31, %v6533_v31  ;;  %v9370_v31 = vld [vmem:[#allocation5 + $0x1224] sm:$0xf0] }
0x44a9   : > { %6608 = vmatmul.bf16.vlgmr.msrb.gmra.mxu3 %v6534_v45  ;;  %6686 = vmatmul.bf16.vlgmr.msrb.gmra.mxu0 %v6534_v45 }
0x44aa   : > { %6764 = vmatmul.bf16.vlgmr.msra.gmra.mxu2 %v6534_v45  ;;  %v8927_v45 = vor.u32 %v9370_v31, %v8926_v14  ;;  %v8962_v31 = vld [vmem:[#allocation5 + $0x1290] sm:$0xf] }
0x4526   : > { %v6687_v61 = vpop.f32.mrf.mxu0 }
0x4527   : > { %v6688_v59 = vadd.f32 %v6687_v61, %v6629_v13  ;;  %v8922_v61 = vld [vmem:[#allocation5 + $0x1210] sm:$0xf] }
0x4529   : > { %v6790_v60 = vpack.c.bf16 %v6688_v59, %v6688_v59  ;;  %v9369_v59 = vld [vmem:[#allocation5 + $0x1214] sm:$0xf0] }
0x452b   : > { %6798 = vmatpush.bf16.xpose.msra.mxu3 %v6790_v60  ;;  %v8923_v60 = vor.u32 %v9369_v59, %v8922_v61  ;;  %v8964_v59 = vld [vmem:[#allocation5 + $0x1298] sm:$0xf0] }
0x452c   : > { %v6609_v8 = vpop.f32.mrf.mxu3 }
0x452d   : > { %v6610_v25 = vadd.f32 %v6609_v8, %v6551_v10  ;;  %v6765_v28 = vpop.f32.mrf.mxu2  ;;  %v8918_v10 = vld [vmem:[#allocation5 + $0x1200] sm:$0xf] }
0x452e   : > { %v6766_v44 = vadd.f32 %v6765_v28, %v6707_v16  ;;  %v6689_v19 = vpop.f32.mrf.mxu0  ;;  %v9368_v16 = vld [vmem:[#allocation5 + $0x1204] sm:$0xf0]  ;;  %v9853_v28 = vld [vmem:[#allocation7 + $0x730] sm:$0xff] }
0x452f   : > { %v6769_v29 = vpack.c.bf16 %v6610_v25, %v6610_v25  ;;  %v8919_v8 = vor.u32 %v9368_v16, %v8918_v10  ;;  %v9854_v19 = vld [vmem:[#allocation7 + $0x740] sm:$0xff]  ;;  %v8954_v10 = vld [vmem:[#allocation5 + $0x1280] sm:$0xf]  ;;  %v9378_v16 = vld [vmem:[#allocation5 + $0x1284] sm:$0xf0] }
0x4530   : > { %v6830_v57 = vpack.c.bf16 %v6766_v44, %v6766_v44 }
0x4531   : > { %v6771_v51 = vsel %vm5947_vm1, %v6769_v29, 0 }
0x4532   : > { %v6835_v55 = vsel %vm5947_vm1, %v6830_v57, 0  ;;  %6780 = vmatpush.bf16.msra.mxu1 %v6771_v51  ;;  %v8914_v51 = vld [vmem:[#allocation5 + $0x11f0] sm:$0xf] }
0x4533   : > { %6844 = vmatpush.bf16.msra.mxu0 %v6835_v55  ;;  %v9367_v55 = vld [vmem:[#allocation5 + $0x11f4] sm:$0xf0] }
0x4534   : > { %v6611_v26 = vpop.f32.mrf.mxu3 }
0x4535   : > { %v6767_v63 = vpop.f32.mrf.mxu2  ;;  %8909 = vmatmul.msk.bf16.vlgmr.msra.gmra.mxu1 %vm5943_vm13, %v11290_v6  ;;  %v8915_v26 = vor.u32 %v9367_v55, %v8914_v51  ;;  %v8948_v55 = vld [vmem:[#allocation5 + $0x1278] sm:$0xf0] }
0x4536   : > { %6932 = vmatpush.bf16.msrb.mxu1 %v8943_v1  ;;  %v9383_v1 = vld [vmem:[#allocation5 + $0x12b4] sm:$0xf] }
0x453a   : > { %6933 = vmatpush.bf16.msrb.mxu1 %v8939_v39  ;;  %v8980_v39 = vld [vmem:[#allocation5 + $0x12b8] sm:$0xf0] }
0x453b   : > { %v8983_v3 = vor.u32 %v9383_v1, %v8980_v39  ;;  %v9059_v1 = vor.u32 %v9403_v54, %v9058_v30  ;;  %v9030_v39 = vld [vmem:[#allocation5 + $0x1340] sm:$0xf] }
0x453e   : > { %6934 = vmatpush.bf16.msrb.mxu1 %v8935_v32  ;;  %v9382_v32 = vld [vmem:[#allocation5 + $0x12a4] sm:$0xf0] }
0x453f   : > { %v8971_v43 = vor.u32 %v9382_v32, %v8970_v41  ;;  %v9054_v41 = vld [vmem:[#allocation5 + $0x13a0] sm:$0xf] }
0x4542   : > { %6935 = vmatpush.bf16.msrb.mxu1 %v8931_v46  ;;  %v8972_v46 = vld [vmem:[#allocation5 + $0x12a8] sm:$0xf0] }
0x4543   : > { %v8975_v14 = vor.u32 %v9381_v21, %v8972_v46  ;;  %v9402_v21 = vld [vmem:[#allocation5 + $0x13a4] sm:$0xf0]  ;;  %v9395_v46 = vld [vmem:[#allocation5 + $0x1334] sm:$0xf0] }
0x4546   : > { %6936 = vmatpush.bf16.msrb.mxu1 %v8927_v45  ;;  %v9380_v45 = vld [vmem:[#allocation5 + $0x1294] sm:$0xf0] }
0x4547   : > { %v8963_v61 = vor.u32 %v9380_v45, %v8962_v31  ;;  %v9050_v31 = vld [vmem:[#allocation5 + $0x1390] sm:$0xf]  ;;  %v9401_v45 = vld [vmem:[#allocation5 + $0x1394] sm:$0xf0] }
0x454a   : > { %6937 = vmatpush.bf16.msrb.mxu1 %v8923_v60 }
0x454e   : > { %6938 = vmatpush.bf16.msrb.mxu1 %v8919_v8  ;;  %v9377_v8 = vld [vmem:[#allocation5 + $0x1284] sm:$0xf] }
0x4552   : > { %6939 = vmatpush.bf16.msrb.mxu1 %v8915_v26 }
0x45b2   : > { %v6782_v5 = vpop.f32.mrf.mxu1 }
0x45b3   : > { %v6787_v36 = vmul.f32 %v6782_v5, %v11295_v40 }
0x45ba   : > { %v6784_v50 = vpop.f32.mrf.mxu1 }
0x45bb   : > { %v6788_v42 = vmul.f32 %v6784_v50, %v11297_v33 }
0x45bd   : > { %v6789_v20 = vpack.c.bf16 %v6788_v42, %v6787_v36  ;;  %v6946_v42 = vld [vmem:[#allocation7 + $0x890] ss:$0 sm:$0xff] }
0x45bf   : > { %6799 = vmatmul.bf16.vlgmr.msra.gmra.mxu3 %v6789_v20 }
0x4642   : > { %v6800_v24 = vpop.f32.mrf.mxu3 }
0x4643   : > { %v6805_v49 = vmul.f32 0.25, %v6800_v24 }
0x4645   : > { %v6807_v2 = vsel %vm5943_vm13, %v6805_v49, -inf }
0x4646   : > { %6808 = vmax.xlane.f32.xlu1 %v6807_v2 }
0x464a   : > { %v6802_v12 = vpop.f32.mrf.mxu3 }
0x464b   : > { %v6806_v27 = vmul.f32 0.25, %v6802_v12  ;;  %v9390_v12 = vld [vmem:[#allocation5 + $0x12e4] sm:$0xf0] }
0x464d   : > { %v6810_v37 = vsel %vm5943_vm13, %v6806_v27, -inf }
0x464e   : > { %6811 = vmax.xlane.f32.xlu2 %v6810_v37 }
0x46b9   : > { %v6809_v17 = vpop.xlane.xlu1 %6808 }
0x46ba   : > { %v6813_v6 = vsub.f32 %v6805_v49, %v6809_v17  ;;  %v9004_v17 = vld [vmem:[#allocation5 + $0x12e8] sm:$0xf0] }
0x46bc   : > { %v6815_v4 = vmul.f32 1.442695, %v6813_v6 }
0x46be   : > { %9813 = vpow2.f32 %v6815_v4 }
0x46c1   : > { %v6812_v18 = vpop.xlane.xlu2 %6811 }
0x46c2   : > { %v6814_v40 = vsub.f32 %v6806_v27, %v6812_v18  ;;  %v9389_v27 = vld [vmem:[#allocation5 + $0x12e4] sm:$0xf] }
0x46c3   : > { %v9007_v6 = vor.u32 %v9389_v27, %v9004_v17  ;;  %v6949_v17 = vld [vmem:[#allocation7 + $0x8b0] ss:$0 sm:$0xff] }
0x46c4   : > { %v9814_v47 = vpop.eup %9813  ;;  %v6817_v33 = vmul.f32 1.442695, %v6814_v40 }
0x46c5   : > { %v6819_v15 = vsel %vm5943_vm13, %v9814_v47, 0.0  ;;  %7091 = vmatpush.bf16.msrb.mxu0 %v9007_v6 }
0x46c6   : > { %9815 = vpow2.f32 %v6817_v33  ;;  %6820 = vadd.xlane.f32.xlu0 %v6819_v15  ;;  %v8994_v33 = vld [vmem:[#allocation5 + $0x12d0] sm:$0xf]  ;;  %v9388_v15 = vld [vmem:[#allocation5 + $0x12d4] sm:$0xf0] }
0x46cc   : > { %v9816_v22 = vpop.eup %9815 }
0x46cd   : > { %v6822_v62 = vsel %vm5943_vm13, %v9816_v22, 0.0 }
0x46ce   : > { %6823 = vadd.xlane.f32.xlu1 %v6822_v62  ;;  %v8995_v62 = vor.u32 %v9388_v15, %v8994_v33  ;;  %v9066_v15 = vld [vmem:[#allocation5 + $0x13d0] sm:$0xf] }
0x4739   : > { %v6821_v34 = vpop.xlane.xlu0 %6820 }
0x473a   : > { %9817 = vrcp.f32 %v6821_v34  ;;  %v8996_v34 = vld [vmem:[#allocation5 + $0x12d8] sm:$0xf0] }
0x4740   : > { %v9818_v11 = vpop.eup %9817 }
0x4741   : > { %v6824_v9 = vpop.xlane.xlu1 %6823  ;;  %v6827_v0 = vmul.f32 %v9818_v11, %v9814_v47  ;;  %v8986_v11 = vld [vmem:[#allocation5 + $0x12c0] sm:$0xf] }
0x4742   : > { %9819 = vrcp.f32 %v6824_v9 }
0x4748   : > { %v9820_v53 = vpop.eup %9819 }
0x4749   : > { %v6828_v52 = vmul.f32 %v9820_v53, %v9816_v22  ;;  %v9387_v22 = vld [vmem:[#allocation5 + $0x12d4] sm:$0xf]  ;;  %v9386_v53 = vld [vmem:[#allocation5 + $0x12c4] sm:$0xf0] }
0x474a   : > { %v8999_v9 = vor.u32 %v9387_v22, %v8996_v34  ;;  %v9405_v22 = vld [vmem:[#allocation5 + $0x13d4] sm:$0xf0]  ;;  %v9038_v34 = vld [vmem:[#allocation5 + $0x1360] sm:$0xf] }
0x474b   : > { %v6829_v23 = vpack.c.bf16 %v6828_v52, %v6827_v0  ;;  %v9385_v0 = vld [vmem:[#allocation5 + $0x12c4] sm:$0xf]  ;;  %v8987_v52 = vor.u32 %v9386_v53, %v8986_v11  ;;  %v9062_v53 = vld [vmem:[#allocation5 + $0x13c0] sm:$0xf] }
0x474c   : > { %7092 = vmatpush.bf16.msrb.mxu0 %v8999_v9  ;;  %v9398_v9 = vld [vmem:[#allocation5 + $0x1364] sm:$0xf0] }
0x474d   : > { %8910 = vmatmul.msk.bf16.vlgmr.msra.gmra.mxu0 %vm5943_vm13, %v6829_v23  ;;  %v8988_v23 = vld [vmem:[#allocation5 + $0x12c8] sm:$0xf0]  ;;  %v9039_v11 = vor.u32 %v9398_v9, %v9038_v34  ;;  %v9010_v9 = vld [vmem:[#allocation5 + $0x12f0] sm:$0xf] }
0x474e   : > { %v8991_v48 = vor.u32 %v9385_v0, %v8988_v23  ;;  %v9404_v0 = vld [vmem:[#allocation5 + $0x13c4] sm:$0xf0]  ;;  %v9397_v23 = vld [vmem:[#allocation5 + $0x1354] sm:$0xf0] }
0x4750   : > { %7093 = vmatpush.bf16.msrb.mxu0 %v8991_v48 }
0x4754   : > { %7094 = vmatpush.bf16.msrb.mxu0 %v8983_v3  ;;  %v9396_v3 = vld [vmem:[#allocation5 + $0x1344] sm:$0xf0] }
0x4755   : > { %v9031_v32 = vor.u32 %v9396_v3, %v9030_v39 }
0x4758   : > { %7095 = vmatpush.bf16.msrb.mxu0 %v8975_v14  ;;  %v9055_v14 = vor.u32 %v9402_v21, %v9054_v41 }
0x47ca   : > { %v6846_v13 = vpop.f32.mrf.mxu0 }
0x47cb   : > { %v6851_v44 = vmul.f32 %v9853_v28, %v6846_v13  ;;  %v9379_v13 = vld [vmem:[#allocation5 + $0x1294] sm:$0xf]  ;;  %v8956_v28 = vld [vmem:[#allocation5 + $0x1288] sm:$0xf0] }
0x47cc   : > { %v8967_v60 = vor.u32 %v9379_v13, %v8964_v59  ;;  %v9051_v59 = vor.u32 %v9401_v45, %v9050_v31 }
0x47ce   : > { %7096 = vmatpush.bf16.msrb.mxu0 %v8967_v60  ;;  %v9022_v60 = vld [vmem:[#allocation5 + $0x1320] sm:$0xf] }
0x47d2   : > { %v6848_v25 = vpop.f32.mrf.mxu0 }
0x47d3   : > { %v6852_v29 = vmul.f32 %v9854_v19, %v6848_v25  ;;  %v8955_v25 = vor.u32 %v9378_v16, %v8954_v10  ;;  %v8946_v19 = vld [vmem:[#allocation5 + $0x1270] sm:$0xf]  ;;  %v9394_v10 = vld [vmem:[#allocation5 + $0x1324] sm:$0xf0]  ;;  %v9046_v16 = vld [vmem:[#allocation5 + $0x1380] sm:$0xf] }
0x47d5   : > { %v6853_v57 = vpack.c.bf16 %v6852_v29, %v6851_v44  ;;  %v8959_v44 = vor.u32 %v9377_v8, %v8956_v28  ;;  %v9376_v29 = vld [vmem:[#allocation5 + $0x1274] sm:$0xf0]  ;;  %v9400_v8 = vld [vmem:[#allocation5 + $0x1384] sm:$0xf0]  ;;  %v9023_v28 = vor.u32 %v9394_v10, %v9022_v60 }
0x47d6   : > { %v8947_v51 = vor.u32 %v9376_v29, %v8946_v19  ;;  %v9047_v19 = vor.u32 %v9400_v8, %v9046_v16  ;;  %v9018_v29 = vld [vmem:[#allocation5 + $0x1310] sm:$0xf] }
0x47d7   : > { %6861 = vmatpush.bf16.msrb.mxu2 %v6853_v57  ;;  %v9375_v57 = vld [vmem:[#allocation5 + $0x1274] sm:$0xf]  ;;  %7097 = vmatpush.bf16.msrb.mxu0 %v8959_v44 }
0x47d8   : > { %v8951_v26 = vor.u32 %v9375_v57, %v8948_v55  ;;  %v9393_v57 = vld [vmem:[#allocation5 + $0x1314] sm:$0xf0] }
0x47d9   : > { %v9399_v55 = vld [vmem:[#allocation5 + $0x1374] sm:$0xf0] }
0x47da   : > { %8911 = vmatmul.msk.bf16.vlgmr.msrb.gmra.mxu2 %vm346_vm0, %v11308_v38  ;;  %v9002_v38 = vld [vmem:[#allocation5 + $0x12e0] sm:$0xf] }
0x47db   : > { %v9003_v37 = vor.u32 %v9390_v12, %v9002_v38  ;;  %7098 = vmatpush.bf16.msrb.mxu0 %v8951_v26  ;;  %v6948_v12 = vld [vmem:[#allocation7 + $0x8a0] ss:$0 sm:$0xff]  ;;  %7297 = vmatpush.bf16.msra.mxu2 %v9039_v11  ;;  %v9391_v11 = vld [vmem:[#allocation5 + $0x12f4] sm:$0xf0] }
0x47dd   : > { %7078 = vmatpush.bf16.msrb.mxu3 %v9003_v37 }
0x47e1   : > { %7079 = vmatpush.bf16.msrb.mxu3 %v8995_v62  ;;  %v9067_v62 = vor.u32 %v9405_v22, %v9066_v15  ;;  %v7122_v15 = vld [vmem:[#allocation7 + $0x8d0] sm:$0x7] }
0x47e5   : > { %7080 = vmatpush.bf16.msrb.mxu3 %v8987_v52  ;;  %v9034_v52 = vld [vmem:[#allocation5 + $0x1350] sm:$0xf] }
0x47e6   : > { %v9035_v48 = vor.u32 %v9397_v23, %v9034_v52  ;;  %v9011_v52 = vor.u32 %v9391_v11, %v9010_v9 }
0x47e8   : > { %7298 = vmatpush.bf16.msra.mxu2 %v9035_v48  ;;  %v7128_v48 = vperm.slane %v7122_v15, 1 }
0x47e9   : > { %7081 = vmatpush.bf16.msrb.mxu3 %v8979_v7  ;;  %v6992_v7 = vld [vmem:[#allocation7 + $0x8c0] ss:$8 sm:$0x3] }
0x47ec   : > { %7299 = vmatpush.bf16.msra.mxu2 %v9031_v32  ;;  %v7134_v32 = vperm.slane %v7122_v15, 2 }
0x47ed   : > { %7082 = vmatpush.bf16.msrb.mxu3 %v8971_v43  ;;  %v9026_v43 = vld [vmem:[#allocation5 + $0x1330] sm:$0xf] }
0x47ee   : > { %v9027_v13 = vor.u32 %v9395_v46, %v9026_v43 }
0x47f0   : > { %7300 = vmatpush.bf16.msra.mxu2 %v9027_v13 }
0x47f1   : > { %7083 = vmatpush.bf16.msrb.mxu3 %v8963_v61  ;;  %v6995_v61 = vperm.slane %v6992_v7, 1 }
0x47f4   : > { %7301 = vmatpush.bf16.msra.mxu2 %v9023_v28 }
0x47f5   : > { %7084 = vmatpush.bf16.msrb.mxu3 %v8955_v25 }
0x47f9   : > { %7085 = vmatpush.bf16.msrb.mxu3 %v8947_v51  ;;  %v9042_v51 = vld [vmem:[#allocation5 + $0x1370] sm:$0xf] }
0x485d   : > { %v6863_v63 = vpop.f32.mrf.mxu2 }
0x485e   : > { %v6867_v5 = vpack.c.bf16 %v6863_v63, %v6863_v63 }
0x4860   : > { %6940 = vmatmul.bf16.vlgmr.msrb.gmra.mxu1 %v6867_v5 }
0x4865   : > { %v6865_v50 = vpop.f32.mrf.mxu2 }
0x48dd   : > { %v6941_v36 = vpop.f32.mrf.mxu1 }
0x48de   : > { %v6945_v20 = vadd.f32 %v6941_v36, %v11340_v56 }
0x48e0   : > { %v11367_v24 = vadd.f32 %v6946_v42, %v6945_v20 }
0x48e2   : > { %v6950_v49 = vsel %vm4439_vm14, %v11367_v24, 0.0 }
0x48e3   : > { %6951 = vadd.xlane.f32.xlu2 %v6950_v49 }
0x48e5   : > { %v6943_v2 = vpop.f32.mrf.mxu1 }
0x4956   : > { %v6952_v4 = vpop.xlane.xlu2 %6951 }
0x4957   : > { %v6953_v18 = vmul.f32 %v6952_v4, %v11271_v58 }
0x4959   : > { %v11373_v56 = vsub.f32 %v11367_v24, %v6953_v18 }
0x495b   : > { %v6955_v40 = vmul.f32 %v11373_v56, %v11373_v56 }
0x495d   : > { %v6956_v47 = vsel %vm4439_vm14, %v6955_v40, 0.0  ;;  %v9070_v40 = vld [vmem:[#allocation5 + $0x13e0] sm:$0xf] }
0x495e   : > { %6957 = vadd.xlane.f32.xlu0 %v6956_v47  ;;  %v9406_v47 = vld [vmem:[#allocation5 + $0x13e4] sm:$0xf0] }
0x495f   : > { %v9071_v33 = vor.u32 %v9406_v47, %v9070_v40 }
0x4961   : > { %7310 = vmatpush.bf16.msra.mxu1 %v9071_v33  ;;  %v7141_v33 = vld [vmem:[#allocation7 + $0x8e0] ss:$8 sm:$0x3] }
0x4962   : > { %v7144_v23 = vperm.slane %v7141_v33, 1 }
0x4965   : > { %7311 = vmatpush.bf16.msra.mxu1 %v9067_v62 }
0x49d1   : > { %v6958_v63 = vpop.xlane.xlu0 %6957 }
0x49d2   : > { %v6959_v5 = vmul.f32 %v6958_v63, %v11271_v58  ;;  %v6994_v63 = vperm.slane %v6992_v7, 0  ;;  %v7124_v7 = vperm.slane %v7122_v15, 0 }
0x49d4   : > { %v6960_v50 = vadd.f32 1e-05, %v6959_v5  ;;  %v9019_v5 = vor.u32 %v9393_v57, %v9018_v29 }
0x49d6   : > { %9821 = vrsqrt.f32 %v6960_v50  ;;  %vm6967_vm5 = vweird.f32 %v6960_v50  ;;  %7302 = vmatpush.bf16.msra.mxu2 %v9019_v5 }
0x49dc   : > { %v9822_v36 = vpop.eup %9821 }
0x49dd   : > { %v6962_v42 = vmul.f32 %v9822_v36, %v6960_v50  ;;  %vm6968_vm0 = vweird.f32 %v9822_v36 }
0x49de   : > { %vm6969_vm6 = vmor %vm6967_vm5, %vm6968_vm0 }
0x49df   : > { %v6963_v20 = vmul.f32 %v9822_v36, %v6962_v42  ;;  %v9043_v42 = vor.u32 %v9399_v55, %v9042_v51 }
0x49e1   : > { %v6964_v49 = vmul.f32 0.5, %v6963_v20  ;;  %v9014_v20 = vld [vmem:[#allocation5 + $0x1300] sm:$0xf] }
0x49e3   : > { %v6965_v2 = vsub.f32 1.5, %v6964_v49  ;;  %v9392_v49 = vld [vmem:[#allocation5 + $0x1304] sm:$0xf0] }
0x49e5   : > { %v6966_v38 = vmul.f32 %v9822_v36, %v6965_v2 }
0x49e7   : > { %v6970_v27 = vsel %vm6969_vm6, %v9822_v36, %v6966_v38  ;;  %v7123_v36 = vld [vmem:[#allocation7 + $0x8d8] sm:$0x7] }
0x49e8   : > { %v6971_v37 = vmul.f32 %v6970_v27, %v11373_v56  ;;  %v9063_v56 = vor.u32 %v9404_v0, %v9062_v53  ;;  %v7135_v47 = vperm.slane %v7123_v36, 2 }
0x49ea   : > { %v6972_v6 = vmul.f32 %v6971_v37, %v6948_v12  ;;  %7312 = vmatpush.bf16.msra.mxu1 %v9063_v56  ;;  %v7125_v37 = vperm.slane %v7123_v36, 0 }
0x49ec   : > { %v6973_v4 = vadd.f32 %v6972_v6, %v6949_v17  ;;  %v7129_v17 = vperm.slane %v7123_v36, 1 }
0x49ee   : > { %v6974_v18 = vpack.c.bf16 %v6973_v4, %v6973_v4  ;;  %7313 = vmatpush.bf16.msra.mxu1 %v9059_v1  ;;  %v9015_v4 = vor.u32 %v9392_v49, %v9014_v20 }
0x49f0   : > { %7086 = vmatmul.bf16.vlgmr.msrb.gmra.mxu3 %v6974_v18  ;;  %7099 = vmatmul.bf16.vlgmr.msrb.gmra.mxu0 %v6974_v18 }
0x49f1   : > { %7303 = vmatpush.bf16.msra.mxu2 %v9015_v4 }
0x49f2   : > { %7314 = vmatpush.bf16.msra.mxu1 %v9055_v14 }
0x49f5   : > { %7304 = vmatpush.bf16.msra.mxu2 %v9011_v52 }
0x49f6   : > { %7315 = vmatpush.bf16.msra.mxu1 %v9051_v59 }
0x49fa   : > { %7316 = vmatpush.bf16.msra.mxu1 %v9047_v19 }
0x49fe   : > { %7317 = vmatpush.bf16.msra.mxu1 %v9043_v42 }
0x4a6d   : > { %v7100_v25 = vpop.f32.mrf.mxu0 }
0x4a6e   : > { %v7101_v44 = vadd.f32 %v7100_v25, %v6995_v61  ;;  %v7143_v61 = vperm.slane %v7141_v33, 0 }
0x4a70   : > { %v7106_v26 = vrot.slane %v7101_v44, 6  ;;  %v7131_v0 = vmul.f32 %v7129_v17, %v7101_v44 }
0x4a72   : > { %v7107_v50 = vsel %vm6285_vm10, %v7106_v26, %v7101_v44 }
0x4a73   : > { %v7109_v2 = vrot.slane %v7107_v50, 6  ;;  %v7087_v38 = vpop.f32.mrf.mxu3 }
0x4a74   : > { %v7088_v12 = vadd.f32 %v7087_v38, %v6994_v63 }
0x4a75   : > { %v7111_v27 = vsel %vm6285_vm10, %v7109_v2, %v7101_v44  ;;  %v7102_v6 = vpop.f32.mrf.mxu0 }
0x4a76   : > { %v7115_v18 = vrot.slane %v7111_v27, 1  ;;  %v7104_v40 = vrot.slane %v7088_v12, 6  ;;  %v7130_v31 = vmul.f32 %v7128_v48, %v7088_v12 }
0x4a78   : > { %v7119_v22 = vsel %vm615_vm7, 0.0, %v7115_v18  ;;  %v7121_v62 = vsel %vm5675_vm11, 0.0, %v7115_v18  ;;  %v7105_v34 = vsel %vm6285_vm10, %v7104_v40, %v7088_v12 }
0x4a79   : > { %v7127_v53 = vmul.f32 %v7125_v37, %v7119_v22  ;;  %v7108_v56 = vrot.slane %v7105_v34, 6  ;;  %v7137_v54 = vmul.f32 %v7135_v47, %v7121_v62  ;;  %v7324_v37 = vld [vmem:[#allocation7 + $0x8f0] ss:$0 sm:$0xff] }
0x4a7b   : > { %v7133_v30 = vadd.f32 %v7131_v0, %v7127_v53  ;;  %v7110_v1 = vsel %vm6285_vm10, %v7108_v56, %v7088_v12  ;;  %v7089_v39 = vpop.f32.mrf.mxu3 }
0x4a7c   : > { %v7114_v3 = vrot.slane %v7110_v1, 1 }
0x4a7d   : > { %v7139_v41 = vadd.f32 %v7137_v54, %v7133_v30 }
0x4a7e   : > { %v7118_v21 = vsel %vm615_vm7, 0.0, %v7114_v3  ;;  %v7120_v43 = vsel %vm5675_vm11, 0.0, %v7114_v3 }
0x4a7f   : > { %v7148_v46 = vadd.f32 %v7144_v23, %v7139_v41  ;;  %v7126_v14 = vmul.f32 %v7124_v7, %v7118_v21  ;;  %v7136_v13 = vmul.f32 %v7134_v32, %v7120_v43 }
0x4a81   : > { %v7132_v45 = vadd.f32 %v7130_v31, %v7126_v14  ;;  %v7152_v59 = vmul.f32 0.044715, %v7148_v46  ;;  %v7150_v55 = vmul.f32 0.5, %v7148_v46 }
0x4a83   : > { %v7138_v60 = vadd.f32 %v7136_v13, %v7132_v45  ;;  %v7154_v10 = vmul.f32 %v7152_v59, %v7148_v46 }
0x4a85   : > { %v7147_v16 = vadd.f32 %v7143_v61, %v7138_v60  ;;  %v7156_v8 = vmul.f32 %v7154_v10, %v7148_v46 }
0x4a87   : > { %v7158_v25 = vadd.f32 %v7156_v8, %v7148_v46  ;;  %v7151_v28 = vmul.f32 0.044715, %v7147_v16  ;;  %v7149_v36 = vmul.f32 0.5, %v7147_v16 }
0x4a89   : > { %v7160_v44 = vmul.f32 0.7978846, %v7158_v25  ;;  %v7153_v19 = vmul.f32 %v7151_v28, %v7147_v16 }
0x4a8b   : > { %9823 = vtanh.f32 %v7160_v44  ;;  %v7155_v29 = vmul.f32 %v7153_v19, %v7147_v16 }
0x4a8d   : > { %v7157_v57 = vadd.f32 %v7155_v29, %v7147_v16 }
0x4a8f   : > { %v7159_v35 = vmul.f32 0.7978846, %v7157_v57 }
0x4a91   : > { %v9824_v51 = vpop.eup %9823  ;;  %9825 = vtanh.f32 %v7159_v35 }
0x4a92   : > { %v7164_v26 = vadd.f32 1.0, %v9824_v51 }
0x4a94   : > { %v7166_v63 = vmul.f32 %v7164_v26, %v7150_v55 }
0x4a96   : > { %v7168_v5 = vpack.c.bf16 %v7166_v63, %v7166_v63 }
0x4a97   : > { %v9826_v50 = vpop.eup %9825 }
0x4a98   : > { %7318 = vmatmul.bf16.vlgmr.msra.gmra.mxu1 %v7168_v5  ;;  %v7163_v42 = vadd.f32 1.0, %v9826_v50 }
0x4a9a   : > { %v7165_v20 = vmul.f32 %v7163_v42, %v7149_v36 }
0x4a9c   : > { %v7167_v49 = vpack.c.bf16 %v7165_v20, %v7165_v20 }
0x4a9e   : > { %7305 = vmatmul.bf16.vlgmr.msra.gmra.mxu2 %v7167_v49 }
0x4b15   : > { %v7319_v2 = vpop.f32.mrf.mxu1 }
0x4b1d   : > { %v7321_v38 = vpop.f32.mrf.mxu1 }
0x4b21   : > { %v7306_v12 = vpop.f32.mrf.mxu2 }
0x4b22   : > { %v7320_v27 = vadd.f32 %v7319_v2, %v7306_v12 }
0x4b24   : > { %v7323_v17 = vadd.f32 %v7320_v27, %v11367_v24 }
0x4b26   : > { %v7325_v6 = vadd.f32 %v7324_v37, %v7323_v17 }
0x4b28   : > { %v7328_v4 = vsel %vm4439_vm14, %v7325_v6, 0.0 }
0x4b29   : > { %7329 = vadd.xlane.f32.xlu1 %v7328_v4  ;;  %v7308_v18 = vpop.f32.mrf.mxu2 }
0x4b9c   : > { %v7330_v40 = vpop.xlane.xlu1 %7329 }
0x4b9d   : > { %v7331_v47 = vmul.f32 %v7330_v40, %v11271_v58 }
0x4b9f   : > { %v11395_v33 = vsub.f32 %v7325_v6, %v7331_v47 }
0x4ba1   : > { %v7333_v15 = vmul.f32 %v11395_v33, %v11395_v33 }
0x4ba3   : > { %v7334_v22 = vsel %vm4439_vm14, %v7333_v15, 0.0 }
0x4ba4   : > { %7335 = vadd.xlane.f32.xlu2 %v7334_v22 }
0x4ba5   : > { %9972 = shalt.err (!%p9969_p10)
}
0x4ba6   : > { %9419 = dma.vmem_to_hbm [thread:$0]  (%p10229_p5), %s7399_s18, 128, %s7401_s14, %s11406_s15  }
0x4ba7   : > { %s9407_s8 = sshll.u32 %s10176_s25, 4  ;;  %s7381_s2 = sshll.u32 %s10886_s26, 4  ;;  %s7382_s2 = int_to_ptr.vmem [resolvable:$true] %s7381_s2 }
0x4ba8   : > { %s7380_s13 = scalar_lea.hbm %s11492_s3, %s9407_s8  ;;  %s9079_s17 = sshll.u32 %s10176_s25, 2 }
0x4ba9   : > { %s7383_s1 = sshll.u32 %s7380_s13, 4  ;;  %s7354_s10 = scalar_lea.sflag [#allocation4], %s10259_s12  ;;  %s7384_s1 = int_to_ptr.hbm [resolvable:$true] %s7383_s1 }
0x4baa   : > { %s9987_s11 = sshra.s32 %s7384_s1, 4  ;;  %s9993_s14 = scalar_lea.hbm %s11492_s3, 32  ;;  %s9988_s11 = int_to_ptr.hbm [resolvable:$true] %s9987_s11 }
0x4bab   : > { %s9989_s27 = scalar_lea.hbm %s9988_s11, 16  ;;  %p9994_p3 = scmp.lt.s32.totalorder %s9988_s11, %s11492_s3 }
0x4bac   : > { %p9990_p12 = scmp.ne.s32.totalorder %s9988_s11, %s9989_s27  ;;  %p9995_p7 = scmp.lt.s32.totalorder %s9993_s14, %s9989_s27 }
0x4bae   : > { %p9991_p13 = pnand %p9990_p12, %p10229_p5  ;;  %p9996_p1 = por %p9995_p7, %p9994_p3 }
0x4bb0   : > { %p9992_p0 = pneg %p9991_p13 }
0x4bb2   : > { %p9997_p4 = pnand %p9996_p1, %p9992_p0 }
0x4bb4   : > { %10000 = shalt.err (!%p9997_p4)
}
0x4bb5   : > { %s10118_s26 = smov 128   ;;  %s10119_s8 = smov 8  }
0x4bb6   : > { %9418 = dma.vmem_to_hbm [thread:$0]  (%p10229_p5), %s7382_s2, 256, %s7384_s1, %s7354_s10, %s10118_s26, %s10118_s26, %s10119_s8  }
0x4bb7   : > { %s7410_s19 = scalar_lea.hbm %s11494_s5, %s9079_s17  ;;  %s7412_s18 = sshll.u32 %s11259_s29, 4  ;;  %s7413_s18 = int_to_ptr.vmem [resolvable:$true] %s7412_s18 }
0x4bb8   : > { %s7414_s4 = sshll.u32 %s7410_s19, 4  ;;  %s10021_s0 = scalar_lea.hbm %s11494_s5, 8  ;;  %s7415_s4 = int_to_ptr.hbm [resolvable:$true] %s7414_s4 }
0x4bb9   : > { %s10015_s11 = sshra.s32 %s7415_s4, 4  ;;  %s10016_s11 = int_to_ptr.hbm [resolvable:$true] %s10015_s11 }
0x4bba   : > { %s10017_s27 = scalar_lea.hbm %s10016_s11, 4  ;;  %p10022_p2 = scmp.lt.s32.totalorder %s10016_s11, %s11494_s5 }
0x4bbb   : > { %p10018_p8 = scmp.ne.s32.totalorder %s10016_s11, %s10017_s27  ;;  %p10023_p10 = scmp.lt.s32.totalorder %s10021_s0, %s10017_s27 }
0x4bbd   : > { %p10019_p11 = pnand %p10018_p8, %p10229_p5  ;;  %p10024_p12 = por %p10023_p10, %p10022_p2 }
0x4bbf   : > { %p10020_p9 = pneg %p10019_p11 }
0x4bc1   : > { %p10025_p13 = pnand %p10024_p12, %p10020_p9 }
0x4bc3   : > { %10028 = shalt.err (!%p10025_p13)
}
0x4bc4   : > { %9420 = dma.vmem_to_hbm [thread:$0]  (%p10229_p5), %s7413_s18, 64, %s7415_s4, %s11406_s15   ;;  %v7326_v23 = vld [vmem:[#allocation7 + $0x900] ss:$0 sm:$0xff]  ;;  %v7327_v30 = vld [vmem:[#allocation7 + $0x910] ss:$0 sm:$0xff] }
0x4bc5   : > { %s7629_s29 = sshll.u32 %s10259_s12, 1  ;;  %s9080_s17 = sshll.u32 %s10176_s25, 1 }
0x4bc6   : > { %s7424_s4 = scalar_lea.hbm %s11495_s6, %s9080_s17  ;;  %s332_s15 = scalar_lea.vmem [#allocation12], %s7629_s29 }
0x4bc7   : > { %s7426_s8 = sshll.u32 %s332_s15, 4  ;;  %s7428_s30 = sshll.u32 %s7424_s4, 4  ;;  %s7427_s8 = int_to_ptr.vmem [resolvable:$true] %s7426_s8  ;;  %s7429_s30 = int_to_ptr.hbm [resolvable:$true] %s7428_s30 }
0x4bc8   : > { %s7369_s25 = scalar_lea.sflag [#allocation13], %s10259_s12  ;;  %s10043_s13 = sshra.s32 %s7429_s30, 4  ;;  %s10044_s13 = int_to_ptr.hbm [resolvable:$true] %s10043_s13 }
0x4bc9   : > { %s10045_s19 = scalar_lea.hbm %s10044_s13, 2  ;;  %s10049_s27 = scalar_lea.hbm %s11495_s6, 4 }
0x4bca   : > { %p10046_p0 = scmp.ne.s32.totalorder %s10044_s13, %s10045_s19  ;;  %p10050_p1 = scmp.lt.s32.totalorder %s10044_s13, %s11495_s6 }
0x4bcb   : > { %p10051_p4 = scmp.lt.s32.totalorder %s10049_s27, %s10045_s19 }
0x4bcc   : > { %p10047_p3 = pnand %p10046_p0, %p10229_p5 }
0x4bcd   : > { %p10052_p8 = por %p10051_p4, %p10050_p1 }
0x4bce   : > { %p10048_p7 = pneg %p10047_p3 }
0x4bd0   : > { %p10053_p11 = pnand %p10052_p8, %p10048_p7 }
0x4c17   : > { %v7336_v24 = vpop.xlane.xlu2 %7335 }
0x4c18   : > { %v7337_v62 = vmul.f32 %v7336_v24, %v11271_v58 }
0x4c1a   : > { %v7338_v34 = vadd.f32 1e-05, %v7337_v62 }
0x4c1c   : > { %9827 = vrsqrt.f32 %v7338_v34  ;;  %vm7345_vm14 = vweird.f32 %v7338_v34 }
0x4c22   : > { %v9828_v9 = vpop.eup %9827 }
0x4c23   : > { %v7340_v11 = vmul.f32 %v9828_v9, %v7338_v34  ;;  %vm7346_vm7 = vweird.f32 %v9828_v9 }
0x4c24   : > { %vm7347_vm12 = vmor %vm7345_vm14, %vm7346_vm7 }
0x4c25   : > { %v7341_v53 = vmul.f32 %v9828_v9, %v7340_v11 }
0x4c27   : > { %v7342_v0 = vmul.f32 0.5, %v7341_v53 }
0x4c29   : > { %v7343_v56 = vsub.f32 1.5, %v7342_v0 }
0x4c2b   : > { %v7344_v52 = vmul.f32 %v9828_v9, %v7343_v56 }
0x4c2d   : > { %v7348_v58 = vsel %vm7347_vm12, %v9828_v9, %v7344_v52 }
0x4c2e   : > { %v7349_v48 = vmul.f32 %v7348_v58, %v11395_v33 }
0x4c30   : > { %v7350_v54 = vmul.f32 %v7349_v48, %v7326_v23 }
0x4c32   : > { %v7351_v1 = vadd.f32 %v7350_v54, %v7327_v30 }
0x4c34   : > { %7352 = vst [vmem:[%s332_s15] sm:$0x3] %v7351_v1 }
0x4c35   : > { %10056 = shalt.err (!%p10053_p11)
}
0x4c36   : > { %9421 = dma.vmem_to_hbm [thread:$0]  (%p10229_p5), %s7427_s8, 32, %s7429_s30, %s7369_s25  }
0x4c37 PF: > { %s7440_s12 = sand.u32 1, %s10095_s21   ;;  %p11514_p9 = scmp.ge.s32.totalorder %s10107_s24, 2 }
0x4c38   : > { %s7441_s0 = scalar_lea.sflag [#allocation4], %s7440_s12 }
0x4c39   : > { %p9438_p2 = pnand %p11514_p9, %p10192_p6 }
0x4c3b   : > { %p9439_p10 = pneg %p9438_p2 }
0x4c3d   : > { %10082 = dma.done.wait (%p9439_p10), %s7441_s0, 256  }
0x4c3e   : > { %10084 = vsyncadd (%p9439_p10), %s7441_s0, 4294967040  ;;  %s11515_s2 = sadd.s32 4294967294, %s10107_s24  }
0x4c3f   : > { %s7450_s1 = sand.u32 1, %s11515_s2  }
0x4c40   : > { %s7451_s29 = scalar_lea.sflag [#allocation10], %s7450_s1 }
0x4c41   : > { %10086 = dma.done.wait (%p9439_p10), %s7451_s29, 192  }
0x4c42   : > { %10088 = vsyncadd (%p9439_p10), %s7451_s29, 4294967104  ;;  %s7471_s7 = scalar_lea.sflag [#allocation13], %s7440_s12 }
0x4c43   : > { %10090 = dma.done.wait (%p9439_p10), %s7471_s7, 32  }
0x4c44   : > { %10092 = vsyncadd (%p9439_p10), %s7471_s7, 4294967264  ;;  %p27_p5 = scmp.ge.s32.totalorder %s10216_s20, 4   ;;  %s11516_s21 = smov %s10099_s22 }
0x4c45   : > { %s11517_s22 = smov %s10103_s23  ;;  %s11518_s23 = smov %s10225_s9 }
0x4c46   : > { %s11519_s24 = smov %s10216_s20  ;;  %29 = sbr.rel (!%p27_p5) target bundleno = 15 (0xf), region = 138 }
0x4c4b   :  { %7477 = vsyncpa [#allocation3], 1 }
0x4c4c   :  { %7479 = vsyncpa [#allocation3 + $0x1], 1 }
0x4c4d   :  { %7480 = vsyncpa [#allocation6], 1 }
0x4c4e   :  { %7481 = vsyncpa [#allocation4], 1 }
0x4c4f   :  { %7483 = vsyncpa [#allocation4 + $0x1], 1 }
0x4c50   :  { %7484 = vsyncpa [#allocation10], 1 }
0x4c51   :  { %7486 = vsyncpa [#allocation10 + $0x1], 1 }
0x4c52   :  { %7487 = vsyncpa [#allocation13], 1 }
0x4c53   :  { %7489 = vsyncpa [#allocation13 + $0x1], 1 }

</bundles_post_ra>
